<compile_context>
chip_gen: v5e
topology: v5e:2x2
jax: 0.10.0
libtpu: 0.0.40
codegen_flags: <defaults>
</compile_context>

<pallas_src>
import numpy as np

import jax
import jax.numpy as jnp
from jax import lax
from jax.experimental import pallas as pl
from jax.experimental.pallas import tpu as pltpu

# Compat shim for the compiler-params class name across jax versions.
_CompilerParams = getattr(pltpu, "CompilerParams", None)
if _CompilerParams is None:  # pragma: no cover - older jax naming
    _CompilerParams = pltpu.TPUCompilerParams


# -----------------------------------------------------------------------------
# Host-side constant builders (trace-time numpy; become bf16 kernel operands)
# -----------------------------------------------------------------------------
def _bf16(a):
    return jnp.asarray(a, dtype=jnp.bfloat16)


def _gather_stack(H, W, stride):
    """(9*Mo, H*W) 0/1 matrix.  Row t*Mo + m gathers the input pixel read by
    3x3-conv tap t = dh*3+dw at output pixel m = ho*Wo+wo; rows whose tap falls
    in the zero padding stay all-zero (implicit 'same' padding).  Stride is baked
    into the row->column mapping, so one bf16 matmul yields all 9 shifted,
    strided, zero-padded views at once."""
    Ho, Wo = H // stride, W // stride
    Mo = Ho * Wo
    g = np.zeros((9 * Mo, H * W), np.float32)
    for dh in range(3):
        for dw in range(3):
            t = dh * 3 + dw
            for ho in range(Ho):
                ih = stride * ho + dh - 1
                if not (0 <= ih < H):
                    continue
                for wo in range(Wo):
                    iw = stride * wo + dw - 1
                    if 0 <= iw < W:
                        g[t * Mo + ho * Wo + wo, ih * W + iw] = 1.0
    return _bf16(g)


def _upsample_mat(Hs, Ws):
    """(4*Hs*Ws, Hs*Ws) 0/1 nearest-2x upsample matrix (exact in bf16)."""
    u = np.zeros((4 * Hs * Ws, Hs * Ws), np.float32)
    Wo = 2 * Ws
    for ho in range(2 * Hs):
        for wo in range(Wo):
            u[ho * Wo + wo, (ho // 2) * Ws + (wo // 2)] = 1.0
    return _bf16(u)


# -----------------------------------------------------------------------------
# In-kernel helpers (traced inside the Pallas kernel; 2D values only)
# -----------------------------------------------------------------------------
def _conv3x3(x, g_ref, w_ref, b_ref):
    """3x3 'same' conv on a flattened (H*W, Cin) activation:
       1) one stacked gather matmul -> (9*Mo, Cin) shifted views (bf16 MXU),
       2) lane-concat the 9 views into the (Mo, 9*Cin) im2col,
       3) one weight matmul against (9*Cin, Cout), bias from broadcast, ReLU."""
    Mo = g_ref.shape[0] // 9
    col = jnp.dot(g_ref[...], x.astype(jnp.bfloat16),
                  preferred_element_type=jnp.float32)              # exact copies
    col = col.astype(jnp.bfloat16)
    im2col = jnp.concatenate([col[t * Mo:(t + 1) * Mo, :] for t in range(9)],
                             axis=1)                                # (Mo, 9*Cin)
    acc = jnp.dot(im2col, w_ref[...],
                  preferred_element_type=jnp.float32) + b_ref[...]
    return jnp.maximum(acc, 0.0)


def _mm(x, w_ref, r0, rows):
    """bf16 MXU matmul of x against weight rows [r0, r0+rows) — split-row weights
    fold every channel-concat into the consuming 1x1 conv (no HBM/VMEM concat)."""
    return jnp.dot(x.astype(jnp.bfloat16), w_ref[r0:r0 + rows, :],
                   preferred_element_type=jnp.float32)


def _up2(x, u_ref):
    """Nearest 2x upsample as a precomputed 0/1 bf16 gather matmul.  Exact w.r.t.
    the downstream math: the upsampled value only ever feeds bf16 matmuls, so the
    bf16 rounding here is identical to the rounding at the consumer."""
    return jnp.dot(u_ref[...], x.astype(jnp.bfloat16),
                   preferred_element_type=jnp.float32)


def _memselect_msff(f, mem_ref, msq_ref, w_ref, b_ref):
    """memory_bank.select (first-index nearest prototype, residual f - m*) fused
    with the following MSFF 1x1 conv over concat([f, f - m*]) (split weight rows).
    The (M,K<=64x16) score and the prototype gather deliberately stay in f32 so
    the argmin / residual are bit-faithful to an f32 reference; |m|^2 is a
    precomputed host-side constant (no ones-row matmul)."""
    mem = mem_ref[...]                                              # (K, C) f32
    K = mem.shape[0]
    C = f.shape[1]
    xm = lax.dot_general(f, mem, (((1,), (1,)), ((), ())),
                         preferred_element_type=jnp.float32)        # (M, K)
    score = msq_ref[...] - 2.0 * xm       # |m|^2 - 2 f.m (|f|^2 const over k)
    smin = jnp.min(score, axis=-1, keepdims=True)
    k_i = lax.broadcasted_iota(jnp.int32, score.shape, 1).astype(jnp.float32)
    idx = jnp.min(jnp.where(score <= smin, k_i, jnp.float32(K)),
                  axis=-1, keepdims=True)                           # first argmin
    onehot = jnp.where(k_i == idx, 1.0, 0.0)
    nearest = jnp.dot(onehot, mem, preferred_element_type=jnp.float32)
    resid = f - nearest
    acc = _mm(f, w_ref, 0, C) + _mm(resid, w_ref, C, C) + b_ref[...]
    return jnp.maximum(acc, 0.0)


# -----------------------------------------------------------------------------
# The fused MAPL kernel (one image per grid step, everything VMEM-resident)
# -----------------------------------------------------------------------------
def _mapl_kernel(x_ref,
                 g0, w0, b0, g1, w1, b1, g2, w2, b2, g3, w3, b3,
                 mem1, m1sq, mem2, m2sq,
                 ms1w, ms1b, ms2w, ms2b, latw, latb,
                 u2, u4, u8,
                 d2w, d2b, d1w, d1b, d0w, d0b, dowt, dob,
                 out_ref):
    x = x_ref[0]                                                    # (H*W, 3) f32

    # ---- feature_extractor(inputs): 4-stage strided 3x3 conv pyramid ----
    f0 = _conv3x3(x,  g0, w0, b0)                                   # (256, 16)
    f1 = _conv3x3(f0, g1, w1, b1)                                   # ( 64, 32)
    f2 = _conv3x3(f1, g2, w2, b2)                                   # ( 16, 64)
    f3 = _conv3x3(f2, g3, w3, b3)                                   # (  4,128)

    # ---- memory_bank.select + fused MSFF 1x1 fuse conv (no HBM concat) ----
    m1 = _memselect_msff(f1, mem1, m1sq, ms1w, ms1b)                # ( 64, 32)
    m2 = _memselect_msff(f2, mem2, m2sq, ms2w, ms2b)                # ( 16, 64)

    # MSFF top-down lateral: m1 += 1x1(up2(m2))   [no relu]
    m1 = m1 + _mm(_up2(m2, u4), latw, 0, latw.shape[0]) + latb[...]

    # ---- Decoder: progressive x2 upsample + skip-concat (split-weight matmuls) ----
    d = _up2(f3, u2)                                                # ( 16,128)
    d = jnp.maximum(_mm(d, d2w, 0, 128) + _mm(m2, d2w, 128, 64) + d2b[...], 0.0)
    d = _up2(d, u4)                                                 # ( 64, 64)
    d = jnp.maximum(_mm(d, d1w, 0, 64) + _mm(m1, d1w, 64, 32) + d1b[...], 0.0)
    d = _up2(d, u8)                                                 # (256, 32)
    d = jnp.maximum(_mm(d, d0w, 0, 32) + _mm(f0, d0w, 32, 16) + d0b[...], 0.0)

    # Final 1x1 conv computed transposed -> lane-dense (1, H*W) store.
    mask_t = lax.dot_general(dowt[...], d.astype(jnp.bfloat16),
                             (((1,), (1,)), ((), ())),
                             preferred_element_type=jnp.float32)    # (1, 256)
    out_ref[0] = (mask_t + dob[...]).astype(out_ref.dtype)


# -----------------------------------------------------------------------------
# Parameters (deterministic, in-script synthetic stand-ins)
# -----------------------------------------------------------------------------
def make_params(key):
    def nk():
        nonlocal key
        key, sub = jax.random.split(key)
        return sub

    def conv_p(cin, cout, ksize):
        fan_in = ksize * ksize * cin
        if ksize == 3:
            w = jax.random.normal(nk(), (9, cin, cout), jnp.float32) / jnp.sqrt(fan_in)
        else:
            w = jax.random.normal(nk(), (cin, cout), jnp.float32) / jnp.sqrt(fan_in)
        b = 0.01 * jax.random.normal(nk(), (1, cout), jnp.float32)
        return {"w": w, "b": b}

    return {
        # feature extractor pyramid
        "fe0": conv_p(3, 16, 3),
        "fe1": conv_p(16, 32, 3),
        "fe2": conv_p(32, 64, 3),
        "fe3": conv_p(64, 128, 3),
        # memory bank prototypes (16 items per intermediate level)
        "mem1": jax.random.normal(nk(), (16, 32), jnp.float32),
        "mem2": jax.random.normal(nk(), (16, 64), jnp.float32),
        # MSFF
        "msff1": conv_p(64, 32, 1),
        "msff2": conv_p(128, 64, 1),
        "msff_lat": conv_p(64, 32, 1),
        # Decoder
        "dec2": conv_p(128 + 64, 64, 1),
        "dec1": conv_p(64 + 32, 32, 1),
        "dec0": conv_p(32 + 16, 16, 1),
        "dec_out": conv_p(16, 1, 1),
    }


# -----------------------------------------------------------------------------
# MAPL forward: one fused pallas_call, batch-parallel grid
# -----------------------------------------------------------------------------
def mapl_forward(x_nchw, params):
    N, Cin, H, W = x_nchw.shape
    HW = H * W
    # NCHW -> NHWC -> (N, H*W, C): channels on the lane axis, spatial flattened.
    x = jnp.transpose(x_nchw, (0, 2, 3, 1)).astype(jnp.float32).reshape(N, HW, Cin)

    # --- host-precomputed constants (no in-kernel VPU constant construction) ---
    g0 = _gather_stack(H, W, 1)
    g1 = _gather_stack(H, W, 2)
    g2 = _gather_stack(H // 2, W // 2, 2)
    g3 = _gather_stack(H // 4, W // 4, 2)
    u2 = _upsample_mat(H // 8, W // 8)     # 2x2 -> 4x4
    u4 = _upsample_mat(H // 4, W // 4)     # 4x4 -> 8x8
    u8 = _upsample_mat(H // 2, W // 2)     # 8x8 -> 16x16

    def conv_w(p):                          # (9, Cin, Cout) -> (9*Cin, Cout) bf16
        w = p["w"]
        return _bf16(w.reshape(w.shape[0] * w.shape[1], w.shape[2]))

    mem1 = params["mem1"].astype(jnp.float32)
    mem2 = params["mem2"].astype(jnp.float32)
    m1sq = jnp.sum(mem1 * mem1, axis=1, keepdims=True).T            # (1, K)
    m2sq = jnp.sum(mem2 * mem2, axis=1, keepdims=True).T            # (1, K)

    weight_args = (
        g0, conv_w(params["fe0"]), params["fe0"]["b"],
        g1, conv_w(params["fe1"]), params["fe1"]["b"],
        g2, conv_w(params["fe2"]), params["fe2"]["b"],
        g3, conv_w(params["fe3"]), params["fe3"]["b"],
        mem1, m1sq, mem2, m2sq,
        _bf16(params["msff1"]["w"]), params["msff1"]["b"],
        _bf16(params["msff2"]["w"]), params["msff2"]["b"],
        _bf16(params["msff_lat"]["w"]), params["msff_lat"]["b"],
        u2, u4, u8,
        _bf16(params["dec2"]["w"]), params["dec2"]["b"],
        _bf16(params["dec1"]["w"]), params["dec1"]["b"],
        _bf16(params["dec0"]["w"]), params["dec0"]["b"],
        _bf16(params["dec_out"]["w"].T), params["dec_out"]["b"],
    )

    def const_spec(a):
        nd = a.ndim
        return pl.BlockSpec(a.shape, lambda i, _nd=nd: (0,) * _nd)

    in_specs = [pl.BlockSpec((1, HW, Cin), lambda i: (i, 0, 0))]
    in_specs += [const_spec(a) for a in weight_args]

    # Advisory cost estimate so XLA schedules the NCHW<->flat transposes around us.
    stage_cfg = [(H, W, 1, Cin, 16), (H, W, 2, 16, 32),
                 (H // 2, W // 2, 2, 32, 64), (H // 4, W // 4, 2, 64, 128)]
    flops = 0
    for (h, w, s, ci, co) in stage_cfg:
        mo = (h // s) * (w // s)
        flops += 2 * (9 * mo * h * w * ci + 9 * mo * ci * co)
    flops = (flops + 4_000_000) * N            # + memory-select / MSFF / decoder
    bytes_accessed = int(N * HW * Cin * 4 + N * HW * 4 +
                         sum(int(np.prod(a.shape)) * jnp.dtype(a.dtype).itemsize
                             for a in weight_args))

    out = pl.pallas_call(
        _mapl_kernel,
        out_shape=jax.ShapeDtypeStruct((N, 1, HW), jnp.float32),
        grid=(N,),
        in_specs=in_specs,
        out_specs=pl.BlockSpec((1, 1, HW), lambda i: (i, 0, 0)),
        compiler_params=_CompilerParams(dimension_semantics=("parallel",)),
        cost_estimate=pl.CostEstimate(flops=flops, transcendentals=0,
                                      bytes_accessed=bytes_accessed),
    )(x, *weight_args)

    # (N, 1, H*W) lane-dense slab -> NCHW (N, 1, H, W) (pure reshape, no transpose).
    return out.reshape(N, 1, H, W)


if __name__ == "__main__":
    key = jax.random.PRNGKey(0)
    k_x, k_p = jax.random.split(key)
    x = jax.random.normal(k_x, (2, 3, 16, 16), jnp.float32)  # NCHW input
    params = make_params(k_p)

    predicted_mask = jax.jit(mapl_forward)(x, params)
    predicted_mask = jax.block_until_ready(predicted_mask)
    assert predicted_mask.shape == (2, 1, 16, 16)
    assert bool(jnp.all(jnp.isfinite(predicted_mask)))
    print("KERNEL_OK")
</pallas_src>

<mosaic_0001>
module attributes {stable_mosaic.version = 11 : i64} {
  func.func @_mapl_kernel(%arg0: i32, %arg1: memref<1x256x3xf32, #tpu.memory_space<vmem>>, %arg2: memref<2304x256xbf16, #tpu.memory_space<vmem>>, %arg3: memref<27x16xbf16, #tpu.memory_space<vmem>>, %arg4: memref<1x16xf32, #tpu.memory_space<vmem>>, %arg5: memref<576x256xbf16, #tpu.memory_space<vmem>>, %arg6: memref<144x32xbf16, #tpu.memory_space<vmem>>, %arg7: memref<1x32xf32, #tpu.memory_space<vmem>>, %arg8: memref<144x64xbf16, #tpu.memory_space<vmem>>, %arg9: memref<288x64xbf16, #tpu.memory_space<vmem>>, %arg10: memref<1x64xf32, #tpu.memory_space<vmem>>, %arg11: memref<36x16xbf16, #tpu.memory_space<vmem>>, %arg12: memref<576x128xbf16, #tpu.memory_space<vmem>>, %arg13: memref<1x128xf32, #tpu.memory_space<vmem>>, %arg14: memref<16x32xf32, #tpu.memory_space<vmem>>, %arg15: memref<1x16xf32, #tpu.memory_space<vmem>>, %arg16: memref<16x64xf32, #tpu.memory_space<vmem>>, %arg17: memref<1x16xf32, #tpu.memory_space<vmem>>, %arg18: memref<64x32xbf16, #tpu.memory_space<vmem>>, %arg19: memref<1x32xf32, #tpu.memory_space<vmem>>, %arg20: memref<128x64xbf16, #tpu.memory_space<vmem>>, %arg21: memref<1x64xf32, #tpu.memory_space<vmem>>, %arg22: memref<64x32xbf16, #tpu.memory_space<vmem>>, %arg23: memref<1x32xf32, #tpu.memory_space<vmem>>, %arg24: memref<16x4xbf16, #tpu.memory_space<vmem>>, %arg25: memref<64x16xbf16, #tpu.memory_space<vmem>>, %arg26: memref<256x64xbf16, #tpu.memory_space<vmem>>, %arg27: memref<192x64xbf16, #tpu.memory_space<vmem>>, %arg28: memref<1x64xf32, #tpu.memory_space<vmem>>, %arg29: memref<96x32xbf16, #tpu.memory_space<vmem>>, %arg30: memref<1x32xf32, #tpu.memory_space<vmem>>, %arg31: memref<48x16xbf16, #tpu.memory_space<vmem>>, %arg32: memref<1x16xf32, #tpu.memory_space<vmem>>, %arg33: memref<1x16xbf16, #tpu.memory_space<vmem>>, %arg34: memref<1x1xf32, #tpu.memory_space<vmem>>, %arg35: memref<1x1x256xf32, #tpu.memory_space<vmem>>) attributes {dimension_semantics = [#tpu.dimension_semantics<parallel>], iteration_bounds = array<i64: 2>, scalar_prefetch = 0 : i64, scratch_operands = 0 : i64, tpu.core_type = #tpu.core_type<tc>, window_params = [{transform_indices = @transform_0, window_bounds = array<i64: 1, 256, 3>}, {pipeline_mode = #tpu.pipeline_mode<synchronous>, transform_indices = @transform_1, window_bounds = array<i64: 2304, 256>}, {pipeline_mode = #tpu.pipeline_mode<synchronous>, transform_indices = @transform_2, window_bounds = array<i64: 27, 16>}, {pipeline_mode = #tpu.pipeline_mode<synchronous>, transform_indices = @transform_3, window_bounds = array<i64: 1, 16>}, {pipeline_mode = #tpu.pipeline_mode<synchronous>, transform_indices = @transform_4, window_bounds = array<i64: 576, 256>}, {pipeline_mode = #tpu.pipeline_mode<synchronous>, transform_indices = @transform_5, window_bounds = array<i64: 144, 32>}, {pipeline_mode = #tpu.pipeline_mode<synchronous>, transform_indices = @transform_6, window_bounds = array<i64: 1, 32>}, {pipeline_mode = #tpu.pipeline_mode<synchronous>, transform_indices = @transform_7, window_bounds = array<i64: 144, 64>}, {pipeline_mode = #tpu.pipeline_mode<synchronous>, transform_indices = @transform_8, window_bounds = array<i64: 288, 64>}, {pipeline_mode = #tpu.pipeline_mode<synchronous>, transform_indices = @transform_9, window_bounds = array<i64: 1, 64>}, {pipeline_mode = #tpu.pipeline_mode<synchronous>, transform_indices = @transform_10, window_bounds = array<i64: 36, 16>}, {pipeline_mode = #tpu.pipeline_mode<synchronous>, transform_indices = @transform_11, window_bounds = array<i64: 576, 128>}, {pipeline_mode = #tpu.pipeline_mode<synchronous>, transform_indices = @transform_12, window_bounds = array<i64: 1, 128>}, {pipeline_mode = #tpu.pipeline_mode<synchronous>, transform_indices = @transform_13, window_bounds = array<i64: 16, 32>}, {pipeline_mode = #tpu.pipeline_mode<synchronous>, transform_indices = @transform_14, window_bounds = array<i64: 1, 16>}, {pipeline_mode = #tpu.pipeline_mode<synchronous>, transform_indices = @transform_15, window_bounds = array<i64: 16, 64>}, {pipeline_mode = #tpu.pipeline_mode<synchronous>, transform_indices = @transform_16, window_bounds = array<i64: 1, 16>}, {pipeline_mode = #tpu.pipeline_mode<synchronous>, transform_indices = @transform_17, window_bounds = array<i64: 64, 32>}, {pipeline_mode = #tpu.pipeline_mode<synchronous>, transform_indices = @transform_18, window_bounds = array<i64: 1, 32>}, {pipeline_mode = #tpu.pipeline_mode<synchronous>, transform_indices = @transform_19, window_bounds = array<i64: 128, 64>}, {pipeline_mode = #tpu.pipeline_mode<synchronous>, transform_indices = @transform_20, window_bounds = array<i64: 1, 64>}, {pipeline_mode = #tpu.pipeline_mode<synchronous>, transform_indices = @transform_21, window_bounds = array<i64: 64, 32>}, {pipeline_mode = #tpu.pipeline_mode<synchronous>, transform_indices = @transform_22, window_bounds = array<i64: 1, 32>}, {pipeline_mode = #tpu.pipeline_mode<synchronous>, transform_indices = @transform_23, window_bounds = array<i64: 16, 4>}, {pipeline_mode = #tpu.pipeline_mode<synchronous>, transform_indices = @transform_24, window_bounds = array<i64: 64, 16>}, {pipeline_mode = #tpu.pipeline_mode<synchronous>, transform_indices = @transform_25, window_bounds = array<i64: 256, 64>}, {pipeline_mode = #tpu.pipeline_mode<synchronous>, transform_indices = @transform_26, window_bounds = array<i64: 192, 64>}, {pipeline_mode = #tpu.pipeline_mode<synchronous>, transform_indices = @transform_27, window_bounds = array<i64: 1, 64>}, {pipeline_mode = #tpu.pipeline_mode<synchronous>, transform_indices = @transform_28, window_bounds = array<i64: 96, 32>}, {pipeline_mode = #tpu.pipeline_mode<synchronous>, transform_indices = @transform_29, window_bounds = array<i64: 1, 32>}, {pipeline_mode = #tpu.pipeline_mode<synchronous>, transform_indices = @transform_30, window_bounds = array<i64: 48, 16>}, {pipeline_mode = #tpu.pipeline_mode<synchronous>, transform_indices = @transform_31, window_bounds = array<i64: 1, 16>}, {pipeline_mode = #tpu.pipeline_mode<synchronous>, transform_indices = @transform_32, window_bounds = array<i64: 1, 16>}, {pipeline_mode = #tpu.pipeline_mode<synchronous>, transform_indices = @transform_33, window_bounds = array<i64: 1, 1>}, {transform_indices = @transform_34, window_bounds = array<i64: 1, 1, 256>}]} {
    %c0 = arith.constant 0 : index
    %c0_0 = arith.constant 0 : index
    %c0_1 = arith.constant 0 : index
    %0 = vector.load %arg1[%c0, %c0_0, %c0_1] : memref<1x256x3xf32, #tpu.memory_space<vmem>>, vector<1x256x3xf32>
    %1 = vector.shape_cast %0 : vector<1x256x3xf32> to vector<256x3xf32>
    %c0_2 = arith.constant 0 : index
    %c0_3 = arith.constant 0 : index
    %2 = vector.load %arg2[%c0_2, %c0_3] : memref<2304x256xbf16, #tpu.memory_space<vmem>>, vector<2304x256xbf16>
    %3 = arith.truncf %1 : vector<256x3xf32> to vector<256x3xbf16>
    %cst = arith.constant dense<0.000000e+00> : vector<2304x3xf32>
    %4 = tpu.matmul %2, %3, %cst {dimension_numbers = #tpu.dot_dimension_numbers<[1], [0], [0], [1], [0, 0, 1, 1], [], []>} : vector<2304x256xbf16>, vector<256x3xbf16>, vector<2304x3xf32> -> vector<2304x3xf32>
    %5 = arith.truncf %4 : vector<2304x3xf32> to vector<2304x3xbf16>
    %6 = vector.extract_strided_slice %5 {offsets = [0, 0], sizes = [256, 3], strides = [1, 1]} : vector<2304x3xbf16> to vector<256x3xbf16>
    %7 = vector.extract_strided_slice %5 {offsets = [256, 0], sizes = [256, 3], strides = [1, 1]} : vector<2304x3xbf16> to vector<256x3xbf16>
    %8 = vector.extract_strided_slice %5 {offsets = [512, 0], sizes = [256, 3], strides = [1, 1]} : vector<2304x3xbf16> to vector<256x3xbf16>
    %9 = vector.extract_strided_slice %5 {offsets = [768, 0], sizes = [256, 3], strides = [1, 1]} : vector<2304x3xbf16> to vector<256x3xbf16>
    %10 = vector.extract_strided_slice %5 {offsets = [1024, 0], sizes = [256, 3], strides = [1, 1]} : vector<2304x3xbf16> to vector<256x3xbf16>
    %11 = vector.extract_strided_slice %5 {offsets = [1280, 0], sizes = [256, 3], strides = [1, 1]} : vector<2304x3xbf16> to vector<256x3xbf16>
    %12 = vector.extract_strided_slice %5 {offsets = [1536, 0], sizes = [256, 3], strides = [1, 1]} : vector<2304x3xbf16> to vector<256x3xbf16>
    %13 = vector.extract_strided_slice %5 {offsets = [1792, 0], sizes = [256, 3], strides = [1, 1]} : vector<2304x3xbf16> to vector<256x3xbf16>
    %14 = vector.extract_strided_slice %5 {offsets = [2048, 0], sizes = [256, 3], strides = [1, 1]} : vector<2304x3xbf16> to vector<256x3xbf16>
    %15 = tpu.concatenate %6, %7, %8, %9, %10, %11, %12, %13, %14 in 1 : vector<256x3xbf16>, vector<256x3xbf16>, vector<256x3xbf16>, vector<256x3xbf16>, vector<256x3xbf16>, vector<256x3xbf16>, vector<256x3xbf16>, vector<256x3xbf16>, vector<256x3xbf16> -> vector<256x27xbf16>
    %c0_4 = arith.constant 0 : index
    %c0_5 = arith.constant 0 : index
    %16 = vector.load %arg3[%c0_4, %c0_5] : memref<27x16xbf16, #tpu.memory_space<vmem>>, vector<27x16xbf16>
    %cst_6 = arith.constant dense<0.000000e+00> : vector<256x16xf32>
    %17 = tpu.matmul %15, %16, %cst_6 {dimension_numbers = #tpu.dot_dimension_numbers<[1], [0], [0], [1], [0, 0, 1, 1], [], []>} : vector<256x27xbf16>, vector<27x16xbf16>, vector<256x16xf32> -> vector<256x16xf32>
    %c0_7 = arith.constant 0 : index
    %c0_8 = arith.constant 0 : index
    %18 = vector.load %arg4[%c0_7, %c0_8] : memref<1x16xf32, #tpu.memory_space<vmem>>, vector<1x16xf32>
    %19 = vector.broadcast %18 : vector<1x16xf32> to vector<256x16xf32>
    %20 = arith.addf %17, %19 : vector<256x16xf32>
    %cst_9 = arith.constant 0.000000e+00 : f32
    %21 = vector.broadcast %cst_9 : f32 to vector<256x16xf32>
    %22 = arith.maximumf %20, %21 : vector<256x16xf32>
    %c0_10 = arith.constant 0 : index
    %c0_11 = arith.constant 0 : index
    %23 = vector.load %arg5[%c0_10, %c0_11] : memref<576x256xbf16, #tpu.memory_space<vmem>>, vector<576x256xbf16>
    %24 = arith.truncf %22 : vector<256x16xf32> to vector<256x16xbf16>
    %cst_12 = arith.constant dense<0.000000e+00> : vector<576x16xf32>
    %25 = tpu.matmul %23, %24, %cst_12 {dimension_numbers = #tpu.dot_dimension_numbers<[1], [0], [0], [1], [0, 0, 1, 1], [], []>} : vector<576x256xbf16>, vector<256x16xbf16>, vector<576x16xf32> -> vector<576x16xf32>
    %26 = arith.truncf %25 : vector<576x16xf32> to vector<576x16xbf16>
    %27 = vector.extract_strided_slice %26 {offsets = [0, 0], sizes = [64, 16], strides = [1, 1]} : vector<576x16xbf16> to vector<64x16xbf16>
    %28 = vector.extract_strided_slice %26 {offsets = [64, 0], sizes = [64, 16], strides = [1, 1]} : vector<576x16xbf16> to vector<64x16xbf16>
    %29 = vector.extract_strided_slice %26 {offsets = [128, 0], sizes = [64, 16], strides = [1, 1]} : vector<576x16xbf16> to vector<64x16xbf16>
    %30 = vector.extract_strided_slice %26 {offsets = [192, 0], sizes = [64, 16], strides = [1, 1]} : vector<576x16xbf16> to vector<64x16xbf16>
    %31 = vector.extract_strided_slice %26 {offsets = [256, 0], sizes = [64, 16], strides = [1, 1]} : vector<576x16xbf16> to vector<64x16xbf16>
    %32 = vector.extract_strided_slice %26 {offsets = [320, 0], sizes = [64, 16], strides = [1, 1]} : vector<576x16xbf16> to vector<64x16xbf16>
    %33 = vector.extract_strided_slice %26 {offsets = [384, 0], sizes = [64, 16], strides = [1, 1]} : vector<576x16xbf16> to vector<64x16xbf16>
    %34 = vector.extract_strided_slice %26 {offsets = [448, 0], sizes = [64, 16], strides = [1, 1]} : vector<576x16xbf16> to vector<64x16xbf16>
    %35 = vector.extract_strided_slice %26 {offsets = [512, 0], sizes = [64, 16], strides = [1, 1]} : vector<576x16xbf16> to vector<64x16xbf16>
    %36 = tpu.concatenate %27, %28, %29, %30, %31, %32, %33, %34, %35 in 1 : vector<64x16xbf16>, vector<64x16xbf16>, vector<64x16xbf16>, vector<64x16xbf16>, vector<64x16xbf16>, vector<64x16xbf16>, vector<64x16xbf16>, vector<64x16xbf16>, vector<64x16xbf16> -> vector<64x144xbf16>
    %c0_13 = arith.constant 0 : index
    %c0_14 = arith.constant 0 : index
    %37 = vector.load %arg6[%c0_13, %c0_14] : memref<144x32xbf16, #tpu.memory_space<vmem>>, vector<144x32xbf16>
    %cst_15 = arith.constant dense<0.000000e+00> : vector<64x32xf32>
    %38 = tpu.matmul %36, %37, %cst_15 {dimension_numbers = #tpu.dot_dimension_numbers<[1], [0], [0], [1], [0, 0, 1, 1], [], []>} : vector<64x144xbf16>, vector<144x32xbf16>, vector<64x32xf32> -> vector<64x32xf32>
    %c0_16 = arith.constant 0 : index
    %c0_17 = arith.constant 0 : index
    %39 = vector.load %arg7[%c0_16, %c0_17] : memref<1x32xf32, #tpu.memory_space<vmem>>, vector<1x32xf32>
    %40 = vector.broadcast %39 : vector<1x32xf32> to vector<64x32xf32>
    %41 = arith.addf %38, %40 : vector<64x32xf32>
    %cst_18 = arith.constant 0.000000e+00 : f32
    %42 = vector.broadcast %cst_18 : f32 to vector<64x32xf32>
    %43 = arith.maximumf %41, %42 : vector<64x32xf32>
    %c0_19 = arith.constant 0 : index
    %c0_20 = arith.constant 0 : index
    %44 = vector.load %arg8[%c0_19, %c0_20] : memref<144x64xbf16, #tpu.memory_space<vmem>>, vector<144x64xbf16>
    %45 = arith.truncf %43 : vector<64x32xf32> to vector<64x32xbf16>
    %cst_21 = arith.constant dense<0.000000e+00> : vector<144x32xf32>
    %46 = tpu.matmul %44, %45, %cst_21 {dimension_numbers = #tpu.dot_dimension_numbers<[1], [0], [0], [1], [0, 0, 1, 1], [], []>} : vector<144x64xbf16>, vector<64x32xbf16>, vector<144x32xf32> -> vector<144x32xf32>
    %47 = arith.truncf %46 : vector<144x32xf32> to vector<144x32xbf16>
    %48 = vector.extract_strided_slice %47 {offsets = [0, 0], sizes = [16, 32], strides = [1, 1]} : vector<144x32xbf16> to vector<16x32xbf16>
    %49 = vector.extract_strided_slice %47 {offsets = [16, 0], sizes = [16, 32], strides = [1, 1]} : vector<144x32xbf16> to vector<16x32xbf16>
    %50 = vector.extract_strided_slice %47 {offsets = [32, 0], sizes = [16, 32], strides = [1, 1]} : vector<144x32xbf16> to vector<16x32xbf16>
    %51 = vector.extract_strided_slice %47 {offsets = [48, 0], sizes = [16, 32], strides = [1, 1]} : vector<144x32xbf16> to vector<16x32xbf16>
    %52 = vector.extract_strided_slice %47 {offsets = [64, 0], sizes = [16, 32], strides = [1, 1]} : vector<144x32xbf16> to vector<16x32xbf16>
    %53 = vector.extract_strided_slice %47 {offsets = [80, 0], sizes = [16, 32], strides = [1, 1]} : vector<144x32xbf16> to vector<16x32xbf16>
    %54 = vector.extract_strided_slice %47 {offsets = [96, 0], sizes = [16, 32], strides = [1, 1]} : vector<144x32xbf16> to vector<16x32xbf16>
    %55 = vector.extract_strided_slice %47 {offsets = [112, 0], sizes = [16, 32], strides = [1, 1]} : vector<144x32xbf16> to vector<16x32xbf16>
    %56 = vector.extract_strided_slice %47 {offsets = [128, 0], sizes = [16, 32], strides = [1, 1]} : vector<144x32xbf16> to vector<16x32xbf16>
    %57 = tpu.concatenate %48, %49, %50, %51, %52, %53, %54, %55, %56 in 1 : vector<16x32xbf16>, vector<16x32xbf16>, vector<16x32xbf16>, vector<16x32xbf16>, vector<16x32xbf16>, vector<16x32xbf16>, vector<16x32xbf16>, vector<16x32xbf16>, vector<16x32xbf16> -> vector<16x288xbf16>
    %c0_22 = arith.constant 0 : index
    %c0_23 = arith.constant 0 : index
    %58 = vector.load %arg9[%c0_22, %c0_23] : memref<288x64xbf16, #tpu.memory_space<vmem>>, vector<288x64xbf16>
    %cst_24 = arith.constant dense<0.000000e+00> : vector<16x64xf32>
    %59 = tpu.matmul %57, %58, %cst_24 {dimension_numbers = #tpu.dot_dimension_numbers<[1], [0], [0], [1], [0, 0, 1, 1], [], []>} : vector<16x288xbf16>, vector<288x64xbf16>, vector<16x64xf32> -> vector<16x64xf32>
    %c0_25 = arith.constant 0 : index
    %c0_26 = arith.constant 0 : index
    %60 = vector.load %arg10[%c0_25, %c0_26] : memref<1x64xf32, #tpu.memory_space<vmem>>, vector<1x64xf32>
    %61 = vector.broadcast %60 : vector<1x64xf32> to vector<16x64xf32>
    %62 = arith.addf %59, %61 : vector<16x64xf32>
    %cst_27 = arith.constant 0.000000e+00 : f32
    %63 = vector.broadcast %cst_27 : f32 to vector<16x64xf32>
    %64 = arith.maximumf %62, %63 : vector<16x64xf32>
    %c0_28 = arith.constant 0 : index
    %c0_29 = arith.constant 0 : index
    %65 = vector.load %arg11[%c0_28, %c0_29] : memref<36x16xbf16, #tpu.memory_space<vmem>>, vector<36x16xbf16>
    %66 = arith.truncf %64 : vector<16x64xf32> to vector<16x64xbf16>
    %cst_30 = arith.constant dense<0.000000e+00> : vector<36x64xf32>
    %67 = tpu.matmul %65, %66, %cst_30 {dimension_numbers = #tpu.dot_dimension_numbers<[1], [0], [0], [1], [0, 0, 1, 1], [], []>} : vector<36x16xbf16>, vector<16x64xbf16>, vector<36x64xf32> -> vector<36x64xf32>
    %68 = arith.truncf %67 : vector<36x64xf32> to vector<36x64xbf16>
    %69 = vector.extract_strided_slice %68 {offsets = [0, 0], sizes = [4, 64], strides = [1, 1]} : vector<36x64xbf16> to vector<4x64xbf16>
    %70 = vector.extract_strided_slice %68 {offsets = [4, 0], sizes = [4, 64], strides = [1, 1]} : vector<36x64xbf16> to vector<4x64xbf16>
    %71 = vector.extract_strided_slice %68 {offsets = [8, 0], sizes = [4, 64], strides = [1, 1]} : vector<36x64xbf16> to vector<4x64xbf16>
    %72 = vector.extract_strided_slice %68 {offsets = [12, 0], sizes = [4, 64], strides = [1, 1]} : vector<36x64xbf16> to vector<4x64xbf16>
    %73 = vector.extract_strided_slice %68 {offsets = [16, 0], sizes = [4, 64], strides = [1, 1]} : vector<36x64xbf16> to vector<4x64xbf16>
    %74 = vector.extract_strided_slice %68 {offsets = [20, 0], sizes = [4, 64], strides = [1, 1]} : vector<36x64xbf16> to vector<4x64xbf16>
    %75 = vector.extract_strided_slice %68 {offsets = [24, 0], sizes = [4, 64], strides = [1, 1]} : vector<36x64xbf16> to vector<4x64xbf16>
    %76 = vector.extract_strided_slice %68 {offsets = [28, 0], sizes = [4, 64], strides = [1, 1]} : vector<36x64xbf16> to vector<4x64xbf16>
    %77 = vector.extract_strided_slice %68 {offsets = [32, 0], sizes = [4, 64], strides = [1, 1]} : vector<36x64xbf16> to vector<4x64xbf16>
    %78 = tpu.concatenate %69, %70, %71, %72, %73, %74, %75, %76, %77 in 1 : vector<4x64xbf16>, vector<4x64xbf16>, vector<4x64xbf16>, vector<4x64xbf16>, vector<4x64xbf16>, vector<4x64xbf16>, vector<4x64xbf16>, vector<4x64xbf16>, vector<4x64xbf16> -> vector<4x576xbf16>
    %c0_31 = arith.constant 0 : index
    %c0_32 = arith.constant 0 : index
    %79 = vector.load %arg12[%c0_31, %c0_32] : memref<576x128xbf16, #tpu.memory_space<vmem>>, vector<576x128xbf16>
    %cst_33 = arith.constant dense<0.000000e+00> : vector<4x128xf32>
    %80 = tpu.matmul %78, %79, %cst_33 {dimension_numbers = #tpu.dot_dimension_numbers<[1], [0], [0], [1], [0, 0, 1, 1], [], []>} : vector<4x576xbf16>, vector<576x128xbf16>, vector<4x128xf32> -> vector<4x128xf32>
    %c0_34 = arith.constant 0 : index
    %c0_35 = arith.constant 0 : index
    %81 = vector.load %arg13[%c0_34, %c0_35] : memref<1x128xf32, #tpu.memory_space<vmem>>, vector<1x128xf32>
    %82 = vector.broadcast %81 : vector<1x128xf32> to vector<4x128xf32>
    %83 = arith.addf %80, %82 : vector<4x128xf32>
    %cst_36 = arith.constant 0.000000e+00 : f32
    %84 = vector.broadcast %cst_36 : f32 to vector<4x128xf32>
    %85 = arith.maximumf %83, %84 : vector<4x128xf32>
    %c0_37 = arith.constant 0 : index
    %c0_38 = arith.constant 0 : index
    %86 = vector.load %arg14[%c0_37, %c0_38] : memref<16x32xf32, #tpu.memory_space<vmem>>, vector<16x32xf32>
    %cst_39 = arith.constant dense<0.000000e+00> : vector<64x16xf32>
    %87 = tpu.matmul %43, %86, %cst_39 {dimension_numbers = #tpu.dot_dimension_numbers<[1], [1], [0], [0], [0, 0, 1, 0], [], []>} : vector<64x32xf32>, vector<16x32xf32>, vector<64x16xf32> -> vector<64x16xf32>
    %c0_40 = arith.constant 0 : index
    %c0_41 = arith.constant 0 : index
    %88 = vector.load %arg15[%c0_40, %c0_41] : memref<1x16xf32, #tpu.memory_space<vmem>>, vector<1x16xf32>
    %cst_42 = arith.constant 2.000000e+00 : f32
    %89 = vector.broadcast %cst_42 : f32 to vector<64x16xf32>
    %90 = arith.mulf %89, %87 : vector<64x16xf32>
    %91 = vector.broadcast %88 : vector<1x16xf32> to vector<64x16xf32>
    %92 = arith.subf %91, %90 : vector<64x16xf32>
    %cst_43 = arith.constant dense<0x7F800000> : vector<64xf32>
    %93 = vector.multi_reduction <minimumf>, %92, %cst_43 [1] : vector<64x16xf32> to vector<64xf32>
    %94 = vector.shape_cast %93 : vector<64xf32> to vector<64x1xf32>
    %95 = tpu.iota {dimensions = array<i32: 1>} : vector<64x16xi32>
    %96 = arith.sitofp %95 : vector<64x16xi32> to vector<64x16xf32>
    %97 = vector.broadcast %94 : vector<64x1xf32> to vector<64x16xf32>
    %98 = arith.cmpf ole, %92, %97 : vector<64x16xf32>
    %cst_44 = arith.constant 1.600000e+01 : f32
    %99 = vector.broadcast %cst_44 : f32 to vector<64x16xf32>
    %100 = arith.select %98, %96, %99 : vector<64x16xi1>, vector<64x16xf32>
    %cst_45 = arith.constant dense<0x7F800000> : vector<64xf32>
    %101 = vector.multi_reduction <minimumf>, %100, %cst_45 [1] : vector<64x16xf32> to vector<64xf32>
    %102 = vector.shape_cast %101 : vector<64xf32> to vector<64x1xf32>
    %103 = vector.broadcast %102 : vector<64x1xf32> to vector<64x16xf32>
    %104 = arith.cmpf oeq, %96, %103 : vector<64x16xf32>
    %cst_46 = arith.constant 1.000000e+00 : f32
    %cst_47 = arith.constant 0.000000e+00 : f32
    %105 = vector.broadcast %cst_46 : f32 to vector<64x16xf32>
    %106 = vector.broadcast %cst_47 : f32 to vector<64x16xf32>
    %107 = arith.select %104, %105, %106 : vector<64x16xi1>, vector<64x16xf32>
    %cst_48 = arith.constant dense<0.000000e+00> : vector<64x32xf32>
    %108 = tpu.matmul %107, %86, %cst_48 {dimension_numbers = #tpu.dot_dimension_numbers<[1], [0], [0], [1], [0, 0, 1, 1], [], []>} : vector<64x16xf32>, vector<16x32xf32>, vector<64x32xf32> -> vector<64x32xf32>
    %109 = arith.subf %43, %108 : vector<64x32xf32>
    %110 = arith.truncf %43 : vector<64x32xf32> to vector<64x32xbf16>
    %c0_49 = arith.constant 0 : index
    %c0_50 = arith.constant 0 : index
    %111 = vector.load %arg18[%c0_49, %c0_50] : memref<64x32xbf16, #tpu.memory_space<vmem>>, vector<32x32xbf16>
    %cst_51 = arith.constant dense<0.000000e+00> : vector<64x32xf32>
    %112 = tpu.matmul %110, %111, %cst_51 {dimension_numbers = #tpu.dot_dimension_numbers<[1], [0], [0], [1], [0, 0, 1, 1], [], []>} : vector<64x32xbf16>, vector<32x32xbf16>, vector<64x32xf32> -> vector<64x32xf32>
    %113 = arith.truncf %109 : vector<64x32xf32> to vector<64x32xbf16>
    %c32 = arith.constant 32 : index
    %c0_52 = arith.constant 0 : index
    %114 = vector.load %arg18[%c32, %c0_52] : memref<64x32xbf16, #tpu.memory_space<vmem>>, vector<32x32xbf16>
    %cst_53 = arith.constant dense<0.000000e+00> : vector<64x32xf32>
    %115 = tpu.matmul %113, %114, %cst_53 {dimension_numbers = #tpu.dot_dimension_numbers<[1], [0], [0], [1], [0, 0, 1, 1], [], []>} : vector<64x32xbf16>, vector<32x32xbf16>, vector<64x32xf32> -> vector<64x32xf32>
    %116 = arith.addf %112, %115 : vector<64x32xf32>
    %c0_54 = arith.constant 0 : index
    %c0_55 = arith.constant 0 : index
    %117 = vector.load %arg19[%c0_54, %c0_55] : memref<1x32xf32, #tpu.memory_space<vmem>>, vector<1x32xf32>
    %118 = vector.broadcast %117 : vector<1x32xf32> to vector<64x32xf32>
    %119 = arith.addf %116, %118 : vector<64x32xf32>
    %cst_56 = arith.constant 0.000000e+00 : f32
    %120 = vector.broadcast %cst_56 : f32 to vector<64x32xf32>
    %121 = arith.maximumf %119, %120 : vector<64x32xf32>
    %c0_57 = arith.constant 0 : index
    %c0_58 = arith.constant 0 : index
    %122 = vector.load %arg16[%c0_57, %c0_58] : memref<16x64xf32, #tpu.memory_space<vmem>>, vector<16x64xf32>
    %cst_59 = arith.constant dense<0.000000e+00> : vector<16x16xf32>
    %123 = tpu.matmul %64, %122, %cst_59 {dimension_numbers = #tpu.dot_dimension_numbers<[1], [1], [0], [0], [0, 0, 1, 0], [], []>} : vector<16x64xf32>, vector<16x64xf32>, vector<16x16xf32> -> vector<16x16xf32>
    %c0_60 = arith.constant 0 : index
    %c0_61 = arith.constant 0 : index
    %124 = vector.load %arg17[%c0_60, %c0_61] : memref<1x16xf32, #tpu.memory_space<vmem>>, vector<1x16xf32>
    %cst_62 = arith.constant 2.000000e+00 : f32
    %125 = vector.broadcast %cst_62 : f32 to vector<16x16xf32>
    %126 = arith.mulf %125, %123 : vector<16x16xf32>
    %127 = vector.broadcast %124 : vector<1x16xf32> to vector<16x16xf32>
    %128 = arith.subf %127, %126 : vector<16x16xf32>
    %cst_63 = arith.constant dense<0x7F800000> : vector<16xf32>
    %129 = vector.multi_reduction <minimumf>, %128, %cst_63 [1] : vector<16x16xf32> to vector<16xf32>
    %130 = vector.shape_cast %129 : vector<16xf32> to vector<16x1xf32>
    %131 = tpu.iota {dimensions = array<i32: 1>} : vector<16x16xi32>
    %132 = arith.sitofp %131 : vector<16x16xi32> to vector<16x16xf32>
    %133 = vector.broadcast %130 : vector<16x1xf32> to vector<16x16xf32>
    %134 = arith.cmpf ole, %128, %133 : vector<16x16xf32>
    %cst_64 = arith.constant 1.600000e+01 : f32
    %135 = vector.broadcast %cst_64 : f32 to vector<16x16xf32>
    %136 = arith.select %134, %132, %135 : vector<16x16xi1>, vector<16x16xf32>
    %cst_65 = arith.constant dense<0x7F800000> : vector<16xf32>
    %137 = vector.multi_reduction <minimumf>, %136, %cst_65 [1] : vector<16x16xf32> to vector<16xf32>
    %138 = vector.shape_cast %137 : vector<16xf32> to vector<16x1xf32>
    %139 = vector.broadcast %138 : vector<16x1xf32> to vector<16x16xf32>
    %140 = arith.cmpf oeq, %132, %139 : vector<16x16xf32>
    %cst_66 = arith.constant 1.000000e+00 : f32
    %cst_67 = arith.constant 0.000000e+00 : f32
    %141 = vector.broadcast %cst_66 : f32 to vector<16x16xf32>
    %142 = vector.broadcast %cst_67 : f32 to vector<16x16xf32>
    %143 = arith.select %140, %141, %142 : vector<16x16xi1>, vector<16x16xf32>
    %cst_68 = arith.constant dense<0.000000e+00> : vector<16x64xf32>
    %144 = tpu.matmul %143, %122, %cst_68 {dimension_numbers = #tpu.dot_dimension_numbers<[1], [0], [0], [1], [0, 0, 1, 1], [], []>} : vector<16x16xf32>, vector<16x64xf32>, vector<16x64xf32> -> vector<16x64xf32>
    %145 = arith.subf %64, %144 : vector<16x64xf32>
    %146 = arith.truncf %64 : vector<16x64xf32> to vector<16x64xbf16>
    %c0_69 = arith.constant 0 : index
    %c0_70 = arith.constant 0 : index
    %147 = vector.load %arg20[%c0_69, %c0_70] : memref<128x64xbf16, #tpu.memory_space<vmem>>, vector<64x64xbf16>
    %cst_71 = arith.constant dense<0.000000e+00> : vector<16x64xf32>
    %148 = tpu.matmul %146, %147, %cst_71 {dimension_numbers = #tpu.dot_dimension_numbers<[1], [0], [0], [1], [0, 0, 1, 1], [], []>} : vector<16x64xbf16>, vector<64x64xbf16>, vector<16x64xf32> -> vector<16x64xf32>
    %149 = arith.truncf %145 : vector<16x64xf32> to vector<16x64xbf16>
    %c64 = arith.constant 64 : index
    %c0_72 = arith.constant 0 : index
    %150 = vector.load %arg20[%c64, %c0_72] : memref<128x64xbf16, #tpu.memory_space<vmem>>, vector<64x64xbf16>
    %cst_73 = arith.constant dense<0.000000e+00> : vector<16x64xf32>
    %151 = tpu.matmul %149, %150, %cst_73 {dimension_numbers = #tpu.dot_dimension_numbers<[1], [0], [0], [1], [0, 0, 1, 1], [], []>} : vector<16x64xbf16>, vector<64x64xbf16>, vector<16x64xf32> -> vector<16x64xf32>
    %152 = arith.addf %148, %151 : vector<16x64xf32>
    %c0_74 = arith.constant 0 : index
    %c0_75 = arith.constant 0 : index
    %153 = vector.load %arg21[%c0_74, %c0_75] : memref<1x64xf32, #tpu.memory_space<vmem>>, vector<1x64xf32>
    %154 = vector.broadcast %153 : vector<1x64xf32> to vector<16x64xf32>
    %155 = arith.addf %152, %154 : vector<16x64xf32>
    %cst_76 = arith.constant 0.000000e+00 : f32
    %156 = vector.broadcast %cst_76 : f32 to vector<16x64xf32>
    %157 = arith.maximumf %155, %156 : vector<16x64xf32>
    %c0_77 = arith.constant 0 : index
    %c0_78 = arith.constant 0 : index
    %158 = vector.load %arg25[%c0_77, %c0_78] : memref<64x16xbf16, #tpu.memory_space<vmem>>, vector<64x16xbf16>
    %159 = arith.truncf %157 : vector<16x64xf32> to vector<16x64xbf16>
    %cst_79 = arith.constant dense<0.000000e+00> : vector<64x64xf32>
    %160 = tpu.matmul %158, %159, %cst_79 {dimension_numbers = #tpu.dot_dimension_numbers<[1], [0], [0], [1], [0, 0, 1, 1], [], []>} : vector<64x16xbf16>, vector<16x64xbf16>, vector<64x64xf32> -> vector<64x64xf32>
    %161 = arith.truncf %160 : vector<64x64xf32> to vector<64x64xbf16>
    %c0_80 = arith.constant 0 : index
    %c0_81 = arith.constant 0 : index
    %162 = vector.load %arg22[%c0_80, %c0_81] : memref<64x32xbf16, #tpu.memory_space<vmem>>, vector<64x32xbf16>
    %cst_82 = arith.constant dense<0.000000e+00> : vector<64x32xf32>
    %163 = tpu.matmul %161, %162, %cst_82 {dimension_numbers = #tpu.dot_dimension_numbers<[1], [0], [0], [1], [0, 0, 1, 1], [], []>} : vector<64x64xbf16>, vector<64x32xbf16>, vector<64x32xf32> -> vector<64x32xf32>
    %164 = arith.addf %121, %163 : vector<64x32xf32>
    %c0_83 = arith.constant 0 : index
    %c0_84 = arith.constant 0 : index
    %165 = vector.load %arg23[%c0_83, %c0_84] : memref<1x32xf32, #tpu.memory_space<vmem>>, vector<1x32xf32>
    %166 = vector.broadcast %165 : vector<1x32xf32> to vector<64x32xf32>
    %167 = arith.addf %164, %166 : vector<64x32xf32>
    %c0_85 = arith.constant 0 : index
    %c0_86 = arith.constant 0 : index
    %168 = vector.load %arg24[%c0_85, %c0_86] : memref<16x4xbf16, #tpu.memory_space<vmem>>, vector<16x4xbf16>
    %169 = arith.truncf %85 : vector<4x128xf32> to vector<4x128xbf16>
    %cst_87 = arith.constant dense<0.000000e+00> : vector<16x128xf32>
    %170 = tpu.matmul %168, %169, %cst_87 {dimension_numbers = #tpu.dot_dimension_numbers<[1], [0], [0], [1], [0, 0, 1, 1], [], []>} : vector<16x4xbf16>, vector<4x128xbf16>, vector<16x128xf32> -> vector<16x128xf32>
    %171 = arith.truncf %170 : vector<16x128xf32> to vector<16x128xbf16>
    %c0_88 = arith.constant 0 : index
    %c0_89 = arith.constant 0 : index
    %172 = vector.load %arg27[%c0_88, %c0_89] : memref<192x64xbf16, #tpu.memory_space<vmem>>, vector<128x64xbf16>
    %cst_90 = arith.constant dense<0.000000e+00> : vector<16x64xf32>
    %173 = tpu.matmul %171, %172, %cst_90 {dimension_numbers = #tpu.dot_dimension_numbers<[1], [0], [0], [1], [0, 0, 1, 1], [], []>} : vector<16x128xbf16>, vector<128x64xbf16>, vector<16x64xf32> -> vector<16x64xf32>
    %174 = arith.truncf %157 : vector<16x64xf32> to vector<16x64xbf16>
    %c128 = arith.constant 128 : index
    %c0_91 = arith.constant 0 : index
    %175 = vector.load %arg27[%c128, %c0_91] : memref<192x64xbf16, #tpu.memory_space<vmem>>, vector<64x64xbf16>
    %cst_92 = arith.constant dense<0.000000e+00> : vector<16x64xf32>
    %176 = tpu.matmul %174, %175, %cst_92 {dimension_numbers = #tpu.dot_dimension_numbers<[1], [0], [0], [1], [0, 0, 1, 1], [], []>} : vector<16x64xbf16>, vector<64x64xbf16>, vector<16x64xf32> -> vector<16x64xf32>
    %177 = arith.addf %173, %176 : vector<16x64xf32>
    %c0_93 = arith.constant 0 : index
    %c0_94 = arith.constant 0 : index
    %178 = vector.load %arg28[%c0_93, %c0_94] : memref<1x64xf32, #tpu.memory_space<vmem>>, vector<1x64xf32>
    %179 = vector.broadcast %178 : vector<1x64xf32> to vector<16x64xf32>
    %180 = arith.addf %177, %179 : vector<16x64xf32>
    %cst_95 = arith.constant 0.000000e+00 : f32
    %181 = vector.broadcast %cst_95 : f32 to vector<16x64xf32>
    %182 = arith.maximumf %180, %181 : vector<16x64xf32>
    %c0_96 = arith.constant 0 : index
    %c0_97 = arith.constant 0 : index
    %183 = vector.load %arg25[%c0_96, %c0_97] : memref<64x16xbf16, #tpu.memory_space<vmem>>, vector<64x16xbf16>
    %184 = arith.truncf %182 : vector<16x64xf32> to vector<16x64xbf16>
    %cst_98 = arith.constant dense<0.000000e+00> : vector<64x64xf32>
    %185 = tpu.matmul %183, %184, %cst_98 {dimension_numbers = #tpu.dot_dimension_numbers<[1], [0], [0], [1], [0, 0, 1, 1], [], []>} : vector<64x16xbf16>, vector<16x64xbf16>, vector<64x64xf32> -> vector<64x64xf32>
    %186 = arith.truncf %185 : vector<64x64xf32> to vector<64x64xbf16>
    %c0_99 = arith.constant 0 : index
    %c0_100 = arith.constant 0 : index
    %187 = vector.load %arg29[%c0_99, %c0_100] : memref<96x32xbf16, #tpu.memory_space<vmem>>, vector<64x32xbf16>
    %cst_101 = arith.constant dense<0.000000e+00> : vector<64x32xf32>
    %188 = tpu.matmul %186, %187, %cst_101 {dimension_numbers = #tpu.dot_dimension_numbers<[1], [0], [0], [1], [0, 0, 1, 1], [], []>} : vector<64x64xbf16>, vector<64x32xbf16>, vector<64x32xf32> -> vector<64x32xf32>
    %189 = arith.truncf %167 : vector<64x32xf32> to vector<64x32xbf16>
    %c64_102 = arith.constant 64 : index
    %c0_103 = arith.constant 0 : index
    %190 = vector.load %arg29[%c64_102, %c0_103] : memref<96x32xbf16, #tpu.memory_space<vmem>>, vector<32x32xbf16>
    %cst_104 = arith.constant dense<0.000000e+00> : vector<64x32xf32>
    %191 = tpu.matmul %189, %190, %cst_104 {dimension_numbers = #tpu.dot_dimension_numbers<[1], [0], [0], [1], [0, 0, 1, 1], [], []>} : vector<64x32xbf16>, vector<32x32xbf16>, vector<64x32xf32> -> vector<64x32xf32>
    %192 = arith.addf %188, %191 : vector<64x32xf32>
    %c0_105 = arith.constant 0 : index
    %c0_106 = arith.constant 0 : index
    %193 = vector.load %arg30[%c0_105, %c0_106] : memref<1x32xf32, #tpu.memory_space<vmem>>, vector<1x32xf32>
    %194 = vector.broadcast %193 : vector<1x32xf32> to vector<64x32xf32>
    %195 = arith.addf %192, %194 : vector<64x32xf32>
    %cst_107 = arith.constant 0.000000e+00 : f32
    %196 = vector.broadcast %cst_107 : f32 to vector<64x32xf32>
    %197 = arith.maximumf %195, %196 : vector<64x32xf32>
    %c0_108 = arith.constant 0 : index
    %c0_109 = arith.constant 0 : index
    %198 = vector.load %arg26[%c0_108, %c0_109] : memref<256x64xbf16, #tpu.memory_space<vmem>>, vector<256x64xbf16>
    %199 = arith.truncf %197 : vector<64x32xf32> to vector<64x32xbf16>
    %cst_110 = arith.constant dense<0.000000e+00> : vector<256x32xf32>
    %200 = tpu.matmul %198, %199, %cst_110 {dimension_numbers = #tpu.dot_dimension_numbers<[1], [0], [0], [1], [0, 0, 1, 1], [], []>} : vector<256x64xbf16>, vector<64x32xbf16>, vector<256x32xf32> -> vector<256x32xf32>
    %201 = arith.truncf %200 : vector<256x32xf32> to vector<256x32xbf16>
    %c0_111 = arith.constant 0 : index
    %c0_112 = arith.constant 0 : index
    %202 = vector.load %arg31[%c0_111, %c0_112] : memref<48x16xbf16, #tpu.memory_space<vmem>>, vector<32x16xbf16>
    %cst_113 = arith.constant dense<0.000000e+00> : vector<256x16xf32>
    %203 = tpu.matmul %201, %202, %cst_113 {dimension_numbers = #tpu.dot_dimension_numbers<[1], [0], [0], [1], [0, 0, 1, 1], [], []>} : vector<256x32xbf16>, vector<32x16xbf16>, vector<256x16xf32> -> vector<256x16xf32>
    %204 = arith.truncf %22 : vector<256x16xf32> to vector<256x16xbf16>
    %c32_114 = arith.constant 32 : index
    %c0_115 = arith.constant 0 : index
    %205 = vector.load %arg31[%c32_114, %c0_115] : memref<48x16xbf16, #tpu.memory_space<vmem>>, vector<16x16xbf16>
    %cst_116 = arith.constant dense<0.000000e+00> : vector<256x16xf32>
    %206 = tpu.matmul %204, %205, %cst_116 {dimension_numbers = #tpu.dot_dimension_numbers<[1], [0], [0], [1], [0, 0, 1, 1], [], []>} : vector<256x16xbf16>, vector<16x16xbf16>, vector<256x16xf32> -> vector<256x16xf32>
    %207 = arith.addf %203, %206 : vector<256x16xf32>
    %c0_117 = arith.constant 0 : index
    %c0_118 = arith.constant 0 : index
    %208 = vector.load %arg32[%c0_117, %c0_118] : memref<1x16xf32, #tpu.memory_space<vmem>>, vector<1x16xf32>
    %209 = vector.broadcast %208 : vector<1x16xf32> to vector<256x16xf32>
    %210 = arith.addf %207, %209 : vector<256x16xf32>
    %cst_119 = arith.constant 0.000000e+00 : f32
    %211 = vector.broadcast %cst_119 : f32 to vector<256x16xf32>
    %212 = arith.maximumf %210, %211 : vector<256x16xf32>
    %c0_120 = arith.constant 0 : index
    %c0_121 = arith.constant 0 : index
    %213 = vector.load %arg33[%c0_120, %c0_121] : memref<1x16xbf16, #tpu.memory_space<vmem>>, vector<1x16xbf16>
    %214 = arith.truncf %212 : vector<256x16xf32> to vector<256x16xbf16>
    %cst_122 = arith.constant dense<0.000000e+00> : vector<1x256xf32>
    %215 = tpu.matmul %213, %214, %cst_122 {dimension_numbers = #tpu.dot_dimension_numbers<[1], [1], [0], [0], [0, 0, 1, 0], [], []>} : vector<1x16xbf16>, vector<256x16xbf16>, vector<1x256xf32> -> vector<1x256xf32>
    %c0_123 = arith.constant 0 : index
    %c0_124 = arith.constant 0 : index
    %216 = vector.load %arg34[%c0_123, %c0_124] : memref<1x1xf32, #tpu.memory_space<vmem>>, vector<1x1xf32>
    %217 = vector.broadcast %216 : vector<1x1xf32> to vector<1x256xf32>
    %218 = arith.addf %215, %217 : vector<1x256xf32>
    %c0_125 = arith.constant 0 : index
    %c0_126 = arith.constant 0 : index
    %c0_127 = arith.constant 0 : index
    %219 = vector.load %arg35[%c0_125, %c0_126, %c0_127] : memref<1x1x256xf32, #tpu.memory_space<vmem>>, vector<1x1x256xf32>
    %220 = vector.shape_cast %219 : vector<1x1x256xf32> to vector<1x256xf32>
    %221 = vector.shape_cast %218 : vector<1x256xf32> to vector<1x1x256xf32>
    tpu.vector_store %arg35[%c0_125, %c0_126, %c0_127], %221 {strides = array<i32>} : memref<1x1x256xf32, #tpu.memory_space<vmem>>, vector<1x1x256xf32>,
    return
  }
  func.func @transform_0(%arg0: i32) -> (i32, i32, i32) {
    %c0_i32 = arith.constant 0 : i32
    %c0_i32_0 = arith.constant 0 : i32
    %c0_i32_1 = arith.constant 0 : i32
    return %arg0, %c0_i32, %c0_i32_0 : i32, i32, i32
  }
  func.func @transform_1(%arg0: i32) -> (i32, i32) {
    %c0_i32 = arith.constant 0 : i32
    %c0_i32_0 = arith.constant 0 : i32
    %c0_i32_1 = arith.constant 0 : i32
    return %c0_i32, %c0_i32_0 : i32, i32
  }
  func.func @transform_2(%arg0: i32) -> (i32, i32) {
    %c0_i32 = arith.constant 0 : i32
    %c0_i32_0 = arith.constant 0 : i32
    %c0_i32_1 = arith.constant 0 : i32
    return %c0_i32, %c0_i32_0 : i32, i32
  }
  func.func @transform_3(%arg0: i32) -> (i32, i32) {
    %c0_i32 = arith.constant 0 : i32
    %c0_i32_0 = arith.constant 0 : i32
    %c0_i32_1 = arith.constant 0 : i32
    return %c0_i32, %c0_i32_0 : i32, i32
  }
  func.func @transform_4(%arg0: i32) -> (i32, i32) {
    %c0_i32 = arith.constant 0 : i32
    %c0_i32_0 = arith.constant 0 : i32
    %c0_i32_1 = arith.constant 0 : i32
    return %c0_i32, %c0_i32_0 : i32, i32
  }
  func.func @transform_5(%arg0: i32) -> (i32, i32) {
    %c0_i32 = arith.constant 0 : i32
    %c0_i32_0 = arith.constant 0 : i32
    %c0_i32_1 = arith.constant 0 : i32
    return %c0_i32, %c0_i32_0 : i32, i32
  }
  func.func @transform_6(%arg0: i32) -> (i32, i32) {
    %c0_i32 = arith.constant 0 : i32
    %c0_i32_0 = arith.constant 0 : i32
    %c0_i32_1 = arith.constant 0 : i32
    return %c0_i32, %c0_i32_0 : i32, i32
  }
  func.func @transform_7(%arg0: i32) -> (i32, i32) {
    %c0_i32 = arith.constant 0 : i32
    %c0_i32_0 = arith.constant 0 : i32
    %c0_i32_1 = arith.constant 0 : i32
    return %c0_i32, %c0_i32_0 : i32, i32
  }
  func.func @transform_8(%arg0: i32) -> (i32, i32) {
    %c0_i32 = arith.constant 0 : i32
    %c0_i32_0 = arith.constant 0 : i32
    %c0_i32_1 = arith.constant 0 : i32
    return %c0_i32, %c0_i32_0 : i32, i32
  }
  func.func @transform_9(%arg0: i32) -> (i32, i32) {
    %c0_i32 = arith.constant 0 : i32
    %c0_i32_0 = arith.constant 0 : i32
    %c0_i32_1 = arith.constant 0 : i32
    return %c0_i32, %c0_i32_0 : i32, i32
  }
  func.func @transform_10(%arg0: i32) -> (i32, i32) {
    %c0_i32 = arith.constant 0 : i32
    %c0_i32_0 = arith.constant 0 : i32
    %c0_i32_1 = arith.constant 0 : i32
    return %c0_i32, %c0_i32_0 : i32, i32
  }
  func.func @transform_11(%arg0: i32) -> (i32, i32) {
    %c0_i32 = arith.constant 0 : i32
    %c0_i32_0 = arith.constant 0 : i32
    %c0_i32_1 = arith.constant 0 : i32
    return %c0_i32, %c0_i32_0 : i32, i32
  }
  func.func @transform_12(%arg0: i32) -> (i32, i32) {
    %c0_i32 = arith.constant 0 : i32
    %c0_i32_0 = arith.constant 0 : i32
    %c0_i32_1 = arith.constant 0 : i32
    return %c0_i32, %c0_i32_0 : i32, i32
  }
  func.func @transform_13(%arg0: i32) -> (i32, i32) {
    %c0_i32 = arith.constant 0 : i32
    %c0_i32_0 = arith.constant 0 : i32
    %c0_i32_1 = arith.constant 0 : i32
    return %c0_i32, %c0_i32_0 : i32, i32
  }
  func.func @transform_14(%arg0: i32) -> (i32, i32) {
    %c0_i32 = arith.constant 0 : i32
    %c0_i32_0 = arith.constant 0 : i32
    %c0_i32_1 = arith.constant 0 : i32
    return %c0_i32, %c0_i32_0 : i32, i32
  }
  func.func @transform_15(%arg0: i32) -> (i32, i32) {
    %c0_i32 = arith.constant 0 : i32
    %c0_i32_0 = arith.constant 0 : i32
    %c0_i32_1 = arith.constant 0 : i32
    return %c0_i32, %c0_i32_0 : i32, i32
  }
  func.func @transform_16(%arg0: i32) -> (i32, i32) {
    %c0_i32 = arith.constant 0 : i32
    %c0_i32_0 = arith.constant 0 : i32
    %c0_i32_1 = arith.constant 0 : i32
    return %c0_i32, %c0_i32_0 : i32, i32
  }
  func.func @transform_17(%arg0: i32) -> (i32, i32) {
    %c0_i32 = arith.constant 0 : i32
    %c0_i32_0 = arith.constant 0 : i32
    %c0_i32_1 = arith.constant 0 : i32
    return %c0_i32, %c0_i32_0 : i32, i32
  }
  func.func @transform_18(%arg0: i32) -> (i32, i32) {
    %c0_i32 = arith.constant 0 : i32
    %c0_i32_0 = arith.constant 0 : i32
    %c0_i32_1 = arith.constant 0 : i32
    return %c0_i32, %c0_i32_0 : i32, i32
  }
  func.func @transform_19(%arg0: i32) -> (i32, i32) {
    %c0_i32 = arith.constant 0 : i32
    %c0_i32_0 = arith.constant 0 : i32
    %c0_i32_1 = arith.constant 0 : i32
    return %c0_i32, %c0_i32_0 : i32, i32
  }
  func.func @transform_20(%arg0: i32) -> (i32, i32) {
    %c0_i32 = arith.constant 0 : i32
    %c0_i32_0 = arith.constant 0 : i32
    %c0_i32_1 = arith.constant 0 : i32
    return %c0_i32, %c0_i32_0 : i32, i32
  }
  func.func @transform_21(%arg0: i32) -> (i32, i32) {
    %c0_i32 = arith.constant 0 : i32
    %c0_i32_0 = arith.constant 0 : i32
    %c0_i32_1 = arith.constant 0 : i32
    return %c0_i32, %c0_i32_0 : i32, i32
  }
  func.func @transform_22(%arg0: i32) -> (i32, i32) {
    %c0_i32 = arith.constant 0 : i32
    %c0_i32_0 = arith.constant 0 : i32
    %c0_i32_1 = arith.constant 0 : i32
    return %c0_i32, %c0_i32_0 : i32, i32
  }
  func.func @transform_23(%arg0: i32) -> (i32, i32) {
    %c0_i32 = arith.constant 0 : i32
    %c0_i32_0 = arith.constant 0 : i32
    %c0_i32_1 = arith.constant 0 : i32
    return %c0_i32, %c0_i32_0 : i32, i32
  }
  func.func @transform_24(%arg0: i32) -> (i32, i32) {
    %c0_i32 = arith.constant 0 : i32
    %c0_i32_0 = arith.constant 0 : i32
    %c0_i32_1 = arith.constant 0 : i32
    return %c0_i32, %c0_i32_0 : i32, i32
  }
  func.func @transform_25(%arg0: i32) -> (i32, i32) {
    %c0_i32 = arith.constant 0 : i32
    %c0_i32_0 = arith.constant 0 : i32
    %c0_i32_1 = arith.constant 0 : i32
    return %c0_i32, %c0_i32_0 : i32, i32
  }
  func.func @transform_26(%arg0: i32) -> (i32, i32) {
    %c0_i32 = arith.constant 0 : i32
    %c0_i32_0 = arith.constant 0 : i32
    %c0_i32_1 = arith.constant 0 : i32
    return %c0_i32, %c0_i32_0 : i32, i32
  }
  func.func @transform_27(%arg0: i32) -> (i32, i32) {
    %c0_i32 = arith.constant 0 : i32
    %c0_i32_0 = arith.constant 0 : i32
    %c0_i32_1 = arith.constant 0 : i32
    return %c0_i32, %c0_i32_0 : i32, i32
  }
  func.func @transform_28(%arg0: i32) -> (i32, i32) {
    %c0_i32 = arith.constant 0 : i32
    %c0_i32_0 = arith.constant 0 : i32
    %c0_i32_1 = arith.constant 0 : i32
    return %c0_i32, %c0_i32_0 : i32, i32
  }
  func.func @transform_29(%arg0: i32) -> (i32, i32) {
    %c0_i32 = arith.constant 0 : i32
    %c0_i32_0 = arith.constant 0 : i32
    %c0_i32_1 = arith.constant 0 : i32
    return %c0_i32, %c0_i32_0 : i32, i32
  }
  func.func @transform_30(%arg0: i32) -> (i32, i32) {
    %c0_i32 = arith.constant 0 : i32
    %c0_i32_0 = arith.constant 0 : i32
    %c0_i32_1 = arith.constant 0 : i32
    return %c0_i32, %c0_i32_0 : i32, i32
  }
  func.func @transform_31(%arg0: i32) -> (i32, i32) {
    %c0_i32 = arith.constant 0 : i32
    %c0_i32_0 = arith.constant 0 : i32
    %c0_i32_1 = arith.constant 0 : i32
    return %c0_i32, %c0_i32_0 : i32, i32
  }
  func.func @transform_32(%arg0: i32) -> (i32, i32) {
    %c0_i32 = arith.constant 0 : i32
    %c0_i32_0 = arith.constant 0 : i32
    %c0_i32_1 = arith.constant 0 : i32
    return %c0_i32, %c0_i32_0 : i32, i32
  }
  func.func @transform_33(%arg0: i32) -> (i32, i32) {
    %c0_i32 = arith.constant 0 : i32
    %c0_i32_0 = arith.constant 0 : i32
    %c0_i32_1 = arith.constant 0 : i32
    return %c0_i32, %c0_i32_0 : i32, i32
  }
  func.func @transform_34(%arg0: i32) -> (i32, i32, i32) {
    %c0_i32 = arith.constant 0 : i32
    %c0_i32_0 = arith.constant 0 : i32
    %c0_i32_1 = arith.constant 0 : i32
    return %arg0, %c0_i32, %c0_i32_0 : i32, i32, i32
  }
}

</mosaic_0001>

<bundles_post_ra>
// kernel: mapl_forward.1
= control target key start
LH: loop header
LB: loop body
LE: loop exit
PB: predicated region body
PF: predicated region fallthrough
CT: control target
= control target key end

     0   :  { %s12918_s6 = smov 1   ;;  %s12919_s10 = smov 2   ;;  %s16145_s0 = inlined_call_operand.smem [shape: u32[35], index: -1, kind: input, shape index: {}] }
   0x1   :  { %s12978_s5 = sld [smem:[%s16145_s0]]   ;;  %s12920_s14 = smov 3  }
   0x2   :  { %s12983_s9 = sld [smem:[%s16145_s0 + %s12918_s6]]   ;;  %s12921_s18 = smov 4  }
   0x3   :  { %s12988_s13 = sld [smem:[%s16145_s0 + %s12919_s10]]   ;;  %s12922_s22 = smov 5  }
   0x4   :  { %s12993_s17 = sld [smem:[%s16145_s0 + %s12920_s14]]   ;;  %s12923_s26 = smov 6  }
   0x5   :  { %s12998_s21 = sld [smem:[%s16145_s0 + %s12921_s18]]   ;;  %s12924_s30 = smov 7  }
   0x6   :  { %s13003_s25 = sld [smem:[%s16145_s0 + %s12922_s22]]   ;;  %s12925_s4 = smov 8  }
   0x7   :  { %s13008_s29 = sld [smem:[%s16145_s0 + %s12923_s26]]   ;;  %s12926_s10 = smov 9  }
   0x8   :  { %s13013_s3 = sld [smem:[%s16145_s0 + %s12924_s30]]   ;;  %s12927_s15 = smov 10  }
   0x9   :  { %s13018_s8 = sld [smem:[%s16145_s0 + %s12925_s4]]   ;;  %s12928_s20 = smov 11  }
   0xa   :  { %s13023_s14 = sld [smem:[%s16145_s0 + %s12926_s10]]   ;;  %s12929_s26 = smov 12  }
   0xb   :  { %s13028_s19 = sld [smem:[%s16145_s0 + %s12927_s15]]   ;;  %s12930_s1 = smov 13  }
   0xc   :  { %s13033_s24 = sld [smem:[%s16145_s0 + %s12928_s20]]   ;;  %s12931_s7 = smov 14  }
   0xd   :  { %s13038_s30 = sld [smem:[%s16145_s0 + %s12929_s26]]   ;;  %s12932_s15 = smov 15  }
   0xe   :  { %s13043_s6 = sld [smem:[%s16145_s0 + %s12930_s1]]   ;;  %s12933_s22 = smov 16  }
   0xf   :  { %s13048_s12 = sld [smem:[%s16145_s0 + %s12931_s7]]   ;;  %s12934_s28 = smov 17  }
  0x10   :  { %s13053_s20 = sld [smem:[%s16145_s0 + %s12932_s15]]   ;;  %s12935_s7 = smov 18  }
  0x11   :  { %s13058_s27 = sld [smem:[%s16145_s0 + %s12933_s22]]   ;;  %s12936_s15 = smov 19  }
  0x12   :  { %s13063_s4 = sld [smem:[%s16145_s0 + %s12934_s28]]   ;;  %s12937_s22 = smov 20  }
  0x13   :  { %16275 = sst [smem:[#allocation3_spill]] %s13038_s30  ;;  %s12938_s28 = smov 21  }
  0x14   :  { %s13068_s30 = sld [smem:[%s16145_s0 + %s12935_s7]]   ;;  %s12939_s7 = smov 22  }
  0x15   :  { %s12951_s10 = smov 34  }
  0x16   :  { %16276 = sst [smem:[#allocation4_spill]] %s13053_s20 }
  0x17   :  { %16277 = sst [smem:[#allocation5_spill]] %s13058_s27 }
  0x18   :  { %16278 = sst [smem:[#allocation6_spill]] %s13063_s4 }
  0x19   :  { %s13073_s20 = sld [smem:[%s16145_s0 + %s12936_s15]]   ;;  %s12940_s15 = smov 23  }
  0x1a   :  { %16279 = sst [smem:[#allocation7_spill]] %s13068_s30 }
  0x1b   :  { %s13078_s27 = sld [smem:[%s16145_s0 + %s12937_s22]]   ;;  %s12941_s22 = smov 24  }
  0x1c   :  { %s13083_s4 = sld [smem:[%s16145_s0 + %s12938_s28]]   ;;  %s12942_s28 = smov 25  }
  0x1d   :  { %s13088_s30 = sld [smem:[%s16145_s0 + %s12939_s7]]   ;;  %s12943_s7 = smov 26  }
  0x1f   :  { %16280 = sst [smem:[#allocation8_spill]] %s13073_s20 }
  0x20   :  { %s13093_s20 = sld [smem:[%s16145_s0 + %s12940_s15]]   ;;  %s12944_s15 = smov 27  }
  0x21   :  { %16281 = sst [smem:[#allocation9_spill]] %s13078_s27 }
  0x22   :  { %16282 = sst [smem:[#allocation10_spill]] %s13083_s4 }
  0x23   :  { %16283 = sst [smem:[#allocation11_spill]] %s13088_s30 }
  0x24   :  { %s13098_s27 = sld [smem:[%s16145_s0 + %s12941_s22]]   ;;  %s12945_s22 = smov 28  }
  0x25   :  { %s13103_s4 = sld [smem:[%s16145_s0 + %s12942_s28]]   ;;  %s12946_s28 = smov 29  }
  0x26   :  { %16284 = sst [smem:[#allocation12_spill]] %s13093_s20 }
  0x27   :  { %s13108_s30 = sld [smem:[%s16145_s0 + %s12943_s7]]   ;;  %s12947_s7 = smov 30  }
  0x28   :  { %s13113_s20 = sld [smem:[%s16145_s0 + %s12944_s15]]   ;;  %s12948_s15 = smov 31  }
  0x2a   :  { %16285 = sst [smem:[#allocation13_spill]] %s13098_s27 }
  0x2b   :  { %16286 = sst [smem:[#allocation14_spill]] %s13103_s4 }
  0x2c   :  { %s13118_s27 = sld [smem:[%s16145_s0 + %s12945_s22]]   ;;  %s12949_s22 = smov 32  }
  0x2d   :  { %16287 = sst [smem:[#allocation15_spill]] %s13108_s30 }
  0x2e   :  { %16288 = sst [smem:[#allocation16_spill]] %s13113_s20 }
  0x2f   :  { %s13123_s4 = sld [smem:[%s16145_s0 + %s12946_s28]]   ;;  %s12950_s28 = smov 33  }
  0x30   :  { %s13128_s30 = sld [smem:[%s16145_s0 + %s12947_s7]]  }
  0x31   :  { %s13133_s20 = sld [smem:[%s16145_s0 + %s12948_s15]]   ;;  %s13148_s15 = smov 0  }
  0x32   :  { %16289 = sst [smem:[#allocation17_spill]] %s13118_s27 }
  0x33   :  { %s13138_s27 = sld [smem:[%s16145_s0 + %s12949_s22]]  }
  0x35   :  { %16290 = sst [smem:[#allocation18_spill]] %s13123_s4 }
  0x36   :  { %16291 = sst [smem:[#allocation19_spill]] %s13128_s30 }
  0x37   :  { %s10195_s4 = sld [smem:[%s16145_s0 + %s12950_s28]]  }
  0x38   :  { %s13146_s30 = sld [smem:[%s16145_s0 + %s12951_s10]]  }
  0x3d   :  { %v74_v0 = vstv %s10195_s4 }
  0x3e   :  { %75 = vst [vmem:[#allocation2] sm:$0x1] %v74_v0 }
  0x3f LB: > { %s10197_s16 = sadd.s32 4294967295, %s12916_s15   ;;  %p10201_p0 = scmp.ge.s32.totalorder %s12916_s15, 1  ;;  %s12916_s15 = sphi %s13148_s15, %s81_s15  }
  0x40   : > { %p949_p1 = scmp.lt.s32.totalorder %s12916_s15, 3 }
  0x42   : > { %p950_p2 = pnand %p10201_p0, %p949_p1 }
  0x44   : > { %953 = sbr.rel (%p950_p2) target bundleno = 7262 (0x1c5e), region = 156 }
  0x49   : > { %p1034_p3 = scmp.lt.s32.totalorder %s10197_s16, 1  ;;  %v10207_v48 = vld [vmem:[%s12983_s9] sm:$0xf]  ;;  %v12325_v49 = vld [vmem:[%s12983_s9 + $0x4] sm:$0xf0]  ;;  %s12952_s18 = smov 24  }
  0x4a   : > { %v12324_v51 = vld [vmem:[%s12983_s9 + $0x4] sm:$0xf]  ;;  %v10209_v52 = vld [vmem:[%s12983_s9 + $0x8] sm:$0xf0]  ;;  %v10208_v53 = vor.u32 %v12325_v49, %v10207_v48  ;;  %v10215_v55 = vld [vmem:[%s12983_s9 + $0x10] sm:$0xf] }
  0x4b   : > { %s16654_s16 = smov (!%p1034_p3, %s10197_s16), 1  ;;  %v10212_v54 = vor.u32 %v12324_v51, %v10209_v52  ;;  %v12327_v56 = vld [vmem:[%s12983_s9 + $0x14] sm:$0xf0]  ;;  %v12326_v57 = vld [vmem:[%s12983_s9 + $0x14] sm:$0xf]  ;;  %s12953_s22 = smov 3  }
  0x4c   : > { %s12323_s0 = sshll.u32 %s16654_s16, 8  ;;  %v10217_v58 = vld [vmem:[%s12983_s9 + $0x18] sm:$0xf0]  ;;  %v10216_v59 = vor.u32 %v12327_v56, %v10215_v55  ;;  %v10223_v61 = vld [vmem:[%s12983_s9 + $0x20] sm:$0xf]  ;;  %s12954_s23 = smov 6  }
  0x4d   : > { %s13160_s4 = scalar_lea.vmem %s12978_s5, %s12323_s0  ;;  %v10220_v60 = vor.u32 %v12326_v57, %v10217_v58  ;;  %v12329_v62 = vld [vmem:[%s12983_s9 + $0x24] sm:$0xf0]  ;;  %v12328_v63 = vld [vmem:[%s12983_s9 + $0x24] sm:$0xf]  ;;  %v10225_v0 = vld [vmem:[%s12983_s9 + $0x28] sm:$0xf0] }
  0x4e   : > { %v1058_v1 = vld [vmem:[%s13160_s4 + $0x70] sm:$0xff]  ;;  %v1059_v2 = vld [vmem:[%s13160_s4 + $0x78] sm:$0xff]  ;;  %v1056_v6 = vld [vmem:[%s13160_s4 + $0x60] sm:$0xff]  ;;  %s12955_s26 = smov 9   ;;  %s12956_s28 = smov 12   ;;  %vm5874_vm0 = vcmask 1044480  }
  0x4f   : > { %v1074_v3 = vld [vmem:[%s13160_s4 + $0xf0] sm:$0xff]  ;;  %v1371_v4 = vpack.c.bf16 %v1059_v2, %v1058_v1  ;;  %v1075_v5 = vld [vmem:[%s13160_s4 + $0xf8] sm:$0xff]  ;;  %v1057_v7 = vld [vmem:[%s13160_s4 + $0x68] sm:$0xff]  ;;  %v10224_v1 = vor.u32 %v12329_v62, %v10223_v61  ;;  %v10228_v2 = vor.u32 %v12328_v63, %v10225_v0  ;;  %s12957_s1 = smov 15   ;;  %s12958_s2 = smov 18   ;;  %vm5875_vm1 = vcmask 1045504  }
  0x50   : > { %v1379_v8 = vpack.c.bf16 %v1075_v5, %v1074_v3  ;;  %v1072_v9 = vld [vmem:[%s13160_s4 + $0xe0] sm:$0xff]  ;;  %v1073_v10 = vld [vmem:[%s13160_s4 + $0xe8] sm:$0xff]  ;;  %v1370_v11 = vpack.c.bf16 %v1057_v7, %v1056_v6  ;;  %v1054_v13 = vld [vmem:[%s13160_s4 + $0x50] sm:$0xff]  ;;  %s12959_s10 = smov 21   ;;  %vm5591_vm2 = vcmask 48128   ;;  %vm5542_vm3 = vcmask 23552  }
  0x51   : > { %2820 = vmatpush.bf16.msra.mxu0 %v1371_v4  ;;  %12818 = vmatpush.bf16.msra.mxu2 %v1371_v4  ;;  %v1378_v12 = vpack.c.bf16 %v1073_v10, %v1072_v9  ;;  %v1055_v14 = vld [vmem:[%s13160_s4 + $0x58] sm:$0xff]  ;;  %v1070_v15 = vld [vmem:[%s13160_s4 + $0xd0] sm:$0xff]  ;;  %v1052_v19 = vld [vmem:[%s13160_s4 + $0x40] sm:$0xff]  ;;  %vm5624_vm4 = vcmask 72704   ;;  %vm5690_vm5 = vcmask 121856   ;;  %vm5657_vm6 = vcmask 97280  }
  0x52   : > { %3549 = vmatpush.bf16.msra.mxu1 %v1379_v8  ;;  %12826 = vmatpush.bf16.msra.mxu3 %v1379_v8  ;;  %v1071_v16 = vld [vmem:[%s13160_s4 + $0xd8] sm:$0xff]  ;;  %v1369_v17 = vpack.c.bf16 %v1055_v14, %v1054_v13  ;;  %v1053_v20 = vld [vmem:[%s13160_s4 + $0x48] sm:$0xff]  ;;  %v1068_v21 = vld [vmem:[%s13160_s4 + $0xc0] sm:$0xff]  ;;  %vm5723_vm7 = vcmask 146432   ;;  %vm5756_vm8 = vcmask 171008   ;;  %vm5841_vm9 = vcmask 220160  }
  0x53   : > { %v1377_v18 = vpack.c.bf16 %v1071_v16, %v1070_v15  ;;  %v1069_v22 = vld [vmem:[%s13160_s4 + $0xc8] sm:$0xff]  ;;  %v1368_v23 = vpack.c.bf16 %v1053_v20, %v1052_v19  ;;  %v1050_v25 = vld [vmem:[%s13160_s4 + $0x30] sm:$0xff]  ;;  %v1051_v26 = vld [vmem:[%s13160_s4 + $0x38] sm:$0xff]  ;;  %vm5789_vm10 = vcmask 195584   ;;  %s12961_s7 = smov 16   ;;  %s12962_s11 = smov 32  }
  0x54   : > { %v1376_v24 = vpack.c.bf16 %v1069_v22, %v1068_v21  ;;  %v1066_v27 = vld [vmem:[%s13160_s4 + $0xb0] sm:$0xff]  ;;  %v1067_v28 = vld [vmem:[%s13160_s4 + $0xb8] sm:$0xff]  ;;  %v1367_v29 = vpack.c.bf16 %v1051_v26, %v1050_v25  ;;  %v1048_v31 = vld [vmem:[%s13160_s4 + $0x20] sm:$0xff]  ;;  %s12963_s0 = smov 48   ;;  %vm7136_vm11 = vcmask 130048   ;;  %vm7149_vm12 = vcmask 261120  }
  0x55   : > { %2821 = vmatpush.bf16.msra.mxu0 %v1370_v11  ;;  %12819 = vmatpush.bf16.msra.mxu2 %v1370_v11  ;;  %v1375_v30 = vpack.c.bf16 %v1067_v28, %v1066_v27  ;;  %v1049_v32 = vld [vmem:[%s13160_s4 + $0x28] sm:$0xff]  ;;  %v1064_v33 = vld [vmem:[%s13160_s4 + $0xa0] sm:$0xff]  ;;  %v1046_v37 = vld [vmem:[%s13160_s4 + $0x10] sm:$0xff]  ;;  %vm7167_vm13 = vcmask 523264   ;;  %vm7158_vm14 = vcmask 392192   ;;  %vm7176_vm15 = vcmask 654336  }
  0x56   : > { %3550 = vmatpush.bf16.msra.mxu1 %v1378_v12  ;;  %12827 = vmatpush.bf16.msra.mxu3 %v1378_v12  ;;  %v1065_v34 = vld [vmem:[%s13160_s4 + $0xa8] sm:$0xff]  ;;  %v1366_v35 = vpack.c.bf16 %v1049_v32, %v1048_v31  ;;  %v1047_v38 = vld [vmem:[%s13160_s4 + $0x18] sm:$0xff]  ;;  %v1062_v39 = vld [vmem:[%s13160_s4 + $0x90] sm:$0xff] }
  0x57   : > { %v1374_v36 = vpack.c.bf16 %v1065_v34, %v1064_v33  ;;  %v1063_v40 = vld [vmem:[%s13160_s4 + $0x98] sm:$0xff]  ;;  %v1365_v41 = vpack.c.bf16 %v1047_v38, %v1046_v37  ;;  %v1044_v43 = vld [vmem:[%s13160_s4] sm:$0xff]  ;;  %v1045_v44 = vld [vmem:[%s13160_s4 + $0x8] sm:$0xff] }
  0x58   : > { %v1373_v42 = vpack.c.bf16 %v1063_v40, %v1062_v39  ;;  %v1060_v45 = vld [vmem:[%s13160_s4 + $0x80] sm:$0xff]  ;;  %v1061_v46 = vld [vmem:[%s13160_s4 + $0x88] sm:$0xff]  ;;  %v1364_v47 = vpack.c.bf16 %v1045_v44, %v1044_v43  ;;  %v10231_v3 = vld [vmem:[%s12983_s9 + $0x30] sm:$0xf]  ;;  %s12964_s4 = smov 64  }
  0x59   : > { %2822 = vmatpush.bf16.msra.mxu0 %v1369_v17  ;;  %12820 = vmatpush.bf16.msra.mxu2 %v1369_v17  ;;  %v1372_v50 = vpack.c.bf16 %v1061_v46, %v1060_v45  ;;  %v12331_v4 = vld [vmem:[%s12983_s9 + $0x34] sm:$0xf0]  ;;  %v12330_v5 = vld [vmem:[%s12983_s9 + $0x34] sm:$0xf]  ;;  %v10233_v6 = vld [vmem:[%s12983_s9 + $0x38] sm:$0xf0] }
  0x5a   : > { %3551 = vmatpush.bf16.msra.mxu1 %v1377_v18  ;;  %12828 = vmatpush.bf16.msra.mxu3 %v1377_v18  ;;  %v10232_v7 = vor.u32 %v12331_v4, %v10231_v3  ;;  %v10236_v8 = vor.u32 %v12330_v5, %v10233_v6  ;;  %v10239_v9 = vld [vmem:[%s12983_s9 + $0x40] sm:$0xf]  ;;  %v12333_v10 = vld [vmem:[%s12983_s9 + $0x44] sm:$0xf0]  ;;  %v12332_v11 = vld [vmem:[%s12983_s9 + $0x44] sm:$0xf] }
  0x5b   : > { %v10241_v12 = vld [vmem:[%s12983_s9 + $0x48] sm:$0xf0]  ;;  %v10240_v13 = vor.u32 %v12333_v10, %v10239_v9  ;;  %v10247_v15 = vld [vmem:[%s12983_s9 + $0x50] sm:$0xf]  ;;  %v12335_v16 = vld [vmem:[%s12983_s9 + $0x54] sm:$0xf0] }
  0x5c   : > { %v10244_v14 = vor.u32 %v12332_v11, %v10241_v12  ;;  %v12334_v17 = vld [vmem:[%s12983_s9 + $0x54] sm:$0xf]  ;;  %v10249_v18 = vld [vmem:[%s12983_s9 + $0x58] sm:$0xf0]  ;;  %v10248_v19 = vor.u32 %v12335_v16, %v10247_v15  ;;  %v10255_v21 = vld [vmem:[%s12983_s9 + $0x60] sm:$0xf] }
  0x5d   : > { %2823 = vmatpush.bf16.msra.mxu0 %v1368_v23  ;;  %12821 = vmatpush.bf16.msra.mxu2 %v1368_v23  ;;  %v10252_v20 = vor.u32 %v12334_v17, %v10249_v18  ;;  %v12337_v22 = vld [vmem:[%s12983_s9 + $0x64] sm:$0xf0]  ;;  %v12336_v23 = vld [vmem:[%s12983_s9 + $0x64] sm:$0xf]  ;;  %v10263_v27 = vld [vmem:[%s12983_s9 + $0x70] sm:$0xf] }
  0x5e   : > { %3552 = vmatpush.bf16.msra.mxu1 %v1376_v24  ;;  %12829 = vmatpush.bf16.msra.mxu3 %v1376_v24  ;;  %v10257_v24 = vld [vmem:[%s12983_s9 + $0x68] sm:$0xf0]  ;;  %v10256_v25 = vor.u32 %v12337_v22, %v10255_v21  ;;  %v12339_v28 = vld [vmem:[%s12983_s9 + $0x74] sm:$0xf0]  ;;  %v10271_v33 = vld [vmem:[%s12983_s9 + $0x80] sm:$0xf] }
  0x5f   : > { %v10260_v26 = vor.u32 %v12336_v23, %v10257_v24  ;;  %v10264_v31 = vor.u32 %v12339_v28, %v10263_v27  ;;  %v12341_v34 = vld [vmem:[%s12983_s9 + $0x84] sm:$0xf0]  ;;  %v12579_v43 = vld [vmem:[%s12983_s9 + $0x7f4] sm:$0xf0]  ;;  %v12578_v44 = vld [vmem:[%s12983_s9 + $0x7f4] sm:$0xf] }
  0x60   : > { %v10272_v37 = vor.u32 %v12341_v34, %v10271_v33  ;;  %v11225_v46 = vld [vmem:[%s12983_s9 + $0x7f8] sm:$0xf0]  ;;  %v12342_v55 = vld [vmem:[%s12983_s9 + $0x94] sm:$0xf]  ;;  %v12580_v3 = vld [vmem:[%s12983_s9 + $0x804] sm:$0xf] }
  0x61   : > { %2824 = vmatpush.bf16.msra.mxu0 %v1367_v29  ;;  %12822 = vmatpush.bf16.msra.mxu2 %v1367_v29  ;;  %v12338_v29 = vld [vmem:[%s12983_s9 + $0x74] sm:$0xf]  ;;  %v10281_v56 = vld [vmem:[%s12983_s9 + $0x98] sm:$0xf0]  ;;  %v11233_v5 = vld [vmem:[%s12983_s9 + $0x808] sm:$0xf0] }
  0x62   : > { %3553 = vmatpush.bf16.msra.mxu1 %v1375_v30  ;;  %12830 = vmatpush.bf16.msra.mxu3 %v1375_v30  ;;  %v10265_v30 = vld [vmem:[%s12983_s9 + $0x78] sm:$0xf0]  ;;  %v10284_v62 = vor.u32 %v12342_v55, %v10281_v56  ;;  %v11236_v6 = vor.u32 %v12580_v3, %v11233_v5  ;;  %v10287_v12 = vld [vmem:[%s12983_s9 + $0xa0] sm:$0xf]  ;;  %v10289_v15 = vld [vmem:[%s12983_s9 + $0xa8] sm:$0xf0] }
  0x63   : > { %v10268_v32 = vor.u32 %v12338_v29, %v10265_v30  ;;  %v11239_v24 = vld [vmem:[%s12983_s9 + $0x810] sm:$0xf]  ;;  %v11241_v28 = vld [vmem:[%s12983_s9 + $0x818] sm:$0xf0] }
  0x65   : > { %2825 = vmatpush.bf16.msra.mxu0 %v1366_v35  ;;  %12823 = vmatpush.bf16.msra.mxu2 %v1366_v35  ;;  %v12340_v35 = vld [vmem:[%s12983_s9 + $0x84] sm:$0xf] }
  0x66   : > { %3554 = vmatpush.bf16.msra.mxu1 %v1374_v36  ;;  %12831 = vmatpush.bf16.msra.mxu3 %v1374_v36  ;;  %v10273_v36 = vld [vmem:[%s12983_s9 + $0x88] sm:$0xf0] }
  0x67   : > { %v10276_v39 = vor.u32 %v12340_v35, %v10273_v36  ;;  %v10295_v35 = vld [vmem:[%s12983_s9 + $0xb0] sm:$0xf]  ;;  %v12347_v36 = vld [vmem:[%s12983_s9 + $0xb4] sm:$0xf0] }
  0x69   : > { %2826 = vmatpush.bf16.msra.mxu0 %v1365_v41  ;;  %12824 = vmatpush.bf16.msra.mxu2 %v1365_v41 }
  0x6a   : > { %3555 = vmatpush.bf16.msra.mxu1 %v1373_v42  ;;  %12832 = vmatpush.bf16.msra.mxu3 %v1373_v42  ;;  %v11223_v42 = vld [vmem:[%s12983_s9 + $0x7f0] sm:$0xf] }
  0x6b   : > { %v11224_v45 = vor.u32 %v12579_v43, %v11223_v42 }
  0x6d   : > { %2827 = vmatpush.bf16.msra.mxu0 %v1364_v47  ;;  %12825 = vmatpush.bf16.msra.mxu2 %v1364_v47  ;;  %v11228_v47 = vor.u32 %v12578_v44, %v11225_v46 }
  0x6e   : > { %3556 = vmatpush.bf16.msra.mxu1 %v1372_v50  ;;  %12833 = vmatpush.bf16.msra.mxu3 %v1372_v50 }
  0x70   : > { %2828 = vmatmul.bf16.vlgmr.msra.gmra.mxu0 %v10208_v53  ;;  %3463 = vmatmul.bf16.vlgmr.msra.gmra.mxu2 %v11224_v45  ;;  %v10279_v53 = vld [vmem:[%s12983_s9 + $0x90] sm:$0xf] }
  0x71   : > { %3557 = vmatmul.bf16.vlgmr.msra.gmra.mxu1 %v10212_v54  ;;  %4192 = vmatmul.bf16.vlgmr.msra.gmra.mxu3 %v11228_v47  ;;  %v12343_v54 = vld [vmem:[%s12983_s9 + $0x94] sm:$0xf0]  ;;  %v11247_v47 = vld [vmem:[%s12983_s9 + $0x820] sm:$0xf] }
  0x80   : > { %2833 = vmatmul.bf16.gmra.mxu0 %v10216_v59  ;;  %v10280_v59 = vor.u32 %v12343_v54, %v10279_v53 }
  0x81   : > { %3562 = vmatmul.bf16.gmra.mxu1 %v10220_v60  ;;  %4197 = vmatmul.bf16.gmra.mxu3 %v11236_v6  ;;  %v12394_v60 = vld [vmem:[%s12983_s9 + $0x234] sm:$0xf] }
  0x90   : > { %2838 = vmatmul.bf16.gmra.mxu0 %v10224_v1  ;;  %v11231_v1 = vld [vmem:[%s12983_s9 + $0x800] sm:$0xf] }
  0x91   : > { %3567 = vmatmul.bf16.gmra.mxu1 %v10228_v2  ;;  %v12581_v2 = vld [vmem:[%s12983_s9 + $0x804] sm:$0xf0] }
  0x92   : > { %v11232_v4 = vor.u32 %v12581_v2, %v11231_v1 }
  0x94   : > { %3468 = vmatmul.bf16.gmra.mxu2 %v11232_v4 }
  0xa0   : > { %2843 = vmatmul.bf16.gmra.mxu0 %v10232_v7 }
  0xa1   : > { %3572 = vmatmul.bf16.gmra.mxu1 %v10236_v8 }
  0xb0   : > { %2848 = vmatmul.bf16.gmra.mxu0 %v10240_v13  ;;  %v12345_v13 = vld [vmem:[%s12983_s9 + $0xa4] sm:$0xf0] }
  0xb1   : > { %3577 = vmatmul.bf16.gmra.mxu1 %v10244_v14  ;;  %v12344_v14 = vld [vmem:[%s12983_s9 + $0xa4] sm:$0xf]  ;;  %v10288_v18 = vor.u32 %v12345_v13, %v10287_v12  ;;  %v11257_v13 = vld [vmem:[%s12983_s9 + $0x838] sm:$0xf0] }
  0xb2   : > { %v10292_v21 = vor.u32 %v12344_v14, %v10289_v15 }
  0xc0   : > { %2853 = vmatmul.bf16.gmra.mxu0 %v10248_v19  ;;  %v12368_v19 = vld [vmem:[%s12983_s9 + $0x164] sm:$0xf] }
  0xc1   : > { %3582 = vmatmul.bf16.gmra.mxu1 %v10252_v20 }
  0xd0   : > { %2858 = vmatmul.bf16.gmra.mxu0 %v10256_v25  ;;  %v12583_v25 = vld [vmem:[%s12983_s9 + $0x814] sm:$0xf0] }
  0xd1   : > { %3587 = vmatmul.bf16.gmra.mxu1 %v10260_v26  ;;  %v12582_v26 = vld [vmem:[%s12983_s9 + $0x814] sm:$0xf]  ;;  %v11240_v27 = vor.u32 %v12583_v25, %v11239_v24  ;;  %v12351_v24 = vld [vmem:[%s12983_s9 + $0xd4] sm:$0xf0] }
  0xd2   : > { %v11244_v29 = vor.u32 %v12582_v26, %v11241_v28  ;;  %v12350_v25 = vld [vmem:[%s12983_s9 + $0xd4] sm:$0xf]  ;;  %v10313_v26 = vld [vmem:[%s12983_s9 + $0xd8] sm:$0xf0] }
  0xd3   : > { %3473 = vmatmul.bf16.gmra.mxu2 %v11240_v27 }
  0xd4   : > { %4202 = vmatmul.bf16.gmra.mxu3 %v11244_v29 }
  0xe0   : > { %2863 = vmatmul.bf16.gmra.mxu0 %v10264_v31 }
  0xe1   : > { %3592 = vmatmul.bf16.gmra.mxu1 %v10268_v32 }
  0xed   : > { %v2829_v38 = vpop.f32.mrf.mxu0 }
  0xee   : > { %v3558_v40 = vpop.f32.mrf.mxu1 }
  0xef   : > { %v3559_v41 = vadd.f32 %v3558_v40, %v2829_v38  ;;  %v10297_v38 = vld [vmem:[%s12983_s9 + $0xb8] sm:$0xf0] }
  0xf0   : > { %2868 = vmatmul.bf16.gmra.mxu0 %v10272_v37  ;;  %v12346_v37 = vld [vmem:[%s12983_s9 + $0xb4] sm:$0xf] }
  0xf1   : > { %3597 = vmatmul.bf16.gmra.mxu1 %v10276_v39  ;;  %v4278_v50 = vpack.c.bf16 %v3559_v41, %v3559_v41  ;;  %v10296_v41 = vor.u32 %v12347_v36, %v10295_v35  ;;  %v10300_v44 = vor.u32 %v12346_v37, %v10297_v38  ;;  %v11263_v35 = vld [vmem:[%s12983_s9 + $0x840] sm:$0xf]  ;;  %v12589_v36 = vld [vmem:[%s12983_s9 + $0x844] sm:$0xf0]  ;;  %v12588_v37 = vld [vmem:[%s12983_s9 + $0x844] sm:$0xf] }
  0xf2   : > { %v11264_v38 = vor.u32 %v12589_v36, %v11263_v35 }
  0xf3   : > { %v13238_v57 = vunpack.c.l.b16 %v4278_v50 }
  0xf5   : > { %v2831_v48 = vpop.f32.mrf.mxu0  ;;  %16292 = vst [vmem:[#allocation20_spill] sm:$0xff] %v13238_v57  ;;  %v10993_v57 = vld [vmem:[%s12983_s9 + $0x628] sm:$0xf0] }
  0xf6   : > { %v3560_v49 = vpop.f32.mrf.mxu1 }
  0xf7   : > { %v3561_v51 = vadd.f32 %v3560_v49, %v2831_v48  ;;  %v12585_v48 = vld [vmem:[%s12983_s9 + $0x824] sm:$0xf0]  ;;  %v12584_v49 = vld [vmem:[%s12983_s9 + $0x824] sm:$0xf] }
  0xf8   : > { %v11248_v50 = vor.u32 %v12585_v48, %v11247_v47 }
  0xf9   : > { %v4279_v52 = vpack.c.bf16 %v3561_v51, %v3561_v51  ;;  %v11249_v51 = vld [vmem:[%s12983_s9 + $0x828] sm:$0xf0] }
  0xfa   : > { %3478 = vmatmul.bf16.gmra.mxu2 %v11248_v50  ;;  %v12353_v50 = vld [vmem:[%s12983_s9 + $0xe4] sm:$0xf0] }
  0xfb   : > { %v13240_v58 = vunpack.c.l.b16 %v4279_v52  ;;  %v11252_v52 = vor.u32 %v12584_v49, %v11249_v51  ;;  %v10319_v49 = vld [vmem:[%s12983_s9 + $0xe0] sm:$0xf]  ;;  %v12352_v51 = vld [vmem:[%s12983_s9 + $0xe4] sm:$0xf] }
  0xfd   : > { %16293 = vst [vmem:[#allocation21_spill] sm:$0xff] %v13240_v58  ;;  %v2834_v61 = vpop.f32.mrf.mxu0  ;;  %4207 = vmatmul.bf16.gmra.mxu3 %v11252_v52  ;;  %v10321_v52 = vld [vmem:[%s12983_s9 + $0xe8] sm:$0xf0]  ;;  %v12522_v58 = vld [vmem:[%s12983_s9 + $0x634] sm:$0xf] }
  0xfe   : > { %v3563_v63 = vpop.f32.mrf.mxu1 }
  0xff   : > { %v3564_v0 = vadd.f32 %v3563_v63, %v2834_v61  ;;  %v10303_v61 = vld [vmem:[%s12983_s9 + $0xc0] sm:$0xf]  ;;  %v12348_v63 = vld [vmem:[%s12983_s9 + $0xc4] sm:$0xf] }
 0x100   : > { %2873 = vmatmul.bf16.gmra.mxu0 %v10280_v59 }
 0x101   : > { %3602 = vmatmul.bf16.gmra.mxu1 %v10284_v62  ;;  %v4280_v9 = vpack.c.bf16 %v3564_v0, %v3564_v0  ;;  %v12349_v62 = vld [vmem:[%s12983_s9 + $0xc4] sm:$0xf0]  ;;  %v10305_v0 = vld [vmem:[%s12983_s9 + $0xc8] sm:$0xf0] }
 0x102   : > { %v10304_v3 = vor.u32 %v12349_v62, %v10303_v61  ;;  %v10308_v6 = vor.u32 %v12348_v63, %v10305_v0  ;;  %v10324_v61 = vor.u32 %v12352_v51, %v10321_v52  ;;  %v4193_v51 = vpop.f32.mrf.mxu3 }
 0x103   : > { %v13252_v16 = vunpack.c.l.b16 %v4280_v9  ;;  %v11255_v9 = vld [vmem:[%s12983_s9 + $0x830] sm:$0xf] }
 0x105   : > { %v2836_v7 = vpop.f32.mrf.mxu0  ;;  %16294 = vst [vmem:[#allocation22_spill] sm:$0xff] %v13252_v16  ;;  %v10865_v16 = vld [vmem:[%s12983_s9 + $0x528] sm:$0xf0] }
 0x106   : > { %v3565_v8 = vpop.f32.mrf.mxu1 }
 0x107   : > { %v3566_v10 = vadd.f32 %v3565_v8, %v2836_v7 }
 0x109   : > { %v4281_v11 = vpack.c.bf16 %v3566_v10, %v3566_v10  ;;  %v12587_v10 = vld [vmem:[%s12983_s9 + $0x834] sm:$0xf0] }
 0x10a   : > { %v11256_v12 = vor.u32 %v12587_v10, %v11255_v9  ;;  %v12355_v9 = vld [vmem:[%s12983_s9 + $0xf4] sm:$0xf0]  ;;  %v12354_v10 = vld [vmem:[%s12983_s9 + $0xf4] sm:$0xf] }
 0x10b   : > { %v13254_v17 = vunpack.c.l.b16 %v4281_v11  ;;  %v12586_v11 = vld [vmem:[%s12983_s9 + $0x834] sm:$0xf] }
 0x10c   : > { %v11260_v14 = vor.u32 %v12586_v11, %v11257_v13  ;;  %3483 = vmatmul.bf16.gmra.mxu2 %v11256_v12  ;;  %v10329_v11 = vld [vmem:[%s12983_s9 + $0xf8] sm:$0xf0] }
 0x10d   : > { %16295 = vst [vmem:[#allocation23_spill] sm:$0xff] %v13254_v17  ;;  %v2839_v20 = vpop.f32.mrf.mxu0  ;;  %v12490_v17 = vld [vmem:[%s12983_s9 + $0x534] sm:$0xf] }
 0x10e   : > { %v3568_v22 = vpop.f32.mrf.mxu1  ;;  %4212 = vmatmul.bf16.gmra.mxu3 %v11260_v14 }
 0x10f   : > { %v3569_v23 = vadd.f32 %v3568_v22, %v2839_v20 }
 0x110   : > { %2878 = vmatmul.bf16.gmra.mxu0 %v10288_v18 }
 0x111   : > { %3607 = vmatmul.bf16.gmra.mxu1 %v10292_v21  ;;  %v4282_v32 = vpack.c.bf16 %v3569_v23, %v3569_v23  ;;  %v10311_v23 = vld [vmem:[%s12983_s9 + $0xd0] sm:$0xf] }
 0x112   : > { %v10312_v29 = vor.u32 %v12351_v24, %v10311_v23 }
 0x113   : > { %v13266_v39 = vunpack.c.l.b16 %v4282_v32  ;;  %v10316_v32 = vor.u32 %v12350_v25, %v10313_v26 }
 0x115   : > { %v2841_v30 = vpop.f32.mrf.mxu0  ;;  %16296 = vst [vmem:[#allocation24_spill] sm:$0xff] %v13266_v39  ;;  %v10761_v39 = vld [vmem:[%s12983_s9 + $0x458] sm:$0xf0] }
 0x116   : > { %v3570_v31 = vpop.f32.mrf.mxu1 }
 0x117   : > { %v3571_v33 = vadd.f32 %v3570_v31, %v2841_v30 }
 0x119   : > { %v4283_v34 = vpack.c.bf16 %v3571_v33, %v3571_v33 }
 0x11b   : > { %v13268_v40 = vunpack.c.l.b16 %v4283_v34 }
 0x11c   : > { %3488 = vmatmul.bf16.gmra.mxu2 %v11264_v38 }
 0x11d   : > { %16297 = vst [vmem:[#allocation25_spill] sm:$0xff] %v13268_v40  ;;  %v2844_v43 = vpop.f32.mrf.mxu0  ;;  %v12464_v40 = vld [vmem:[%s12983_s9 + $0x464] sm:$0xf] }
 0x11e   : > { %v3573_v45 = vpop.f32.mrf.mxu1 }
 0x11f   : > { %v3574_v46 = vadd.f32 %v3573_v45, %v2844_v43 }
 0x120   : > { %2883 = vmatmul.bf16.gmra.mxu0 %v10296_v41  ;;  %v11265_v41 = vld [vmem:[%s12983_s9 + $0x848] sm:$0xf0] }
 0x121   : > { %3612 = vmatmul.bf16.gmra.mxu1 %v10300_v44  ;;  %v4284_v55 = vpack.c.bf16 %v3574_v46, %v3574_v46  ;;  %v11268_v43 = vor.u32 %v12588_v37, %v11265_v41 }
 0x123   : > { %v13280_v1 = vunpack.c.l.b16 %v4284_v55  ;;  %4217 = vmatmul.bf16.gmra.mxu3 %v11268_v43  ;;  %v10320_v55 = vor.u32 %v12353_v50, %v10319_v49 }
 0x125   : > { %v2846_v53 = vpop.f32.mrf.mxu0  ;;  %16298 = vst [vmem:[#allocation26_spill] sm:$0xff] %v13280_v1  ;;  %v10737_v1 = vld [vmem:[%s12983_s9 + $0x428] sm:$0xf0] }
 0x126   : > { %v3575_v54 = vpop.f32.mrf.mxu1 }
 0x127   : > { %v3576_v56 = vadd.f32 %v3575_v54, %v2846_v53 }
 0x129   : > { %v4285_v59 = vpack.c.bf16 %v3576_v56, %v3576_v56  ;;  %v10385_v56 = vld [vmem:[%s12983_s9 + $0x168] sm:$0xf0] }
 0x12b   : > { %v13282_v2 = vunpack.c.l.b16 %v4285_v59 }
 0x12d   : > { %16299 = vst [vmem:[#allocation27_spill] sm:$0xff] %v13282_v2  ;;  %v2849_v5 = vpop.f32.mrf.mxu0  ;;  %v12458_v2 = vld [vmem:[%s12983_s9 + $0x434] sm:$0xf] }
 0x12e   : > { %v3578_v7 = vpop.f32.mrf.mxu1 }
 0x12f   : > { %v3579_v8 = vadd.f32 %v3578_v7, %v2849_v5 }
 0x130   : > { %2888 = vmatmul.bf16.gmra.mxu0 %v10304_v3 }
 0x131   : > { %3617 = vmatmul.bf16.gmra.mxu1 %v10308_v6  ;;  %v4286_v20 = vpack.c.bf16 %v3579_v8, %v3579_v8  ;;  %v10327_v8 = vld [vmem:[%s12983_s9 + $0xf0] sm:$0xf] }
 0x132   : > { %v10328_v14 = vor.u32 %v12355_v9, %v10327_v8 }
 0x133   : > { %v13294_v27 = vunpack.c.l.b16 %v4286_v20  ;;  %v10332_v20 = vor.u32 %v12354_v10, %v10329_v11 }
 0x135   : > { %v2851_v15 = vpop.f32.mrf.mxu0  ;;  %16300 = vst [vmem:[#allocation28_spill] sm:$0xff] %v13294_v27  ;;  %v10649_v27 = vld [vmem:[%s12983_s9 + $0x378] sm:$0xf0] }
 0x136   : > { %v3580_v18 = vpop.f32.mrf.mxu1 }
 0x137   : > { %v3581_v21 = vadd.f32 %v3580_v18, %v2851_v15  ;;  %v12369_v15 = vld [vmem:[%s12983_s9 + $0x164] sm:$0xf0] }
 0x139   : > { %v4287_v22 = vpack.c.bf16 %v3581_v21, %v3581_v21 }
 0x13b   : > { %v13296_v28 = vunpack.c.l.b16 %v4287_v22 }
 0x13d   : > { %16301 = vst [vmem:[#allocation29_spill] sm:$0xff] %v13296_v28  ;;  %v2854_v31 = vpop.f32.mrf.mxu0  ;;  %v12452_v28 = vld [vmem:[%s12983_s9 + $0x404] sm:$0xf] }
 0x13e   : > { %v3583_v33 = vpop.f32.mrf.mxu1 }
 0x13f   : > { %v3584_v34 = vadd.f32 %v3583_v33, %v2854_v31  ;;  %v10335_v31 = vld [vmem:[%s12983_s9 + $0x100] sm:$0xf]  ;;  %v12356_v33 = vld [vmem:[%s12983_s9 + $0x104] sm:$0xf] }
 0x140   : > { %2893 = vmatmul.bf16.gmra.mxu0 %v10312_v29 }
 0x141   : > { %3622 = vmatmul.bf16.gmra.mxu1 %v10316_v32  ;;  %v4288_v46 = vpack.c.bf16 %v3584_v34, %v3584_v34  ;;  %v12357_v32 = vld [vmem:[%s12983_s9 + $0x104] sm:$0xf0]  ;;  %v10337_v34 = vld [vmem:[%s12983_s9 + $0x108] sm:$0xf0] }
 0x142   : > { %v10336_v37 = vor.u32 %v12357_v32, %v10335_v31  ;;  %v10340_v43 = vor.u32 %v12356_v33, %v10337_v34  ;;  %v12360_v31 = vld [vmem:[%s12983_s9 + $0x124] sm:$0xf]  ;;  %v10353_v32 = vld [vmem:[%s12983_s9 + $0x128] sm:$0xf0] }
 0x143   : > { %v13308_v53 = vunpack.c.l.b16 %v4288_v46 }
 0x145   : > { %v2856_v44 = vpop.f32.mrf.mxu0  ;;  %16302 = vst [vmem:[#allocation30_spill] sm:$0xff] %v13308_v53  ;;  %v10881_v53 = vld [vmem:[%s12983_s9 + $0x548] sm:$0xf0] }
 0x146   : > { %v3585_v45 = vpop.f32.mrf.mxu1 }
 0x147   : > { %v3586_v47 = vadd.f32 %v3585_v45, %v2856_v44 }
 0x149   : > { %v4289_v48 = vpack.c.bf16 %v3586_v47, %v3586_v47 }
 0x14b   : > { %v13310_v54 = vunpack.c.l.b16 %v4289_v48  ;;  %v3464_v48 = vpop.f32.mrf.mxu2 }
 0x14c   : > { %v13344_v8 = vadd.f32 %v4193_v51, %v3464_v48 }
 0x14d   : > { %16303 = vst [vmem:[#allocation31_spill] sm:$0xff] %v13310_v54  ;;  %v2859_v59 = vpop.f32.mrf.mxu0  ;;  %v12516_v54 = vld [vmem:[%s12983_s9 + $0x604] sm:$0xf] }
 0x14e   : > { %v3588_v62 = vpop.f32.mrf.mxu1  ;;  %16310 = vst [vmem:[#allocation38_spill] sm:$0xff] %v13344_v8  ;;  %v12426_v8 = vld [vmem:[%s12983_s9 + $0x334] sm:$0xf] }
 0x14f   : > { %v3589_v63 = vadd.f32 %v3588_v62, %v2859_v59  ;;  %v12359_v59 = vld [vmem:[%s12983_s9 + $0x114] sm:$0xf0]  ;;  %v10345_v62 = vld [vmem:[%s12983_s9 + $0x118] sm:$0xf0] }
 0x150   : > { %2898 = vmatmul.bf16.gmra.mxu0 %v10320_v55  ;;  %v10343_v55 = vld [vmem:[%s12983_s9 + $0x110] sm:$0xf] }
 0x151   : > { %3627 = vmatmul.bf16.gmra.mxu1 %v10324_v61  ;;  %v4290_v5 = vpack.c.bf16 %v3589_v63, %v3589_v63  ;;  %v12358_v61 = vld [vmem:[%s12983_s9 + $0x114] sm:$0xf] }
 0x153   : > { %v13318_v12 = vunpack.c.l.b16 %v4290_v5  ;;  %v13346_v10 = vpop.f32.mrf.mxu2 }
 0x154   : > { %16311 = vst [vmem:[#allocation39_spill] sm:$0xff] %v13346_v10  ;;  %v12428_v10 = vld [vmem:[%s12983_s9 + $0x344] sm:$0xf] }
 0x155   : > { %v2861_v0 = vpop.f32.mrf.mxu0  ;;  %16304 = vst [vmem:[#allocation32_spill] sm:$0xff] %v13318_v12  ;;  %v10769_v12 = vld [vmem:[%s12983_s9 + $0x468] sm:$0xf0] }
 0x156   : > { %v3590_v3 = vpop.f32.mrf.mxu1 }
 0x157   : > { %v3591_v6 = vadd.f32 %v3590_v3, %v2861_v0  ;;  %v10344_v3 = vor.u32 %v12359_v59, %v10343_v55 }
 0x159   : > { %v4291_v7 = vpack.c.bf16 %v3591_v6, %v3591_v6 }
 0x15b   : > { %v13320_v13 = vunpack.c.l.b16 %v4291_v7  ;;  %v10348_v7 = vor.u32 %v12358_v61, %v10345_v62 }
 0x15d   : > { %16305 = vst [vmem:[#allocation33_spill] sm:$0xff] %v13320_v13  ;;  %v2864_v18 = vpop.f32.mrf.mxu0  ;;  %v12484_v13 = vld [vmem:[%s12983_s9 + $0x504] sm:$0xf] }
 0x15e   : > { %v3593_v21 = vpop.f32.mrf.mxu1 }
 0x15f   : > { %v3594_v22 = vadd.f32 %v3593_v21, %v2864_v18  ;;  %v3469_v21 = vpop.f32.mrf.mxu2 }
 0x160   : > { %2903 = vmatmul.bf16.gmra.mxu0 %v10328_v14  ;;  %v13348_v14 = vpop.f32.mrf.mxu3 }
 0x161   : > { %3632 = vmatmul.bf16.gmra.mxu1 %v10332_v20  ;;  %v4292_v25 = vpack.c.bf16 %v3594_v22, %v3594_v22  ;;  %16312 = vst [vmem:[#allocation40_spill] sm:$0xff] %v13348_v14  ;;  %v10617_v14 = vld [vmem:[%s12983_s9 + $0x338] sm:$0xf0] }
 0x163   : > { %v13328_v35 = vunpack.c.l.b16 %v4292_v25 }
 0x165   : > { %v2866_v23 = vpop.f32.mrf.mxu0  ;;  %16306 = vst [vmem:[#allocation34_spill] sm:$0xff] %v13328_v35  ;;  %v10745_v35 = vld [vmem:[%s12983_s9 + $0x438] sm:$0xf0] }
 0x166   : > { %v3595_v24 = vpop.f32.mrf.mxu1 }
 0x167   : > { %v3596_v26 = vadd.f32 %v3595_v24, %v2866_v23 }
 0x168   : > { %v4198_v24 = vpop.f32.mrf.mxu3 }
 0x169   : > { %v4293_v29 = vpack.c.bf16 %v3596_v26, %v3596_v26  ;;  %v10351_v26 = vld [vmem:[%s12983_s9 + $0x120] sm:$0xf] }
 0x16b   : > { %v13330_v36 = vunpack.c.l.b16 %v4293_v29  ;;  %v12361_v29 = vld [vmem:[%s12983_s9 + $0x124] sm:$0xf0] }
 0x16d   : > { %16307 = vst [vmem:[#allocation35_spill] sm:$0xff] %v13330_v36  ;;  %v2869_v41 = vpop.f32.mrf.mxu0  ;;  %v12460_v36 = vld [vmem:[%s12983_s9 + $0x444] sm:$0xf] }
 0x16e   : > { %v3598_v44 = vpop.f32.mrf.mxu1 }
 0x16f   : > { %v3599_v45 = vadd.f32 %v3598_v44, %v2869_v41  ;;  %v10356_v44 = vor.u32 %v12360_v31, %v10353_v32 }
 0x170   : > { %2908 = vmatmul.bf16.gmra.mxu0 %v10336_v37  ;;  %v10352_v37 = vor.u32 %v12361_v29, %v10351_v26 }
 0x171   : > { %3637 = vmatmul.bf16.gmra.mxu1 %v10340_v43  ;;  %v4294_v49 = vpack.c.bf16 %v3599_v45, %v3599_v45  ;;  %v13360_v45 = vadd.f32 %v4198_v24, %v3469_v21  ;;  %v10377_v21 = vld [vmem:[%s12983_s9 + $0x158] sm:$0xf0] }
 0x173   : > { %v13338_v63 = vunpack.c.l.b16 %v4294_v49  ;;  %v13364_v49 = vpop.f32.mrf.mxu3 }
 0x175   : > { %v2871_v46 = vpop.f32.mrf.mxu0  ;;  %16308 = vst [vmem:[#allocation36_spill] sm:$0xff] %v13338_v63  ;;  %v12424_v63 = vld [vmem:[%s12983_s9 + $0x324] sm:$0xf] }
 0x176   : > { %v3600_v47 = vpop.f32.mrf.mxu1 }
 0x177   : > { %v3601_v50 = vadd.f32 %v3600_v47, %v2871_v46  ;;  %v13362_v47 = vpop.f32.mrf.mxu2 }
 0x179   : > { %v4295_v52 = vpack.c.bf16 %v3601_v50, %v3601_v50 }
 0x17b   : > { %v13340_v0 = vunpack.c.l.b16 %v4295_v52  ;;  %v13368_v61 = vpop.f32.mrf.mxu3 }
 0x17d   : > { %16309 = vst [vmem:[#allocation37_spill] sm:$0xff] %v13340_v0  ;;  %v2874_v6 = vpop.f32.mrf.mxu0  ;;  %v10609_v0 = vld [vmem:[%s12983_s9 + $0x328] sm:$0xf0] }
 0x17e   : > { %v3603_v9 = vpop.f32.mrf.mxu1 }
 0x17f   : > { %v3604_v11 = vadd.f32 %v3603_v9, %v2874_v6  ;;  %v13366_v52 = vpop.f32.mrf.mxu2  ;;  %v12363_v6 = vld [vmem:[%s12983_s9 + $0x134] sm:$0xf0]  ;;  %v10361_v9 = vld [vmem:[%s12983_s9 + $0x138] sm:$0xf0] }
 0x180   : > { %2913 = vmatmul.bf16.gmra.mxu0 %v10344_v3  ;;  %v10359_v3 = vld [vmem:[%s12983_s9 + $0x130] sm:$0xf] }
 0x181   : > { %3642 = vmatmul.bf16.gmra.mxu1 %v10348_v7  ;;  %v4296_v22 = vpack.c.bf16 %v3604_v11, %v3604_v11  ;;  %v12362_v7 = vld [vmem:[%s12983_s9 + $0x134] sm:$0xf] }
 0x183   : > { %v13354_v33 = vunpack.c.l.b16 %v4296_v22  ;;  %v4205_v29 = vpop.f32.mrf.mxu3 }
 0x185   : > { %v2876_v18 = vpop.f32.mrf.mxu0  ;;  %16313 = vst [vmem:[#allocation41_spill] sm:$0xff] %v13354_v33  ;;  %v12422_v33 = vld [vmem:[%s12983_s9 + $0x314] sm:$0xf] }
 0x186   : > { %v3605_v20 = vpop.f32.mrf.mxu1 }
 0x187   : > { %v3606_v23 = vadd.f32 %v3605_v20, %v2876_v18  ;;  %v10360_v20 = vor.u32 %v12363_v6, %v10359_v3 }
 0x189   : > { %v4297_v25 = vpack.c.bf16 %v3606_v23, %v3606_v23  ;;  %v10364_v23 = vor.u32 %v12362_v7, %v10361_v9  ;;  %v12366_v7 = vld [vmem:[%s12983_s9 + $0x154] sm:$0xf] }
 0x18a   : > { %v10380_v5 = vor.u32 %v12366_v7, %v10377_v21 }
 0x18b   : > { %v13356_v34 = vunpack.c.l.b16 %v4297_v25  ;;  %v3476_v25 = vpop.f32.mrf.mxu2 }
 0x18d   : > { %16314 = vst [vmem:[#allocation42_spill] sm:$0xff] %v13356_v34  ;;  %v2879_v43 = vpop.f32.mrf.mxu0  ;;  %v10601_v34 = vld [vmem:[%s12983_s9 + $0x318] sm:$0xf0] }
 0x18e   : > { %v3608_v46 = vpop.f32.mrf.mxu1 }
 0x18f   : > { %v3609_v48 = vadd.f32 %v3608_v46, %v2879_v43  ;;  %v13382_v46 = vpop.f32.mrf.mxu3 }
 0x190   : > { %2918 = vmatmul.bf16.gmra.mxu0 %v10352_v37 }
 0x191   : > { %3647 = vmatmul.bf16.gmra.mxu1 %v10356_v44  ;;  %v4298_v55 = vpack.c.bf16 %v3609_v48, %v3609_v48 }
 0x193   : > { %v13374_v11 = vunpack.c.l.b16 %v4298_v55  ;;  %v13380_v37 = vpop.f32.mrf.mxu2  ;;  %v12364_v55 = vld [vmem:[%s12983_s9 + $0x144] sm:$0xf] }
 0x195   : > { %v2881_v50 = vpop.f32.mrf.mxu0  ;;  %16315 = vst [vmem:[#allocation43_spill] sm:$0xff] %v13374_v11 }
 0x196   : > { %v3610_v51 = vpop.f32.mrf.mxu1 }
 0x197   : > { %v3611_v59 = vadd.f32 %v3610_v51, %v2881_v50  ;;  %v10367_v50 = vld [vmem:[%s12983_s9 + $0x140] sm:$0xf]  ;;  %v12365_v51 = vld [vmem:[%s12983_s9 + $0x144] sm:$0xf0] }
 0x198   : > { %v10368_v6 = vor.u32 %v12365_v51, %v10367_v50 }
 0x199   : > { %v4299_v62 = vpack.c.bf16 %v3611_v59, %v3611_v59  ;;  %v10369_v59 = vld [vmem:[%s12983_s9 + $0x148] sm:$0xf0] }
 0x19b   : > { %v13376_v18 = vunpack.c.l.b16 %v4299_v62 }
 0x19d   : > { %16316 = vst [vmem:[#allocation44_spill] sm:$0xff] %v13376_v18  ;;  %v2884_v22 = vpop.f32.mrf.mxu0 }
 0x19e   : > { %v3613_v24 = vpop.f32.mrf.mxu1 }
 0x19f   : > { %v3614_v26 = vadd.f32 %v3613_v24, %v2884_v22 }
 0x1a0   : > { %2923 = vmatmul.bf16.gmra.mxu0 %v10360_v20  ;;  %v10372_v20 = vor.u32 %v12364_v55, %v10369_v59  ;;  %v10375_v55 = vld [vmem:[%s12983_s9 + $0x150] sm:$0xf]  ;;  %v12367_v59 = vld [vmem:[%s12983_s9 + $0x154] sm:$0xf0] }
 0x1a1   : > { %3652 = vmatmul.bf16.gmra.mxu1 %v10364_v23  ;;  %v4300_v43 = vpack.c.bf16 %v3614_v26, %v3614_v26  ;;  %v13394_v23 = vpop.f32.mrf.mxu2  ;;  %v13396_v26 = vpop.f32.mrf.mxu3 }
 0x1a3   : > { %v13388_v62 = vunpack.c.l.b16 %v4300_v43 }
 0x1a5   : > { %v2886_v31 = vpop.f32.mrf.mxu0  ;;  %16317 = vst [vmem:[#allocation45_spill] sm:$0xff] %v13388_v62  ;;  %v12406_v62 = vld [vmem:[%s12983_s9 + $0x294] sm:$0xf] }
 0x1a6   : > { %v3615_v32 = vpop.f32.mrf.mxu1 }
 0x1a7   : > { %v3616_v44 = vadd.f32 %v3615_v32, %v2886_v31 }
 0x1a9   : > { %v4301_v48 = vpack.c.bf16 %v3616_v44, %v3616_v44  ;;  %v13398_v43 = vpop.f32.mrf.mxu2  ;;  %v13400_v50 = vpop.f32.mrf.mxu3 }
 0x1ab   : > { %v13390_v3 = vunpack.c.l.b16 %v4301_v48 }
 0x1ad   : > { %16318 = vst [vmem:[#allocation46_spill] sm:$0xff] %v13390_v3  ;;  %v2889_v9 = vpop.f32.mrf.mxu0  ;;  %v10537_v3 = vld [vmem:[%s12983_s9 + $0x298] sm:$0xf0] }
 0x1ae   : > { %v3618_v22 = vpop.f32.mrf.mxu1 }
 0x1af   : > { %v3619_v24 = vadd.f32 %v3618_v22, %v2889_v9  ;;  %v10376_v22 = vor.u32 %v12367_v59, %v10375_v55 }
 0x1b0   : > { %2928 = vmatmul.bf16.gmra.mxu0 %v10368_v6 }
 0x1b1   : > { %3657 = vmatmul.bf16.gmra.mxu1 %v10372_v20  ;;  %v4302_v44 = vpack.c.bf16 %v3619_v24, %v3619_v24  ;;  %v13412_v24 = vpop.f32.mrf.mxu2 }
 0x1b3   : > { %v13406_v41 = vunpack.c.l.b16 %v4302_v44  ;;  %v4204_v44 = vadd.f32 %v13368_v61, %v13366_v52 }
 0x1b5   : > { %v2891_v31 = vpop.f32.mrf.mxu0  ;;  %16319 = vst [vmem:[#allocation47_spill] sm:$0xff] %v13406_v41  ;;  %v12404_v41 = vld [vmem:[%s12983_s9 + $0x284] sm:$0xf] }
 0x1b6   : > { %v3620_v32 = vpop.f32.mrf.mxu1 }
 0x1b7   : > { %v3621_v48 = vadd.f32 %v3620_v32, %v2891_v31  ;;  %v13414_v32 = vpop.f32.mrf.mxu3 }
 0x1b9   : > { %v4303_v51 = vpack.c.bf16 %v3621_v48, %v3621_v48  ;;  %v4206_v48 = vadd.f32 %v4205_v29, %v3476_v25  ;;  %v3489_v7 = vpop.f32.mrf.mxu2  ;;  %v10487_v25 = vld [vmem:[%s12983_s9 + $0x230] sm:$0xf] }
 0x1bb   : > { %v13408_v9 = vunpack.c.l.b16 %v4303_v51  ;;  %v4536_v51 = vpack.c.bf16 %v4204_v44, %v4204_v44  ;;  %v4537_v55 = vpack.c.bf16 %v4206_v48, %v4206_v48  ;;  %v10388_v44 = vor.u32 %v12368_v19, %v10385_v56 }
 0x1bd   : > { %16320 = vst [vmem:[#allocation48_spill] sm:$0xff] %v13408_v9  ;;  %v2894_v20 = vpop.f32.mrf.mxu0  ;;  %v5465_v38 = vunpack.c.l.b16 %v4537_v55  ;;  %v10529_v9 = vld [vmem:[%s12983_s9 + $0x288] sm:$0xf0] }
 0x1be   : > { %v3623_v30 = vpop.f32.mrf.mxu1 }
 0x1bf   : > { %v3624_v31 = vadd.f32 %v3623_v30, %v2894_v20  ;;  %v4218_v30 = vpop.f32.mrf.mxu3  ;;  %v5464_v20 = vunpack.c.l.b16 %v4536_v51 }
 0x1c0   : > { %2933 = vmatmul.bf16.gmra.mxu0 %v10376_v22  ;;  %v10383_v22 = vld [vmem:[%s12983_s9 + $0x160] sm:$0xf] }
 0x1c1   : > { %3662 = vmatmul.bf16.gmra.mxu1 %v10380_v5  ;;  %v4304_v6 = vpack.c.bf16 %v3624_v31, %v3624_v31  ;;  %v10384_v5 = vor.u32 %v12369_v15, %v10383_v22  ;;  %v4219_v31 = vadd.f32 %v4218_v30, %v3489_v7  ;;  %v5495_v48 = vpack.c.b16 %v5465_v38, %v5464_v20  ;;  %v3491_v51 = vpop.f32.mrf.mxu2 }
 0x1c2   : > { %v4209_v22 = vadd.f32 %v13382_v46, %v13380_v37 }
 0x1c3   : > { %v13422_v52 = vunpack.c.l.b16 %v4304_v6  ;;  %5512 = vrot.lane.b32.xlu0 %v5495_v48, %s12952_s18  ;;  %v12370_v48 = vld [vmem:[%s12983_s9 + $0x174] sm:$0xf] }
 0x1c5   : > { %v2896_v59 = vpop.f32.mrf.mxu0  ;;  %16321 = vst [vmem:[#allocation49_spill] sm:$0xff] %v13422_v52  ;;  %v12402_v52 = vld [vmem:[%s12983_s9 + $0x274] sm:$0xf] }
 0x1c6   : > { %v3625_v21 = vpop.f32.mrf.mxu1 }
 0x1c7   : > { %v3626_v4 = vadd.f32 %v3625_v21, %v2896_v59  ;;  %v4220_v21 = vpop.f32.mrf.mxu3 }
 0x1c9   : > { %v4305_v42 = vpack.c.bf16 %v3626_v4, %v3626_v4  ;;  %v4542_v4 = vpack.c.bf16 %v4219_v31, %v4219_v31  ;;  %v10391_v31 = vld [vmem:[%s12983_s9 + $0x170] sm:$0xf] }
 0x1cb   : > { %v13424_v61 = vunpack.c.l.b16 %v4305_v42  ;;  %v4221_v42 = vadd.f32 %v4220_v21, %v3491_v51  ;;  %v5470_v15 = vunpack.c.l.b16 %v4542_v4 }
 0x1cd   : > { %16322 = vst [vmem:[#allocation50_spill] sm:$0xff] %v13424_v61  ;;  %v2899_v29 = vpop.f32.mrf.mxu0  ;;  %v4543_v6 = vpack.c.bf16 %v4221_v42, %v4221_v42  ;;  %v10521_v61 = vld [vmem:[%s12983_s9 + $0x278] sm:$0xf0] }
 0x1ce   : > { %v3628_v59 = vpop.f32.mrf.mxu1 }
 0x1cf   : > { %v3629_v55 = vadd.f32 %v3628_v59, %v2899_v29  ;;  %v5471_v19 = vunpack.c.l.b16 %v4543_v6  ;;  %v10393_v59 = vld [vmem:[%s12983_s9 + $0x178] sm:$0xf0] }
 0x1d0   : > { %2938 = vmatmul.bf16.gmra.mxu0 %v10384_v5  ;;  %v4211_v5 = vadd.f32 %v13396_v26, %v13394_v23  ;;  %v10396_v37 = vor.u32 %v12370_v48, %v10393_v59  ;;  %v4201_v23 = vadd.f32 %v13364_v49, %v13362_v47  ;;  %v4214_v47 = vadd.f32 %v13400_v50, %v13398_v43  ;;  %v10399_v59 = vld [vmem:[%s12983_s9 + $0x180] sm:$0xf]  ;;  %v12392_v43 = vld [vmem:[%s12983_s9 + $0x224] sm:$0xf] }
 0x1d1   : > { %3667 = vmatmul.bf16.gmra.mxu1 %v10388_v44  ;;  %v5498_v7 = vpack.c.b16 %v5471_v19, %v5470_v15  ;;  %v4306_v30 = vpack.c.bf16 %v3629_v55, %v3629_v55  ;;  %v12371_v44 = vld [vmem:[%s12983_s9 + $0x174] sm:$0xf0]  ;;  %v4538_v55 = vpack.c.bf16 %v4209_v22, %v4209_v22  ;;  %v10481_v15 = vld [vmem:[%s12983_s9 + $0x228] sm:$0xf0] }
 0x1d2   : > { %v10392_v21 = vor.u32 %v12371_v44, %v10391_v31  ;;  %v4539_v42 = vpack.c.bf16 %v4211_v5, %v4211_v5  ;;  %v4216_v44 = vadd.f32 %v13414_v32, %v13412_v24 }
 0x1d3   : > { %5518 = vrot.lane.b32.xlu0 %v5498_v7, %s12952_s18  ;;  %v13438_v51 = vunpack.c.l.b16 %v4306_v30  ;;  %v5466_v26 = vunpack.c.l.b16 %v4538_v55  ;;  %v4535_v7 = vpack.c.bf16 %v4201_v23, %v4201_v23  ;;  %v10401_v55 = vld [vmem:[%s12983_s9 + $0x188] sm:$0xf0] }
 0x1d5   : > { %v2901_v56 = vpop.f32.mrf.mxu0  ;;  %16323 = vst [vmem:[#allocation51_spill] sm:$0xff] %v13438_v51  ;;  %v5463_v31 = vunpack.c.l.b16 %v4535_v7  ;;  %v12400_v51 = vld [vmem:[%s12983_s9 + $0x264] sm:$0xf] }
 0x1d6   : > { %v3630_v38 = vpop.f32.mrf.mxu1 }
 0x1d7   : > { %v3631_v20 = vadd.f32 %v3630_v38, %v2901_v56  ;;  %v5467_v56 = vunpack.c.l.b16 %v4539_v42  ;;  %v4534_v38 = vpack.c.bf16 %v13360_v45, %v13360_v45  ;;  %v12373_v45 = vld [vmem:[%s12983_s9 + $0x184] sm:$0xf0] }
 0x1d9   : > { %v4307_v29 = vpack.c.bf16 %v3631_v20, %v3631_v20  ;;  %v5496_v20 = vpack.c.b16 %v5467_v56, %v5466_v26  ;;  %v5462_v49 = vunpack.c.l.b16 %v4534_v38 }
 0x1db   : > { %v13440_v4 = vunpack.c.l.b16 %v4307_v29  ;;  %5514 = vrot.lane.b32.xlu2 %v5496_v20, %s12952_s18  ;;  %v5494_v26 = vpack.c.b16 %v5463_v31, %v5462_v49  ;;  %v12375_v49 = vld [vmem:[%s12983_s9 + $0x194] sm:$0xf0]  ;;  %v12374_v31 = vld [vmem:[%s12983_s9 + $0x194] sm:$0xf] }
 0x1dd   : > { %16324 = vst [vmem:[#allocation52_spill] sm:$0xff] %v13440_v4  ;;  %v2904_v6 = vpop.f32.mrf.mxu0  ;;  %5510 = vrot.lane.b32.xlu1 %v5494_v26, %s12952_s18  ;;  %v10513_v4 = vld [vmem:[%s12983_s9 + $0x268] sm:$0xf0] }
 0x1de   : > { %v3633_v46 = vpop.f32.mrf.mxu1 }
 0x1df   : > { %v3634_v19 = vadd.f32 %v3633_v46, %v2904_v6  ;;  %v10400_v46 = vor.u32 %v12373_v45, %v10399_v59 }
 0x1e0   : > { %2943 = vmatmul.bf16.gmra.mxu0 %v10392_v21  ;;  %v12372_v21 = vld [vmem:[%s12983_s9 + $0x184] sm:$0xf] }
 0x1e1   : > { %3672 = vmatmul.bf16.gmra.mxu1 %v10396_v37  ;;  %v4308_v5 = vpack.c.bf16 %v3634_v19, %v3634_v19  ;;  %v4540_v37 = vpack.c.bf16 %v4214_v47, %v4214_v47  ;;  %v4541_v19 = vpack.c.bf16 %v4216_v44, %v4216_v44  ;;  %v10404_v23 = vor.u32 %v12372_v21, %v10401_v55  ;;  %v10407_v47 = vld [vmem:[%s12983_s9 + $0x190] sm:$0xf]  ;;  %v10409_v44 = vld [vmem:[%s12983_s9 + $0x198] sm:$0xf0] }
 0x1e2   : > { %v10408_v45 = vor.u32 %v12375_v49, %v10407_v47 }
 0x1e3   : > { %v13457_v42 = vunpack.c.l.b16 %v4308_v5  ;;  %v5468_v32 = vunpack.c.l.b16 %v4540_v37  ;;  %v5469_v56 = vunpack.c.l.b16 %v4541_v19  ;;  %v10412_v37 = vor.u32 %v12374_v31, %v10409_v44 }
 0x1e5   : > { %v2906_v30 = vpop.f32.mrf.mxu0  ;;  %16325 = vst [vmem:[#allocation53_spill] sm:$0xff] %v13457_v42  ;;  %v12398_v42 = vld [vmem:[%s12983_s9 + $0x254] sm:$0xf] }
 0x1e6   : > { %v3635_v22 = vpop.f32.mrf.mxu1 }
 0x1e7   : > { %v3636_v29 = vadd.f32 %v3635_v22, %v2906_v30  ;;  %v5497_v30 = vpack.c.b16 %v5469_v56, %v5468_v32  ;;  %v10415_v56 = vld [vmem:[%s12983_s9 + $0x1a0] sm:$0xf] }
 0x1e9   : > { %v4309_v48 = vpack.c.bf16 %v3636_v29, %v3636_v29  ;;  %5516 = vrot.lane.b32.xlu1 %v5497_v30, %s12952_s18  ;;  %v10417_v30 = vld [vmem:[%s12983_s9 + $0x1a8] sm:$0xf0] }
 0x1eb   : > { %v13459_v6 = vunpack.c.l.b16 %v4309_v48 }
 0x1ed   : > { %16326 = vst [vmem:[#allocation54_spill] sm:$0xff] %v13459_v6  ;;  %v2909_v50 = vpop.f32.mrf.mxu0  ;;  %v10505_v6 = vld [vmem:[%s12983_s9 + $0x258] sm:$0xf0] }
 0x1ee   : > { %v3638_v24 = vpop.f32.mrf.mxu1 }
 0x1ef   : > { %v3639_v38 = vadd.f32 %v3638_v24, %v2909_v50 }
 0x1f0   : > { %2948 = vmatmul.bf16.gmra.mxu0 %v10400_v46 }
 0x1f1   : > { %3677 = vmatmul.bf16.gmra.mxu1 %v10404_v23  ;;  %v4310_v22 = vpack.c.bf16 %v3639_v38, %v3639_v38  ;;  %v12377_v38 = vld [vmem:[%s12983_s9 + $0x1a4] sm:$0xf0] }
 0x1f3   : > { %v4678_v48 = vunpack.c.l.b16 %v4310_v22 }
 0x1f5   : > { %v2911_v7 = vpop.f32.mrf.mxu0 }
 0x1f6   : > { %v3640_v20 = vpop.f32.mrf.mxu1 }
 0x1f7   : > { %v3641_v5 = vadd.f32 %v3640_v20, %v2911_v7  ;;  %v12376_v7 = vld [vmem:[%s12983_s9 + $0x1a4] sm:$0xf] }
 0x1f8   : > { %v10420_v49 = vor.u32 %v12376_v7, %v10417_v30 }
 0x1f9   : > { %v4311_v29 = vpack.c.bf16 %v3641_v5, %v3641_v5  ;;  %v10416_v5 = vor.u32 %v12377_v38, %v10415_v56 }
 0x1fb   : > { %v4679_v59 = vunpack.c.l.b16 %v4311_v29 }
 0x1fd   : > { %v2914_v21 = vpop.f32.mrf.mxu0  ;;  %v4710_v55 = vpack.c.b16 %v4679_v59, %v4678_v48 }
 0x1fe   : > { %v3643_v46 = vpop.f32.mrf.mxu1 }
 0x1ff   : > { %4726 = vrot.lane.b32.xlu0 %v4710_v55, %s12953_s22  ;;  %v3644_v19 = vadd.f32 %v3643_v46, %v2914_v21  ;;  %v12379_v46 = vld [vmem:[%s12983_s9 + $0x1b4] sm:$0xf0] }
 0x200   : > { %2953 = vmatmul.bf16.gmra.mxu0 %v10408_v45 }
 0x201   : > { %3682 = vmatmul.bf16.gmra.mxu1 %v10412_v37  ;;  %v4312_v26 = vpack.c.bf16 %v3644_v19, %v3644_v19  ;;  %v10423_v37 = vld [vmem:[%s12983_s9 + $0x1b0] sm:$0xf]  ;;  %v12378_v19 = vld [vmem:[%s12983_s9 + $0x1b4] sm:$0xf] }
 0x203   : > { %v4680_v20 = vunpack.c.l.b16 %v4312_v26 }
 0x205   : > { %v2916_v50 = vpop.f32.mrf.mxu0 }
 0x206   : > { %v3645_v23 = vpop.f32.mrf.mxu1 }
 0x207   : > { %v3646_v24 = vadd.f32 %v3645_v23, %v2916_v50  ;;  %v10425_v50 = vld [vmem:[%s12983_s9 + $0x1b8] sm:$0xf0] }
 0x208   : > { %v10428_v38 = vor.u32 %v12378_v19, %v10425_v50 }
 0x209   : > { %v4313_v32 = vpack.c.bf16 %v3646_v24, %v3646_v24  ;;  %v10424_v24 = vor.u32 %v12379_v46, %v10423_v37 }
 0x20b   : > { %v4681_v22 = vunpack.c.l.b16 %v4313_v32 }
 0x20d   : > { %v2919_v29 = vpop.f32.mrf.mxu0  ;;  %v4711_v47 = vpack.c.b16 %v4681_v22, %v4680_v20 }
 0x20e   : > { %v3648_v31 = vpop.f32.mrf.mxu1 }
 0x20f   : > { %4728 = vrot.lane.b32.xlu2 %v4711_v47, %s12953_s22  ;;  %v3649_v44 = vadd.f32 %v3648_v31, %v2919_v29  ;;  %v12381_v31 = vld [vmem:[%s12983_s9 + $0x1c4] sm:$0xf0] }
 0x210   : > { %2958 = vmatmul.bf16.gmra.mxu0 %v10416_v5 }
 0x211   : > { %3687 = vmatmul.bf16.gmra.mxu1 %v10420_v49  ;;  %v4314_v45 = vpack.c.bf16 %v3649_v44, %v3649_v44  ;;  %v10431_v49 = vld [vmem:[%s12983_s9 + $0x1c0] sm:$0xf]  ;;  %v12380_v44 = vld [vmem:[%s12983_s9 + $0x1c4] sm:$0xf] }
 0x213   : > { %v4682_v23 = vunpack.c.l.b16 %v4314_v45 }
 0x215   : > { %v2921_v48 = vpop.f32.mrf.mxu0 }
 0x216   : > { %v3650_v59 = vpop.f32.mrf.mxu1 }
 0x217   : > { %v3651_v21 = vadd.f32 %v3650_v59, %v2921_v48  ;;  %v10433_v48 = vld [vmem:[%s12983_s9 + $0x1c8] sm:$0xf0] }
 0x218   : > { %v10436_v46 = vor.u32 %v12380_v44, %v10433_v48 }
 0x219   : > { %v4315_v55 = vpack.c.bf16 %v3651_v21, %v3651_v21  ;;  %v10432_v21 = vor.u32 %v12381_v31, %v10431_v49 }
 0x21b   : > { %v4683_v26 = vunpack.c.l.b16 %v4315_v55 }
 0x21d   : > { %v2924_v32 = vpop.f32.mrf.mxu0  ;;  %v4712_v56 = vpack.c.b16 %v4683_v26, %v4682_v23 }
 0x21e   : > { %v3653_v7 = vpop.f32.mrf.mxu1 }
 0x21f   : > { %4730 = vrot.lane.b32.xlu1 %v4712_v56, %s12953_s22  ;;  %v3654_v30 = vadd.f32 %v3653_v7, %v2924_v32  ;;  %v12383_v7 = vld [vmem:[%s12983_s9 + $0x1d4] sm:$0xf0] }
 0x220   : > { %2963 = vmatmul.bf16.gmra.mxu0 %v10424_v24 }
 0x221   : > { %3692 = vmatmul.bf16.gmra.mxu1 %v10428_v38  ;;  %v4316_v5 = vpack.c.bf16 %v3654_v30, %v3654_v30  ;;  %v10439_v38 = vld [vmem:[%s12983_s9 + $0x1d0] sm:$0xf]  ;;  %v12382_v30 = vld [vmem:[%s12983_s9 + $0x1d4] sm:$0xf] }
 0x223   : > { %v4684_v59 = vunpack.c.l.b16 %v4316_v5 }
 0x225   : > { %v2926_v20 = vpop.f32.mrf.mxu0 }
 0x226   : > { %v3655_v22 = vpop.f32.mrf.mxu1 }
 0x227   : > { %v3656_v29 = vadd.f32 %v3655_v22, %v2926_v20  ;;  %v10441_v20 = vld [vmem:[%s12983_s9 + $0x1d8] sm:$0xf0] }
 0x228   : > { %v10444_v31 = vor.u32 %v12382_v30, %v10441_v20 }
 0x229   : > { %v4317_v47 = vpack.c.bf16 %v3656_v29, %v3656_v29  ;;  %v10440_v29 = vor.u32 %v12383_v7, %v10439_v38 }
 0x22b   : > { %v4685_v45 = vunpack.c.l.b16 %v4317_v47 }
 0x22d   : > { %v2929_v55 = vpop.f32.mrf.mxu0  ;;  %v4713_v37 = vpack.c.b16 %v4685_v45, %v4684_v59 }
 0x22e   : > { %v3658_v19 = vpop.f32.mrf.mxu1 }
 0x22f   : > { %4732 = vrot.lane.b32.xlu0 %v4713_v37, %s12953_s22  ;;  %v3659_v50 = vadd.f32 %v3658_v19, %v2929_v55  ;;  %v12385_v19 = vld [vmem:[%s12983_s9 + $0x1e4] sm:$0xf0] }
 0x230   : > { %2968 = vmatmul.bf16.gmra.mxu0 %v10432_v21 }
 0x231   : > { %3697 = vmatmul.bf16.gmra.mxu1 %v10436_v46  ;;  %v4318_v24 = vpack.c.bf16 %v3659_v50, %v3659_v50  ;;  %v10447_v46 = vld [vmem:[%s12983_s9 + $0x1e0] sm:$0xf]  ;;  %v12384_v50 = vld [vmem:[%s12983_s9 + $0x1e4] sm:$0xf] }
 0x233   : > { %v4686_v22 = vunpack.c.l.b16 %v4318_v24 }
 0x235   : > { %v2931_v23 = vpop.f32.mrf.mxu0 }
 0x236   : > { %v3660_v26 = vpop.f32.mrf.mxu1 }
 0x237   : > { %v3661_v32 = vadd.f32 %v3660_v26, %v2931_v23  ;;  %v10449_v23 = vld [vmem:[%s12983_s9 + $0x1e8] sm:$0xf0] }
 0x238   : > { %v10452_v7 = vor.u32 %v12384_v50, %v10449_v23 }
 0x239   : > { %v4319_v56 = vpack.c.bf16 %v3661_v32, %v3661_v32  ;;  %v10448_v32 = vor.u32 %v12385_v19, %v10447_v46  ;;  %v10497_v19 = vld [vmem:[%s12983_s9 + $0x248] sm:$0xf0] }
 0x23b   : > { %v4687_v5 = vunpack.c.l.b16 %v4319_v56 }
 0x23d   : > { %v2934_v47 = vpop.f32.mrf.mxu0  ;;  %v4714_v49 = vpack.c.b16 %v4687_v5, %v4686_v22 }
 0x23e   : > { %v3663_v44 = vpop.f32.mrf.mxu1 }
 0x23f   : > { %4734 = vrot.lane.b32.xlu2 %v4714_v49, %s12953_s22  ;;  %v3664_v48 = vadd.f32 %v3663_v44, %v2934_v47  ;;  %v12387_v44 = vld [vmem:[%s12983_s9 + $0x1f4] sm:$0xf0] }
 0x240   : > { %2973 = vmatmul.bf16.gmra.mxu0 %v10440_v29 }
 0x241   : > { %3702 = vmatmul.bf16.gmra.mxu1 %v10444_v31  ;;  %v4320_v21 = vpack.c.bf16 %v3664_v48, %v3664_v48  ;;  %v10455_v31 = vld [vmem:[%s12983_s9 + $0x1f0] sm:$0xf]  ;;  %v12386_v48 = vld [vmem:[%s12983_s9 + $0x1f4] sm:$0xf] }
 0x243   : > { %v4688_v26 = vunpack.c.l.b16 %v4320_v21 }
 0x245   : > { %v2936_v59 = vpop.f32.mrf.mxu0 }
 0x246   : > { %v3665_v45 = vpop.f32.mrf.mxu1 }
 0x247   : > { %v3666_v55 = vadd.f32 %v3665_v45, %v2936_v59  ;;  %v10457_v59 = vld [vmem:[%s12983_s9 + $0x1f8] sm:$0xf0] }
 0x248   : > { %v10460_v46 = vor.u32 %v12386_v48, %v10457_v59 }
 0x249   : > { %v4321_v37 = vpack.c.bf16 %v3666_v55, %v3666_v55  ;;  %v10456_v55 = vor.u32 %v12387_v44, %v10455_v31  ;;  %v12396_v44 = vld [vmem:[%s12983_s9 + $0x244] sm:$0xf] }
 0x24b   : > { %v4689_v24 = vunpack.c.l.b16 %v4321_v37 }
 0x24d   : > { %v2939_v56 = vpop.f32.mrf.mxu0  ;;  %v4715_v38 = vpack.c.b16 %v4689_v24, %v4688_v26 }
 0x24e   : > { %v3668_v30 = vpop.f32.mrf.mxu1 }
 0x24f   : > { %v3669_v20 = vadd.f32 %v3668_v30, %v2939_v56  ;;  %4736 = vrot.lane.b32.xlu1 %v4715_v38, %s12953_s22  ;;  %v12389_v30 = vld [vmem:[%s12983_s9 + $0x204] sm:$0xf0] }
 0x250   : > { %2978 = vmatmul.bf16.gmra.mxu0 %v10448_v32 }
 0x251   : > { %3707 = vmatmul.bf16.gmra.mxu1 %v10452_v7  ;;  %v4322_v29 = vpack.c.bf16 %v3669_v20, %v3669_v20  ;;  %v10463_v7 = vld [vmem:[%s12983_s9 + $0x200] sm:$0xf]  ;;  %v12388_v20 = vld [vmem:[%s12983_s9 + $0x204] sm:$0xf] }
 0x253   : > { %v13499_v45 = vunpack.c.l.b16 %v4322_v29 }
 0x255   : > { %v2941_v22 = vpop.f32.mrf.mxu0 }
 0x256   : > { %v3670_v5 = vpop.f32.mrf.mxu1 }
 0x257   : > { %v3671_v47 = vadd.f32 %v3670_v5, %v2941_v22  ;;  %v10465_v22 = vld [vmem:[%s12983_s9 + $0x208] sm:$0xf0] }
 0x258   : > { %v10468_v31 = vor.u32 %v12388_v20, %v10465_v22 }
 0x259   : > { %v4323_v49 = vpack.c.bf16 %v3671_v47, %v3671_v47  ;;  %v10464_v47 = vor.u32 %v12389_v30, %v10463_v7 }
 0x25b   : > { %v13501_v21 = vunpack.c.l.b16 %v4323_v49 }
 0x25d   : > { %v2944_v37 = vpop.f32.mrf.mxu0 }
 0x25e   : > { %v3673_v50 = vpop.f32.mrf.mxu1 }
 0x25f   : > { %v3674_v23 = vadd.f32 %v3673_v50, %v2944_v37 }
 0x260   : > { %2983 = vmatmul.bf16.gmra.mxu0 %v10456_v55 }
 0x261   : > { %3712 = vmatmul.bf16.gmra.mxu1 %v10460_v46  ;;  %v4324_v32 = vpack.c.bf16 %v3674_v23, %v3674_v23 }
 0x263   : > { %v13509_v5 = vunpack.c.l.b16 %v4324_v32  ;;  %v12390_v32 = vld [vmem:[%s12983_s9 + $0x214] sm:$0xf] }
 0x265   : > { %v2946_v26 = vpop.f32.mrf.mxu0 }
 0x266   : > { %v3675_v24 = vpop.f32.mrf.mxu1 }
 0x267   : > { %v3676_v56 = vadd.f32 %v3675_v24, %v2946_v26  ;;  %v10471_v26 = vld [vmem:[%s12983_s9 + $0x210] sm:$0xf]  ;;  %v12391_v24 = vld [vmem:[%s12983_s9 + $0x214] sm:$0xf0] }
 0x268   : > { %v10472_v30 = vor.u32 %v12391_v24, %v10471_v26 }
 0x269   : > { %v4325_v38 = vpack.c.bf16 %v3676_v56, %v3676_v56  ;;  %v10473_v56 = vld [vmem:[%s12983_s9 + $0x218] sm:$0xf0] }
 0x26a   : > { %v10476_v22 = vor.u32 %v12390_v32, %v10473_v56 }
 0x26b   : > { %v13511_v29 = vunpack.c.l.b16 %v4325_v38 }
 0x26d   : > { %v2949_v49 = vpop.f32.mrf.mxu0 }
 0x26e   : > { %v3678_v48 = vpop.f32.mrf.mxu1 }
 0x26f   : > { %v3679_v59 = vadd.f32 %v3678_v48, %v2949_v49 }
 0x270   : > { %2988 = vmatmul.bf16.gmra.mxu0 %v10464_v47  ;;  %v10489_v47 = vld [vmem:[%s12983_s9 + $0x238] sm:$0xf0] }
 0x271   : > { %3717 = vmatmul.bf16.gmra.mxu1 %v10468_v31  ;;  %v4326_v46 = vpack.c.bf16 %v3679_v59, %v3679_v59 }
 0x273   : > { %v13519_v38 = vunpack.c.l.b16 %v4326_v46 }
 0x275   : > { %v2951_v55 = vpop.f32.mrf.mxu0 }
 0x276   : > { %v3680_v37 = vpop.f32.mrf.mxu1 }
 0x277   : > { %v3681_v50 = vadd.f32 %v3680_v37, %v2951_v55 }
 0x279   : > { %v4327_v23 = vpack.c.bf16 %v3681_v50, %v3681_v50  ;;  %v10479_v50 = vld [vmem:[%s12983_s9 + $0x220] sm:$0xf] }
 0x27b   : > { %v13521_v7 = vunpack.c.l.b16 %v4327_v23  ;;  %v12393_v23 = vld [vmem:[%s12983_s9 + $0x224] sm:$0xf0] }
 0x27c   : > { %v10480_v32 = vor.u32 %v12393_v23, %v10479_v50 }
 0x27d   : > { %v2954_v20 = vpop.f32.mrf.mxu0 }
 0x27e   : > { %v3683_v49 = vpop.f32.mrf.mxu1 }
 0x27f   : > { %v3684_v31 = vadd.f32 %v3683_v49, %v2954_v20  ;;  %v10495_v20 = vld [vmem:[%s12983_s9 + $0x240] sm:$0xf] }
 0x280   : > { %2993 = vmatmul.bf16.gmra.mxu0 %v10472_v30  ;;  %v10484_v30 = vor.u32 %v12392_v43, %v10481_v15 }
 0x281   : > { %3722 = vmatmul.bf16.gmra.mxu1 %v10476_v22  ;;  %v4328_v55 = vpack.c.bf16 %v3684_v31, %v3684_v31 }
 0x283   : > { %v13529_v26 = vunpack.c.l.b16 %v4328_v55 }
 0x285   : > { %v2956_v48 = vpop.f32.mrf.mxu0 }
 0x286   : > { %v3685_v59 = vpop.f32.mrf.mxu1 }
 0x287   : > { %v3686_v37 = vadd.f32 %v3685_v59, %v2956_v48 }
 0x289   : > { %v4329_v46 = vpack.c.bf16 %v3686_v37, %v3686_v37 }
 0x28b   : > { %v13531_v24 = vunpack.c.l.b16 %v4329_v46  ;;  %v12395_v46 = vld [vmem:[%s12983_s9 + $0x234] sm:$0xf0] }
 0x28c   : > { %v10488_v43 = vor.u32 %v12395_v46, %v10487_v25 }
 0x28d   : > { %v2959_v56 = vpop.f32.mrf.mxu0 }
 0x28e   : > { %v3688_v22 = vpop.f32.mrf.mxu1 }
 0x28f   : > { %v3689_v49 = vadd.f32 %v3688_v22, %v2959_v56  ;;  %v10503_v56 = vld [vmem:[%s12983_s9 + $0x250] sm:$0xf] }
 0x290   : > { %2998 = vmatmul.bf16.gmra.mxu0 %v10480_v32  ;;  %v10492_v32 = vor.u32 %v12394_v60, %v10489_v47 }
 0x291   : > { %3727 = vmatmul.bf16.gmra.mxu1 %v10484_v30  ;;  %v4330_v59 = vpack.c.bf16 %v3689_v49, %v3689_v49 }
 0x293   : > { %v13539_v50 = vunpack.c.l.b16 %v4330_v59 }
 0x295   : > { %v2961_v31 = vpop.f32.mrf.mxu0  ;;  %16327 = vst [vmem:[#allocation55_spill] sm:$0xff] %v13539_v50  ;;  %v10977_v50 = vld [vmem:[%s12983_s9 + $0x608] sm:$0xf0] }
 0x296   : > { %v3690_v48 = vpop.f32.mrf.mxu1 }
 0x297   : > { %v3691_v55 = vadd.f32 %v3690_v48, %v2961_v31 }
 0x299   : > { %v4331_v37 = vpack.c.bf16 %v3691_v55, %v3691_v55 }
 0x29b   : > { %v13541_v15 = vunpack.c.l.b16 %v4331_v37  ;;  %v12397_v37 = vld [vmem:[%s12983_s9 + $0x244] sm:$0xf0] }
 0x29c   : > { %v10496_v47 = vor.u32 %v12397_v37, %v10495_v20 }
 0x29d   : > { %16328 = vst [vmem:[#allocation56_spill] sm:$0xff] %v13541_v15  ;;  %v2964_v23 = vpop.f32.mrf.mxu0  ;;  %v12518_v15 = vld [vmem:[%s12983_s9 + $0x614] sm:$0xf] }
 0x29e   : > { %v3693_v30 = vpop.f32.mrf.mxu1 }
 0x29f   : > { %v3694_v22 = vadd.f32 %v3693_v30, %v2964_v23  ;;  %v10511_v23 = vld [vmem:[%s12983_s9 + $0x260] sm:$0xf] }
 0x2a0   : > { %3003 = vmatmul.bf16.gmra.mxu0 %v10488_v43  ;;  %v10500_v43 = vor.u32 %v12396_v44, %v10497_v19 }
 0x2a1   : > { %3732 = vmatmul.bf16.gmra.mxu1 %v10492_v32  ;;  %v4332_v48 = vpack.c.bf16 %v3694_v22, %v3694_v22 }
 0x2a3   : > { %v13549_v25 = vunpack.c.l.b16 %v4332_v48 }
 0x2a5   : > { %v2966_v49 = vpop.f32.mrf.mxu0  ;;  %16329 = vst [vmem:[#allocation57_spill] sm:$0xff] %v13549_v25  ;;  %v10753_v25 = vld [vmem:[%s12983_s9 + $0x448] sm:$0xf0] }
 0x2a6   : > { %v3695_v31 = vpop.f32.mrf.mxu1 }
 0x2a7   : > { %v3696_v59 = vadd.f32 %v3695_v31, %v2966_v49 }
 0x2a9   : > { %v4333_v55 = vpack.c.bf16 %v3696_v59, %v3696_v59 }
 0x2ab   : > { %v13551_v60 = vunpack.c.l.b16 %v4333_v55  ;;  %v12399_v55 = vld [vmem:[%s12983_s9 + $0x254] sm:$0xf0] }
 0x2ac   : > { %v10504_v44 = vor.u32 %v12399_v55, %v10503_v56 }
 0x2ad   : > { %16330 = vst [vmem:[#allocation58_spill] sm:$0xff] %v13551_v60  ;;  %v2969_v46 = vpop.f32.mrf.mxu0  ;;  %v12462_v60 = vld [vmem:[%s12983_s9 + $0x454] sm:$0xf] }
 0x2ae   : > { %v3698_v32 = vpop.f32.mrf.mxu1 }
 0x2af   : > { %v3699_v30 = vadd.f32 %v3698_v32, %v2969_v46  ;;  %v10519_v46 = vld [vmem:[%s12983_s9 + $0x270] sm:$0xf] }
 0x2b0   : > { %3008 = vmatmul.bf16.gmra.mxu0 %v10496_v47  ;;  %v10508_v47 = vor.u32 %v12398_v42, %v10505_v6 }
 0x2b1   : > { %3737 = vmatmul.bf16.gmra.mxu1 %v10500_v43  ;;  %v4334_v31 = vpack.c.bf16 %v3699_v30, %v3699_v30 }
 0x2b3   : > { %v13559_v20 = vunpack.c.l.b16 %v4334_v31 }
 0x2b5   : > { %v2971_v22 = vpop.f32.mrf.mxu0  ;;  %16331 = vst [vmem:[#allocation59_spill] sm:$0xff] %v13559_v20  ;;  %v10729_v20 = vld [vmem:[%s12983_s9 + $0x418] sm:$0xf0] }
 0x2b6   : > { %v3700_v49 = vpop.f32.mrf.mxu1 }
 0x2b7   : > { %v3701_v48 = vadd.f32 %v3700_v49, %v2971_v22 }
 0x2b9   : > { %v4335_v59 = vpack.c.bf16 %v3701_v48, %v3701_v48 }
 0x2bb   : > { %v13561_v19 = vunpack.c.l.b16 %v4335_v59  ;;  %v12401_v59 = vld [vmem:[%s12983_s9 + $0x264] sm:$0xf0] }
 0x2bc   : > { %v10512_v6 = vor.u32 %v12401_v59, %v10511_v23 }
 0x2bd   : > { %16332 = vst [vmem:[#allocation60_spill] sm:$0xff] %v13561_v19  ;;  %v2974_v37 = vpop.f32.mrf.mxu0  ;;  %v12456_v19 = vld [vmem:[%s12983_s9 + $0x424] sm:$0xf] }
 0x2be   : > { %v3703_v43 = vpop.f32.mrf.mxu1 }
 0x2bf   : > { %v3704_v32 = vadd.f32 %v3703_v43, %v2974_v37  ;;  %v10527_v37 = vld [vmem:[%s12983_s9 + $0x280] sm:$0xf] }
 0x2c0   : > { %3013 = vmatmul.bf16.gmra.mxu0 %v10504_v44  ;;  %v10516_v44 = vor.u32 %v12400_v51, %v10513_v4 }
 0x2c1   : > { %3742 = vmatmul.bf16.gmra.mxu1 %v10508_v47  ;;  %v4336_v49 = vpack.c.bf16 %v3704_v32, %v3704_v32 }
 0x2c3   : > { %v13569_v56 = vunpack.c.l.b16 %v4336_v49 }
 0x2c5   : > { %v2976_v30 = vpop.f32.mrf.mxu0  ;;  %16333 = vst [vmem:[#allocation61_spill] sm:$0xff] %v13569_v56  ;;  %v10641_v56 = vld [vmem:[%s12983_s9 + $0x368] sm:$0xf0] }
 0x2c6   : > { %v3705_v22 = vpop.f32.mrf.mxu1 }
 0x2c7   : > { %v3706_v31 = vadd.f32 %v3705_v22, %v2976_v30 }
 0x2c9   : > { %v4337_v48 = vpack.c.bf16 %v3706_v31, %v3706_v31 }
 0x2cb   : > { %v13571_v42 = vunpack.c.l.b16 %v4337_v48  ;;  %v12403_v48 = vld [vmem:[%s12983_s9 + $0x274] sm:$0xf0] }
 0x2cc   : > { %v10520_v4 = vor.u32 %v12403_v48, %v10519_v46 }
 0x2cd   : > { %16334 = vst [vmem:[#allocation62_spill] sm:$0xff] %v13571_v42  ;;  %v2979_v55 = vpop.f32.mrf.mxu0  ;;  %v12434_v42 = vld [vmem:[%s12983_s9 + $0x374] sm:$0xf] }
 0x2ce   : > { %v3708_v47 = vpop.f32.mrf.mxu1 }
 0x2cf   : > { %v3709_v43 = vadd.f32 %v3708_v47, %v2979_v55  ;;  %v10535_v55 = vld [vmem:[%s12983_s9 + $0x290] sm:$0xf] }
 0x2d0   : > { %3018 = vmatmul.bf16.gmra.mxu0 %v10512_v6  ;;  %v10524_v6 = vor.u32 %v12402_v52, %v10521_v61 }
 0x2d1   : > { %3747 = vmatmul.bf16.gmra.mxu1 %v10516_v44  ;;  %v4338_v22 = vpack.c.bf16 %v3709_v43, %v3709_v43 }
 0x2d3   : > { %v13579_v23 = vunpack.c.l.b16 %v4338_v22 }
 0x2d5   : > { %v2981_v32 = vpop.f32.mrf.mxu0  ;;  %16335 = vst [vmem:[#allocation63_spill] sm:$0xff] %v13579_v23  ;;  %v10633_v23 = vld [vmem:[%s12983_s9 + $0x358] sm:$0xf0] }
 0x2d6   : > { %v3710_v30 = vpop.f32.mrf.mxu1 }
 0x2d7   : > { %v3711_v49 = vadd.f32 %v3710_v30, %v2981_v32 }
 0x2d9   : > { %v4339_v31 = vpack.c.bf16 %v3711_v49, %v3711_v49 }
 0x2db   : > { %v13581_v51 = vunpack.c.l.b16 %v4339_v31  ;;  %v12405_v31 = vld [vmem:[%s12983_s9 + $0x284] sm:$0xf0] }
 0x2dc   : > { %v10528_v61 = vor.u32 %v12405_v31, %v10527_v37 }
 0x2dd   : > { %16336 = vst [vmem:[#allocation64_spill] sm:$0xff] %v13581_v51  ;;  %v2984_v59 = vpop.f32.mrf.mxu0  ;;  %v12432_v51 = vld [vmem:[%s12983_s9 + $0x364] sm:$0xf] }
 0x2de   : > { %v3713_v44 = vpop.f32.mrf.mxu1 }
 0x2df   : > { %v3714_v47 = vadd.f32 %v3713_v44, %v2984_v59 }
 0x2e0   : > { %3023 = vmatmul.bf16.gmra.mxu0 %v10520_v4  ;;  %v10532_v4 = vor.u32 %v12404_v41, %v10529_v9 }
 0x2e1   : > { %3752 = vmatmul.bf16.gmra.mxu1 %v10524_v6  ;;  %v4340_v30 = vpack.c.bf16 %v3714_v47, %v3714_v47 }
 0x2e3   : > { %v13589_v46 = vunpack.c.l.b16 %v4340_v30 }
 0x2e5   : > { %v2986_v43 = vpop.f32.mrf.mxu0  ;;  %16337 = vst [vmem:[#allocation65_spill] sm:$0xff] %v13589_v46  ;;  %v10625_v46 = vld [vmem:[%s12983_s9 + $0x348] sm:$0xf0] }
 0x2e6   : > { %v3715_v32 = vpop.f32.mrf.mxu1 }
 0x2e7   : > { %v3716_v22 = vadd.f32 %v3715_v32, %v2986_v43 }
 0x2e9   : > { %v4341_v49 = vpack.c.bf16 %v3716_v22, %v3716_v22 }
 0x2eb   : > { %v13591_v52 = vunpack.c.l.b16 %v4341_v49  ;;  %v12407_v49 = vld [vmem:[%s12983_s9 + $0x294] sm:$0xf0] }
 0x2ec   : > { %v10536_v41 = vor.u32 %v12407_v49, %v10535_v55  ;;  %v12409_v55 = vld [vmem:[%s12983_s9 + $0x2a4] sm:$0xf0]  ;;  %v10545_v49 = vld [vmem:[%s12983_s9 + $0x2a8] sm:$0xf0] }
 0x2ed   : > { %16338 = vst [vmem:[#allocation66_spill] sm:$0xff] %v13591_v52  ;;  %v2989_v48 = vpop.f32.mrf.mxu0  ;;  %v12430_v52 = vld [vmem:[%s12983_s9 + $0x354] sm:$0xf] }
 0x2ee   : > { %v3718_v6 = vpop.f32.mrf.mxu1 }
 0x2ef   : > { %v3719_v44 = vadd.f32 %v3718_v6, %v2989_v48 }
 0x2f0   : > { %3028 = vmatmul.bf16.gmra.mxu0 %v10528_v61  ;;  %v10540_v61 = vor.u32 %v12406_v62, %v10537_v3 }
 0x2f1   : > { %3757 = vmatmul.bf16.gmra.mxu1 %v10532_v4  ;;  %v4342_v32 = vpack.c.bf16 %v3719_v44, %v3719_v44 }
 0x2f3   : > { %v4790_v37 = vunpack.c.l.b16 %v4342_v32 }
 0x2f5   : > { %v2991_v47 = vpop.f32.mrf.mxu0 }
 0x2f6   : > { %v3720_v43 = vpop.f32.mrf.mxu1 }
 0x2f7   : > { %v3721_v30 = vadd.f32 %v3720_v43, %v2991_v47 }
 0x2f9   : > { %v4343_v22 = vpack.c.bf16 %v3721_v30, %v3721_v30  ;;  %v10543_v30 = vld [vmem:[%s12983_s9 + $0x2a0] sm:$0xf] }
 0x2fa   : > { %v10544_v62 = vor.u32 %v12409_v55, %v10543_v30  ;;  %v10553_v30 = vld [vmem:[%s12983_s9 + $0x2b8] sm:$0xf0] }
 0x2fb   : > { %v4791_v31 = vunpack.c.l.b16 %v4343_v22  ;;  %v12408_v22 = vld [vmem:[%s12983_s9 + $0x2a4] sm:$0xf] }
 0x2fd   : > { %v2994_v9 = vpop.f32.mrf.mxu0  ;;  %v4822_v59 = vpack.c.b16 %v4791_v31, %v4790_v37  ;;  %v10548_v31 = vor.u32 %v12408_v22, %v10545_v49 }
 0x2fe   : > { %v3723_v48 = vpop.f32.mrf.mxu1 }
 0x2ff   : > { %4838 = vrot.lane.b32.xlu0 %v4822_v59, %s12954_s23  ;;  %v3724_v4 = vadd.f32 %v3723_v48, %v2994_v9 }
 0x300   : > { %3033 = vmatmul.bf16.gmra.mxu0 %v10536_v41 }
 0x301   : > { %3762 = vmatmul.bf16.gmra.mxu1 %v10540_v61  ;;  %v4344_v47 = vpack.c.bf16 %v3724_v4, %v3724_v4 }
 0x303   : > { %v4792_v11 = vunpack.c.l.b16 %v4344_v47  ;;  %v10551_v47 = vld [vmem:[%s12983_s9 + $0x2b0] sm:$0xf] }
 0x305   : > { %v2996_v6 = vpop.f32.mrf.mxu0 }
 0x306   : > { %v3725_v44 = vpop.f32.mrf.mxu1 }
 0x307   : > { %v3726_v43 = vadd.f32 %v3725_v44, %v2996_v6 }
 0x309   : > { %v4345_v32 = vpack.c.bf16 %v3726_v43, %v3726_v43  ;;  %v12411_v43 = vld [vmem:[%s12983_s9 + $0x2b4] sm:$0xf0] }
 0x30b   : > { %v4793_v37 = vunpack.c.l.b16 %v4345_v32  ;;  %v12410_v32 = vld [vmem:[%s12983_s9 + $0x2b4] sm:$0xf] }
 0x30d   : > { %v2999_v3 = vpop.f32.mrf.mxu0  ;;  %v4823_v59 = vpack.c.b16 %v4793_v37, %v4792_v11  ;;  %v10552_v11 = vor.u32 %v12411_v43, %v10551_v47  ;;  %v10556_v37 = vor.u32 %v12410_v32, %v10553_v30 }
 0x30e   : > { %v3728_v41 = vpop.f32.mrf.mxu1 }
 0x30f   : > { %4840 = vrot.lane.b32.xlu0 %v4823_v59, %s12954_s23  ;;  %v3729_v9 = vadd.f32 %v3728_v41, %v2999_v3 }
 0x310   : > { %3038 = vmatmul.bf16.gmra.mxu0 %v10544_v62 }
 0x311   : > { %3767 = vmatmul.bf16.gmra.mxu1 %v10548_v31  ;;  %v4346_v4 = vpack.c.bf16 %v3729_v9, %v3729_v9 }
 0x313   : > { %v4794_v55 = vunpack.c.l.b16 %v4346_v4  ;;  %v12413_v4 = vld [vmem:[%s12983_s9 + $0x2c4] sm:$0xf0] }
 0x315   : > { %v3001_v61 = vpop.f32.mrf.mxu0 }
 0x316   : > { %v3730_v48 = vpop.f32.mrf.mxu1 }
 0x317   : > { %v3731_v6 = vadd.f32 %v3730_v48, %v3001_v61  ;;  %v10559_v48 = vld [vmem:[%s12983_s9 + $0x2c0] sm:$0xf] }
 0x319   : > { %v4347_v44 = vpack.c.bf16 %v3731_v6, %v3731_v6  ;;  %v12412_v6 = vld [vmem:[%s12983_s9 + $0x2c4] sm:$0xf] }
 0x31b   : > { %v4795_v18 = vunpack.c.l.b16 %v4347_v44  ;;  %v10561_v44 = vld [vmem:[%s12983_s9 + $0x2c8] sm:$0xf0] }
 0x31d   : > { %v3004_v22 = vpop.f32.mrf.mxu0  ;;  %v4824_v49 = vpack.c.b16 %v4795_v18, %v4794_v55  ;;  %v10560_v18 = vor.u32 %v12413_v4, %v10559_v48  ;;  %v10564_v55 = vor.u32 %v12412_v6, %v10561_v44 }
 0x31e   : > { %v3733_v62 = vpop.f32.mrf.mxu1 }
 0x31f   : > { %4842 = vrot.lane.b32.xlu2 %v4824_v49, %s12954_s23  ;;  %v3734_v3 = vadd.f32 %v3733_v62, %v3004_v22 }
 0x320   : > { %3043 = vmatmul.bf16.gmra.mxu0 %v10552_v11 }
 0x321   : > { %3772 = vmatmul.bf16.gmra.mxu1 %v10556_v37  ;;  %v4348_v41 = vpack.c.bf16 %v3734_v3, %v3734_v3 }
 0x323   : > { %v4796_v47 = vunpack.c.l.b16 %v4348_v41  ;;  %v12415_v41 = vld [vmem:[%s12983_s9 + $0x2d4] sm:$0xf0] }
 0x325   : > { %v3006_v59 = vpop.f32.mrf.mxu0 }
 0x326   : > { %v3735_v31 = vpop.f32.mrf.mxu1 }
 0x327   : > { %v3736_v9 = vadd.f32 %v3735_v31, %v3006_v59  ;;  %v10567_v31 = vld [vmem:[%s12983_s9 + $0x2d0] sm:$0xf] }
 0x328   : > { %v10568_v6 = vor.u32 %v12415_v41, %v10567_v31 }
 0x329   : > { %v4349_v61 = vpack.c.bf16 %v3736_v9, %v3736_v9  ;;  %v12414_v9 = vld [vmem:[%s12983_s9 + $0x2d4] sm:$0xf] }
 0x32b   : > { %v4797_v43 = vunpack.c.l.b16 %v4349_v61  ;;  %v10569_v61 = vld [vmem:[%s12983_s9 + $0x2d8] sm:$0xf0] }
 0x32d   : > { %v3009_v32 = vpop.f32.mrf.mxu0  ;;  %v4825_v30 = vpack.c.b16 %v4797_v43, %v4796_v47  ;;  %v10572_v43 = vor.u32 %v12414_v9, %v10569_v61 }
 0x32e   : > { %v3738_v11 = vpop.f32.mrf.mxu1 }
 0x32f   : > { %4844 = vrot.lane.b32.xlu1 %v4825_v30, %s12954_s23  ;;  %v3739_v22 = vadd.f32 %v3738_v11, %v3009_v32 }
 0x330   : > { %3048 = vmatmul.bf16.gmra.mxu0 %v10560_v18 }
 0x331   : > { %3777 = vmatmul.bf16.gmra.mxu1 %v10564_v55  ;;  %v4350_v62 = vpack.c.bf16 %v3739_v22, %v3739_v22 }
 0x333   : > { %v4798_v48 = vunpack.c.l.b16 %v4350_v62  ;;  %v12417_v62 = vld [vmem:[%s12983_s9 + $0x2e4] sm:$0xf0] }
 0x335   : > { %v3011_v49 = vpop.f32.mrf.mxu0 }
 0x336   : > { %v3740_v37 = vpop.f32.mrf.mxu1 }
 0x337   : > { %v3741_v3 = vadd.f32 %v3740_v37, %v3011_v49  ;;  %v10575_v37 = vld [vmem:[%s12983_s9 + $0x2e0] sm:$0xf] }
 0x338   : > { %v10576_v9 = vor.u32 %v12417_v62, %v10575_v37 }
 0x339   : > { %v4351_v59 = vpack.c.bf16 %v3741_v3, %v3741_v3  ;;  %v12416_v3 = vld [vmem:[%s12983_s9 + $0x2e4] sm:$0xf] }
 0x33b   : > { %v4799_v4 = vunpack.c.l.b16 %v4351_v59  ;;  %v10577_v59 = vld [vmem:[%s12983_s9 + $0x2e8] sm:$0xf0] }
 0x33d   : > { %v3014_v44 = vpop.f32.mrf.mxu0  ;;  %v4826_v47 = vpack.c.b16 %v4799_v4, %v4798_v48  ;;  %v10580_v4 = vor.u32 %v12416_v3, %v10577_v59 }
 0x33e   : > { %v3743_v18 = vpop.f32.mrf.mxu1 }
 0x33f   : > { %4846 = vrot.lane.b32.xlu0 %v4826_v47, %s12954_s23  ;;  %v3744_v32 = vadd.f32 %v3743_v18, %v3014_v44 }
 0x340   : > { %3053 = vmatmul.bf16.gmra.mxu0 %v10568_v6 }
 0x341   : > { %3782 = vmatmul.bf16.gmra.mxu1 %v10572_v43  ;;  %v4352_v11 = vpack.c.bf16 %v3744_v32, %v3744_v32 }
 0x343   : > { %v4800_v31 = vunpack.c.l.b16 %v4352_v11  ;;  %v12419_v11 = vld [vmem:[%s12983_s9 + $0x2f4] sm:$0xf0] }
 0x345   : > { %v3016_v30 = vpop.f32.mrf.mxu0 }
 0x346   : > { %v3745_v55 = vpop.f32.mrf.mxu1 }
 0x347   : > { %v3746_v22 = vadd.f32 %v3745_v55, %v3016_v30  ;;  %v10583_v55 = vld [vmem:[%s12983_s9 + $0x2f0] sm:$0xf] }
 0x348   : > { %v10584_v3 = vor.u32 %v12419_v11, %v10583_v55 }
 0x349   : > { %v4353_v49 = vpack.c.bf16 %v3746_v22, %v3746_v22  ;;  %v12418_v22 = vld [vmem:[%s12983_s9 + $0x2f4] sm:$0xf] }
 0x34b   : > { %v4801_v41 = vunpack.c.l.b16 %v4353_v49  ;;  %v10585_v49 = vld [vmem:[%s12983_s9 + $0x2f8] sm:$0xf0] }
 0x34d   : > { %v3019_v61 = vpop.f32.mrf.mxu0  ;;  %v4827_v48 = vpack.c.b16 %v4801_v41, %v4800_v31  ;;  %v10588_v31 = vor.u32 %v12418_v22, %v10585_v49  ;;  %v10599_v41 = vld [vmem:[%s12983_s9 + $0x310] sm:$0xf] }
 0x34e   : > { %v3748_v6 = vpop.f32.mrf.mxu1 }
 0x34f   : > { %v3749_v44 = vadd.f32 %v3748_v6, %v3019_v61  ;;  %4848 = vrot.lane.b32.xlu2 %v4827_v48, %s12954_s23 }
 0x350   : > { %3058 = vmatmul.bf16.gmra.mxu0 %v10576_v9 }
 0x351   : > { %3787 = vmatmul.bf16.gmra.mxu1 %v10580_v4  ;;  %v4354_v18 = vpack.c.bf16 %v3749_v44, %v3749_v44 }
 0x353   : > { %v13629_v37 = vunpack.c.l.b16 %v4354_v18  ;;  %v12421_v18 = vld [vmem:[%s12983_s9 + $0x304] sm:$0xf0] }
 0x355   : > { %v3021_v47 = vpop.f32.mrf.mxu0 }
 0x356   : > { %v3750_v43 = vpop.f32.mrf.mxu1 }
 0x357   : > { %v3751_v32 = vadd.f32 %v3750_v43, %v3021_v47  ;;  %v10591_v43 = vld [vmem:[%s12983_s9 + $0x300] sm:$0xf] }
 0x358   : > { %v10592_v22 = vor.u32 %v12421_v18, %v10591_v43 }
 0x359   : > { %v4355_v30 = vpack.c.bf16 %v3751_v32, %v3751_v32  ;;  %v12420_v32 = vld [vmem:[%s12983_s9 + $0x304] sm:$0xf] }
 0x35b   : > { %v13631_v62 = vunpack.c.l.b16 %v4355_v30  ;;  %v10593_v30 = vld [vmem:[%s12983_s9 + $0x308] sm:$0xf0] }
 0x35d   : > { %v3024_v59 = vpop.f32.mrf.mxu0 }
 0x35e   : > { %v3753_v9 = vpop.f32.mrf.mxu1 }
 0x35f   : > { %v3754_v61 = vadd.f32 %v3753_v9, %v3024_v59  ;;  %v10607_v59 = vld [vmem:[%s12983_s9 + $0x320] sm:$0xf] }
 0x360   : > { %3063 = vmatmul.bf16.gmra.mxu0 %v10584_v3  ;;  %v10596_v3 = vor.u32 %v12420_v32, %v10593_v30 }
 0x361   : > { %3792 = vmatmul.bf16.gmra.mxu1 %v10588_v31  ;;  %v4356_v6 = vpack.c.bf16 %v3754_v61, %v3754_v61 }
 0x363   : > { %v13639_v55 = vunpack.c.l.b16 %v4356_v6 }
 0x365   : > { %v3026_v48 = vpop.f32.mrf.mxu0 }
 0x366   : > { %v3755_v4 = vpop.f32.mrf.mxu1 }
 0x367   : > { %v3756_v44 = vadd.f32 %v3755_v4, %v3026_v48 }
 0x369   : > { %v4357_v47 = vpack.c.bf16 %v3756_v44, %v3756_v44 }
 0x36b   : > { %v13641_v11 = vunpack.c.l.b16 %v4357_v47  ;;  %v12423_v47 = vld [vmem:[%s12983_s9 + $0x314] sm:$0xf0] }
 0x36c   : > { %v10600_v32 = vor.u32 %v12423_v47, %v10599_v41 }
 0x36d   : > { %v3029_v49 = vpop.f32.mrf.mxu0 }
 0x36e   : > { %v3758_v31 = vpop.f32.mrf.mxu1 }
 0x36f   : > { %v3759_v9 = vadd.f32 %v3758_v31, %v3029_v49  ;;  %v10615_v49 = vld [vmem:[%s12983_s9 + $0x330] sm:$0xf] }
 0x370   : > { %3068 = vmatmul.bf16.gmra.mxu0 %v10592_v22  ;;  %v10604_v22 = vor.u32 %v12422_v33, %v10601_v34 }
 0x371   : > { %3797 = vmatmul.bf16.gmra.mxu1 %v10596_v3  ;;  %v4358_v4 = vpack.c.bf16 %v3759_v9, %v3759_v9 }
 0x373   : > { %v13649_v43 = vunpack.c.l.b16 %v4358_v4 }
 0x375   : > { %v3031_v61 = vpop.f32.mrf.mxu0 }
 0x376   : > { %v3760_v48 = vpop.f32.mrf.mxu1 }
 0x377   : > { %v3761_v6 = vadd.f32 %v3760_v48, %v3031_v61 }
 0x379   : > { %v4359_v44 = vpack.c.bf16 %v3761_v6, %v3761_v6 }
 0x37b   : > { %v13651_v18 = vunpack.c.l.b16 %v4359_v44  ;;  %v12425_v44 = vld [vmem:[%s12983_s9 + $0x324] sm:$0xf0] }
 0x37c   : > { %v10608_v34 = vor.u32 %v12425_v44, %v10607_v59 }
 0x37d   : > { %v3034_v30 = vpop.f32.mrf.mxu0 }
 0x37e   : > { %v3763_v3 = vpop.f32.mrf.mxu1 }
 0x37f   : > { %v3764_v31 = vadd.f32 %v3763_v3, %v3034_v30  ;;  %v10623_v30 = vld [vmem:[%s12983_s9 + $0x340] sm:$0xf] }
 0x380   : > { %3073 = vmatmul.bf16.gmra.mxu0 %v10600_v32  ;;  %v10612_v32 = vor.u32 %v12424_v63, %v10609_v0 }
 0x381   : > { %3802 = vmatmul.bf16.gmra.mxu1 %v10604_v22  ;;  %v4360_v48 = vpack.c.bf16 %v3764_v31, %v3764_v31 }
 0x383   : > { %v13659_v41 = vunpack.c.l.b16 %v4360_v48 }
 0x385   : > { %v3036_v9 = vpop.f32.mrf.mxu0  ;;  %16339 = vst [vmem:[#allocation67_spill] sm:$0xff] %v13659_v41 }
 0x386   : > { %v3765_v61 = vpop.f32.mrf.mxu1 }
 0x387   : > { %v3766_v4 = vadd.f32 %v3765_v61, %v3036_v9 }
 0x389   : > { %v4361_v6 = vpack.c.bf16 %v3766_v4, %v3766_v4 }
 0x38b   : > { %v13661_v33 = vunpack.c.l.b16 %v4361_v6  ;;  %v12427_v6 = vld [vmem:[%s12983_s9 + $0x334] sm:$0xf0] }
 0x38c   : > { %v10616_v0 = vor.u32 %v12427_v6, %v10615_v49 }
 0x38d   : > { %16340 = vst [vmem:[#allocation68_spill] sm:$0xff] %v13661_v33  ;;  %v3039_v47 = vpop.f32.mrf.mxu0 }
 0x38e   : > { %v3768_v22 = vpop.f32.mrf.mxu1 }
 0x38f   : > { %v3769_v3 = vadd.f32 %v3768_v22, %v3039_v47  ;;  %v10631_v47 = vld [vmem:[%s12983_s9 + $0x350] sm:$0xf] }
 0x390   : > { %3078 = vmatmul.bf16.gmra.mxu0 %v10608_v34  ;;  %v10620_v34 = vor.u32 %v12426_v8, %v10617_v14 }
 0x391   : > { %3807 = vmatmul.bf16.gmra.mxu1 %v10612_v32  ;;  %v4362_v61 = vpack.c.bf16 %v3769_v3, %v3769_v3 }
 0x393   : > { %v13669_v59 = vunpack.c.l.b16 %v4362_v61 }
 0x395   : > { %v3041_v31 = vpop.f32.mrf.mxu0  ;;  %16341 = vst [vmem:[#allocation69_spill] sm:$0xff] %v13669_v59  ;;  %v10985_v59 = vld [vmem:[%s12983_s9 + $0x618] sm:$0xf0] }
 0x396   : > { %v3770_v9 = vpop.f32.mrf.mxu1 }
 0x397   : > { %v3771_v48 = vadd.f32 %v3770_v9, %v3041_v31 }
 0x399   : > { %v4363_v4 = vpack.c.bf16 %v3771_v48, %v3771_v48 }
 0x39b   : > { %v13671_v63 = vunpack.c.l.b16 %v4363_v4  ;;  %v12429_v4 = vld [vmem:[%s12983_s9 + $0x344] sm:$0xf0] }
 0x39c   : > { %v10624_v14 = vor.u32 %v12429_v4, %v10623_v30 }
 0x39d   : > { %16342 = vst [vmem:[#allocation70_spill] sm:$0xff] %v13671_v63  ;;  %v3044_v44 = vpop.f32.mrf.mxu0  ;;  %v12520_v63 = vld [vmem:[%s12983_s9 + $0x624] sm:$0xf] }
 0x39e   : > { %v3773_v32 = vpop.f32.mrf.mxu1 }
 0x39f   : > { %v3774_v22 = vadd.f32 %v3773_v32, %v3044_v44  ;;  %v10639_v44 = vld [vmem:[%s12983_s9 + $0x360] sm:$0xf] }
 0x3a0   : > { %3083 = vmatmul.bf16.gmra.mxu0 %v10616_v0  ;;  %v10628_v0 = vor.u32 %v12428_v10, %v10625_v46 }
 0x3a1   : > { %3812 = vmatmul.bf16.gmra.mxu1 %v10620_v34  ;;  %v4364_v9 = vpack.c.bf16 %v3774_v22, %v3774_v22 }
 0x3a3   : > { %v13679_v49 = vunpack.c.l.b16 %v4364_v9 }
 0x3a5   : > { %v3046_v3 = vpop.f32.mrf.mxu0  ;;  %16343 = vst [vmem:[#allocation71_spill] sm:$0xff] %v13679_v49  ;;  %v10849_v49 = vld [vmem:[%s12983_s9 + $0x508] sm:$0xf0] }
 0x3a6   : > { %v3775_v31 = vpop.f32.mrf.mxu1 }
 0x3a7   : > { %v3776_v61 = vadd.f32 %v3775_v31, %v3046_v3 }
 0x3a9   : > { %v4365_v48 = vpack.c.bf16 %v3776_v61, %v3776_v61 }
 0x3ab   : > { %v13681_v8 = vunpack.c.l.b16 %v4365_v48  ;;  %v12431_v48 = vld [vmem:[%s12983_s9 + $0x354] sm:$0xf0] }
 0x3ac   : > { %v10632_v46 = vor.u32 %v12431_v48, %v10631_v47 }
 0x3ad   : > { %16344 = vst [vmem:[#allocation72_spill] sm:$0xff] %v13681_v8  ;;  %v3049_v6 = vpop.f32.mrf.mxu0  ;;  %v12486_v8 = vld [vmem:[%s12983_s9 + $0x514] sm:$0xf] }
 0x3ae   : > { %v3778_v34 = vpop.f32.mrf.mxu1 }
 0x3af   : > { %v3779_v32 = vadd.f32 %v3778_v34, %v3049_v6  ;;  %v10647_v6 = vld [vmem:[%s12983_s9 + $0x370] sm:$0xf] }
 0x3b0   : > { %3088 = vmatmul.bf16.gmra.mxu0 %v10624_v14  ;;  %v10636_v14 = vor.u32 %v12430_v52, %v10633_v23 }
 0x3b1   : > { %3817 = vmatmul.bf16.gmra.mxu1 %v10628_v0  ;;  %v4366_v31 = vpack.c.bf16 %v3779_v32, %v3779_v32 }
 0x3b3   : > { %v13689_v30 = vunpack.c.l.b16 %v4366_v31 }
 0x3b5   : > { %v3051_v22 = vpop.f32.mrf.mxu0  ;;  %16345 = vst [vmem:[#allocation73_spill] sm:$0xff] %v13689_v30  ;;  %v10721_v30 = vld [vmem:[%s12983_s9 + $0x408] sm:$0xf0] }
 0x3b6   : > { %v3780_v3 = vpop.f32.mrf.mxu1 }
 0x3b7   : > { %v3781_v9 = vadd.f32 %v3780_v3, %v3051_v22 }
 0x3b9   : > { %v4367_v61 = vpack.c.bf16 %v3781_v9, %v3781_v9 }
 0x3bb   : > { %v13691_v10 = vunpack.c.l.b16 %v4367_v61  ;;  %v12433_v61 = vld [vmem:[%s12983_s9 + $0x364] sm:$0xf0] }
 0x3bc   : > { %v10640_v52 = vor.u32 %v12433_v61, %v10639_v44 }
 0x3bd   : > { %16346 = vst [vmem:[#allocation74_spill] sm:$0xff] %v13691_v10  ;;  %v3054_v4 = vpop.f32.mrf.mxu0  ;;  %v12454_v10 = vld [vmem:[%s12983_s9 + $0x414] sm:$0xf] }
 0x3be   : > { %v3783_v0 = vpop.f32.mrf.mxu1 }
 0x3bf   : > { %v3784_v34 = vadd.f32 %v3783_v0, %v3054_v4  ;;  %v10655_v4 = vld [vmem:[%s12983_s9 + $0x380] sm:$0xf] }
 0x3c0   : > { %3093 = vmatmul.bf16.gmra.mxu0 %v10632_v46  ;;  %v10644_v46 = vor.u32 %v12432_v51, %v10641_v56 }
 0x3c1   : > { %3822 = vmatmul.bf16.gmra.mxu1 %v10636_v14  ;;  %v4368_v3 = vpack.c.bf16 %v3784_v34, %v3784_v34 }
 0x3c3   : > { %v13699_v47 = vunpack.c.l.b16 %v4368_v3 }
 0x3c5   : > { %v3056_v32 = vpop.f32.mrf.mxu0  ;;  %16347 = vst [vmem:[#allocation75_spill] sm:$0xff] %v13699_v47  ;;  %v12436_v47 = vld [vmem:[%s12983_s9 + $0x384] sm:$0xf] }
 0x3c6   : > { %v3785_v22 = vpop.f32.mrf.mxu1 }
 0x3c7   : > { %v3786_v31 = vadd.f32 %v3785_v22, %v3056_v32 }
 0x3c9   : > { %v4369_v9 = vpack.c.bf16 %v3786_v31, %v3786_v31 }
 0x3cb   : > { %v13701_v23 = vunpack.c.l.b16 %v4369_v9  ;;  %v12435_v9 = vld [vmem:[%s12983_s9 + $0x374] sm:$0xf0] }
 0x3cc   : > { %v10648_v51 = vor.u32 %v12435_v9, %v10647_v6 }
 0x3cd   : > { %16348 = vst [vmem:[#allocation76_spill] sm:$0xff] %v13701_v23  ;;  %v3059_v48 = vpop.f32.mrf.mxu0  ;;  %v10657_v23 = vld [vmem:[%s12983_s9 + $0x388] sm:$0xf0] }
 0x3ce   : > { %v3788_v14 = vpop.f32.mrf.mxu1 }
 0x3cf   : > { %v3789_v0 = vadd.f32 %v3788_v14, %v3059_v48  ;;  %v10663_v48 = vld [vmem:[%s12983_s9 + $0x390] sm:$0xf] }
 0x3d0   : > { %3098 = vmatmul.bf16.gmra.mxu0 %v10640_v52  ;;  %v10652_v52 = vor.u32 %v12434_v42, %v10649_v27 }
 0x3d1   : > { %3827 = vmatmul.bf16.gmra.mxu1 %v10644_v46  ;;  %v4370_v22 = vpack.c.bf16 %v3789_v0, %v3789_v0 }
 0x3d3   : > { %v13709_v44 = vunpack.c.l.b16 %v4370_v22 }
 0x3d5   : > { %v3061_v34 = vpop.f32.mrf.mxu0  ;;  %16349 = vst [vmem:[#allocation77_spill] sm:$0xff] %v13709_v44  ;;  %v12438_v44 = vld [vmem:[%s12983_s9 + $0x394] sm:$0xf] }
 0x3d6   : > { %v3790_v32 = vpop.f32.mrf.mxu1 }
 0x3d7   : > { %v3791_v3 = vadd.f32 %v3790_v32, %v3061_v34 }
 0x3d9   : > { %v4371_v31 = vpack.c.bf16 %v3791_v3, %v3791_v3 }
 0x3db   : > { %v13711_v56 = vunpack.c.l.b16 %v4371_v31  ;;  %v12437_v31 = vld [vmem:[%s12983_s9 + $0x384] sm:$0xf0] }
 0x3dc   : > { %v10656_v42 = vor.u32 %v12437_v31, %v10655_v4 }
 0x3dd   : > { %16350 = vst [vmem:[#allocation78_spill] sm:$0xff] %v13711_v56  ;;  %v3064_v61 = vpop.f32.mrf.mxu0  ;;  %v10665_v56 = vld [vmem:[%s12983_s9 + $0x398] sm:$0xf0] }
 0x3de   : > { %v3793_v46 = vpop.f32.mrf.mxu1 }
 0x3df   : > { %v3794_v14 = vadd.f32 %v3793_v46, %v3064_v61 }
 0x3e0   : > { %3103 = vmatmul.bf16.gmra.mxu0 %v10648_v51  ;;  %v10660_v51 = vor.u32 %v12436_v47, %v10657_v23 }
 0x3e1   : > { %3832 = vmatmul.bf16.gmra.mxu1 %v10652_v52  ;;  %v4372_v32 = vpack.c.bf16 %v3794_v14, %v3794_v14 }
 0x3e3   : > { %v13719_v6 = vunpack.c.l.b16 %v4372_v32 }
 0x3e5   : > { %v3066_v0 = vpop.f32.mrf.mxu0  ;;  %16351 = vst [vmem:[#allocation79_spill] sm:$0xff] %v13719_v6 }
 0x3e6   : > { %v3795_v34 = vpop.f32.mrf.mxu1 }
 0x3e7   : > { %v3796_v22 = vadd.f32 %v3795_v34, %v3066_v0 }
 0x3e9   : > { %v4373_v3 = vpack.c.bf16 %v3796_v22, %v3796_v22 }
 0x3eb   : > { %v13721_v27 = vunpack.c.l.b16 %v4373_v3  ;;  %v12439_v3 = vld [vmem:[%s12983_s9 + $0x394] sm:$0xf0] }
 0x3ec   : > { %v10664_v47 = vor.u32 %v12439_v3, %v10663_v48  ;;  %v12441_v48 = vld [vmem:[%s12983_s9 + $0x3a4] sm:$0xf0]  ;;  %v10673_v3 = vld [vmem:[%s12983_s9 + $0x3a8] sm:$0xf0] }
 0x3ed   : > { %16352 = vst [vmem:[#allocation80_spill] sm:$0xff] %v13721_v27  ;;  %v3069_v9 = vpop.f32.mrf.mxu0 }
 0x3ee   : > { %v3798_v52 = vpop.f32.mrf.mxu1 }
 0x3ef   : > { %v3799_v46 = vadd.f32 %v3798_v52, %v3069_v9 }
 0x3f0   : > { %3108 = vmatmul.bf16.gmra.mxu0 %v10656_v42  ;;  %v10668_v42 = vor.u32 %v12438_v44, %v10665_v56 }
 0x3f1   : > { %3837 = vmatmul.bf16.gmra.mxu1 %v10660_v51  ;;  %v4374_v34 = vpack.c.bf16 %v3799_v46, %v3799_v46 }
 0x3f3   : > { %v4902_v4 = vunpack.c.l.b16 %v4374_v34 }
 0x3f5   : > { %v3071_v14 = vpop.f32.mrf.mxu0 }
 0x3f6   : > { %v3800_v0 = vpop.f32.mrf.mxu1 }
 0x3f7   : > { %v3801_v32 = vadd.f32 %v3800_v0, %v3071_v14 }
 0x3f9   : > { %v4375_v22 = vpack.c.bf16 %v3801_v32, %v3801_v32  ;;  %v10671_v32 = vld [vmem:[%s12983_s9 + $0x3a0] sm:$0xf] }
 0x3fa   : > { %v10672_v44 = vor.u32 %v12441_v48, %v10671_v32  ;;  %v10681_v32 = vld [vmem:[%s12983_s9 + $0x3b8] sm:$0xf0] }
 0x3fb   : > { %v4903_v31 = vunpack.c.l.b16 %v4375_v22  ;;  %v12440_v22 = vld [vmem:[%s12983_s9 + $0x3a4] sm:$0xf] }
 0x3fd   : > { %v3074_v23 = vpop.f32.mrf.mxu0  ;;  %v4934_v61 = vpack.c.b16 %v4903_v31, %v4902_v4  ;;  %v10676_v31 = vor.u32 %v12440_v22, %v10673_v3 }
 0x3fe   : > { %v3803_v9 = vpop.f32.mrf.mxu1 }
 0x3ff   : > { %4950 = vrot.lane.b32.xlu1 %v4934_v61, %s12955_s26  ;;  %v3804_v51 = vadd.f32 %v3803_v9, %v3074_v23 }
 0x400   : > { %3113 = vmatmul.bf16.gmra.mxu0 %v10664_v47 }
 0x401   : > { %3842 = vmatmul.bf16.gmra.mxu1 %v10668_v42  ;;  %v4376_v14 = vpack.c.bf16 %v3804_v51, %v3804_v51 }
 0x403   : > { %v4904_v6 = vunpack.c.l.b16 %v4376_v14  ;;  %v10679_v14 = vld [vmem:[%s12983_s9 + $0x3b0] sm:$0xf] }
 0x405   : > { %v3076_v52 = vpop.f32.mrf.mxu0 }
 0x406   : > { %v3805_v46 = vpop.f32.mrf.mxu1 }
 0x407   : > { %v3806_v0 = vadd.f32 %v3805_v46, %v3076_v52 }
 0x409   : > { %v4377_v34 = vpack.c.bf16 %v3806_v0, %v3806_v0  ;;  %v12443_v0 = vld [vmem:[%s12983_s9 + $0x3b4] sm:$0xf0] }
 0x40b   : > { %v4905_v4 = vunpack.c.l.b16 %v4377_v34  ;;  %v12442_v34 = vld [vmem:[%s12983_s9 + $0x3b4] sm:$0xf] }
 0x40d   : > { %v3079_v56 = vpop.f32.mrf.mxu0  ;;  %v4935_v61 = vpack.c.b16 %v4905_v4, %v4904_v6  ;;  %v10680_v6 = vor.u32 %v12443_v0, %v10679_v14  ;;  %v10684_v4 = vor.u32 %v12442_v34, %v10681_v32 }
 0x40e   : > { %v3808_v47 = vpop.f32.mrf.mxu1 }
 0x40f   : > { %4952 = vrot.lane.b32.xlu1 %v4935_v61, %s12955_s26  ;;  %v3809_v23 = vadd.f32 %v3808_v47, %v3079_v56 }
 0x410   : > { %3118 = vmatmul.bf16.gmra.mxu0 %v10672_v44 }
 0x411   : > { %3847 = vmatmul.bf16.gmra.mxu1 %v10676_v31  ;;  %v4378_v51 = vpack.c.bf16 %v3809_v23, %v3809_v23 }
 0x413   : > { %v4906_v48 = vunpack.c.l.b16 %v4378_v51  ;;  %v12445_v51 = vld [vmem:[%s12983_s9 + $0x3c4] sm:$0xf0] }
 0x415   : > { %v3081_v42 = vpop.f32.mrf.mxu0 }
 0x416   : > { %v3810_v9 = vpop.f32.mrf.mxu1 }
 0x417   : > { %v3811_v52 = vadd.f32 %v3810_v9, %v3081_v42  ;;  %v10687_v9 = vld [vmem:[%s12983_s9 + $0x3c0] sm:$0xf] }
 0x419   : > { %v4379_v46 = vpack.c.bf16 %v3811_v52, %v3811_v52  ;;  %v12444_v52 = vld [vmem:[%s12983_s9 + $0x3c4] sm:$0xf] }
 0x41b   : > { %v4907_v27 = vunpack.c.l.b16 %v4379_v46  ;;  %v10689_v46 = vld [vmem:[%s12983_s9 + $0x3c8] sm:$0xf0] }
 0x41d   : > { %v3084_v22 = vpop.f32.mrf.mxu0  ;;  %v4936_v3 = vpack.c.b16 %v4907_v27, %v4906_v48  ;;  %v10688_v27 = vor.u32 %v12445_v51, %v10687_v9  ;;  %v10692_v48 = vor.u32 %v12444_v52, %v10689_v46 }
 0x41e   : > { %v3813_v44 = vpop.f32.mrf.mxu1 }
 0x41f   : > { %4954 = vrot.lane.b32.xlu0 %v4936_v3, %s12955_s26  ;;  %v3814_v56 = vadd.f32 %v3813_v44, %v3084_v22 }
 0x420   : > { %3123 = vmatmul.bf16.gmra.mxu0 %v10680_v6 }
 0x421   : > { %3852 = vmatmul.bf16.gmra.mxu1 %v10684_v4  ;;  %v4380_v47 = vpack.c.bf16 %v3814_v56, %v3814_v56 }
 0x423   : > { %v4908_v14 = vunpack.c.l.b16 %v4380_v47  ;;  %v12447_v47 = vld [vmem:[%s12983_s9 + $0x3d4] sm:$0xf0] }
 0x425   : > { %v3086_v61 = vpop.f32.mrf.mxu0 }
 0x426   : > { %v3815_v31 = vpop.f32.mrf.mxu1 }
 0x427   : > { %v3816_v23 = vadd.f32 %v3815_v31, %v3086_v61  ;;  %v10695_v31 = vld [vmem:[%s12983_s9 + $0x3d0] sm:$0xf] }
 0x428   : > { %v10696_v52 = vor.u32 %v12447_v47, %v10695_v31 }
 0x429   : > { %v4381_v42 = vpack.c.bf16 %v3816_v23, %v3816_v23  ;;  %v12446_v23 = vld [vmem:[%s12983_s9 + $0x3d4] sm:$0xf] }
 0x42b   : > { %v4909_v0 = vunpack.c.l.b16 %v4381_v42  ;;  %v10697_v42 = vld [vmem:[%s12983_s9 + $0x3d8] sm:$0xf0] }
 0x42d   : > { %v3089_v34 = vpop.f32.mrf.mxu0  ;;  %v4937_v32 = vpack.c.b16 %v4909_v0, %v4908_v14  ;;  %v10700_v0 = vor.u32 %v12446_v23, %v10697_v42 }
 0x42e   : > { %v3818_v6 = vpop.f32.mrf.mxu1 }
 0x42f   : > { %4956 = vrot.lane.b32.xlu2 %v4937_v32, %s12955_s26  ;;  %v3819_v22 = vadd.f32 %v3818_v6, %v3089_v34 }
 0x430   : > { %3128 = vmatmul.bf16.gmra.mxu0 %v10688_v27 }
 0x431   : > { %3857 = vmatmul.bf16.gmra.mxu1 %v10692_v48  ;;  %v4382_v44 = vpack.c.bf16 %v3819_v22, %v3819_v22 }
 0x433   : > { %v4910_v9 = vunpack.c.l.b16 %v4382_v44  ;;  %v12449_v44 = vld [vmem:[%s12983_s9 + $0x3e4] sm:$0xf0] }
 0x435   : > { %v3091_v3 = vpop.f32.mrf.mxu0 }
 0x436   : > { %v3820_v4 = vpop.f32.mrf.mxu1 }
 0x437   : > { %v3821_v56 = vadd.f32 %v3820_v4, %v3091_v3  ;;  %v10703_v4 = vld [vmem:[%s12983_s9 + $0x3e0] sm:$0xf] }
 0x438   : > { %v10704_v23 = vor.u32 %v12449_v44, %v10703_v4 }
 0x439   : > { %v4383_v61 = vpack.c.bf16 %v3821_v56, %v3821_v56  ;;  %v12448_v56 = vld [vmem:[%s12983_s9 + $0x3e4] sm:$0xf] }
 0x43b   : > { %v4911_v51 = vunpack.c.l.b16 %v4383_v61  ;;  %v10705_v61 = vld [vmem:[%s12983_s9 + $0x3e8] sm:$0xf0] }
 0x43d   : > { %v3094_v46 = vpop.f32.mrf.mxu0  ;;  %v4938_v14 = vpack.c.b16 %v4911_v51, %v4910_v9  ;;  %v10708_v9 = vor.u32 %v12448_v56, %v10705_v61  ;;  %v10719_v51 = vld [vmem:[%s12983_s9 + $0x400] sm:$0xf] }
 0x43e   : > { %v3823_v27 = vpop.f32.mrf.mxu1 }
 0x43f   : > { %v3824_v34 = vadd.f32 %v3823_v27, %v3094_v46  ;;  %4958 = vrot.lane.b32.xlu1 %v4938_v14, %s12955_s26 }
 0x440   : > { %3133 = vmatmul.bf16.gmra.mxu0 %v10696_v52 }
 0x441   : > { %3862 = vmatmul.bf16.gmra.mxu1 %v10700_v0  ;;  %v4384_v6 = vpack.c.bf16 %v3824_v34, %v3824_v34 }
 0x443   : > { %v13754_v31 = vunpack.c.l.b16 %v4384_v6  ;;  %v12451_v6 = vld [vmem:[%s12983_s9 + $0x3f4] sm:$0xf0] }
 0x445   : > { %v3096_v32 = vpop.f32.mrf.mxu0 }
 0x446   : > { %v3825_v48 = vpop.f32.mrf.mxu1 }
 0x447   : > { %v3826_v22 = vadd.f32 %v3825_v48, %v3096_v32  ;;  %v10711_v48 = vld [vmem:[%s12983_s9 + $0x3f0] sm:$0xf] }
 0x448   : > { %v10712_v56 = vor.u32 %v12451_v6, %v10711_v48 }
 0x449   : > { %v4385_v3 = vpack.c.bf16 %v3826_v22, %v3826_v22  ;;  %v12450_v22 = vld [vmem:[%s12983_s9 + $0x3f4] sm:$0xf] }
 0x44b   : > { %v13756_v47 = vunpack.c.l.b16 %v4385_v3  ;;  %v10713_v3 = vld [vmem:[%s12983_s9 + $0x3f8] sm:$0xf0] }
 0x44d   : > { %v3099_v42 = vpop.f32.mrf.mxu0 }
 0x44e   : > { %v3828_v52 = vpop.f32.mrf.mxu1 }
 0x44f   : > { %v3829_v46 = vadd.f32 %v3828_v52, %v3099_v42  ;;  %v10727_v42 = vld [vmem:[%s12983_s9 + $0x410] sm:$0xf] }
 0x450   : > { %3138 = vmatmul.bf16.gmra.mxu0 %v10704_v23  ;;  %v10716_v23 = vor.u32 %v12450_v22, %v10713_v3 }
 0x451   : > { %3867 = vmatmul.bf16.gmra.mxu1 %v10708_v9  ;;  %v4386_v27 = vpack.c.bf16 %v3829_v46, %v3829_v46 }
 0x453   : > { %v13764_v4 = vunpack.c.l.b16 %v4386_v27 }
 0x455   : > { %v3101_v14 = vpop.f32.mrf.mxu0 }
 0x456   : > { %v3830_v0 = vpop.f32.mrf.mxu1 }
 0x457   : > { %v3831_v34 = vadd.f32 %v3830_v0, %v3101_v14 }
 0x459   : > { %v4387_v32 = vpack.c.bf16 %v3831_v34, %v3831_v34 }
 0x45b   : > { %v13766_v44 = vunpack.c.l.b16 %v4387_v32  ;;  %v12453_v32 = vld [vmem:[%s12983_s9 + $0x404] sm:$0xf0] }
 0x45c   : > { %v10720_v22 = vor.u32 %v12453_v32, %v10719_v51 }
 0x45d   : > { %v3104_v61 = vpop.f32.mrf.mxu0 }
 0x45e   : > { %v3833_v9 = vpop.f32.mrf.mxu1 }
 0x45f   : > { %v3834_v52 = vadd.f32 %v3833_v9, %v3104_v61  ;;  %v10735_v61 = vld [vmem:[%s12983_s9 + $0x420] sm:$0xf] }
 0x460   : > { %3143 = vmatmul.bf16.gmra.mxu0 %v10712_v56  ;;  %v10724_v56 = vor.u32 %v12452_v28, %v10721_v30 }
 0x461   : > { %3872 = vmatmul.bf16.gmra.mxu1 %v10716_v23  ;;  %v4388_v0 = vpack.c.bf16 %v3834_v52, %v3834_v52 }
 0x463   : > { %v13774_v48 = vunpack.c.l.b16 %v4388_v0 }
 0x465   : > { %v3106_v46 = vpop.f32.mrf.mxu0 }
 0x466   : > { %v3835_v14 = vpop.f32.mrf.mxu1 }
 0x467   : > { %v3836_v27 = vadd.f32 %v3835_v14, %v3106_v46 }
 0x469   : > { %v4389_v34 = vpack.c.bf16 %v3836_v27, %v3836_v27 }
 0x46b   : > { %v13776_v6 = vunpack.c.l.b16 %v4389_v34  ;;  %v12455_v34 = vld [vmem:[%s12983_s9 + $0x414] sm:$0xf0] }
 0x46c   : > { %v10728_v30 = vor.u32 %v12455_v34, %v10727_v42 }
 0x46d   : > { %v3109_v3 = vpop.f32.mrf.mxu0 }
 0x46e   : > { %v3838_v23 = vpop.f32.mrf.mxu1 }
 0x46f   : > { %v3839_v9 = vadd.f32 %v3838_v23, %v3109_v3  ;;  %v10743_v3 = vld [vmem:[%s12983_s9 + $0x430] sm:$0xf] }
 0x470   : > { %3148 = vmatmul.bf16.gmra.mxu0 %v10720_v22  ;;  %v10732_v22 = vor.u32 %v12454_v10, %v10729_v20 }
 0x471   : > { %3877 = vmatmul.bf16.gmra.mxu1 %v10724_v56  ;;  %v4390_v14 = vpack.c.bf16 %v3839_v9, %v3839_v9 }
 0x473   : > { %v13784_v51 = vunpack.c.l.b16 %v4390_v14 }
 0x475   : > { %v3111_v52 = vpop.f32.mrf.mxu0 }
 0x476   : > { %v3840_v46 = vpop.f32.mrf.mxu1 }
 0x477   : > { %v3841_v0 = vadd.f32 %v3840_v46, %v3111_v52 }
 0x479   : > { %v4391_v27 = vpack.c.bf16 %v3841_v0, %v3841_v0 }
 0x47b   : > { %v13786_v28 = vunpack.c.l.b16 %v4391_v27  ;;  %v12457_v27 = vld [vmem:[%s12983_s9 + $0x424] sm:$0xf0] }
 0x47c   : > { %v10736_v10 = vor.u32 %v12457_v27, %v10735_v61 }
 0x47d   : > { %v3114_v32 = vpop.f32.mrf.mxu0 }
 0x47e   : > { %v3843_v56 = vpop.f32.mrf.mxu1 }
 0x47f   : > { %v3844_v23 = vadd.f32 %v3843_v56, %v3114_v32  ;;  %v10751_v32 = vld [vmem:[%s12983_s9 + $0x440] sm:$0xf] }
 0x480   : > { %3153 = vmatmul.bf16.gmra.mxu0 %v10728_v30  ;;  %v10740_v30 = vor.u32 %v12456_v19, %v10737_v1 }
 0x481   : > { %3882 = vmatmul.bf16.gmra.mxu1 %v10732_v22  ;;  %v4392_v46 = vpack.c.bf16 %v3844_v23, %v3844_v23 }
 0x483   : > { %v13794_v42 = vunpack.c.l.b16 %v4392_v46 }
 0x485   : > { %v3116_v9 = vpop.f32.mrf.mxu0 }
 0x486   : > { %v3845_v52 = vpop.f32.mrf.mxu1 }
 0x487   : > { %v3846_v14 = vadd.f32 %v3845_v52, %v3116_v9 }
 0x489   : > { %v4393_v0 = vpack.c.bf16 %v3846_v14, %v3846_v14 }
 0x48b   : > { %v13796_v20 = vunpack.c.l.b16 %v4393_v0  ;;  %v12459_v0 = vld [vmem:[%s12983_s9 + $0x434] sm:$0xf0] }
 0x48c   : > { %v10744_v19 = vor.u32 %v12459_v0, %v10743_v3 }
 0x48d   : > { %v3119_v34 = vpop.f32.mrf.mxu0 }
 0x48e   : > { %v3848_v22 = vpop.f32.mrf.mxu1 }
 0x48f   : > { %v3849_v56 = vadd.f32 %v3848_v22, %v3119_v34  ;;  %v10759_v34 = vld [vmem:[%s12983_s9 + $0x450] sm:$0xf] }
 0x490   : > { %3158 = vmatmul.bf16.gmra.mxu0 %v10736_v10  ;;  %v10748_v10 = vor.u32 %v12458_v2, %v10745_v35 }
 0x491   : > { %3887 = vmatmul.bf16.gmra.mxu1 %v10740_v30  ;;  %v4394_v52 = vpack.c.bf16 %v3849_v56, %v3849_v56 }
 0x493   : > { %v13804_v61 = vunpack.c.l.b16 %v4394_v52 }
 0x495   : > { %v3121_v23 = vpop.f32.mrf.mxu0  ;;  %16353 = vst [vmem:[#allocation81_spill] sm:$0xff] %v13804_v61  ;;  %v10873_v61 = vld [vmem:[%s12983_s9 + $0x538] sm:$0xf0] }
 0x496   : > { %v3850_v9 = vpop.f32.mrf.mxu1 }
 0x497   : > { %v3851_v46 = vadd.f32 %v3850_v9, %v3121_v23 }
 0x499   : > { %v4395_v14 = vpack.c.bf16 %v3851_v46, %v3851_v46 }
 0x49b   : > { %v13806_v1 = vunpack.c.l.b16 %v4395_v14  ;;  %v12461_v14 = vld [vmem:[%s12983_s9 + $0x444] sm:$0xf0] }
 0x49c   : > { %v10752_v35 = vor.u32 %v12461_v14, %v10751_v32 }
 0x49d   : > { %16354 = vst [vmem:[#allocation82_spill] sm:$0xff] %v13806_v1  ;;  %v3124_v27 = vpop.f32.mrf.mxu0  ;;  %v12492_v1 = vld [vmem:[%s12983_s9 + $0x544] sm:$0xf] }
 0x49e   : > { %v3853_v30 = vpop.f32.mrf.mxu1 }
 0x49f   : > { %v3854_v22 = vadd.f32 %v3853_v30, %v3124_v27  ;;  %v10767_v27 = vld [vmem:[%s12983_s9 + $0x460] sm:$0xf] }
 0x4a0   : > { %3163 = vmatmul.bf16.gmra.mxu0 %v10744_v19  ;;  %v10756_v19 = vor.u32 %v12460_v36, %v10753_v25 }
 0x4a1   : > { %3892 = vmatmul.bf16.gmra.mxu1 %v10748_v10  ;;  %v4396_v9 = vpack.c.bf16 %v3854_v22, %v3854_v22 }
 0x4a3   : > { %v13814_v3 = vunpack.c.l.b16 %v4396_v9 }
 0x4a5   : > { %v3126_v56 = vpop.f32.mrf.mxu0  ;;  %16355 = vst [vmem:[#allocation83_spill] sm:$0xff] %v13814_v3  ;;  %v10857_v3 = vld [vmem:[%s12983_s9 + $0x518] sm:$0xf0] }
 0x4a6   : > { %v3855_v23 = vpop.f32.mrf.mxu1 }
 0x4a7   : > { %v3856_v52 = vadd.f32 %v3855_v23, %v3126_v56 }
 0x4a9   : > { %v4397_v46 = vpack.c.bf16 %v3856_v52, %v3856_v52 }
 0x4ab   : > { %v13816_v2 = vunpack.c.l.b16 %v4397_v46  ;;  %v12463_v46 = vld [vmem:[%s12983_s9 + $0x454] sm:$0xf0] }
 0x4ac   : > { %v10760_v25 = vor.u32 %v12463_v46, %v10759_v34 }
 0x4ad   : > { %16356 = vst [vmem:[#allocation84_spill] sm:$0xff] %v13816_v2  ;;  %v3129_v0 = vpop.f32.mrf.mxu0  ;;  %v12488_v2 = vld [vmem:[%s12983_s9 + $0x524] sm:$0xf] }
 0x4ae   : > { %v3858_v10 = vpop.f32.mrf.mxu1 }
 0x4af   : > { %v3859_v30 = vadd.f32 %v3858_v10, %v3129_v0  ;;  %v10775_v0 = vld [vmem:[%s12983_s9 + $0x470] sm:$0xf] }
 0x4b0   : > { %3168 = vmatmul.bf16.gmra.mxu0 %v10752_v35  ;;  %v10764_v35 = vor.u32 %v12462_v60, %v10761_v39 }
 0x4b1   : > { %3897 = vmatmul.bf16.gmra.mxu1 %v10756_v19  ;;  %v4398_v23 = vpack.c.bf16 %v3859_v30, %v3859_v30 }
 0x4b3   : > { %v13824_v32 = vunpack.c.l.b16 %v4398_v23 }
 0x4b5   : > { %v3131_v22 = vpop.f32.mrf.mxu0  ;;  %16357 = vst [vmem:[#allocation85_spill] sm:$0xff] %v13824_v32  ;;  %v12466_v32 = vld [vmem:[%s12983_s9 + $0x474] sm:$0xf] }
 0x4b6   : > { %v3860_v56 = vpop.f32.mrf.mxu1 }
 0x4b7   : > { %v3861_v9 = vadd.f32 %v3860_v56, %v3131_v22 }
 0x4b9   : > { %v4399_v52 = vpack.c.bf16 %v3861_v9, %v3861_v9 }
 0x4bb   : > { %v13826_v36 = vunpack.c.l.b16 %v4399_v52  ;;  %v12465_v52 = vld [vmem:[%s12983_s9 + $0x464] sm:$0xf0] }
 0x4bc   : > { %v10768_v60 = vor.u32 %v12465_v52, %v10767_v27 }
 0x4bd   : > { %16358 = vst [vmem:[#allocation86_spill] sm:$0xff] %v13826_v36  ;;  %v3134_v14 = vpop.f32.mrf.mxu0  ;;  %v10777_v36 = vld [vmem:[%s12983_s9 + $0x478] sm:$0xf0] }
 0x4be   : > { %v3863_v19 = vpop.f32.mrf.mxu1 }
 0x4bf   : > { %v3864_v10 = vadd.f32 %v3863_v19, %v3134_v14  ;;  %v10783_v14 = vld [vmem:[%s12983_s9 + $0x480] sm:$0xf] }
 0x4c0   : > { %3173 = vmatmul.bf16.gmra.mxu0 %v10760_v25  ;;  %v10772_v25 = vor.u32 %v12464_v40, %v10769_v12 }
 0x4c1   : > { %3902 = vmatmul.bf16.gmra.mxu1 %v10764_v35  ;;  %v4400_v56 = vpack.c.bf16 %v3864_v10, %v3864_v10 }
 0x4c3   : > { %v13834_v34 = vunpack.c.l.b16 %v4400_v56 }
 0x4c5   : > { %v3136_v30 = vpop.f32.mrf.mxu0  ;;  %16359 = vst [vmem:[#allocation87_spill] sm:$0xff] %v13834_v34  ;;  %v12468_v34 = vld [vmem:[%s12983_s9 + $0x484] sm:$0xf] }
 0x4c6   : > { %v3865_v22 = vpop.f32.mrf.mxu1 }
 0x4c7   : > { %v3866_v23 = vadd.f32 %v3865_v22, %v3136_v30 }
 0x4c9   : > { %v4401_v9 = vpack.c.bf16 %v3866_v23, %v3866_v23 }
 0x4cb   : > { %v13836_v39 = vunpack.c.l.b16 %v4401_v9  ;;  %v12467_v9 = vld [vmem:[%s12983_s9 + $0x474] sm:$0xf0] }
 0x4cc   : > { %v10776_v12 = vor.u32 %v12467_v9, %v10775_v0 }
 0x4cd   : > { %16360 = vst [vmem:[#allocation88_spill] sm:$0xff] %v13836_v39  ;;  %v3139_v46 = vpop.f32.mrf.mxu0  ;;  %v10785_v39 = vld [vmem:[%s12983_s9 + $0x488] sm:$0xf0] }
 0x4ce   : > { %v3868_v35 = vpop.f32.mrf.mxu1 }
 0x4cf   : > { %v3869_v19 = vadd.f32 %v3868_v35, %v3139_v46  ;;  %v10791_v46 = vld [vmem:[%s12983_s9 + $0x490] sm:$0xf] }
 0x4d0   : > { %3178 = vmatmul.bf16.gmra.mxu0 %v10768_v60  ;;  %v10780_v60 = vor.u32 %v12466_v32, %v10777_v36 }
 0x4d1   : > { %3907 = vmatmul.bf16.gmra.mxu1 %v10772_v25  ;;  %v4402_v22 = vpack.c.bf16 %v3869_v19, %v3869_v19 }
 0x4d3   : > { %v13844_v27 = vunpack.c.l.b16 %v4402_v22 }
 0x4d5   : > { %v3141_v10 = vpop.f32.mrf.mxu0  ;;  %16361 = vst [vmem:[#allocation89_spill] sm:$0xff] %v13844_v27  ;;  %v12470_v27 = vld [vmem:[%s12983_s9 + $0x494] sm:$0xf] }
 0x4d6   : > { %v3870_v30 = vpop.f32.mrf.mxu1 }
 0x4d7   : > { %v3871_v56 = vadd.f32 %v3870_v30, %v3141_v10 }
 0x4d9   : > { %v4403_v23 = vpack.c.bf16 %v3871_v56, %v3871_v56 }
 0x4db   : > { %v13846_v40 = vunpack.c.l.b16 %v4403_v23  ;;  %v12469_v23 = vld [vmem:[%s12983_s9 + $0x484] sm:$0xf0] }
 0x4dc   : > { %v10784_v36 = vor.u32 %v12469_v23, %v10783_v14 }
 0x4dd   : > { %16362 = vst [vmem:[#allocation90_spill] sm:$0xff] %v13846_v40  ;;  %v3144_v52 = vpop.f32.mrf.mxu0  ;;  %v10793_v40 = vld [vmem:[%s12983_s9 + $0x498] sm:$0xf0] }
 0x4de   : > { %v3873_v25 = vpop.f32.mrf.mxu1 }
 0x4df   : > { %v3874_v35 = vadd.f32 %v3873_v25, %v3144_v52 }
 0x4e0   : > { %3183 = vmatmul.bf16.gmra.mxu0 %v10776_v12  ;;  %v10788_v12 = vor.u32 %v12468_v34, %v10785_v39 }
 0x4e1   : > { %3912 = vmatmul.bf16.gmra.mxu1 %v10780_v60  ;;  %v4404_v30 = vpack.c.bf16 %v3874_v35, %v3874_v35 }
 0x4e3   : > { %v13854_v0 = vunpack.c.l.b16 %v4404_v30 }
 0x4e5   : > { %v3146_v19 = vpop.f32.mrf.mxu0  ;;  %16363 = vst [vmem:[#allocation91_spill] sm:$0xff] %v13854_v0 }
 0x4e6   : > { %v3875_v10 = vpop.f32.mrf.mxu1 }
 0x4e7   : > { %v3876_v22 = vadd.f32 %v3875_v10, %v3146_v19 }
 0x4e9   : > { %v4405_v56 = vpack.c.bf16 %v3876_v22, %v3876_v22 }
 0x4eb   : > { %v13856_v32 = vunpack.c.l.b16 %v4405_v56  ;;  %v12471_v56 = vld [vmem:[%s12983_s9 + $0x494] sm:$0xf0] }
 0x4ec   : > { %v10792_v34 = vor.u32 %v12471_v56, %v10791_v46  ;;  %v12473_v46 = vld [vmem:[%s12983_s9 + $0x4a4] sm:$0xf0]  ;;  %v10801_v56 = vld [vmem:[%s12983_s9 + $0x4a8] sm:$0xf0] }
 0x4ed   : > { %16364 = vst [vmem:[#allocation92_spill] sm:$0xff] %v13856_v32  ;;  %v3149_v9 = vpop.f32.mrf.mxu0 }
 0x4ee   : > { %v3878_v60 = vpop.f32.mrf.mxu1 }
 0x4ef   : > { %v3879_v25 = vadd.f32 %v3878_v60, %v3149_v9 }
 0x4f0   : > { %3188 = vmatmul.bf16.gmra.mxu0 %v10784_v36  ;;  %v10796_v36 = vor.u32 %v12470_v27, %v10793_v40 }
 0x4f1   : > { %3917 = vmatmul.bf16.gmra.mxu1 %v10788_v12  ;;  %v4406_v10 = vpack.c.bf16 %v3879_v25, %v3879_v25 }
 0x4f3   : > { %v5014_v14 = vunpack.c.l.b16 %v4406_v10 }
 0x4f5   : > { %v3151_v35 = vpop.f32.mrf.mxu0 }
 0x4f6   : > { %v3880_v19 = vpop.f32.mrf.mxu1 }
 0x4f7   : > { %v3881_v30 = vadd.f32 %v3880_v19, %v3151_v35 }
 0x4f9   : > { %v4407_v22 = vpack.c.bf16 %v3881_v30, %v3881_v30  ;;  %v10799_v30 = vld [vmem:[%s12983_s9 + $0x4a0] sm:$0xf] }
 0x4fa   : > { %v10800_v27 = vor.u32 %v12473_v46, %v10799_v30  ;;  %v10809_v30 = vld [vmem:[%s12983_s9 + $0x4b8] sm:$0xf0] }
 0x4fb   : > { %v5015_v23 = vunpack.c.l.b16 %v4407_v22  ;;  %v12472_v22 = vld [vmem:[%s12983_s9 + $0x4a4] sm:$0xf] }
 0x4fd   : > { %v3154_v39 = vpop.f32.mrf.mxu0  ;;  %v5046_v52 = vpack.c.b16 %v5015_v23, %v5014_v14  ;;  %v10804_v23 = vor.u32 %v12472_v22, %v10801_v56 }
 0x4fe   : > { %v3883_v9 = vpop.f32.mrf.mxu1 }
 0x4ff   : > { %5062 = vrot.lane.b32.xlu1 %v5046_v52, %s12956_s28  ;;  %v3884_v12 = vadd.f32 %v3883_v9, %v3154_v39 }
 0x500   : > { %3193 = vmatmul.bf16.gmra.mxu0 %v10792_v34 }
 0x501   : > { %3922 = vmatmul.bf16.gmra.mxu1 %v10796_v36  ;;  %v4408_v35 = vpack.c.bf16 %v3884_v12, %v3884_v12 }
 0x503   : > { %v5016_v0 = vunpack.c.l.b16 %v4408_v35  ;;  %v10807_v35 = vld [vmem:[%s12983_s9 + $0x4b0] sm:$0xf] }
 0x505   : > { %v3156_v60 = vpop.f32.mrf.mxu0 }
 0x506   : > { %v3885_v25 = vpop.f32.mrf.mxu1 }
 0x507   : > { %v3886_v19 = vadd.f32 %v3885_v25, %v3156_v60 }
 0x509   : > { %v4409_v10 = vpack.c.bf16 %v3886_v19, %v3886_v19  ;;  %v12475_v19 = vld [vmem:[%s12983_s9 + $0x4b4] sm:$0xf0] }
 0x50b   : > { %v5017_v14 = vunpack.c.l.b16 %v4409_v10  ;;  %v12474_v10 = vld [vmem:[%s12983_s9 + $0x4b4] sm:$0xf] }
 0x50d   : > { %v3159_v40 = vpop.f32.mrf.mxu0  ;;  %v5047_v52 = vpack.c.b16 %v5017_v14, %v5016_v0  ;;  %v10808_v0 = vor.u32 %v12475_v19, %v10807_v35  ;;  %v10812_v14 = vor.u32 %v12474_v10, %v10809_v30 }
 0x50e   : > { %v3888_v34 = vpop.f32.mrf.mxu1 }
 0x50f   : > { %5064 = vrot.lane.b32.xlu2 %v5047_v52, %s12956_s28  ;;  %v3889_v39 = vadd.f32 %v3888_v34, %v3159_v40 }
 0x510   : > { %3198 = vmatmul.bf16.gmra.mxu0 %v10800_v27 }
 0x511   : > { %3927 = vmatmul.bf16.gmra.mxu1 %v10804_v23  ;;  %v4410_v12 = vpack.c.bf16 %v3889_v39, %v3889_v39 }
 0x513   : > { %v5018_v46 = vunpack.c.l.b16 %v4410_v12  ;;  %v12477_v12 = vld [vmem:[%s12983_s9 + $0x4c4] sm:$0xf0] }
 0x515   : > { %v3161_v36 = vpop.f32.mrf.mxu0 }
 0x516   : > { %v3890_v9 = vpop.f32.mrf.mxu1 }
 0x517   : > { %v3891_v60 = vadd.f32 %v3890_v9, %v3161_v36  ;;  %v10815_v9 = vld [vmem:[%s12983_s9 + $0x4c0] sm:$0xf] }
 0x519   : > { %v4411_v25 = vpack.c.bf16 %v3891_v60, %v3891_v60  ;;  %v12476_v60 = vld [vmem:[%s12983_s9 + $0x4c4] sm:$0xf] }
 0x51b   : > { %v5019_v32 = vunpack.c.l.b16 %v4411_v25  ;;  %v10817_v25 = vld [vmem:[%s12983_s9 + $0x4c8] sm:$0xf0] }
 0x51d   : > { %v3164_v22 = vpop.f32.mrf.mxu0  ;;  %v5048_v56 = vpack.c.b16 %v5019_v32, %v5018_v46  ;;  %v10816_v32 = vor.u32 %v12477_v12, %v10815_v9  ;;  %v10820_v46 = vor.u32 %v12476_v60, %v10817_v25 }
 0x51e   : > { %v3893_v27 = vpop.f32.mrf.mxu1 }
 0x51f   : > { %5066 = vrot.lane.b32.xlu1 %v5048_v56, %s12956_s28  ;;  %v3894_v40 = vadd.f32 %v3893_v27, %v3164_v22 }
 0x520   : > { %3203 = vmatmul.bf16.gmra.mxu0 %v10808_v0 }
 0x521   : > { %3932 = vmatmul.bf16.gmra.mxu1 %v10812_v14  ;;  %v4412_v34 = vpack.c.bf16 %v3894_v40, %v3894_v40 }
 0x523   : > { %v5020_v35 = vunpack.c.l.b16 %v4412_v34  ;;  %v12479_v34 = vld [vmem:[%s12983_s9 + $0x4d4] sm:$0xf0] }
 0x525   : > { %v3166_v52 = vpop.f32.mrf.mxu0 }
 0x526   : > { %v3895_v23 = vpop.f32.mrf.mxu1 }
 0x527   : > { %v3896_v39 = vadd.f32 %v3895_v23, %v3166_v52  ;;  %v10823_v23 = vld [vmem:[%s12983_s9 + $0x4d0] sm:$0xf] }
 0x528   : > { %v10824_v60 = vor.u32 %v12479_v34, %v10823_v23 }
 0x529   : > { %v4413_v36 = vpack.c.bf16 %v3896_v39, %v3896_v39  ;;  %v12478_v39 = vld [vmem:[%s12983_s9 + $0x4d4] sm:$0xf] }
 0x52b   : > { %v5021_v19 = vunpack.c.l.b16 %v4413_v36  ;;  %v10825_v36 = vld [vmem:[%s12983_s9 + $0x4d8] sm:$0xf0] }
 0x52d   : > { %v3169_v10 = vpop.f32.mrf.mxu0  ;;  %v5049_v30 = vpack.c.b16 %v5021_v19, %v5020_v35  ;;  %v10828_v19 = vor.u32 %v12478_v39, %v10825_v36 }
 0x52e   : > { %v3898_v0 = vpop.f32.mrf.mxu1 }
 0x52f   : > { %5068 = vrot.lane.b32.xlu0 %v5049_v30, %s12956_s28  ;;  %v3899_v22 = vadd.f32 %v3898_v0, %v3169_v10 }
 0x530   : > { %3208 = vmatmul.bf16.gmra.mxu0 %v10816_v32 }
 0x531   : > { %3937 = vmatmul.bf16.gmra.mxu1 %v10820_v46  ;;  %v4414_v27 = vpack.c.bf16 %v3899_v22, %v3899_v22 }
 0x533   : > { %v5022_v9 = vunpack.c.l.b16 %v4414_v27  ;;  %v12481_v27 = vld [vmem:[%s12983_s9 + $0x4e4] sm:$0xf0] }
 0x535   : > { %v3171_v56 = vpop.f32.mrf.mxu0 }
 0x536   : > { %v3900_v14 = vpop.f32.mrf.mxu1 }
 0x537   : > { %v3901_v40 = vadd.f32 %v3900_v14, %v3171_v56  ;;  %v10831_v14 = vld [vmem:[%s12983_s9 + $0x4e0] sm:$0xf] }
 0x538   : > { %v10832_v39 = vor.u32 %v12481_v27, %v10831_v14 }
 0x539   : > { %v4415_v52 = vpack.c.bf16 %v3901_v40, %v3901_v40  ;;  %v12480_v40 = vld [vmem:[%s12983_s9 + $0x4e4] sm:$0xf] }
 0x53b   : > { %v5023_v12 = vunpack.c.l.b16 %v4415_v52  ;;  %v10833_v52 = vld [vmem:[%s12983_s9 + $0x4e8] sm:$0xf0] }
 0x53d   : > { %v3174_v25 = vpop.f32.mrf.mxu0  ;;  %v5050_v35 = vpack.c.b16 %v5023_v12, %v5022_v9  ;;  %v10836_v9 = vor.u32 %v12480_v40, %v10833_v52  ;;  %v10847_v12 = vld [vmem:[%s12983_s9 + $0x500] sm:$0xf] }
 0x53e   : > { %v3903_v32 = vpop.f32.mrf.mxu1 }
 0x53f   : > { %v3904_v10 = vadd.f32 %v3903_v32, %v3174_v25  ;;  %5070 = vrot.lane.b32.xlu2 %v5050_v35, %s12956_s28 }
 0x540   : > { %3213 = vmatmul.bf16.gmra.mxu0 %v10824_v60 }
 0x541   : > { %3942 = vmatmul.bf16.gmra.mxu1 %v10828_v19  ;;  %v4416_v0 = vpack.c.bf16 %v3904_v10, %v3904_v10 }
 0x543   : > { %v13889_v23 = vunpack.c.l.b16 %v4416_v0  ;;  %v12483_v0 = vld [vmem:[%s12983_s9 + $0x4f4] sm:$0xf0] }
 0x545   : > { %v3176_v30 = vpop.f32.mrf.mxu0 }
 0x546   : > { %v3905_v46 = vpop.f32.mrf.mxu1 }
 0x547   : > { %v3906_v22 = vadd.f32 %v3905_v46, %v3176_v30  ;;  %v10839_v46 = vld [vmem:[%s12983_s9 + $0x4f0] sm:$0xf] }
 0x548   : > { %v10840_v40 = vor.u32 %v12483_v0, %v10839_v46 }
 0x549   : > { %v4417_v56 = vpack.c.bf16 %v3906_v22, %v3906_v22  ;;  %v12482_v22 = vld [vmem:[%s12983_s9 + $0x4f4] sm:$0xf] }
 0x54b   : > { %v13891_v34 = vunpack.c.l.b16 %v4417_v56  ;;  %v10841_v56 = vld [vmem:[%s12983_s9 + $0x4f8] sm:$0xf0] }
 0x54d   : > { %v3179_v36 = vpop.f32.mrf.mxu0 }
 0x54e   : > { %v3908_v60 = vpop.f32.mrf.mxu1 }
 0x54f   : > { %v3909_v25 = vadd.f32 %v3908_v60, %v3179_v36  ;;  %v10855_v36 = vld [vmem:[%s12983_s9 + $0x510] sm:$0xf] }
 0x550   : > { %3218 = vmatmul.bf16.gmra.mxu0 %v10832_v39  ;;  %v10844_v39 = vor.u32 %v12482_v22, %v10841_v56 }
 0x551   : > { %3947 = vmatmul.bf16.gmra.mxu1 %v10836_v9  ;;  %v4418_v32 = vpack.c.bf16 %v3909_v25, %v3909_v25 }
 0x553   : > { %v13899_v14 = vunpack.c.l.b16 %v4418_v32 }
 0x555   : > { %v3181_v35 = vpop.f32.mrf.mxu0 }
 0x556   : > { %v3910_v19 = vpop.f32.mrf.mxu1 }
 0x557   : > { %v3911_v10 = vadd.f32 %v3910_v19, %v3181_v35 }
 0x559   : > { %v4419_v30 = vpack.c.bf16 %v3911_v10, %v3911_v10 }
 0x55b   : > { %v13901_v27 = vunpack.c.l.b16 %v4419_v30  ;;  %v12485_v30 = vld [vmem:[%s12983_s9 + $0x504] sm:$0xf0] }
 0x55c   : > { %v10848_v22 = vor.u32 %v12485_v30, %v10847_v12 }
 0x55d   : > { %v3184_v52 = vpop.f32.mrf.mxu0 }
 0x55e   : > { %v3913_v9 = vpop.f32.mrf.mxu1 }
 0x55f   : > { %v3914_v60 = vadd.f32 %v3913_v9, %v3184_v52  ;;  %v10863_v52 = vld [vmem:[%s12983_s9 + $0x520] sm:$0xf] }
 0x560   : > { %3223 = vmatmul.bf16.gmra.mxu0 %v10840_v40  ;;  %v10852_v40 = vor.u32 %v12484_v13, %v10849_v49 }
 0x561   : > { %3952 = vmatmul.bf16.gmra.mxu1 %v10844_v39  ;;  %v4420_v19 = vpack.c.bf16 %v3914_v60, %v3914_v60 }
 0x563   : > { %v13909_v46 = vunpack.c.l.b16 %v4420_v19 }
 0x565   : > { %v3186_v25 = vpop.f32.mrf.mxu0 }
 0x566   : > { %v3915_v35 = vpop.f32.mrf.mxu1 }
 0x567   : > { %v3916_v32 = vadd.f32 %v3915_v35, %v3186_v25 }
 0x569   : > { %v4421_v10 = vpack.c.bf16 %v3916_v32, %v3916_v32 }
 0x56b   : > { %v13911_v0 = vunpack.c.l.b16 %v4421_v10  ;;  %v12487_v10 = vld [vmem:[%s12983_s9 + $0x514] sm:$0xf0] }
 0x56c   : > { %v10856_v49 = vor.u32 %v12487_v10, %v10855_v36 }
 0x56d   : > { %v3189_v56 = vpop.f32.mrf.mxu0 }
 0x56e   : > { %v3918_v39 = vpop.f32.mrf.mxu1 }
 0x56f   : > { %v3919_v9 = vadd.f32 %v3918_v39, %v3189_v56  ;;  %v10871_v56 = vld [vmem:[%s12983_s9 + $0x530] sm:$0xf] }
 0x570   : > { %3228 = vmatmul.bf16.gmra.mxu0 %v10848_v22  ;;  %v10860_v22 = vor.u32 %v12486_v8, %v10857_v3 }
 0x571   : > { %3957 = vmatmul.bf16.gmra.mxu1 %v10852_v40  ;;  %v4422_v35 = vpack.c.bf16 %v3919_v9, %v3919_v9 }
 0x573   : > { %v13919_v12 = vunpack.c.l.b16 %v4422_v35 }
 0x575   : > { %v3191_v60 = vpop.f32.mrf.mxu0 }
 0x576   : > { %v3920_v25 = vpop.f32.mrf.mxu1 }
 0x577   : > { %v3921_v19 = vadd.f32 %v3920_v25, %v3191_v60 }
 0x579   : > { %v4423_v32 = vpack.c.bf16 %v3921_v19, %v3921_v19 }
 0x57b   : > { %v13921_v13 = vunpack.c.l.b16 %v4423_v32  ;;  %v12489_v32 = vld [vmem:[%s12983_s9 + $0x524] sm:$0xf0] }
 0x57c   : > { %v10864_v3 = vor.u32 %v12489_v32, %v10863_v52 }
 0x57d   : > { %v3194_v30 = vpop.f32.mrf.mxu0 }
 0x57e   : > { %v3923_v40 = vpop.f32.mrf.mxu1 }
 0x57f   : > { %v3924_v39 = vadd.f32 %v3923_v40, %v3194_v30  ;;  %v10879_v30 = vld [vmem:[%s12983_s9 + $0x540] sm:$0xf] }
 0x580   : > { %3233 = vmatmul.bf16.gmra.mxu0 %v10856_v49  ;;  %v10868_v49 = vor.u32 %v12488_v2, %v10865_v16 }
 0x581   : > { %3962 = vmatmul.bf16.gmra.mxu1 %v10860_v22  ;;  %v4424_v25 = vpack.c.bf16 %v3924_v39, %v3924_v39 }
 0x583   : > { %v13929_v36 = vunpack.c.l.b16 %v4424_v25 }
 0x585   : > { %v3196_v9 = vpop.f32.mrf.mxu0  ;;  %16365 = vst [vmem:[#allocation93_spill] sm:$0xff] %v13929_v36  ;;  %v11001_v36 = vld [vmem:[%s12983_s9 + $0x638] sm:$0xf0] }
 0x586   : > { %v3925_v60 = vpop.f32.mrf.mxu1 }
 0x587   : > { %v3926_v35 = vadd.f32 %v3925_v60, %v3196_v9 }
 0x589   : > { %v4425_v19 = vpack.c.bf16 %v3926_v35, %v3926_v35 }
 0x58b   : > { %v13931_v8 = vunpack.c.l.b16 %v4425_v19  ;;  %v12491_v19 = vld [vmem:[%s12983_s9 + $0x534] sm:$0xf0] }
 0x58c   : > { %v10872_v2 = vor.u32 %v12491_v19, %v10871_v56 }
 0x58d   : > { %16366 = vst [vmem:[#allocation94_spill] sm:$0xff] %v13931_v8  ;;  %v3199_v10 = vpop.f32.mrf.mxu0  ;;  %v11121_v8 = vld [vmem:[%s12983_s9 + $0x728] sm:$0xf0] }
 0x58e   : > { %v3928_v22 = vpop.f32.mrf.mxu1 }
 0x58f   : > { %v3929_v40 = vadd.f32 %v3928_v22, %v3199_v10  ;;  %v10887_v10 = vld [vmem:[%s12983_s9 + $0x550] sm:$0xf] }
 0x590   : > { %3238 = vmatmul.bf16.gmra.mxu0 %v10864_v3  ;;  %v10876_v3 = vor.u32 %v12490_v17, %v10873_v61 }
 0x591   : > { %3967 = vmatmul.bf16.gmra.mxu1 %v10868_v49  ;;  %v4426_v60 = vpack.c.bf16 %v3929_v40, %v3929_v40 }
 0x593   : > { %v13939_v52 = vunpack.c.l.b16 %v4426_v60 }
 0x595   : > { %v3201_v39 = vpop.f32.mrf.mxu0  ;;  %16367 = vst [vmem:[#allocation95_spill] sm:$0xff] %v13939_v52  ;;  %v12494_v52 = vld [vmem:[%s12983_s9 + $0x554] sm:$0xf] }
 0x596   : > { %v3930_v9 = vpop.f32.mrf.mxu1 }
 0x597   : > { %v3931_v25 = vadd.f32 %v3930_v9, %v3201_v39 }
 0x599   : > { %v4427_v35 = vpack.c.bf16 %v3931_v25, %v3931_v25 }
 0x59b   : > { %v13941_v16 = vunpack.c.l.b16 %v4427_v35  ;;  %v12493_v35 = vld [vmem:[%s12983_s9 + $0x544] sm:$0xf0] }
 0x59c   : > { %v10880_v61 = vor.u32 %v12493_v35, %v10879_v30 }
 0x59d   : > { %16368 = vst [vmem:[#allocation96_spill] sm:$0xff] %v13941_v16  ;;  %v3204_v32 = vpop.f32.mrf.mxu0  ;;  %v10889_v16 = vld [vmem:[%s12983_s9 + $0x558] sm:$0xf0] }
 0x59e   : > { %v3933_v49 = vpop.f32.mrf.mxu1 }
 0x59f   : > { %v3934_v22 = vadd.f32 %v3933_v49, %v3204_v32  ;;  %v10895_v32 = vld [vmem:[%s12983_s9 + $0x560] sm:$0xf] }
 0x5a0   : > { %3243 = vmatmul.bf16.gmra.mxu0 %v10872_v2  ;;  %v10884_v2 = vor.u32 %v12492_v1, %v10881_v53 }
 0x5a1   : > { %3972 = vmatmul.bf16.gmra.mxu1 %v10876_v3  ;;  %v4428_v9 = vpack.c.bf16 %v3934_v22, %v3934_v22 }
 0x5a3   : > { %v13949_v56 = vunpack.c.l.b16 %v4428_v9 }
 0x5a5   : > { %v3206_v40 = vpop.f32.mrf.mxu0  ;;  %16369 = vst [vmem:[#allocation97_spill] sm:$0xff] %v13949_v56  ;;  %v12496_v56 = vld [vmem:[%s12983_s9 + $0x564] sm:$0xf] }
 0x5a6   : > { %v3935_v39 = vpop.f32.mrf.mxu1 }
 0x5a7   : > { %v3936_v60 = vadd.f32 %v3935_v39, %v3206_v40 }
 0x5a9   : > { %v4429_v25 = vpack.c.bf16 %v3936_v60, %v3936_v60 }
 0x5ab   : > { %v13951_v17 = vunpack.c.l.b16 %v4429_v25  ;;  %v12495_v25 = vld [vmem:[%s12983_s9 + $0x554] sm:$0xf0] }
 0x5ac   : > { %v10888_v1 = vor.u32 %v12495_v25, %v10887_v10 }
 0x5ad   : > { %16370 = vst [vmem:[#allocation98_spill] sm:$0xff] %v13951_v17  ;;  %v3209_v19 = vpop.f32.mrf.mxu0  ;;  %v10897_v17 = vld [vmem:[%s12983_s9 + $0x568] sm:$0xf0] }
 0x5ae   : > { %v3938_v3 = vpop.f32.mrf.mxu1 }
 0x5af   : > { %v3939_v49 = vadd.f32 %v3938_v3, %v3209_v19  ;;  %v10903_v19 = vld [vmem:[%s12983_s9 + $0x570] sm:$0xf] }
 0x5b0   : > { %3248 = vmatmul.bf16.gmra.mxu0 %v10880_v61  ;;  %v10892_v61 = vor.u32 %v12494_v52, %v10889_v16 }
 0x5b1   : > { %3977 = vmatmul.bf16.gmra.mxu1 %v10884_v2  ;;  %v4430_v39 = vpack.c.bf16 %v3939_v49, %v3939_v49 }
 0x5b3   : > { %v13959_v30 = vunpack.c.l.b16 %v4430_v39 }
 0x5b5   : > { %v3211_v22 = vpop.f32.mrf.mxu0  ;;  %16371 = vst [vmem:[#allocation99_spill] sm:$0xff] %v13959_v30  ;;  %v12498_v30 = vld [vmem:[%s12983_s9 + $0x574] sm:$0xf] }
 0x5b6   : > { %v3940_v40 = vpop.f32.mrf.mxu1 }
 0x5b7   : > { %v3941_v9 = vadd.f32 %v3940_v40, %v3211_v22 }
 0x5b9   : > { %v4431_v60 = vpack.c.bf16 %v3941_v9, %v3941_v9 }
 0x5bb   : > { %v13961_v53 = vunpack.c.l.b16 %v4431_v60  ;;  %v12497_v60 = vld [vmem:[%s12983_s9 + $0x564] sm:$0xf0] }
 0x5bc   : > { %v10896_v16 = vor.u32 %v12497_v60, %v10895_v32 }
 0x5bd   : > { %16372 = vst [vmem:[#allocation100_spill] sm:$0xff] %v13961_v53  ;;  %v3214_v35 = vpop.f32.mrf.mxu0  ;;  %v10905_v53 = vld [vmem:[%s12983_s9 + $0x578] sm:$0xf0] }
 0x5be   : > { %v3943_v2 = vpop.f32.mrf.mxu1 }
 0x5bf   : > { %v3944_v3 = vadd.f32 %v3943_v2, %v3214_v35  ;;  %v10911_v35 = vld [vmem:[%s12983_s9 + $0x580] sm:$0xf] }
 0x5c0   : > { %3253 = vmatmul.bf16.gmra.mxu0 %v10888_v1  ;;  %v10900_v1 = vor.u32 %v12496_v56, %v10897_v17 }
 0x5c1   : > { %3982 = vmatmul.bf16.gmra.mxu1 %v10892_v61  ;;  %v4432_v40 = vpack.c.bf16 %v3944_v3, %v3944_v3 }
 0x5c3   : > { %v13969_v10 = vunpack.c.l.b16 %v4432_v40 }
 0x5c5   : > { %v3216_v49 = vpop.f32.mrf.mxu0  ;;  %16373 = vst [vmem:[#allocation101_spill] sm:$0xff] %v13969_v10  ;;  %v12500_v10 = vld [vmem:[%s12983_s9 + $0x584] sm:$0xf] }
 0x5c6   : > { %v3945_v22 = vpop.f32.mrf.mxu1 }
 0x5c7   : > { %v3946_v39 = vadd.f32 %v3945_v22, %v3216_v49 }
 0x5c9   : > { %v4433_v9 = vpack.c.bf16 %v3946_v39, %v3946_v39 }
 0x5cb   : > { %v13971_v52 = vunpack.c.l.b16 %v4433_v9  ;;  %v12499_v9 = vld [vmem:[%s12983_s9 + $0x574] sm:$0xf0] }
 0x5cc   : > { %v10904_v17 = vor.u32 %v12499_v9, %v10903_v19 }
 0x5cd   : > { %16374 = vst [vmem:[#allocation102_spill] sm:$0xff] %v13971_v52  ;;  %v3219_v25 = vpop.f32.mrf.mxu0  ;;  %v10913_v52 = vld [vmem:[%s12983_s9 + $0x588] sm:$0xf0] }
 0x5ce   : > { %v3948_v61 = vpop.f32.mrf.mxu1 }
 0x5cf   : > { %v3949_v2 = vadd.f32 %v3948_v61, %v3219_v25  ;;  %v10919_v25 = vld [vmem:[%s12983_s9 + $0x590] sm:$0xf] }
 0x5d0   : > { %3258 = vmatmul.bf16.gmra.mxu0 %v10896_v16  ;;  %v10908_v16 = vor.u32 %v12498_v30, %v10905_v53 }
 0x5d1   : > { %3987 = vmatmul.bf16.gmra.mxu1 %v10900_v1  ;;  %v4434_v22 = vpack.c.bf16 %v3949_v2, %v3949_v2 }
 0x5d3   : > { %v13979_v32 = vunpack.c.l.b16 %v4434_v22 }
 0x5d5   : > { %v3221_v3 = vpop.f32.mrf.mxu0  ;;  %16375 = vst [vmem:[#allocation103_spill] sm:$0xff] %v13979_v32  ;;  %v12502_v32 = vld [vmem:[%s12983_s9 + $0x594] sm:$0xf] }
 0x5d6   : > { %v3950_v49 = vpop.f32.mrf.mxu1 }
 0x5d7   : > { %v3951_v40 = vadd.f32 %v3950_v49, %v3221_v3 }
 0x5d9   : > { %v4435_v39 = vpack.c.bf16 %v3951_v40, %v3951_v40 }
 0x5db   : > { %v13981_v56 = vunpack.c.l.b16 %v4435_v39  ;;  %v12501_v39 = vld [vmem:[%s12983_s9 + $0x584] sm:$0xf0] }
 0x5dc   : > { %v10912_v53 = vor.u32 %v12501_v39, %v10911_v35 }
 0x5dd   : > { %16376 = vst [vmem:[#allocation104_spill] sm:$0xff] %v13981_v56  ;;  %v3224_v60 = vpop.f32.mrf.mxu0  ;;  %v10921_v56 = vld [vmem:[%s12983_s9 + $0x598] sm:$0xf0] }
 0x5de   : > { %v3953_v1 = vpop.f32.mrf.mxu1 }
 0x5df   : > { %v3954_v61 = vadd.f32 %v3953_v1, %v3224_v60 }
 0x5e0   : > { %3263 = vmatmul.bf16.gmra.mxu0 %v10904_v17  ;;  %v10916_v17 = vor.u32 %v12500_v10, %v10913_v52 }
 0x5e1   : > { %3992 = vmatmul.bf16.gmra.mxu1 %v10908_v16  ;;  %v4436_v49 = vpack.c.bf16 %v3954_v61, %v3954_v61 }
 0x5e3   : > { %v13989_v19 = vunpack.c.l.b16 %v4436_v49 }
 0x5e5   : > { %v3226_v2 = vpop.f32.mrf.mxu0  ;;  %16377 = vst [vmem:[#allocation105_spill] sm:$0xff] %v13989_v19 }
 0x5e6   : > { %v3955_v3 = vpop.f32.mrf.mxu1 }
 0x5e7   : > { %v3956_v22 = vadd.f32 %v3955_v3, %v3226_v2 }
 0x5e9   : > { %v4437_v40 = vpack.c.bf16 %v3956_v22, %v3956_v22 }
 0x5eb   : > { %v13991_v30 = vunpack.c.l.b16 %v4437_v40  ;;  %v12503_v40 = vld [vmem:[%s12983_s9 + $0x594] sm:$0xf0] }
 0x5ec   : > { %v10920_v10 = vor.u32 %v12503_v40, %v10919_v25  ;;  %v12505_v25 = vld [vmem:[%s12983_s9 + $0x5a4] sm:$0xf0]  ;;  %v10929_v40 = vld [vmem:[%s12983_s9 + $0x5a8] sm:$0xf0] }
 0x5ed   : > { %16378 = vst [vmem:[#allocation106_spill] sm:$0xff] %v13991_v30  ;;  %v3229_v9 = vpop.f32.mrf.mxu0 }
 0x5ee   : > { %v3958_v16 = vpop.f32.mrf.mxu1 }
 0x5ef   : > { %v3959_v1 = vadd.f32 %v3958_v16, %v3229_v9 }
 0x5f0   : > { %3268 = vmatmul.bf16.gmra.mxu0 %v10912_v53  ;;  %v10924_v53 = vor.u32 %v12502_v32, %v10921_v56 }
 0x5f1   : > { %3997 = vmatmul.bf16.gmra.mxu1 %v10916_v17  ;;  %v4438_v3 = vpack.c.bf16 %v3959_v1, %v3959_v1 }
 0x5f3   : > { %v5126_v35 = vunpack.c.l.b16 %v4438_v3 }
 0x5f5   : > { %v3231_v61 = vpop.f32.mrf.mxu0 }
 0x5f6   : > { %v3960_v2 = vpop.f32.mrf.mxu1 }
 0x5f7   : > { %v3961_v49 = vadd.f32 %v3960_v2, %v3231_v61 }
 0x5f9   : > { %v4439_v22 = vpack.c.bf16 %v3961_v49, %v3961_v49  ;;  %v10927_v49 = vld [vmem:[%s12983_s9 + $0x5a0] sm:$0xf] }
 0x5fa   : > { %v10928_v32 = vor.u32 %v12505_v25, %v10927_v49  ;;  %v10937_v49 = vld [vmem:[%s12983_s9 + $0x5b8] sm:$0xf0] }
 0x5fb   : > { %v5127_v39 = vunpack.c.l.b16 %v4439_v22  ;;  %v12504_v22 = vld [vmem:[%s12983_s9 + $0x5a4] sm:$0xf] }
 0x5fd   : > { %v3234_v52 = vpop.f32.mrf.mxu0  ;;  %v5158_v60 = vpack.c.b16 %v5127_v39, %v5126_v35  ;;  %v10932_v39 = vor.u32 %v12504_v22, %v10929_v40 }
 0x5fe   : > { %v3963_v9 = vpop.f32.mrf.mxu1 }
 0x5ff   : > { %5174 = vrot.lane.b32.xlu2 %v5158_v60, %s12957_s1  ;;  %v3964_v17 = vadd.f32 %v3963_v9, %v3234_v52 }
 0x600   : > { %3273 = vmatmul.bf16.gmra.mxu0 %v10920_v10 }
 0x601   : > { %4002 = vmatmul.bf16.gmra.mxu1 %v10924_v53  ;;  %v4440_v61 = vpack.c.bf16 %v3964_v17, %v3964_v17 }
 0x603   : > { %v5128_v19 = vunpack.c.l.b16 %v4440_v61  ;;  %v10935_v61 = vld [vmem:[%s12983_s9 + $0x5b0] sm:$0xf] }
 0x605   : > { %v3236_v16 = vpop.f32.mrf.mxu0 }
 0x606   : > { %v3965_v1 = vpop.f32.mrf.mxu1 }
 0x607   : > { %v3966_v2 = vadd.f32 %v3965_v1, %v3236_v16 }
 0x609   : > { %v4441_v3 = vpack.c.bf16 %v3966_v2, %v3966_v2  ;;  %v12507_v2 = vld [vmem:[%s12983_s9 + $0x5b4] sm:$0xf0] }
 0x60b   : > { %v5129_v35 = vunpack.c.l.b16 %v4441_v3  ;;  %v12506_v3 = vld [vmem:[%s12983_s9 + $0x5b4] sm:$0xf] }
 0x60d   : > { %v3239_v56 = vpop.f32.mrf.mxu0  ;;  %v5159_v60 = vpack.c.b16 %v5129_v35, %v5128_v19  ;;  %v10936_v19 = vor.u32 %v12507_v2, %v10935_v61  ;;  %v10940_v35 = vor.u32 %v12506_v3, %v10937_v49 }
 0x60e   : > { %v3968_v10 = vpop.f32.mrf.mxu1 }
 0x60f   : > { %5176 = vrot.lane.b32.xlu0 %v5159_v60, %s12957_s1  ;;  %v3969_v52 = vadd.f32 %v3968_v10, %v3239_v56 }
 0x610   : > { %3278 = vmatmul.bf16.gmra.mxu0 %v10928_v32 }
 0x611   : > { %4007 = vmatmul.bf16.gmra.mxu1 %v10932_v39  ;;  %v4442_v17 = vpack.c.bf16 %v3969_v52, %v3969_v52 }
 0x613   : > { %v5130_v25 = vunpack.c.l.b16 %v4442_v17  ;;  %v12509_v17 = vld [vmem:[%s12983_s9 + $0x5c4] sm:$0xf0] }
 0x615   : > { %v3241_v53 = vpop.f32.mrf.mxu0 }
 0x616   : > { %v3970_v9 = vpop.f32.mrf.mxu1 }
 0x617   : > { %v3971_v16 = vadd.f32 %v3970_v9, %v3241_v53  ;;  %v10943_v9 = vld [vmem:[%s12983_s9 + $0x5c0] sm:$0xf] }
 0x619   : > { %v4443_v1 = vpack.c.bf16 %v3971_v16, %v3971_v16  ;;  %v12508_v16 = vld [vmem:[%s12983_s9 + $0x5c4] sm:$0xf] }
 0x61b   : > { %v5131_v30 = vunpack.c.l.b16 %v4443_v1  ;;  %v10945_v1 = vld [vmem:[%s12983_s9 + $0x5c8] sm:$0xf0] }
 0x61d   : > { %v3244_v22 = vpop.f32.mrf.mxu0  ;;  %v5160_v40 = vpack.c.b16 %v5131_v30, %v5130_v25  ;;  %v10944_v30 = vor.u32 %v12509_v17, %v10943_v9  ;;  %v10948_v25 = vor.u32 %v12508_v16, %v10945_v1 }
 0x61e   : > { %v3973_v32 = vpop.f32.mrf.mxu1 }
 0x61f   : > { %5178 = vrot.lane.b32.xlu2 %v5160_v40, %s12957_s1  ;;  %v3974_v56 = vadd.f32 %v3973_v32, %v3244_v22 }
 0x620   : > { %3283 = vmatmul.bf16.gmra.mxu0 %v10936_v19 }
 0x621   : > { %4012 = vmatmul.bf16.gmra.mxu1 %v10940_v35  ;;  %v4444_v10 = vpack.c.bf16 %v3974_v56, %v3974_v56 }
 0x623   : > { %v5132_v61 = vunpack.c.l.b16 %v4444_v10  ;;  %v12511_v10 = vld [vmem:[%s12983_s9 + $0x5d4] sm:$0xf0] }
 0x625   : > { %v3246_v60 = vpop.f32.mrf.mxu0 }
 0x626   : > { %v3975_v39 = vpop.f32.mrf.mxu1 }
 0x627   : > { %v3976_v52 = vadd.f32 %v3975_v39, %v3246_v60  ;;  %v10951_v39 = vld [vmem:[%s12983_s9 + $0x5d0] sm:$0xf] }
 0x628   : > { %v10952_v16 = vor.u32 %v12511_v10, %v10951_v39 }
 0x629   : > { %v4445_v53 = vpack.c.bf16 %v3976_v52, %v3976_v52  ;;  %v12510_v52 = vld [vmem:[%s12983_s9 + $0x5d4] sm:$0xf] }
 0x62b   : > { %v5133_v2 = vunpack.c.l.b16 %v4445_v53  ;;  %v10953_v53 = vld [vmem:[%s12983_s9 + $0x5d8] sm:$0xf0] }
 0x62d   : > { %v3249_v3 = vpop.f32.mrf.mxu0  ;;  %v5161_v49 = vpack.c.b16 %v5133_v2, %v5132_v61  ;;  %v10956_v2 = vor.u32 %v12510_v52, %v10953_v53 }
 0x62e   : > { %v3978_v19 = vpop.f32.mrf.mxu1 }
 0x62f   : > { %5180 = vrot.lane.b32.xlu1 %v5161_v49, %s12957_s1  ;;  %v3979_v22 = vadd.f32 %v3978_v19, %v3249_v3 }
 0x630   : > { %3288 = vmatmul.bf16.gmra.mxu0 %v10944_v30 }
 0x631   : > { %4017 = vmatmul.bf16.gmra.mxu1 %v10948_v25  ;;  %v4446_v32 = vpack.c.bf16 %v3979_v22, %v3979_v22 }
 0x633   : > { %v5134_v9 = vunpack.c.l.b16 %v4446_v32  ;;  %v12513_v32 = vld [vmem:[%s12983_s9 + $0x5e4] sm:$0xf0] }
 0x635   : > { %v3251_v40 = vpop.f32.mrf.mxu0 }
 0x636   : > { %v3980_v35 = vpop.f32.mrf.mxu1 }
 0x637   : > { %v3981_v56 = vadd.f32 %v3980_v35, %v3251_v40  ;;  %v10959_v35 = vld [vmem:[%s12983_s9 + $0x5e0] sm:$0xf] }
 0x638   : > { %v10960_v52 = vor.u32 %v12513_v32, %v10959_v35 }
 0x639   : > { %v4447_v60 = vpack.c.bf16 %v3981_v56, %v3981_v56  ;;  %v12512_v56 = vld [vmem:[%s12983_s9 + $0x5e4] sm:$0xf] }
 0x63b   : > { %v5135_v17 = vunpack.c.l.b16 %v4447_v60  ;;  %v10961_v60 = vld [vmem:[%s12983_s9 + $0x5e8] sm:$0xf0] }
 0x63d   : > { %v3254_v1 = vpop.f32.mrf.mxu0  ;;  %v5162_v61 = vpack.c.b16 %v5135_v17, %v5134_v9  ;;  %v10964_v9 = vor.u32 %v12512_v56, %v10961_v60  ;;  %v10975_v17 = vld [vmem:[%s12983_s9 + $0x600] sm:$0xf] }
 0x63e   : > { %v3983_v30 = vpop.f32.mrf.mxu1 }
 0x63f   : > { %v3984_v3 = vadd.f32 %v3983_v30, %v3254_v1  ;;  %5182 = vrot.lane.b32.xlu0 %v5162_v61, %s12957_s1 }
 0x640   : > { %3293 = vmatmul.bf16.gmra.mxu0 %v10952_v16 }
 0x641   : > { %4022 = vmatmul.bf16.gmra.mxu1 %v10956_v2  ;;  %v4448_v19 = vpack.c.bf16 %v3984_v3, %v3984_v3 }
 0x643   : > { %v14024_v39 = vunpack.c.l.b16 %v4448_v19  ;;  %v12515_v19 = vld [vmem:[%s12983_s9 + $0x5f4] sm:$0xf0] }
 0x645   : > { %v3256_v49 = vpop.f32.mrf.mxu0 }
 0x646   : > { %v3985_v25 = vpop.f32.mrf.mxu1 }
 0x647   : > { %v3986_v22 = vadd.f32 %v3985_v25, %v3256_v49  ;;  %v10967_v25 = vld [vmem:[%s12983_s9 + $0x5f0] sm:$0xf] }
 0x648   : > { %v10968_v56 = vor.u32 %v12515_v19, %v10967_v25 }
 0x649   : > { %v4449_v40 = vpack.c.bf16 %v3986_v22, %v3986_v22  ;;  %v12514_v22 = vld [vmem:[%s12983_s9 + $0x5f4] sm:$0xf] }
 0x64b   : > { %v14026_v10 = vunpack.c.l.b16 %v4449_v40  ;;  %v10969_v40 = vld [vmem:[%s12983_s9 + $0x5f8] sm:$0xf0] }
 0x64d   : > { %v3259_v53 = vpop.f32.mrf.mxu0 }
 0x64e   : > { %v3988_v16 = vpop.f32.mrf.mxu1 }
 0x64f   : > { %v3989_v1 = vadd.f32 %v3988_v16, %v3259_v53  ;;  %v10983_v53 = vld [vmem:[%s12983_s9 + $0x610] sm:$0xf] }
 0x650   : > { %3298 = vmatmul.bf16.gmra.mxu0 %v10960_v52  ;;  %v10972_v52 = vor.u32 %v12514_v22, %v10969_v40 }
 0x651   : > { %4027 = vmatmul.bf16.gmra.mxu1 %v10964_v9  ;;  %v4450_v30 = vpack.c.bf16 %v3989_v1, %v3989_v1 }
 0x653   : > { %v14034_v35 = vunpack.c.l.b16 %v4450_v30 }
 0x655   : > { %v3261_v61 = vpop.f32.mrf.mxu0 }
 0x656   : > { %v3990_v2 = vpop.f32.mrf.mxu1 }
 0x657   : > { %v3991_v3 = vadd.f32 %v3990_v2, %v3261_v61 }
 0x659   : > { %v4451_v49 = vpack.c.bf16 %v3991_v3, %v3991_v3 }
 0x65b   : > { %v14036_v32 = vunpack.c.l.b16 %v4451_v49  ;;  %v12517_v49 = vld [vmem:[%s12983_s9 + $0x604] sm:$0xf0] }
 0x65c   : > { %v10976_v22 = vor.u32 %v12517_v49, %v10975_v17 }
 0x65d   : > { %v3264_v60 = vpop.f32.mrf.mxu0 }
 0x65e   : > { %v3993_v9 = vpop.f32.mrf.mxu1 }
 0x65f   : > { %v3994_v16 = vadd.f32 %v3993_v9, %v3264_v60  ;;  %v10991_v60 = vld [vmem:[%s12983_s9 + $0x620] sm:$0xf] }
 0x660   : > { %3303 = vmatmul.bf16.gmra.mxu0 %v10968_v56  ;;  %v10980_v56 = vor.u32 %v12516_v54, %v10977_v50 }
 0x661   : > { %4032 = vmatmul.bf16.gmra.mxu1 %v10972_v52  ;;  %v4452_v2 = vpack.c.bf16 %v3994_v16, %v3994_v16 }
 0x663   : > { %v14044_v25 = vunpack.c.l.b16 %v4452_v2 }
 0x665   : > { %v3266_v1 = vpop.f32.mrf.mxu0 }
 0x666   : > { %v3995_v61 = vpop.f32.mrf.mxu1 }
 0x667   : > { %v3996_v30 = vadd.f32 %v3995_v61, %v3266_v1 }
 0x669   : > { %v4453_v3 = vpack.c.bf16 %v3996_v30, %v3996_v30 }
 0x66b   : > { %v14046_v19 = vunpack.c.l.b16 %v4453_v3  ;;  %v12519_v3 = vld [vmem:[%s12983_s9 + $0x614] sm:$0xf0] }
 0x66c   : > { %v10984_v50 = vor.u32 %v12519_v3, %v10983_v53 }
 0x66d   : > { %v3269_v40 = vpop.f32.mrf.mxu0 }
 0x66e   : > { %v3998_v52 = vpop.f32.mrf.mxu1 }
 0x66f   : > { %v3999_v9 = vadd.f32 %v3998_v52, %v3269_v40  ;;  %v10999_v40 = vld [vmem:[%s12983_s9 + $0x630] sm:$0xf] }
 0x670   : > { %3308 = vmatmul.bf16.gmra.mxu0 %v10976_v22  ;;  %v10988_v22 = vor.u32 %v12518_v15, %v10985_v59 }
 0x671   : > { %4037 = vmatmul.bf16.gmra.mxu1 %v10980_v56  ;;  %v4454_v61 = vpack.c.bf16 %v3999_v9, %v3999_v9 }
 0x673   : > { %v14054_v17 = vunpack.c.l.b16 %v4454_v61 }
 0x675   : > { %v3271_v16 = vpop.f32.mrf.mxu0 }
 0x676   : > { %v4000_v1 = vpop.f32.mrf.mxu1 }
 0x677   : > { %v4001_v2 = vadd.f32 %v4000_v1, %v3271_v16 }
 0x679   : > { %v4455_v30 = vpack.c.bf16 %v4001_v2, %v4001_v2 }
 0x67b   : > { %v14056_v54 = vunpack.c.l.b16 %v4455_v30  ;;  %v12521_v30 = vld [vmem:[%s12983_s9 + $0x624] sm:$0xf0] }
 0x67c   : > { %v10992_v59 = vor.u32 %v12521_v30, %v10991_v60 }
 0x67d   : > { %v3274_v49 = vpop.f32.mrf.mxu0 }
 0x67e   : > { %v4003_v56 = vpop.f32.mrf.mxu1 }
 0x67f   : > { %v4004_v52 = vadd.f32 %v4003_v56, %v3274_v49  ;;  %v11007_v49 = vld [vmem:[%s12983_s9 + $0x640] sm:$0xf] }
 0x680   : > { %3313 = vmatmul.bf16.gmra.mxu0 %v10984_v50  ;;  %v10996_v50 = vor.u32 %v12520_v63, %v10993_v57 }
 0x681   : > { %4042 = vmatmul.bf16.gmra.mxu1 %v10988_v22  ;;  %v4456_v1 = vpack.c.bf16 %v4004_v52, %v4004_v52 }
 0x683   : > { %v14064_v53 = vunpack.c.l.b16 %v4456_v1 }
 0x685   : > { %v3276_v9 = vpop.f32.mrf.mxu0  ;;  %16379 = vst [vmem:[#allocation107_spill] sm:$0xff] %v14064_v53  ;;  %v12524_v53 = vld [vmem:[%s12983_s9 + $0x644] sm:$0xf] }
 0x686   : > { %v4005_v16 = vpop.f32.mrf.mxu1 }
 0x687   : > { %v4006_v61 = vadd.f32 %v4005_v16, %v3276_v9 }
 0x689   : > { %v4457_v2 = vpack.c.bf16 %v4006_v61, %v4006_v61 }
 0x68b   : > { %v14066_v15 = vunpack.c.l.b16 %v4457_v2  ;;  %v12523_v2 = vld [vmem:[%s12983_s9 + $0x634] sm:$0xf0] }
 0x68c   : > { %v11000_v63 = vor.u32 %v12523_v2, %v10999_v40 }
 0x68d   : > { %16380 = vst [vmem:[#allocation108_spill] sm:$0xff] %v14066_v15  ;;  %v3279_v3 = vpop.f32.mrf.mxu0  ;;  %v11009_v15 = vld [vmem:[%s12983_s9 + $0x648] sm:$0xf0] }
 0x68e   : > { %v4008_v22 = vpop.f32.mrf.mxu1 }
 0x68f   : > { %v4009_v56 = vadd.f32 %v4008_v22, %v3279_v3  ;;  %v11015_v3 = vld [vmem:[%s12983_s9 + $0x650] sm:$0xf] }
 0x690   : > { %3318 = vmatmul.bf16.gmra.mxu0 %v10992_v59  ;;  %v11004_v59 = vor.u32 %v12522_v58, %v11001_v36 }
 0x691   : > { %4047 = vmatmul.bf16.gmra.mxu1 %v10996_v50  ;;  %v4458_v16 = vpack.c.bf16 %v4009_v56, %v4009_v56 }
 0x693   : > { %v14074_v60 = vunpack.c.l.b16 %v4458_v16 }
 0x695   : > { %v3281_v52 = vpop.f32.mrf.mxu0  ;;  %16381 = vst [vmem:[#allocation109_spill] sm:$0xff] %v14074_v60  ;;  %v12526_v60 = vld [vmem:[%s12983_s9 + $0x654] sm:$0xf] }
 0x696   : > { %v4010_v9 = vpop.f32.mrf.mxu1 }
 0x697   : > { %v4011_v1 = vadd.f32 %v4010_v9, %v3281_v52 }
 0x699   : > { %v4459_v61 = vpack.c.bf16 %v4011_v1, %v4011_v1 }
 0x69b   : > { %v14076_v57 = vunpack.c.l.b16 %v4459_v61  ;;  %v12525_v61 = vld [vmem:[%s12983_s9 + $0x644] sm:$0xf0] }
 0x69c   : > { %v11008_v36 = vor.u32 %v12525_v61, %v11007_v49 }
 0x69d   : > { %16382 = vst [vmem:[#allocation110_spill] sm:$0xff] %v14076_v57  ;;  %v3284_v30 = vpop.f32.mrf.mxu0  ;;  %v11017_v57 = vld [vmem:[%s12983_s9 + $0x658] sm:$0xf0] }
 0x69e   : > { %v4013_v50 = vpop.f32.mrf.mxu1 }
 0x69f   : > { %v4014_v22 = vadd.f32 %v4013_v50, %v3284_v30  ;;  %v11023_v30 = vld [vmem:[%s12983_s9 + $0x660] sm:$0xf] }
 0x6a0   : > { %3323 = vmatmul.bf16.gmra.mxu0 %v11000_v63  ;;  %v11012_v63 = vor.u32 %v12524_v53, %v11009_v15 }
 0x6a1   : > { %4052 = vmatmul.bf16.gmra.mxu1 %v11004_v59  ;;  %v4460_v9 = vpack.c.bf16 %v4014_v22, %v4014_v22 }
 0x6a3   : > { %v14084_v40 = vunpack.c.l.b16 %v4460_v9 }
 0x6a5   : > { %v3286_v56 = vpop.f32.mrf.mxu0  ;;  %16383 = vst [vmem:[#allocation111_spill] sm:$0xff] %v14084_v40  ;;  %v12528_v40 = vld [vmem:[%s12983_s9 + $0x664] sm:$0xf] }
 0x6a6   : > { %v4015_v52 = vpop.f32.mrf.mxu1 }
 0x6a7   : > { %v4016_v16 = vadd.f32 %v4015_v52, %v3286_v56 }
 0x6a9   : > { %v4461_v1 = vpack.c.bf16 %v4016_v16, %v4016_v16 }
 0x6ab   : > { %v14086_v58 = vunpack.c.l.b16 %v4461_v1  ;;  %v12527_v1 = vld [vmem:[%s12983_s9 + $0x654] sm:$0xf0] }
 0x6ac   : > { %v11016_v15 = vor.u32 %v12527_v1, %v11015_v3 }
 0x6ad   : > { %16384 = vst [vmem:[#allocation112_spill] sm:$0xff] %v14086_v58  ;;  %v3289_v2 = vpop.f32.mrf.mxu0  ;;  %v11025_v58 = vld [vmem:[%s12983_s9 + $0x668] sm:$0xf0] }
 0x6ae   : > { %v4018_v59 = vpop.f32.mrf.mxu1 }
 0x6af   : > { %v4019_v50 = vadd.f32 %v4018_v59, %v3289_v2  ;;  %v11031_v2 = vld [vmem:[%s12983_s9 + $0x670] sm:$0xf] }
 0x6b0   : > { %3328 = vmatmul.bf16.gmra.mxu0 %v11008_v36  ;;  %v11020_v36 = vor.u32 %v12526_v60, %v11017_v57 }
 0x6b1   : > { %4057 = vmatmul.bf16.gmra.mxu1 %v11012_v63  ;;  %v4462_v52 = vpack.c.bf16 %v4019_v50, %v4019_v50 }
 0x6b3   : > { %v14094_v49 = vunpack.c.l.b16 %v4462_v52 }
 0x6b5   : > { %v3291_v22 = vpop.f32.mrf.mxu0  ;;  %16385 = vst [vmem:[#allocation113_spill] sm:$0xff] %v14094_v49  ;;  %v12530_v49 = vld [vmem:[%s12983_s9 + $0x674] sm:$0xf] }
 0x6b6   : > { %v4020_v56 = vpop.f32.mrf.mxu1 }
 0x6b7   : > { %v4021_v9 = vadd.f32 %v4020_v56, %v3291_v22 }
 0x6b9   : > { %v4463_v16 = vpack.c.bf16 %v4021_v9, %v4021_v9 }
 0x6bb   : > { %v14096_v53 = vunpack.c.l.b16 %v4463_v16  ;;  %v12529_v16 = vld [vmem:[%s12983_s9 + $0x664] sm:$0xf0] }
 0x6bc   : > { %v11024_v57 = vor.u32 %v12529_v16, %v11023_v30 }
 0x6bd   : > { %16386 = vst [vmem:[#allocation114_spill] sm:$0xff] %v14096_v53  ;;  %v3294_v61 = vpop.f32.mrf.mxu0  ;;  %v11033_v53 = vld [vmem:[%s12983_s9 + $0x678] sm:$0xf0] }
 0x6be   : > { %v4023_v63 = vpop.f32.mrf.mxu1 }
 0x6bf   : > { %v4024_v59 = vadd.f32 %v4023_v63, %v3294_v61  ;;  %v11039_v61 = vld [vmem:[%s12983_s9 + $0x680] sm:$0xf] }
 0x6c0   : > { %3333 = vmatmul.bf16.gmra.mxu0 %v11016_v15  ;;  %v11028_v15 = vor.u32 %v12528_v40, %v11025_v58 }
 0x6c1   : > { %4062 = vmatmul.bf16.gmra.mxu1 %v11020_v36  ;;  %v4464_v56 = vpack.c.bf16 %v4024_v59, %v4024_v59 }
 0x6c3   : > { %v14104_v3 = vunpack.c.l.b16 %v4464_v56 }
 0x6c5   : > { %v3296_v50 = vpop.f32.mrf.mxu0  ;;  %16387 = vst [vmem:[#allocation115_spill] sm:$0xff] %v14104_v3  ;;  %v12532_v3 = vld [vmem:[%s12983_s9 + $0x684] sm:$0xf] }
 0x6c6   : > { %v4025_v22 = vpop.f32.mrf.mxu1 }
 0x6c7   : > { %v4026_v52 = vadd.f32 %v4025_v22, %v3296_v50 }
 0x6c9   : > { %v4465_v9 = vpack.c.bf16 %v4026_v52, %v4026_v52 }
 0x6cb   : > { %v14106_v60 = vunpack.c.l.b16 %v4465_v9  ;;  %v12531_v9 = vld [vmem:[%s12983_s9 + $0x674] sm:$0xf0] }
 0x6cc   : > { %v11032_v58 = vor.u32 %v12531_v9, %v11031_v2 }
 0x6cd   : > { %16388 = vst [vmem:[#allocation116_spill] sm:$0xff] %v14106_v60  ;;  %v3299_v1 = vpop.f32.mrf.mxu0  ;;  %v11041_v60 = vld [vmem:[%s12983_s9 + $0x688] sm:$0xf0] }
 0x6ce   : > { %v4028_v36 = vpop.f32.mrf.mxu1 }
 0x6cf   : > { %v4029_v63 = vadd.f32 %v4028_v36, %v3299_v1  ;;  %v11047_v1 = vld [vmem:[%s12983_s9 + $0x690] sm:$0xf] }
 0x6d0   : > { %3338 = vmatmul.bf16.gmra.mxu0 %v11024_v57  ;;  %v11036_v57 = vor.u32 %v12530_v49, %v11033_v53 }
 0x6d1   : > { %4067 = vmatmul.bf16.gmra.mxu1 %v11028_v15  ;;  %v4466_v22 = vpack.c.bf16 %v4029_v63, %v4029_v63 }
 0x6d3   : > { %v14114_v30 = vunpack.c.l.b16 %v4466_v22 }
 0x6d5   : > { %v3301_v59 = vpop.f32.mrf.mxu0  ;;  %16389 = vst [vmem:[#allocation117_spill] sm:$0xff] %v14114_v30  ;;  %v12534_v30 = vld [vmem:[%s12983_s9 + $0x694] sm:$0xf] }
 0x6d6   : > { %v4030_v50 = vpop.f32.mrf.mxu1 }
 0x6d7   : > { %v4031_v56 = vadd.f32 %v4030_v50, %v3301_v59 }
 0x6d9   : > { %v4467_v52 = vpack.c.bf16 %v4031_v56, %v4031_v56 }
 0x6db   : > { %v14116_v40 = vunpack.c.l.b16 %v4467_v52  ;;  %v12533_v52 = vld [vmem:[%s12983_s9 + $0x684] sm:$0xf0] }
 0x6dc   : > { %v11040_v53 = vor.u32 %v12533_v52, %v11039_v61 }
 0x6dd   : > { %16390 = vst [vmem:[#allocation118_spill] sm:$0xff] %v14116_v40  ;;  %v3304_v16 = vpop.f32.mrf.mxu0  ;;  %v11049_v40 = vld [vmem:[%s12983_s9 + $0x698] sm:$0xf0] }
 0x6de   : > { %v4033_v15 = vpop.f32.mrf.mxu1 }
 0x6df   : > { %v4034_v36 = vadd.f32 %v4033_v15, %v3304_v16 }
 0x6e0   : > { %3343 = vmatmul.bf16.gmra.mxu0 %v11032_v58  ;;  %v11044_v58 = vor.u32 %v12532_v3, %v11041_v60 }
 0x6e1   : > { %4072 = vmatmul.bf16.gmra.mxu1 %v11036_v57  ;;  %v4468_v50 = vpack.c.bf16 %v4034_v36, %v4034_v36 }
 0x6e3   : > { %v14124_v2 = vunpack.c.l.b16 %v4468_v50 }
 0x6e5   : > { %v3306_v63 = vpop.f32.mrf.mxu0  ;;  %16391 = vst [vmem:[#allocation119_spill] sm:$0xff] %v14124_v2 }
 0x6e6   : > { %v4035_v59 = vpop.f32.mrf.mxu1 }
 0x6e7   : > { %v4036_v22 = vadd.f32 %v4035_v59, %v3306_v63 }
 0x6e9   : > { %v4469_v56 = vpack.c.bf16 %v4036_v22, %v4036_v22 }
 0x6eb   : > { %v14126_v49 = vunpack.c.l.b16 %v4469_v56  ;;  %v12535_v56 = vld [vmem:[%s12983_s9 + $0x694] sm:$0xf0] }
 0x6ec   : > { %v11048_v3 = vor.u32 %v12535_v56, %v11047_v1  ;;  %v12537_v1 = vld [vmem:[%s12983_s9 + $0x6a4] sm:$0xf0]  ;;  %v11057_v56 = vld [vmem:[%s12983_s9 + $0x6a8] sm:$0xf0] }
 0x6ed   : > { %16392 = vst [vmem:[#allocation120_spill] sm:$0xff] %v14126_v49  ;;  %v3309_v9 = vpop.f32.mrf.mxu0 }
 0x6ee   : > { %v4038_v57 = vpop.f32.mrf.mxu1 }
 0x6ef   : > { %v4039_v15 = vadd.f32 %v4038_v57, %v3309_v9 }
 0x6f0   : > { %3348 = vmatmul.bf16.gmra.mxu0 %v11040_v53  ;;  %v11052_v53 = vor.u32 %v12534_v30, %v11049_v40 }
 0x6f1   : > { %4077 = vmatmul.bf16.gmra.mxu1 %v11044_v58  ;;  %v4470_v59 = vpack.c.bf16 %v4039_v15, %v4039_v15 }
 0x6f3   : > { %v5238_v61 = vunpack.c.l.b16 %v4470_v59 }
 0x6f5   : > { %v3311_v36 = vpop.f32.mrf.mxu0 }
 0x6f6   : > { %v4040_v63 = vpop.f32.mrf.mxu1 }
 0x6f7   : > { %v4041_v50 = vadd.f32 %v4040_v63, %v3311_v36 }
 0x6f9   : > { %v4471_v22 = vpack.c.bf16 %v4041_v50, %v4041_v50  ;;  %v11055_v50 = vld [vmem:[%s12983_s9 + $0x6a0] sm:$0xf] }
 0x6fa   : > { %v11056_v30 = vor.u32 %v12537_v1, %v11055_v50  ;;  %v11065_v50 = vld [vmem:[%s12983_s9 + $0x6b8] sm:$0xf0] }
 0x6fb   : > { %v5239_v52 = vunpack.c.l.b16 %v4471_v22  ;;  %v12536_v22 = vld [vmem:[%s12983_s9 + $0x6a4] sm:$0xf] }
 0x6fd   : > { %v3314_v60 = vpop.f32.mrf.mxu0  ;;  %v5270_v16 = vpack.c.b16 %v5239_v52, %v5238_v61  ;;  %v11060_v52 = vor.u32 %v12536_v22, %v11057_v56 }
 0x6fe   : > { %v4043_v9 = vpop.f32.mrf.mxu1 }
 0x6ff   : > { %5286 = vrot.lane.b32.xlu2 %v5270_v16, %s12958_s2  ;;  %v4044_v58 = vadd.f32 %v4043_v9, %v3314_v60 }
 0x700   : > { %3353 = vmatmul.bf16.gmra.mxu0 %v11048_v3 }
 0x701   : > { %4082 = vmatmul.bf16.gmra.mxu1 %v11052_v53  ;;  %v4472_v36 = vpack.c.bf16 %v4044_v58, %v4044_v58 }
 0x703   : > { %v5240_v2 = vunpack.c.l.b16 %v4472_v36  ;;  %v11063_v36 = vld [vmem:[%s12983_s9 + $0x6b0] sm:$0xf] }
 0x705   : > { %v3316_v57 = vpop.f32.mrf.mxu0 }
 0x706   : > { %v4045_v15 = vpop.f32.mrf.mxu1 }
 0x707   : > { %v4046_v63 = vadd.f32 %v4045_v15, %v3316_v57 }
 0x709   : > { %v4473_v59 = vpack.c.bf16 %v4046_v63, %v4046_v63  ;;  %v12539_v63 = vld [vmem:[%s12983_s9 + $0x6b4] sm:$0xf0] }
 0x70b   : > { %v5241_v61 = vunpack.c.l.b16 %v4473_v59  ;;  %v12538_v59 = vld [vmem:[%s12983_s9 + $0x6b4] sm:$0xf] }
 0x70d   : > { %v3319_v40 = vpop.f32.mrf.mxu0  ;;  %v5271_v16 = vpack.c.b16 %v5241_v61, %v5240_v2  ;;  %v11064_v2 = vor.u32 %v12539_v63, %v11063_v36  ;;  %v11068_v61 = vor.u32 %v12538_v59, %v11065_v50 }
 0x70e   : > { %v4048_v3 = vpop.f32.mrf.mxu1 }
 0x70f   : > { %5288 = vrot.lane.b32.xlu1 %v5271_v16, %s12958_s2  ;;  %v4049_v60 = vadd.f32 %v4048_v3, %v3319_v40 }
 0x710   : > { %3358 = vmatmul.bf16.gmra.mxu0 %v11056_v30 }
 0x711   : > { %4087 = vmatmul.bf16.gmra.mxu1 %v11060_v52  ;;  %v4474_v58 = vpack.c.bf16 %v4049_v60, %v4049_v60 }
 0x713   : > { %v5242_v1 = vunpack.c.l.b16 %v4474_v58  ;;  %v12541_v58 = vld [vmem:[%s12983_s9 + $0x6c4] sm:$0xf0] }
 0x715   : > { %v3321_v53 = vpop.f32.mrf.mxu0 }
 0x716   : > { %v4050_v9 = vpop.f32.mrf.mxu1 }
 0x717   : > { %v4051_v57 = vadd.f32 %v4050_v9, %v3321_v53  ;;  %v11071_v9 = vld [vmem:[%s12983_s9 + $0x6c0] sm:$0xf] }
 0x719   : > { %v4475_v15 = vpack.c.bf16 %v4051_v57, %v4051_v57  ;;  %v12540_v57 = vld [vmem:[%s12983_s9 + $0x6c4] sm:$0xf] }
 0x71b   : > { %v5243_v49 = vunpack.c.l.b16 %v4475_v15  ;;  %v11073_v15 = vld [vmem:[%s12983_s9 + $0x6c8] sm:$0xf0] }
 0x71d   : > { %v3324_v22 = vpop.f32.mrf.mxu0  ;;  %v5272_v56 = vpack.c.b16 %v5243_v49, %v5242_v1  ;;  %v11072_v49 = vor.u32 %v12541_v58, %v11071_v9  ;;  %v11076_v1 = vor.u32 %v12540_v57, %v11073_v15  ;;  %v11081_v9 = vld [vmem:[%s12983_s9 + $0x6d8] sm:$0xf0] }
 0x71e   : > { %v4053_v30 = vpop.f32.mrf.mxu1 }
 0x71f   : > { %5290 = vrot.lane.b32.xlu0 %v5272_v56, %s12958_s2  ;;  %v4054_v40 = vadd.f32 %v4053_v30, %v3324_v22 }
 0x720   : > { %3363 = vmatmul.bf16.gmra.mxu0 %v11064_v2 }
 0x721   : > { %4092 = vmatmul.bf16.gmra.mxu1 %v11068_v61  ;;  %v4476_v3 = vpack.c.bf16 %v4054_v40, %v4054_v40 }
 0x723   : > { %v5244_v36 = vunpack.c.l.b16 %v4476_v3  ;;  %v11079_v3 = vld [vmem:[%s12983_s9 + $0x6d0] sm:$0xf] }
 0x725   : > { %v3326_v16 = vpop.f32.mrf.mxu0 }
 0x726   : > { %v4055_v52 = vpop.f32.mrf.mxu1 }
 0x727   : > { %v4056_v60 = vadd.f32 %v4055_v52, %v3326_v16  ;;  %v16393_v16 = vpack.c.b16 %v14026_v10, %v14024_v39 }
 0x729   : > { %v4477_v53 = vpack.c.bf16 %v4056_v60, %v4056_v60  ;;  %v12543_v60 = vld [vmem:[%s12983_s9 + $0x6d4] sm:$0xf0] }
 0x72a   : > { %v11080_v15 = vor.u32 %v12543_v60, %v11079_v3 }
 0x72b   : > { %v5245_v63 = vunpack.c.l.b16 %v4477_v53  ;;  %v12542_v53 = vld [vmem:[%s12983_s9 + $0x6d4] sm:$0xf] }
 0x72d   : > { %v3329_v59 = vpop.f32.mrf.mxu0  ;;  %v5273_v50 = vpack.c.b16 %v5245_v63, %v5244_v36 }
 0x72e   : > { %v4058_v2 = vpop.f32.mrf.mxu1 }
 0x72f   : > { %5292 = vrot.lane.b32.xlu2 %v5273_v50, %s12958_s2  ;;  %v4059_v22 = vadd.f32 %v4058_v2, %v3329_v59 }
 0x730   : > { %3368 = vmatmul.bf16.gmra.mxu0 %v11072_v49  ;;  %v11084_v49 = vor.u32 %v12542_v53, %v11081_v9 }
 0x731   : > { %4097 = vmatmul.bf16.gmra.mxu1 %v11076_v1  ;;  %v4478_v30 = vpack.c.bf16 %v4059_v22, %v4059_v22  ;;  %v16394_v22 = vpack.c.b16 %v13891_v34, %v13889_v23  ;;  %v12552_v23 = vld [vmem:[%s12983_s9 + $0x724] sm:$0xf] }
 0x733   : > { %v5246_v58 = vunpack.c.l.b16 %v4478_v30  ;;  %v12545_v30 = vld [vmem:[%s12983_s9 + $0x6e4] sm:$0xf0] }
 0x735   : > { %v3331_v56 = vpop.f32.mrf.mxu0 }
 0x736   : > { %v4060_v61 = vpop.f32.mrf.mxu1 }
 0x737   : > { %v4061_v40 = vadd.f32 %v4060_v61, %v3331_v56  ;;  %5184 = vrot.lane.b32.xlu2 %v16393_v16, %s12957_s1  ;;  %v11087_v61 = vld [vmem:[%s12983_s9 + $0x6e0] sm:$0xf]  ;;  %v11089_v16 = vld [vmem:[%s12983_s9 + $0x6e8] sm:$0xf0] }
 0x738   : > { %v11088_v60 = vor.u32 %v12545_v30, %v11087_v61  ;;  %v12553_v61 = vld [vmem:[%s12983_s9 + $0x724] sm:$0xf0] }
 0x739   : > { %v4479_v52 = vpack.c.bf16 %v4061_v40, %v4061_v40  ;;  %v12544_v40 = vld [vmem:[%s12983_s9 + $0x6e4] sm:$0xf] }
 0x73a   : > { %v11092_v9 = vor.u32 %v12544_v40, %v11089_v16  ;;  %v11271_v16 = vld [vmem:[%s12983_s9 + $0x850] sm:$0xf] }
 0x73b   : > { %v5247_v57 = vunpack.c.l.b16 %v4479_v52 }
 0x73d   : > { %v3334_v36 = vpop.f32.mrf.mxu0  ;;  %v5274_v63 = vpack.c.b16 %v5247_v57, %v5246_v58  ;;  %v16395_v57 = vpack.c.b16 %v13631_v62, %v13629_v37 }
 0x73e   : > { %v4063_v59 = vpop.f32.mrf.mxu1 }
 0x73f   : > { %v4064_v50 = vadd.f32 %v4063_v59, %v3334_v36  ;;  %5294 = vrot.lane.b32.xlu1 %v5274_v63, %s12958_s2 }
 0x740   : > { %3373 = vmatmul.bf16.gmra.mxu0 %v11080_v15 }
 0x741   : > { %4102 = vmatmul.bf16.gmra.mxu1 %v11084_v49  ;;  %v4480_v1 = vpack.c.bf16 %v4064_v50, %v4064_v50  ;;  %v11095_v50 = vld [vmem:[%s12983_s9 + $0x6f0] sm:$0xf] }
 0x743   : > { %v14167_v52 = vunpack.c.l.b16 %v4480_v1  ;;  %v11097_v1 = vld [vmem:[%s12983_s9 + $0x6f8] sm:$0xf0] }
 0x745   : > { %v3336_v39 = vpop.f32.mrf.mxu0 }
 0x746   : > { %v4065_v10 = vpop.f32.mrf.mxu1 }
 0x747   : > { %v4066_v2 = vadd.f32 %v4065_v10, %v3336_v39  ;;  %5072 = vrot.lane.b32.xlu1 %v16394_v22, %s12956_s28  ;;  %v12547_v39 = vld [vmem:[%s12983_s9 + $0x6f4] sm:$0xf0]  ;;  %v12546_v10 = vld [vmem:[%s12983_s9 + $0x6f4] sm:$0xf] }
 0x748   : > { %v11096_v37 = vor.u32 %v12547_v39, %v11095_v50  ;;  %v12549_v50 = vld [vmem:[%s12983_s9 + $0x704] sm:$0xf0]  ;;  %v12548_v39 = vld [vmem:[%s12983_s9 + $0x704] sm:$0xf] }
 0x749   : > { %v4481_v56 = vpack.c.bf16 %v4066_v2, %v4066_v2 }
 0x74b   : > { %v14169_v3 = vunpack.c.l.b16 %v4481_v56  ;;  %v11100_v56 = vor.u32 %v12546_v10, %v11097_v1  ;;  %v11105_v10 = vld [vmem:[%s12983_s9 + $0x708] sm:$0xf0] }
 0x74d   : > { %v3339_v53 = vpop.f32.mrf.mxu0 }
 0x74e   : > { %v4068_v34 = vpop.f32.mrf.mxu1 }
 0x74f   : > { %v4069_v58 = vadd.f32 %v4068_v34, %v3339_v53  ;;  %4850 = vrot.lane.b32.xlu1 %v16395_v57, %s12954_s23  ;;  %v12590_v53 = vld [vmem:[%s12983_s9 + $0x854] sm:$0xf]  ;;  %v11273_v34 = vld [vmem:[%s12983_s9 + $0x858] sm:$0xf0] }
 0x750   : > { %3378 = vmatmul.bf16.gmra.mxu0 %v11088_v60  ;;  %v12591_v60 = vld [vmem:[%s12983_s9 + $0x854] sm:$0xf0] }
 0x751   : > { %4107 = vmatmul.bf16.gmra.mxu1 %v11092_v9  ;;  %v4482_v63 = vpack.c.bf16 %v4069_v58, %v4069_v58  ;;  %v11272_v9 = vor.u32 %v12591_v60, %v11271_v16  ;;  %v11276_v58 = vor.u32 %v12590_v53, %v11273_v34  ;;  %v11279_v53 = vld [vmem:[%s12983_s9 + $0x860] sm:$0xf]  ;;  %v12592_v34 = vld [vmem:[%s12983_s9 + $0x864] sm:$0xf] }
 0x753   : > { %v14181_v2 = vunpack.c.l.b16 %v4482_v63  ;;  %3493 = vmatmul.bf16.gmra.mxu2 %v11272_v9  ;;  %4222 = vmatmul.bf16.gmra.mxu3 %v11276_v58  ;;  %v12593_v9 = vld [vmem:[%s12983_s9 + $0x864] sm:$0xf0] }
 0x754   : > { %v11280_v58 = vor.u32 %v12593_v9, %v11279_v53 }
 0x755   : > { %v3341_v15 = vpop.f32.mrf.mxu0 }
 0x756   : > { %v4070_v36 = vpop.f32.mrf.mxu1 }
 0x757   : > { %v4071_v49 = vadd.f32 %v4070_v36, %v3341_v15 }
 0x759   : > { %v4483_v59 = vpack.c.bf16 %v4071_v49, %v4071_v49 }
 0x75b   : > { %v14183_v22 = vunpack.c.l.b16 %v4483_v59  ;;  %v11103_v59 = vld [vmem:[%s12983_s9 + $0x700] sm:$0xf] }
 0x75d   : > { %v3344_v62 = vpop.f32.mrf.mxu0 }
 0x75e   : > { %v4073_v30 = vpop.f32.mrf.mxu1 }
 0x75f   : > { %v4074_v40 = vadd.f32 %v4073_v30, %v3344_v62  ;;  %v11104_v62 = vor.u32 %v12549_v50, %v11103_v59  ;;  %v11108_v30 = vor.u32 %v12548_v39, %v11105_v10  ;;  %v11111_v39 = vld [vmem:[%s12983_s9 + $0x710] sm:$0xf]  ;;  %v12551_v10 = vld [vmem:[%s12983_s9 + $0x714] sm:$0xf0] }
 0x760   : > { %3383 = vmatmul.bf16.gmra.mxu0 %v11096_v37  ;;  %v11112_v53 = vor.u32 %v12551_v10, %v11111_v39  ;;  %v12594_v39 = vld [vmem:[%s12983_s9 + $0x874] sm:$0xf] }
 0x761   : > { %4112 = vmatmul.bf16.gmra.mxu1 %v11100_v56  ;;  %v4484_v36 = vpack.c.bf16 %v4074_v40, %v4074_v40  ;;  %v11119_v40 = vld [vmem:[%s12983_s9 + $0x720] sm:$0xf] }
 0x763   : > { %v14195_v1 = vunpack.c.l.b16 %v4484_v36  ;;  %3498 = vmatmul.bf16.gmra.mxu2 %v11280_v58 }
 0x765   : > { %v3346_v57 = vpop.f32.mrf.mxu0 }
 0x766   : > { %v4075_v15 = vpop.f32.mrf.mxu1 }
 0x767   : > { %v4076_v63 = vadd.f32 %v4075_v15, %v3346_v57  ;;  %v11281_v57 = vld [vmem:[%s12983_s9 + $0x868] sm:$0xf0] }
 0x768   : > { %v11284_v15 = vor.u32 %v12592_v34, %v11281_v57 }
 0x769   : > { %v4485_v49 = vpack.c.bf16 %v4076_v63, %v4076_v63 }
 0x76a   : > { %4227 = vmatmul.bf16.gmra.mxu3 %v11284_v15 }
 0x76b   : > { %v14197_v37 = vunpack.c.l.b16 %v4485_v49 }
 0x76d   : > { %v3349_v56 = vpop.f32.mrf.mxu0 }
 0x76e   : > { %v4078_v16 = vpop.f32.mrf.mxu1 }
 0x76f   : > { %v4079_v60 = vadd.f32 %v4078_v16, %v3349_v56  ;;  %v11113_v56 = vld [vmem:[%s12983_s9 + $0x718] sm:$0xf0] }
 0x770   : > { %3388 = vmatmul.bf16.gmra.mxu0 %v11104_v62  ;;  %v12550_v62 = vld [vmem:[%s12983_s9 + $0x714] sm:$0xf] }
 0x771   : > { %4117 = vmatmul.bf16.gmra.mxu1 %v11108_v30  ;;  %v4486_v49 = vpack.c.bf16 %v4079_v60, %v4079_v60  ;;  %v11116_v34 = vor.u32 %v12550_v62, %v11113_v56  ;;  %v11289_v62 = vld [vmem:[%s12983_s9 + $0x878] sm:$0xf0] }
 0x772   : > { %v11292_v60 = vor.u32 %v12594_v39, %v11289_v62 }
 0x773   : > { %v14209_v16 = vunpack.c.l.b16 %v4486_v49 }
 0x775   : > { %v3351_v36 = vpop.f32.mrf.mxu0 }
 0x776   : > { %v4080_v63 = vpop.f32.mrf.mxu1 }
 0x777   : > { %v4081_v59 = vadd.f32 %v4080_v63, %v3351_v36 }
 0x779   : > { %v4487_v50 = vpack.c.bf16 %v4081_v59, %v4081_v59  ;;  %v11287_v59 = vld [vmem:[%s12983_s9 + $0x870] sm:$0xf] }
 0x77a   : > { %4232 = vmatmul.bf16.gmra.mxu3 %v11292_v60  ;;  %v11127_v60 = vld [vmem:[%s12983_s9 + $0x730] sm:$0xf] }
 0x77b   : > { %v14211_v30 = vunpack.c.l.b16 %v4487_v50  ;;  %v12595_v50 = vld [vmem:[%s12983_s9 + $0x874] sm:$0xf0] }
 0x77c   : > { %v11288_v10 = vor.u32 %v12595_v50, %v11287_v59 }
 0x77d   : > { %v3354_v9 = vpop.f32.mrf.mxu0 }
 0x77e   : > { %v4083_v58 = vpop.f32.mrf.mxu1  ;;  %3503 = vmatmul.bf16.gmra.mxu2 %v11288_v10 }
 0x77f   : > { %v4084_v57 = vadd.f32 %v4083_v58, %v3354_v9 }
 0x780   : > { %3393 = vmatmul.bf16.gmra.mxu0 %v11112_v53 }
 0x781   : > { %4122 = vmatmul.bf16.gmra.mxu1 %v11116_v34  ;;  %v4488_v63 = vpack.c.bf16 %v4084_v57, %v4084_v57  ;;  %v11120_v34 = vor.u32 %v12553_v61, %v11119_v40  ;;  %v11124_v57 = vor.u32 %v12552_v23, %v11121_v8  ;;  %v12555_v61 = vld [vmem:[%s12983_s9 + $0x734] sm:$0xf0]  ;;  %v12554_v40 = vld [vmem:[%s12983_s9 + $0x734] sm:$0xf]  ;;  %v11129_v8 = vld [vmem:[%s12983_s9 + $0x738] sm:$0xf0] }
 0x783   : > { %v14223_v9 = vunpack.c.l.b16 %v4488_v63 }
 0x785   : > { %v3356_v15 = vpop.f32.mrf.mxu0  ;;  %16396 = vst [vmem:[#allocation121_spill] sm:$0xff] %v14223_v9  ;;  %v11151_v9 = vld [vmem:[%s12983_s9 + $0x760] sm:$0xf] }
 0x786   : > { %v4085_v36 = vpop.f32.mrf.mxu1 }
 0x787   : > { %v4086_v49 = vadd.f32 %v4085_v36, %v3356_v15 }
 0x789   : > { %v4489_v56 = vpack.c.bf16 %v4086_v49, %v4086_v49 }
 0x78b   : > { %v14225_v53 = vunpack.c.l.b16 %v4489_v56  ;;  %v11128_v56 = vor.u32 %v12555_v61, %v11127_v60 }
 0x78d   : > { %16397 = vst [vmem:[#allocation122_spill] sm:$0xff] %v14225_v53  ;;  %v3359_v58 = vpop.f32.mrf.mxu0  ;;  %v12561_v53 = vld [vmem:[%s12983_s9 + $0x764] sm:$0xf0] }
 0x78e   : > { %v4088_v36 = vpop.f32.mrf.mxu1 }
 0x78f   : > { %v4089_v49 = vadd.f32 %v4088_v36, %v3359_v58  ;;  %v11132_v58 = vor.u32 %v12554_v40, %v11129_v8 }
 0x790   : > { %3398 = vmatmul.bf16.gmra.mxu0 %v11120_v34 }
 0x791   : > { %4127 = vmatmul.bf16.gmra.mxu1 %v11124_v57  ;;  %v4490_v50 = vpack.c.bf16 %v4089_v49, %v4089_v49  ;;  %v12556_v57 = vld [vmem:[%s12983_s9 + $0x744] sm:$0xf] }
 0x793   : > { %v14233_v23 = vunpack.c.l.b16 %v4490_v50 }
 0x795   : > { %v3361_v59 = vpop.f32.mrf.mxu0  ;;  %16398 = vst [vmem:[#allocation123_spill] sm:$0xff] %v14233_v23  ;;  %v11137_v23 = vld [vmem:[%s12983_s9 + $0x748] sm:$0xf0] }
 0x796   : > { %v4090_v63 = vpop.f32.mrf.mxu1 }
 0x797   : > { %v4091_v39 = vadd.f32 %v4090_v63, %v3361_v59  ;;  %v11295_v59 = vld [vmem:[%s12983_s9 + $0x880] sm:$0xf]  ;;  %v12597_v63 = vld [vmem:[%s12983_s9 + $0x884] sm:$0xf0] }
 0x798   : > { %v11296_v50 = vor.u32 %v12597_v63, %v11295_v59 }
 0x799   : > { %v4491_v10 = vpack.c.bf16 %v4091_v39, %v4091_v39  ;;  %v12596_v39 = vld [vmem:[%s12983_s9 + $0x884] sm:$0xf] }
 0x79a   : > { %3508 = vmatmul.bf16.gmra.mxu2 %v11296_v50 }
 0x79b   : > { %v14235_v62 = vunpack.c.l.b16 %v4491_v10  ;;  %v11297_v10 = vld [vmem:[%s12983_s9 + $0x888] sm:$0xf0] }
 0x79c   : > { %v11300_v15 = vor.u32 %v12596_v39, %v11297_v10  ;;  %v11303_v10 = vld [vmem:[%s12983_s9 + $0x890] sm:$0xf] }
 0x79d   : > { %16399 = vst [vmem:[#allocation124_spill] sm:$0xff] %v14235_v62  ;;  %v3364_v34 = vpop.f32.mrf.mxu0 }
 0x79e   : > { %v4093_v36 = vpop.f32.mrf.mxu1  ;;  %4237 = vmatmul.bf16.gmra.mxu3 %v11300_v15  ;;  %v11140_v15 = vor.u32 %v12556_v57, %v11137_v23 }
 0x79f   : > { %v4094_v49 = vadd.f32 %v4093_v36, %v3364_v34  ;;  %v12557_v36 = vld [vmem:[%s12983_s9 + $0x744] sm:$0xf0] }
 0x7a0   : > { %3403 = vmatmul.bf16.gmra.mxu0 %v11128_v56  ;;  %v11135_v56 = vld [vmem:[%s12983_s9 + $0x740] sm:$0xf] }
 0x7a1   : > { %4132 = vmatmul.bf16.gmra.mxu1 %v11132_v58  ;;  %v4492_v40 = vpack.c.bf16 %v4094_v49, %v4094_v49  ;;  %v11136_v59 = vor.u32 %v12557_v36, %v11135_v56 }
 0x7a3   : > { %v14247_v62 = vunpack.c.l.b16 %v4492_v40 }
 0x7a5   : > { %v3366_v60 = vpop.f32.mrf.mxu0  ;;  %16400 = vst [vmem:[#allocation125_spill] sm:$0xff] %v14247_v62  ;;  %v11145_v62 = vld [vmem:[%s12983_s9 + $0x758] sm:$0xf0] }
 0x7a6   : > { %v4095_v61 = vpop.f32.mrf.mxu1 }
 0x7a7   : > { %v4096_v8 = vadd.f32 %v4095_v61, %v3366_v60  ;;  %v12599_v60 = vld [vmem:[%s12983_s9 + $0x894] sm:$0xf0]  ;;  %v12598_v61 = vld [vmem:[%s12983_s9 + $0x894] sm:$0xf] }
 0x7a8   : > { %v11304_v40 = vor.u32 %v12599_v60, %v11303_v10 }
 0x7a9   : > { %v4493_v34 = vpack.c.bf16 %v4096_v8, %v4096_v8  ;;  %v11305_v8 = vld [vmem:[%s12983_s9 + $0x898] sm:$0xf0] }
 0x7aa   : > { %3513 = vmatmul.bf16.gmra.mxu2 %v11304_v40 }
 0x7ab   : > { %v14249_v58 = vunpack.c.l.b16 %v4493_v34  ;;  %v11308_v34 = vor.u32 %v12598_v61, %v11305_v8 }
 0x7ad   : > { %16401 = vst [vmem:[#allocation126_spill] sm:$0xff] %v14249_v58  ;;  %v3369_v63 = vpop.f32.mrf.mxu0 }
 0x7ae   : > { %v4098_v39 = vpop.f32.mrf.mxu1  ;;  %4242 = vmatmul.bf16.gmra.mxu3 %v11308_v34 }
 0x7af   : > { %v4099_v50 = vadd.f32 %v4098_v39, %v3369_v63  ;;  %v11143_v63 = vld [vmem:[%s12983_s9 + $0x750] sm:$0xf]  ;;  %v12559_v39 = vld [vmem:[%s12983_s9 + $0x754] sm:$0xf0] }
 0x7b0   : > { %3408 = vmatmul.bf16.gmra.mxu0 %v11136_v59  ;;  %v12558_v59 = vld [vmem:[%s12983_s9 + $0x754] sm:$0xf]  ;;  %v11144_v10 = vor.u32 %v12559_v39, %v11143_v63  ;;  %v12600_v63 = vld [vmem:[%s12983_s9 + $0x8a4] sm:$0xf] }
 0x7b1   : > { %4137 = vmatmul.bf16.gmra.mxu1 %v11140_v15  ;;  %v4494_v56 = vpack.c.bf16 %v4099_v50, %v4099_v50  ;;  %v11148_v61 = vor.u32 %v12558_v59, %v11145_v62  ;;  %v11313_v62 = vld [vmem:[%s12983_s9 + $0x8a8] sm:$0xf0] }
 0x7b2   : > { %v11316_v50 = vor.u32 %v12600_v63, %v11313_v62 }
 0x7b3   : > { %v14261_v58 = vunpack.c.l.b16 %v4494_v56  ;;  %v11311_v56 = vld [vmem:[%s12983_s9 + $0x8a0] sm:$0xf] }
 0x7b5   : > { %v3371_v23 = vpop.f32.mrf.mxu0  ;;  %16402 = vst [vmem:[#allocation127_spill] sm:$0xff] %v14261_v58  ;;  %v12560_v58 = vld [vmem:[%s12983_s9 + $0x764] sm:$0xf] }
 0x7b6   : > { %v4100_v57 = vpop.f32.mrf.mxu1 }
 0x7b7   : > { %v4101_v36 = vadd.f32 %v4100_v57, %v3371_v23 }
 0x7b9   : > { %v4495_v49 = vpack.c.bf16 %v4101_v36, %v4101_v36  ;;  %v12601_v36 = vld [vmem:[%s12983_s9 + $0x8a4] sm:$0xf0] }
 0x7ba   : > { %v11312_v39 = vor.u32 %v12601_v36, %v11311_v56 }
 0x7bb   : > { %v14263_v15 = vunpack.c.l.b16 %v4495_v49 }
 0x7bc   : > { %3518 = vmatmul.bf16.gmra.mxu2 %v11312_v39 }
 0x7bd   : > { %16403 = vst [vmem:[#allocation128_spill] sm:$0xff] %v14263_v15  ;;  %v3374_v60 = vpop.f32.mrf.mxu0  ;;  %v11153_v15 = vld [vmem:[%s12983_s9 + $0x768] sm:$0xf0] }
 0x7be   : > { %v4103_v40 = vpop.f32.mrf.mxu1  ;;  %4247 = vmatmul.bf16.gmra.mxu3 %v11316_v50  ;;  %v11159_v50 = vld [vmem:[%s12983_s9 + $0x770] sm:$0xf] }
 0x7bf   : > { %v4104_v8 = vadd.f32 %v4103_v40, %v3374_v60 }
 0x7c0   : > { %3413 = vmatmul.bf16.gmra.mxu0 %v11144_v10 }
 0x7c1   : > { %4142 = vmatmul.bf16.gmra.mxu1 %v11148_v61  ;;  %v4496_v57 = vpack.c.bf16 %v4104_v8, %v4104_v8  ;;  %v11152_v61 = vor.u32 %v12561_v53, %v11151_v9  ;;  %v11156_v8 = vor.u32 %v12560_v58, %v11153_v15  ;;  %v12563_v9 = vld [vmem:[%s12983_s9 + $0x774] sm:$0xf0]  ;;  %v12562_v53 = vld [vmem:[%s12983_s9 + $0x774] sm:$0xf]  ;;  %v11161_v58 = vld [vmem:[%s12983_s9 + $0x778] sm:$0xf0] }
 0x7c3   : > { %v14275_v60 = vunpack.c.l.b16 %v4496_v57 }
 0x7c5   : > { %v3376_v34 = vpop.f32.mrf.mxu0  ;;  %16404 = vst [vmem:[#allocation129_spill] sm:$0xff] %v14275_v60  ;;  %v11175_v60 = vld [vmem:[%s12983_s9 + $0x790] sm:$0xf] }
 0x7c6   : > { %v4105_v23 = vpop.f32.mrf.mxu1 }
 0x7c7   : > { %v4106_v49 = vadd.f32 %v4105_v23, %v3376_v34 }
 0x7c9   : > { %v4497_v59 = vpack.c.bf16 %v4106_v49, %v4106_v49 }
 0x7cb   : > { %v14277_v10 = vunpack.c.l.b16 %v4497_v59  ;;  %v11160_v59 = vor.u32 %v12563_v9, %v11159_v50 }
 0x7cd   : > { %16405 = vst [vmem:[#allocation130_spill] sm:$0xff] %v14277_v10  ;;  %v3379_v40 = vpop.f32.mrf.mxu0  ;;  %v11329_v10 = vld [vmem:[%s12983_s9 + $0x8c8] sm:$0xf0] }
 0x7ce   : > { %v4108_v23 = vpop.f32.mrf.mxu1 }
 0x7cf   : > { %v4109_v49 = vadd.f32 %v4108_v23, %v3379_v40  ;;  %v11164_v40 = vor.u32 %v12562_v53, %v11161_v58 }
 0x7d0   : > { %3418 = vmatmul.bf16.gmra.mxu0 %v11152_v61 }
 0x7d1   : > { %4147 = vmatmul.bf16.gmra.mxu1 %v11156_v8  ;;  %v4498_v36 = vpack.c.bf16 %v4109_v49, %v4109_v49 }
 0x7d3   : > { %v14285_v15 = vunpack.c.l.b16 %v4498_v36 }
 0x7d5   : > { %v3381_v56 = vpop.f32.mrf.mxu0  ;;  %16406 = vst [vmem:[#allocation131_spill] sm:$0xff] %v14285_v15  ;;  %v11169_v15 = vld [vmem:[%s12983_s9 + $0x788] sm:$0xf0] }
 0x7d6   : > { %v4110_v57 = vpop.f32.mrf.mxu1  ;;  %v4223_v41 = vpop.f32.mrf.mxu3 }
 0x7d7   : > { %v4111_v63 = vadd.f32 %v4110_v57, %v3381_v56  ;;  %v11319_v56 = vld [vmem:[%s12983_s9 + $0x8b0] sm:$0xf]  ;;  %v12603_v57 = vld [vmem:[%s12983_s9 + $0x8b4] sm:$0xf0] }
 0x7d8   : > { %v11320_v36 = vor.u32 %v12603_v57, %v11319_v56 }
 0x7d9   : > { %v4499_v39 = vpack.c.bf16 %v4111_v63, %v4111_v63  ;;  %v12602_v63 = vld [vmem:[%s12983_s9 + $0x8b4] sm:$0xf] }
 0x7da   : > { %3523 = vmatmul.bf16.gmra.mxu2 %v11320_v36 }
 0x7db   : > { %v14287_v62 = vunpack.c.l.b16 %v4499_v39  ;;  %v11321_v39 = vld [vmem:[%s12983_s9 + $0x8b8] sm:$0xf0] }
 0x7dc   : > { %v11324_v34 = vor.u32 %v12602_v63, %v11321_v39 }
 0x7dd   : > { %16407 = vst [vmem:[#allocation132_spill] sm:$0xff] %v14287_v62  ;;  %v3384_v61 = vpop.f32.mrf.mxu0 }
 0x7de   : > { %v4113_v23 = vpop.f32.mrf.mxu1  ;;  %4252 = vmatmul.bf16.gmra.mxu3 %v11324_v34 }
 0x7df   : > { %v4114_v49 = vadd.f32 %v4113_v23, %v3384_v61  ;;  %v11167_v61 = vld [vmem:[%s12983_s9 + $0x780] sm:$0xf]  ;;  %v12565_v23 = vld [vmem:[%s12983_s9 + $0x784] sm:$0xf0] }
 0x7e0   : > { %3423 = vmatmul.bf16.gmra.mxu0 %v11160_v59  ;;  %v12564_v59 = vld [vmem:[%s12983_s9 + $0x784] sm:$0xf]  ;;  %v11168_v56 = vor.u32 %v12565_v23, %v11167_v61 }
 0x7e1   : > { %4152 = vmatmul.bf16.gmra.mxu1 %v11164_v40  ;;  %v4500_v53 = vpack.c.bf16 %v4114_v49, %v4114_v49  ;;  %v11172_v34 = vor.u32 %v12564_v59, %v11169_v15  ;;  %v12604_v61 = vld [vmem:[%s12983_s9 + $0x8c4] sm:$0xf]  ;;  %v12567_v15 = vld [vmem:[%s12983_s9 + $0x794] sm:$0xf0]  ;;  %v12566_v49 = vld [vmem:[%s12983_s9 + $0x794] sm:$0xf] }
 0x7e3   : > { %v14299_v62 = vunpack.c.l.b16 %v4500_v53  ;;  %v11327_v53 = vld [vmem:[%s12983_s9 + $0x8c0] sm:$0xf] }
 0x7e5   : > { %v3386_v50 = vpop.f32.mrf.mxu0  ;;  %16408 = vst [vmem:[#allocation133_spill] sm:$0xff] %v14299_v62  ;;  %v11177_v62 = vld [vmem:[%s12983_s9 + $0x798] sm:$0xf0] }
 0x7e6   : > { %v4115_v9 = vpop.f32.mrf.mxu1 }
 0x7e7   : > { %v4116_v58 = vadd.f32 %v4115_v9, %v3386_v50 }
 0x7e9   : > { %v4501_v8 = vpack.c.bf16 %v4116_v58, %v4116_v58  ;;  %v12605_v58 = vld [vmem:[%s12983_s9 + $0x8c4] sm:$0xf0] }
 0x7ea   : > { %v11328_v59 = vor.u32 %v12605_v58, %v11327_v53  ;;  %v4225_v53 = vpop.f32.mrf.mxu3 }
 0x7eb   : > { %v14301_v40 = vunpack.c.l.b16 %v4501_v8 }
 0x7ec   : > { %3528 = vmatmul.bf16.gmra.mxu2 %v11328_v59 }
 0x7ed   : > { %16409 = vst [vmem:[#allocation134_spill] sm:$0xff] %v14301_v40  ;;  %v3389_v57 = vpop.f32.mrf.mxu0  ;;  %v3494_v40 = vpop.f32.mrf.mxu2 }
 0x7ee   : > { %v4118_v63 = vpop.f32.mrf.mxu1 }
 0x7ef   : > { %v4119_v36 = vadd.f32 %v4118_v63, %v3389_v57  ;;  %v11176_v57 = vor.u32 %v12567_v15, %v11175_v60  ;;  %v14313_v63 = vpop.permute.xlu2 %5514 }
 0x7f0   : > { %3428 = vmatmul.bf16.gmra.mxu0 %v11168_v56  ;;  %v11332_v56 = vor.u32 %v12604_v61, %v11329_v10  ;;  %16410 = vst [vmem:[#allocation135_spill] sm:$0xff] %v14313_v63 }
 0x7f1   : > { %4157 = vmatmul.bf16.gmra.mxu1 %v11172_v34  ;;  %v4502_v9 = vpack.c.bf16 %v4119_v36, %v4119_v36 }
 0x7f2   : > { %4257 = vmatmul.bf16.gmra.mxu3 %v11332_v56  ;;  %v11183_v56 = vld [vmem:[%s12983_s9 + $0x7a0] sm:$0xf] }
 0x7f3   : > { %v5350_v33 = vunpack.c.l.b16 %v4502_v9 }
 0x7f5   : > { %v3391_v39 = vpop.f32.mrf.mxu0  ;;  %v3496_v9 = vpop.f32.mrf.mxu2 }
 0x7f6   : > { %v4120_v50 = vpop.f32.mrf.mxu1  ;;  %v4226_v15 = vadd.f32 %v4225_v53, %v3496_v9 }
 0x7f7   : > { %v4121_v8 = vadd.f32 %v4120_v50, %v3391_v39  ;;  %v11180_v50 = vor.u32 %v12566_v49, %v11177_v62  ;;  %v14316_v61 = vpop.permute.xlu2 %4728  ;;  %v4224_v62 = vadd.f32 %v4223_v41, %v3494_v40  ;;  %v16412_v49 = vpack.c.b16 %v13756_v47, %v13754_v31 }
 0x7f8   : > { %16411 = vst [vmem:[#allocation136_spill] sm:$0xff] %v14316_v61  ;;  %v4545_v63 = vpack.c.bf16 %v4226_v15, %v4226_v15  ;;  %v12606_v15 = vld [vmem:[%s12983_s9 + $0x8d4] sm:$0xf] }
 0x7f9   : > { %v4503_v23 = vpack.c.bf16 %v4121_v8, %v4121_v8 }
 0x7fb   : > { %v5351_v34 = vunpack.c.l.b16 %v4503_v23 }
 0x7fd   : > { %v3394_v36 = vpop.f32.mrf.mxu0  ;;  %v5382_v39 = vpack.c.b16 %v5351_v34, %v5350_v33  ;;  %v12569_v34 = vld [vmem:[%s12983_s9 + $0x7a4] sm:$0xf0] }
 0x7fe   : > { %v4123_v8 = vpop.f32.mrf.mxu1  ;;  %v11184_v61 = vor.u32 %v12569_v34, %v11183_v56  ;;  %v14339_v56 = vpop.permute.xlu1 %5510 }
 0x7ff   : > { %5398 = vrot.lane.b32.xlu0 %v5382_v39, %s12959_s10  ;;  %v4124_v10 = vadd.f32 %v4123_v8, %v3394_v36  ;;  %v11185_v36 = vld [vmem:[%s12983_s9 + $0x7a8] sm:$0xf0]  ;;  %v4544_v8 = vpack.c.bf16 %v4224_v62, %v4224_v62  ;;  %v14328_v9 = vpop.permute.xlu2 %4734  ;;  %v11335_v62 = vld [vmem:[%s12983_s9 + $0x8d0] sm:$0xf] }
 0x800   : > { %3433 = vmatmul.bf16.gmra.mxu0 %v11176_v57  ;;  %v12568_v57 = vld [vmem:[%s12983_s9 + $0x7a4] sm:$0xf] }
 0x801   : > { %4162 = vmatmul.bf16.gmra.mxu1 %v11180_v50  ;;  %v4504_v23 = vpack.c.bf16 %v4124_v10, %v4124_v10  ;;  %v14326_v10 = vpop.permute.xlu0 %5512  ;;  %v11188_v47 = vor.u32 %v12568_v57, %v11185_v36  ;;  %v5472_v53 = vunpack.c.l.b16 %v4544_v8 }
 0x803   : > { %v5352_v39 = vunpack.c.l.b16 %v4504_v23  ;;  %v3499_v23 = vpop.f32.mrf.mxu2 }
 0x805   : > { %v3396_v60 = vpop.f32.mrf.mxu0 }
 0x806   : > { %v4125_v58 = vpop.f32.mrf.mxu1 }
 0x807   : > { %v4126_v33 = vadd.f32 %v4125_v58, %v3396_v60  ;;  %4960 = vrot.lane.b32.xlu0 %v16412_v49, %s12955_s26  ;;  %v5473_v60 = vunpack.c.l.b16 %v4545_v63  ;;  %v16413_v58 = vpack.c.b16 %v14169_v3, %v14167_v52  ;;  %v12607_v49 = vld [vmem:[%s12983_s9 + $0x8d4] sm:$0xf0] }
 0x808   : > { %v11336_v34 = vor.u32 %v12607_v49, %v11335_v62  ;;  %v11193_v62 = vld [vmem:[%s12983_s9 + $0x7b8] sm:$0xf0] }
 0x809   : > { %v4505_v59 = vpack.c.bf16 %v4126_v33, %v4126_v33  ;;  %v4228_v33 = vpop.f32.mrf.mxu3  ;;  %v5499_v36 = vpack.c.b16 %v5473_v60, %v5472_v53 }
 0x80a   : > { %3533 = vmatmul.bf16.gmra.mxu2 %v11336_v34 }
 0x80b   : > { %v5353_v50 = vunpack.c.l.b16 %v4505_v59  ;;  %v11337_v59 = vld [vmem:[%s12983_s9 + $0x8d8] sm:$0xf0]  ;;  %v3501_v53 = vpop.f32.mrf.mxu2 }
 0x80c   : > { %v11340_v63 = vor.u32 %v12606_v15, %v11337_v59  ;;  %v14354_v59 = vpop.permute.xlu1 %5516 }
 0x80d   : > { %v3399_v41 = vpop.f32.mrf.mxu0  ;;  %v5383_v31 = vpack.c.b16 %v5353_v50, %v5352_v39  ;;  %v14343_v39 = vpop.permute.xlu2 %4842 }
 0x80e   : > { %v4128_v40 = vpop.f32.mrf.mxu1  ;;  %4262 = vmatmul.bf16.gmra.mxu3 %v11340_v63 }
 0x80f   : > { %5296 = vrot.lane.b32.xlu0 %v16413_v58, %s12958_s2  ;;  %5400 = vrot.lane.b32.xlu2 %v5383_v31, %s12959_s10  ;;  %v4129_v57 = vadd.f32 %v4128_v40, %v3399_v41  ;;  %v16415_v31 = vpack.c.b16 %v13501_v21, %v13499_v45  ;;  %v12571_v40 = vld [vmem:[%s12983_s9 + $0x7b4] sm:$0xf0]  ;;  %v12570_v58 = vld [vmem:[%s12983_s9 + $0x7b4] sm:$0xf]  ;;  %v16416_v21 = vpack.c.b16 %v13901_v27, %v13899_v14 }
 0x810   : > { %3438 = vmatmul.bf16.gmra.mxu0 %v11184_v61  ;;  %v14341_v61 = vpop.permute.xlu0 %5518 }
 0x811   : > { %4167 = vmatmul.bf16.gmra.mxu1 %v11188_v47  ;;  %16414 = vst [vmem:[#allocation137_spill] sm:$0xff] %v14341_v61  ;;  %v4506_v50 = vpack.c.bf16 %v4129_v57, %v4129_v57  ;;  %v11191_v47 = vld [vmem:[%s12983_s9 + $0x7b0] sm:$0xf]  ;;  %v4230_v60 = vpop.f32.mrf.mxu3 }
 0x812   : > { %v11192_v34 = vor.u32 %v12571_v40, %v11191_v47 }
 0x813   : > { %v5354_v49 = vunpack.c.l.b16 %v4506_v50 }
 0x814   : > { %v14369_v27 = vpop.permute.xlu1 %4730 }
 0x815   : > { %v3401_v52 = vpop.f32.mrf.mxu0  ;;  %v14356_v45 = vpop.permute.xlu2 %4848 }
 0x816   : > { %v4130_v3 = vpop.f32.mrf.mxu1 }
 0x817   : > { %v4131_v8 = vadd.f32 %v4130_v3, %v3401_v52  ;;  %4738 = vrot.lane.b32.xlu0 %v16415_v31, %s12953_s22  ;;  %5520 = vrot.lane.b32.xlu2 %v5499_v36, %s12952_s18  ;;  %v11196_v52 = vor.u32 %v12570_v58, %v11193_v62  ;;  %v16417_v36 = vpack.c.b16 %v13766_v44, %v13764_v4 }
 0x818   : > { %v14367_v50 = vpop.permute.xlu0 %4726  ;;  %v4231_v31 = vadd.f32 %v4230_v60, %v3501_v53  ;;  %v16418_v53 = vpack.c.b16 %v13641_v11, %v13639_v55  ;;  %v16419_v60 = vpack.c.b16 %v14183_v22, %v14181_v2  ;;  %v12608_v55 = vld [vmem:[%s12983_s9 + $0x8e4] sm:$0xf]  ;;  %v11201_v2 = vld [vmem:[%s12983_s9 + $0x7c8] sm:$0xf0] }
 0x819   : > { %v4507_v41 = vpack.c.bf16 %v4131_v8, %v4131_v8  ;;  %v4229_v8 = vadd.f32 %v4228_v33, %v3499_v23  ;;  %v4233_v47 = vpop.f32.mrf.mxu3 }
 0x81a   : > { %v4547_v44 = vpack.c.bf16 %v4231_v31, %v4231_v31 }
 0x81b   : > { %v5355_v15 = vunpack.c.l.b16 %v4507_v41  ;;  %v3504_v41 = vpop.f32.mrf.mxu2  ;;  %v4546_v4 = vpack.c.bf16 %v4229_v8, %v4229_v8  ;;  %v11345_v8 = vld [vmem:[%s12983_s9 + $0x8e8] sm:$0xf0] }
 0x81d   : > { %v3404_v63 = vpop.f32.mrf.mxu0  ;;  %v5384_v57 = vpack.c.b16 %v5355_v15, %v5354_v49  ;;  %v14371_v62 = vpop.permute.xlu2 %4956  ;;  %v16420_v49 = vpack.c.b16 %v14036_v32, %v14034_v35  ;;  %v11199_v15 = vld [vmem:[%s12983_s9 + $0x7c0] sm:$0xf]  ;;  %v5474_v11 = vunpack.c.l.b16 %v4546_v4  ;;  %v11348_v35 = vor.u32 %v12608_v55, %v11345_v8  ;;  %v12613_v4 = vld [vmem:[%s12988_s13 + $0x8] sm:$0x30] }
 0x81e   : > { %v4133_v3 = vpop.f32.mrf.mxu1  ;;  %v12960_v55 = vmov 65535  }
 0x81f   : > { %5074 = vrot.lane.b32.xlu0 %v16416_v21, %s12956_s28  ;;  %4962 = vrot.lane.b32.xlu2 %v16417_v36, %s12955_s26  ;;  %v4134_v40 = vadd.f32 %v4133_v3, %v3404_v63  ;;  %v12609_v3 = vld [vmem:[%s12983_s9 + $0x8e4] sm:$0xf0]  ;;  %v5475_v21 = vunpack.c.l.b16 %v4547_v44  ;;  %v12572_v36 = vld [vmem:[%s12983_s9 + $0x7c4] sm:$0xf]  ;;  %v14397_v44 = vpop.permute.xlu1 %4736 }
 0x820   : > { %5402 = vrot.lane.b32.xlu1 %v5384_v57, %s12959_s10  ;;  %3443 = vmatmul.bf16.gmra.mxu0 %v11192_v34  ;;  %v12573_v34 = vld [vmem:[%s12983_s9 + $0x7c4] sm:$0xf0]  ;;  %v14387_v63 = vpop.permute.xlu0 %4732 }
 0x821   : > { %4172 = vmatmul.bf16.gmra.mxu1 %v11196_v52  ;;  %v4508_v23 = vpack.c.bf16 %v4134_v40, %v4134_v40  ;;  %v11343_v52 = vld [vmem:[%s12983_s9 + $0x8e0] sm:$0xf]  ;;  %v11200_v32 = vor.u32 %v12573_v34, %v11199_v15  ;;  %4267 = vmatmul.bf16.gmra.mxu3 %v11348_v35  ;;  %v16421_v15 = vpack.c.b16 %v13511_v29, %v13509_v5 }
 0x822   : > { %v11344_v22 = vor.u32 %v12609_v3, %v11343_v52  ;;  %v5500_v52 = vpack.c.b16 %v5475_v21, %v5474_v11 }
 0x823   : > { %v5356_v31 = vunpack.c.l.b16 %v4508_v23 }
 0x824   : > { %3538 = vmatmul.bf16.gmra.mxu2 %v11344_v22 }
 0x825   : > { %v3406_v14 = vpop.f32.mrf.mxu0  ;;  %v14399_v23 = vpop.permute.xlu2 %5064 }
 0x826   : > { %v4135_v58 = vpop.f32.mrf.mxu1 }
 0x827   : > { %v4136_v33 = vadd.f32 %v4135_v58, %v3406_v14  ;;  %4852 = vrot.lane.b32.xlu0 %v16418_v53, %s12954_s23  ;;  %5298 = vrot.lane.b32.xlu2 %v16419_v60, %s12958_s2  ;;  %v3506_v14 = vpop.f32.mrf.mxu2  ;;  %v4235_v58 = vpop.f32.mrf.mxu3  ;;  %v11204_v60 = vor.u32 %v12572_v36, %v11201_v2  ;;  %v5876_v36 = vsel %vm5874_vm0, 4294967295, %v12960_v55  ;;  %vm7185_vm0 = vcmask 785408  }
 0x828   : > { %5186 = vrot.lane.b32.xlu1 %v16420_v49, %s12957_s1  ;;  %v11363_v49 = vld [vmem:[%s12988_s13 + $0x8] sm:$0xf]  ;;  %v4236_v34 = vadd.f32 %v4235_v58, %v3506_v14  ;;  %v5877_v2 = vsel %vm5875_vm1, %v5876_v36, 0  ;;  %v14407_v22 = vpop.permute.xlu0 %4838  ;;  %v14409_v29 = vpop.permute.xlu1 %4844  ;;  %v16423_v58 = vpack.c.b16 %v14046_v19, %v14044_v25  ;;  %v11353_v25 = vld [vmem:[%s12983_s9 + $0x8f8] sm:$0xf0]  ;;  %vm7194_vm1 = vcmask 916480  }
 0x829   : > { %v4509_v57 = vpack.c.bf16 %v4136_v33, %v4136_v33  ;;  %v11364_v3 = vor.u32 %v12613_v4, %v11363_v49 }
 0x82a   : > { %v4549_v21 = vpack.c.bf16 %v4236_v34, %v4236_v34 }
 0x82b   : > { %v5357_v40 = vunpack.c.l.b16 %v4509_v57  ;;  %v4234_v57 = vadd.f32 %v4233_v47, %v3504_v41  ;;  %v5879_v11 = vand.u32 %v11364_v3, %v5877_v2  ;;  %v12611_v3 = vld [vmem:[%s12983_s9 + $0x8f4] sm:$0xf0] }
 0x82d   : > { %v5385_v53 = vpack.c.b16 %v5357_v40, %v5356_v31  ;;  %v3409_v33 = vpop.f32.mrf.mxu0  ;;  %v4548_v41 = vpack.c.bf16 %v4234_v57, %v4234_v57  ;;  %5887 = vmatpush.bf16.msrb.mxu2 %v5879_v11  ;;  %v14411_v31 = vpop.permute.xlu2 %5070  ;;  %v11209_v57 = vld [vmem:[%s12983_s9 + $0x7d8] sm:$0xf0] }
 0x82e   : > { %v4138_v61 = vpop.f32.mrf.mxu1 }
 0x82f   : > { %4740 = vrot.lane.b32.xlu2 %v16421_v15, %s12953_s22  ;;  %5404 = vrot.lane.b32.xlu0 %v5385_v53, %s12959_s10  ;;  %v4139_v47 = vadd.f32 %v4138_v61, %v3409_v33  ;;  %v5476_v40 = vunpack.c.l.b16 %v4548_v41  ;;  %v16422_v61 = vpack.c.b16 %v13911_v0, %v13909_v46  ;;  %v16424_v53 = vpack.c.b16 %v13776_v6, %v13774_v48  ;;  %v11207_v33 = vld [vmem:[%s12983_s9 + $0x7d0] sm:$0xf]  ;;  %v12610_v46 = vld [vmem:[%s12983_s9 + $0x8f4] sm:$0xf]  ;;  %v3509_v15 = vpop.f32.mrf.mxu2  ;;  %v4238_v34 = vpop.f32.mrf.mxu3 }
 0x830   : > { %5522 = vrot.lane.b32.xlu1 %v5500_v52, %s12952_s18  ;;  %3448 = vmatmul.bf16.gmra.mxu0 %v11200_v32  ;;  %v5477_v32 = vunpack.c.l.b16 %v4549_v21  ;;  %v14427_v49 = vpop.permute.xlu0 %4840  ;;  %v11351_v52 = vld [vmem:[%s12983_s9 + $0x8f0] sm:$0xf]  ;;  %v12574_v0 = vld [vmem:[%s12983_s9 + $0x7d4] sm:$0xf]  ;;  %v11356_v11 = vor.u32 %v12610_v46, %v11353_v25  ;;  %v14435_v21 = vpop.permute.xlu1 %4950  ;;  %v12576_v25 = vld [vmem:[%s12983_s9 + $0x7e4] sm:$0xf] }
 0x831   : > { %4177 = vmatmul.bf16.gmra.mxu1 %v11204_v60  ;;  %v4510_v35 = vpack.c.bf16 %v4139_v47, %v4139_v47  ;;  %v12575_v60 = vld [vmem:[%s12983_s9 + $0x7d4] sm:$0xf0]  ;;  %v11352_v55 = vor.u32 %v12611_v3, %v11351_v52  ;;  %v11212_v47 = vor.u32 %v12574_v0, %v11209_v57  ;;  %v16426_v52 = vpack.c.b16 %v13786_v28, %v13784_v51 }
 0x832   : > { %v5501_v2 = vpack.c.b16 %v5477_v32, %v5476_v40  ;;  %v11208_v48 = vor.u32 %v12575_v60, %v11207_v33  ;;  %4272 = vmatmul.bf16.gmra.mxu3 %v11356_v11  ;;  %v16425_v40 = vpack.c.b16 %v14197_v37, %v14195_v1  ;;  %v4239_v60 = vadd.f32 %v4238_v34, %v3509_v15  ;;  %v11215_v34 = vld [vmem:[%s12983_s9 + $0x7e0] sm:$0xf] }
 0x833   : > { %v5358_v19 = vunpack.c.l.b16 %v4510_v35  ;;  %v16427_v3 = vpack.c.b16 %v13651_v18, %v13649_v43  ;;  %v16428_v0 = vpack.c.b16 %v13521_v7, %v13519_v38 }
 0x834   : > { %3543 = vmatmul.bf16.gmra.mxu2 %v11352_v55  ;;  %v12577_v55 = vld [vmem:[%s12983_s9 + $0x7e4] sm:$0xf0] }
 0x835   : > { %v3411_v5 = vpop.f32.mrf.mxu0  ;;  %v11216_v43 = vor.u32 %v12577_v55, %v11215_v34 }
 0x836   : > { %v4140_v8 = vpop.f32.mrf.mxu1 }
 0x837   : > { %v4141_v14 = vadd.f32 %v4140_v8, %v3411_v5  ;;  %5076 = vrot.lane.b32.xlu2 %v16422_v61, %s12956_s28  ;;  %5188 = vrot.lane.b32.xlu0 %v16423_v58, %s12957_s1  ;;  %v14437_v8 = vpop.permute.xlu2 %5174  ;;  %v4240_v61 = vpop.f32.mrf.mxu3 }
 0x838   : > { %4964 = vrot.lane.b32.xlu1 %v16424_v53, %s12955_s26  ;;  %v14445_v35 = vpop.permute.xlu0 %4846  ;;  %v14447_v53 = vpop.permute.xlu1 %4952 }
 0x839   : > { %v4511_v4 = vpack.c.bf16 %v4141_v14, %v4141_v14  ;;  %v3511_v14 = vpop.f32.mrf.mxu2 }
 0x83a   : > { %v4241_v46 = vadd.f32 %v4240_v61, %v3511_v14  ;;  %v12612_v61 = vld [vmem:[%s12988_s13] sm:$0xff] }
 0x83b   : > { %v5359_v36 = vunpack.c.l.b16 %v4511_v4  ;;  %5888 = vmatpush.bf16.msrb.mxu2 %v12612_v61 }
 0x83d   : > { %v5386_v6 = vpack.c.b16 %v5359_v36, %v5358_v19  ;;  %v3414_v41 = vpop.f32.mrf.mxu0  ;;  %v11217_v19 = vld [vmem:[%s12983_s9 + $0x7e8] sm:$0xf0]  ;;  %v4550_v36 = vpack.c.bf16 %v4239_v60, %v4239_v60 }
 0x83e   : > { %v4143_v5 = vpop.f32.mrf.mxu1 }
 0x83f   : > { %5524 = vrot.lane.b32.xlu0 %v5501_v2, %s12952_s18  ;;  %5406 = vrot.lane.b32.xlu2 %v5386_v6, %s12959_s10  ;;  %v4144_v32 = vadd.f32 %v4143_v5, %v3414_v41  ;;  %v14449_v4 = vpop.permute.xlu2 %5178  ;;  %v4551_v2 = vpack.c.bf16 %v4241_v46, %v4241_v46  ;;  %v5478_v41 = vunpack.c.l.b16 %v4550_v36  ;;  %v16429_v5 = vpack.c.b16 %v14211_v30, %v14209_v16  ;;  %v4243_v14 = vpop.f32.mrf.mxu3 }
 0x840   : > { %5300 = vrot.lane.b32.xlu1 %v16425_v40, %s12958_s2  ;;  %3453 = vmatmul.bf16.gmra.mxu0 %v11208_v48  ;;  %v14463_v57 = vpop.permute.xlu0 %4954  ;;  %v11220_v48 = vor.u32 %v12576_v25, %v11217_v19  ;;  %v14469_v6 = vpop.permute.xlu1 %4958  ;;  %v16430_v40 = vpack.c.b16 %v14056_v54, %v14054_v17  ;;  %v16431_v54 = vpack.c.b16 %v13531_v24, %v13529_v26 }
 0x841   : > { %4182 = vmatmul.bf16.gmra.mxu1 %v11212_v47  ;;  %v4512_v1 = vpack.c.bf16 %v4144_v32, %v4144_v32  ;;  %v5479_v47 = vunpack.c.l.b16 %v4551_v2  ;;  %v3514_v32 = vpop.f32.mrf.mxu2  ;;  %v16433_v24 = vpack.c.b16 %v13796_v20, %v13794_v42 }
 0x843   : > { %v5360_v51 = vunpack.c.l.b16 %v4512_v1  ;;  %v5502_v60 = vpack.c.b16 %v5479_v47, %v5478_v41 }
 0x845   : > { %v3416_v58 = vpop.f32.mrf.mxu0 }
 0x846   : > { %v4145_v33 = vpop.f32.mrf.mxu1 }
 0x847   : > { %v4146_v37 = vadd.f32 %v4145_v33, %v3416_v58  ;;  %4966 = vrot.lane.b32.xlu0 %v16426_v52, %s12955_s26  ;;  %4854 = vrot.lane.b32.xlu2 %v16427_v3, %s12954_s23  ;;  %v14471_v7 = vpop.permute.xlu2 %5286  ;;  %v16432_v3 = vpack.c.b16 %v13921_v13, %v13919_v12  ;;  %v4245_v34 = vpop.f32.mrf.mxu3  ;;  %v16434_v12 = vld [vmem:[#allocation68_spill] sm:$0xff]  ;;  %v16435_v13 = vld [vmem:[#allocation67_spill] sm:$0xff] }
 0x848   : > { %4742 = vrot.lane.b32.xlu1 %v16428_v0, %s12953_s22  ;;  %v14483_v58 = vpop.permute.xlu0 %5068  ;;  %v5063_v16 = vpop.permute.xlu1 %5062  ;;  %v16436_v36 = vpack.c.b16 %v16434_v12, %v16435_v13 }
 0x849   : > { %v4513_v15 = vpack.c.bf16 %v4146_v37, %v4146_v37 }
 0x84b   : > { %v5361_v28 = vunpack.c.l.b16 %v4513_v15  ;;  %v3516_v15 = vpop.f32.mrf.mxu2 }
 0x84d   : > { %v5387_v18 = vpack.c.b16 %v5361_v28, %v5360_v51  ;;  %v3419_v11 = vpop.f32.mrf.mxu0 }
 0x84e   : > { %v4148_v38 = vpop.f32.mrf.mxu1 }
 0x84f   : > { %5302 = vrot.lane.b32.xlu0 %v16429_v5, %s12958_s2  ;;  %5190 = vrot.lane.b32.xlu2 %v16430_v40, %s12957_s1  ;;  %v4149_v33 = vadd.f32 %v4148_v38, %v3419_v11  ;;  %v14485_v37 = vpop.permute.xlu2 %5292  ;;  %v4246_v11 = vadd.f32 %v4245_v34, %v3516_v15  ;;  %v4248_v38 = vpop.f32.mrf.mxu3 }
 0x850   : > { %5408 = vrot.lane.b32.xlu1 %v5387_v18, %s12959_s10  ;;  %3458 = vmatmul.bf16.gmra.mxu0 %v11216_v43  ;;  %v14496_v46 = vpop.permute.xlu0 %5176  ;;  %v14498_v28 = vpop.permute.xlu1 %5066  ;;  %v4244_v18 = vadd.f32 %v4243_v14, %v3514_v32  ;;  %v16441_v32 = vld [vmem:[#allocation93_spill] sm:$0xff] }
 0x851   : > { %4187 = vmatmul.bf16.gmra.mxu1 %v11220_v48  ;;  %v4514_v52 = vpack.c.bf16 %v4149_v33, %v4149_v33  ;;  %v4553_v20 = vpack.c.bf16 %v4246_v11, %v4246_v11 }
 0x852   : > { %v4552_v42 = vpack.c.bf16 %v4244_v18, %v4244_v18 }
 0x853   : > { %v5362_v55 = vunpack.c.l.b16 %v4514_v52  ;;  %v3519_v48 = vpop.f32.mrf.mxu2  ;;  %v16440_v52 = vld [vmem:[#allocation94_spill] sm:$0xff] }
 0x854   : > { %v16442_v14 = vpack.c.b16 %v16440_v52, %v16441_v32 }
 0x855   : > { %v3421_v1 = vpop.f32.mrf.mxu0 }
 0x856   : > { %v4150_v30 = vpop.f32.mrf.mxu1 }
 0x857   : > { %v4151_v17 = vadd.f32 %v4150_v30, %v3421_v1  ;;  %4744 = vrot.lane.b32.xlu0 %v16431_v54, %s12953_s22  ;;  %5526 = vrot.lane.b32.xlu2 %v5502_v60, %s12952_s18  ;;  %v14511_v43 = vpop.permute.xlu2 %5184  ;;  %v16437_v60 = vld [vmem:[#allocation122_spill] sm:$0xff]  ;;  %v16438_v1 = vld [vmem:[#allocation121_spill] sm:$0xff]  ;;  %v16444_v54 = vld [vmem:[#allocation107_spill] sm:$0xff]  ;;  %v4250_v18 = vpop.f32.mrf.mxu3 }
 0x858   : > { %5078 = vrot.lane.b32.xlu1 %v16432_v3, %s12956_s28  ;;  %v14509_v2 = vpop.permute.xlu0 %5182  ;;  %v14513_v5 = vpop.permute.xlu1 %5180  ;;  %v16439_v30 = vpack.c.b16 %v16437_v60, %v16438_v1  ;;  %v4249_v60 = vadd.f32 %v4248_v38, %v3519_v48  ;;  %v16450_v1 = vld [vmem:[#allocation69_spill] sm:$0xff] }
 0x859   : > { %v4515_v0 = vpack.c.bf16 %v4151_v17, %v4151_v17  ;;  %v16443_v17 = vld [vmem:[#allocation108_spill] sm:$0xff] }
 0x85a   : > { %v16445_v3 = vpack.c.b16 %v16443_v17, %v16444_v54  ;;  %v4554_v38 = vpack.c.bf16 %v4249_v60, %v4249_v60 }
 0x85b   : > { %v5363_v25 = vunpack.c.l.b16 %v4515_v0 }
 0x85d   : > { %v5388_v19 = vpack.c.b16 %v5363_v25, %v5362_v55  ;;  %v3424_v51 = vpop.f32.mrf.mxu0  ;;  %v5480_v55 = vunpack.c.l.b16 %v4552_v42  ;;  %v5481_v25 = vunpack.c.l.b16 %v4553_v20 }
 0x85e   : > { %v4153_v26 = vpop.f32.mrf.mxu1 }
 0x85f   : > { %4968 = vrot.lane.b32.xlu2 %v16433_v24, %s12955_s26  ;;  %5410 = vrot.lane.b32.xlu0 %v5388_v19, %s12959_s10  ;;  %v4154_v41 = vadd.f32 %v4153_v26, %v3424_v51  ;;  %v16446_v26 = vld [vmem:[#allocation21_spill] sm:$0xff]  ;;  %v16447_v24 = vld [vmem:[#allocation20_spill] sm:$0xff] }
 0x860   : > { %4856 = vrot.lane.b32.xlu1 %v16436_v36, %s12954_s23  ;;  %v14527_v0 = vpop.permute.xlu0 %5290  ;;  %v16448_v12 = vpack.c.b16 %v16446_v26, %v16447_v24  ;;  %v3521_v36 = vpop.f32.mrf.mxu2  ;;  %v16453_v26 = vld [vmem:[#allocation109_spill] sm:$0xff] }
 0x861   : > { %v4516_v61 = vpack.c.bf16 %v4154_v41, %v4154_v41  ;;  %v5289_v20 = vpop.permute.xlu1 %5288 }
 0x862   : > { %v5545_v13 = vsel %vm5542_vm3, %v16448_v12, %v14367_v50  ;;  %v16449_v50 = vld [vmem:[#allocation70_spill] sm:$0xff]  ;;  %v16455_v12 = vld [vmem:[#allocation56_spill] sm:$0xff] }
 0x863   : > { %v5364_v19 = vunpack.c.l.b16 %v4516_v61  ;;  %v5593_v11 = vsel %vm5591_vm2, %v5545_v13, %v14407_v22  ;;  %v5503_v61 = vpack.c.b16 %v5481_v25, %v5480_v55  ;;  %v4251_v22 = vadd.f32 %v4250_v18, %v3521_v36  ;;  %v16456_v13 = vld [vmem:[#allocation55_spill] sm:$0xff]  ;;  %v16459_v18 = vld [vmem:[#allocation30_spill] sm:$0xff] }
 0x864   : > { %v5626_v42 = vsel %vm5624_vm4, %v5593_v11, %v14435_v21  ;;  %v16458_v36 = vld [vmem:[#allocation31_spill] sm:$0xff] }
 0x865   : > { %v3426_v47 = vpop.f32.mrf.mxu0  ;;  %v4555_v54 = vpack.c.bf16 %v4251_v22, %v4251_v22  ;;  %v16460_v11 = vpack.c.b16 %v16458_v36, %v16459_v18  ;;  %v16466_v22 = vld [vmem:[#allocation22_spill] sm:$0xff] }
 0x866   : > { %v4155_v40 = vpop.f32.mrf.mxu1 }
 0x867   : > { %v4156_v33 = vadd.f32 %v4155_v40, %v3426_v47  ;;  %5304 = vrot.lane.b32.xlu2 %v16439_v30, %s12958_s2  ;;  %5080 = vrot.lane.b32.xlu0 %v16442_v14, %s12956_s28  ;;  %v16451_v30 = vpack.c.b16 %v16449_v50, %v16450_v1  ;;  %v5483_v25 = vunpack.c.l.b16 %v4555_v54  ;;  %v16464_v1 = vld [vmem:[#allocation136_spill] sm:$0xff] }
 0x868   : > { %5192 = vrot.lane.b32.xlu1 %v16445_v3, %s12957_s1 }
 0x869   : > { %v4517_v15 = vpack.c.bf16 %v4156_v33, %v4156_v33  ;;  %v14529_v34 = vpop.permute.xlu2 %5400  ;;  %v5659_v33 = vsel %vm5657_vm6, %v5626_v42, %v5063_v16  ;;  %v14557_v3 = vpop.permute.xlu1 %5294  ;;  %v16462_v42 = vld [vmem:[#allocation81_spill] sm:$0xff] }
 0x86a   : > { %v5692_v52 = vsel %vm5690_vm5, %v5659_v33, %v14437_v8 }
 0x86b   : > { %v5365_v51 = vunpack.c.l.b16 %v4517_v15  ;;  %v5725_v21 = vsel %vm5723_vm7, %v5692_v52, %v14471_v7  ;;  %v5482_v15 = vunpack.c.l.b16 %v4554_v38 }
 0x86d   : > { %v5389_v41 = vpack.c.b16 %v5365_v51, %v5364_v19  ;;  %v3429_v47 = vpop.f32.mrf.mxu0  ;;  %v16452_v51 = vld [vmem:[#allocation110_spill] sm:$0xff] }
 0x86e   : > { %v4158_v40 = vpop.f32.mrf.mxu1  ;;  %v16454_v24 = vpack.c.b16 %v16452_v51, %v16453_v26 }
 0x86f   : > { %4858 = vrot.lane.b32.xlu0 %v16451_v30, %s12954_s23  ;;  %5412 = vrot.lane.b32.xlu2 %v5389_v41, %s12959_s10  ;;  %v4159_v14 = vadd.f32 %v4158_v40, %v3429_v47  ;;  %v5560_v41 = vsel %vm5542_vm3, %v16460_v11, %v14397_v44  ;;  %v16461_v47 = vld [vmem:[#allocation82_spill] sm:$0xff]  ;;  %v16465_v30 = vld [vmem:[#allocation23_spill] sm:$0xff] }
 0x870   : > { %5528 = vrot.lane.b32.xlu1 %v5503_v61, %s12952_s18  ;;  %v16463_v40 = vpack.c.b16 %v16461_v47, %v16462_v42  ;;  %v5603_v61 = vsel %vm5591_vm2, %v5560_v41, %v14356_v45  ;;  %v16467_v52 = vpack.c.b16 %v16465_v30, %v16466_v22  ;;  %v16472_v42 = vld [vmem:[#allocation83_spill] sm:$0xff] }
 0x871   : > { %v5399_v32 = vpop.permute.xlu0 %5398  ;;  %v14551_v16 = vpop.permute.xlu2 %5520  ;;  %v4518_v55 = vpack.c.bf16 %v4159_v14, %v4159_v14  ;;  %v16478_v30 = vld [vmem:[#allocation123_spill] sm:$0xff] }
 0x872   : > { %v5758_v48 = vsel %vm5756_vm8, %v5725_v21, %v5399_v32  ;;  %v5548_v21 = vsel %vm5542_vm3, %v16467_v52, %v16464_v1  ;;  %v3524_v32 = vpop.f32.mrf.mxu2  ;;  %v16477_v1 = vld [vmem:[#allocation124_spill] sm:$0xff] }
 0x873   : > { %v5791_v17 = vsel %vm5789_vm10, %v5758_v48, %v14339_v56  ;;  %v16457_v56 = vpack.c.b16 %v16455_v12, %v16456_v13  ;;  %v4253_v48 = vpop.f32.mrf.mxu3  ;;  %v5595_v38 = vsel %vm5591_vm2, %v5548_v21, %v14427_v49  ;;  %v5366_v14 = vunpack.c.l.b16 %v4518_v55  ;;  %v16468_v49 = vld [vmem:[#allocation96_spill] sm:$0xff]  ;;  %v16469_v55 = vld [vmem:[#allocation95_spill] sm:$0xff] }
 0x874   : > { %11365 = vmatmul.msk.bf16.vlgmr.msrb.gmra.mxu2 %vm5841_vm9, %v5791_v17  ;;  %v5504_v17 = vpack.c.b16 %v5483_v25, %v5482_v15  ;;  %v5628_v54 = vsel %vm5624_vm4, %v5595_v38, %v14447_v53  ;;  %v16470_v15 = vpack.c.b16 %v16468_v49, %v16469_v55  ;;  %v14602_v25 = vpop.permute.xlu1 %5072  ;;  %v4254_v11 = vadd.f32 %v4253_v48, %v3524_v32 }
 0x875   : > { %v3431_v8 = vpop.f32.mrf.mxu0  ;;  %v16479_v22 = vpack.c.b16 %v16477_v1, %v16478_v30  ;;  %v16492_v1 = vld [vmem:[#allocation135_spill] sm:$0xff] }
 0x876   : > { %v4160_v7 = vpop.f32.mrf.mxu1  ;;  %v4556_v38 = vpack.c.bf16 %v4254_v11, %v4254_v11  ;;  %v16487_v11 = vld [vmem:[#allocation111_spill] sm:$0xff] }
 0x877   : > { %v4161_v19 = vadd.f32 %v4160_v7, %v3431_v8  ;;  %5194 = vrot.lane.b32.xlu0 %v16454_v24, %s12957_s1  ;;  %4746 = vrot.lane.b32.xlu2 %v16457_v56, %s12953_s22  ;;  %v5661_v8 = vsel %vm5657_vm6, %v5628_v54, %v14399_v23 }
 0x878   : > { %4970 = vrot.lane.b32.xlu1 %v16463_v40, %s12955_s26  ;;  %v5694_v51 = vsel %vm5690_vm5, %v5661_v8, %v14496_v46 }
 0x879   : > { %v4519_v33 = vpack.c.bf16 %v4161_v19, %v4161_v19  ;;  %v4961_v60 = vpop.permute.xlu0 %4960  ;;  %v14578_v50 = vpop.permute.xlu2 %4962  ;;  %v5727_v24 = vsel %vm5723_vm7, %v5694_v51, %v5289_v20 }
 0x87a   : > { %v14586_v44 = vsel %vm5624_vm4, %v5603_v61, %v4961_v60  ;;  %v5760_v23 = vsel %vm5756_vm8, %v5727_v24, %v14529_v34  ;;  %v3526_v13 = vpop.f32.mrf.mxu2  ;;  %v16471_v34 = vld [vmem:[#allocation84_spill] sm:$0xff] }
 0x87b   : > { %v5367_v45 = vunpack.c.l.b16 %v4519_v33  ;;  %v5793_v20 = vsel %vm5789_vm10, %v5760_v23, %v14326_v10  ;;  %v4255_v56 = vpop.f32.mrf.mxu3  ;;  %v16473_v40 = vpack.c.b16 %v16471_v34, %v16472_v42  ;;  %v16474_v61 = vld [vmem:[#allocation72_spill] sm:$0xff]  ;;  %v16475_v33 = vld [vmem:[#allocation71_spill] sm:$0xff]  ;;  %v16490_v34 = vld [vmem:[#allocation57_spill] sm:$0xff] }
 0x87c   : > { %v16476_v60 = vpack.c.b16 %v16474_v61, %v16475_v33  ;;  %v4256_v10 = vadd.f32 %v4255_v56, %v3526_v13  ;;  %v4851_v48 = vpop.permute.xlu1 %4850  ;;  %v16484_v24 = vld [vmem:[#allocation24_spill] sm:$0xff]  ;;  %v5484_v56 = vunpack.c.l.b16 %v4556_v38  ;;  %v16493_v38 = vld [vmem:[#allocation126_spill] sm:$0xff] }
 0x87d   : > { %v5390_v7 = vpack.c.b16 %v5367_v45, %v5366_v14  ;;  %v3434_v19 = vpop.f32.mrf.mxu0  ;;  %v16480_v14 = vld [vmem:[#allocation33_spill] sm:$0xff]  ;;  %v16481_v45 = vld [vmem:[#allocation32_spill] sm:$0xff] }
 0x87e   : > { %v4163_v26 = vpop.f32.mrf.mxu1  ;;  %v4557_v51 = vpack.c.bf16 %v4256_v10, %v4256_v10 }
 0x87f   : > { %5530 = vrot.lane.b32.xlu0 %v5504_v17, %s12952_s18  ;;  %5082 = vrot.lane.b32.xlu2 %v16470_v15, %s12956_s28  ;;  %v4164_v12 = vadd.f32 %v4163_v26, %v3434_v19  ;;  %v16482_v17 = vpack.c.b16 %v16480_v14, %v16481_v45  ;;  %v16483_v26 = vld [vmem:[#allocation25_spill] sm:$0xff]  ;;  %v16496_v45 = vld [vmem:[#allocation98_spill] sm:$0xff] }
 0x880   : > { %5414 = vrot.lane.b32.xlu1 %v5390_v7, %s12959_s10  ;;  %v16485_v49 = vpack.c.b16 %v16483_v26, %v16484_v24 }
 0x881   : > { %v14607_v53 = vpop.permute.xlu0 %5296  ;;  %v14609_v46 = vpop.permute.xlu2 %5298  ;;  %v4520_v41 = vpack.c.bf16 %v4164_v12, %v4164_v12 }
 0x882   : > { %v5551_v55 = vsel %vm5542_vm3, %v16485_v49, %v14369_v27 }
 0x883   : > { %v5368_v8 = vunpack.c.l.b16 %v4520_v41  ;;  %v5597_v12 = vsel %vm5591_vm2, %v5551_v55, %v14343_v39 }
 0x884   : > { %11366 = vmatmul.msk.bf16.gmra.mxu2 %vm5841_vm9, %v5793_v20  ;;  %v5630_v13 = vsel %vm5624_vm4, %v5597_v12, %v14463_v57 }
 0x885   : > { %v3436_v36 = vpop.f32.mrf.mxu0  ;;  %v5663_v27 = vsel %vm5657_vm6, %v5630_v13, %v14498_v28 }
 0x886   : > { %v4165_v18 = vpop.f32.mrf.mxu1  ;;  %v5696_v57 = vsel %vm5690_vm5, %v5663_v27, %v14449_v4  ;;  %v3529_v4 = vpop.f32.mrf.mxu2 }
 0x887   : > { %v4166_v47 = vadd.f32 %v4165_v18, %v3436_v36  ;;  %4972 = vrot.lane.b32.xlu0 %v16473_v40, %s12955_s26  ;;  %4860 = vrot.lane.b32.xlu2 %v16476_v60, %s12954_s23  ;;  %v5485_v36 = vunpack.c.l.b16 %v4557_v51  ;;  %v16486_v18 = vld [vmem:[#allocation112_spill] sm:$0xff]  ;;  %v5729_v61 = vsel %vm5723_vm7, %v5696_v57, %v14527_v0  ;;  %v16494_v0 = vld [vmem:[#allocation125_spill] sm:$0xff]  ;;  %v16500_v51 = vld [vmem:[#allocation34_spill] sm:$0xff] }
 0x888   : > { %5306 = vrot.lane.b32.xlu1 %v16479_v22, %s12958_s2  ;;  %v16488_v41 = vpack.c.b16 %v16486_v18, %v16487_v11  ;;  %v16495_v14 = vpack.c.b16 %v16493_v38, %v16494_v0  ;;  %v16505_v57 = vld [vmem:[#allocation60_spill] sm:$0xff] }
 0x889   : > { %v4521_v52 = vpack.c.bf16 %v4166_v47, %v4166_v47  ;;  %v4739_v21 = vpop.permute.xlu0 %4738  ;;  %v4741_v32 = vpop.permute.xlu2 %4740  ;;  %v16489_v47 = vld [vmem:[#allocation58_spill] sm:$0xff]  ;;  %v5505_v28 = vpack.c.b16 %v5485_v36, %v5484_v56  ;;  %v16502_v56 = vld [vmem:[#allocation27_spill] sm:$0xff] }
 0x88a   : > { %v5563_v54 = vsel %vm5542_vm3, %v16482_v17, %v4739_v21  ;;  %v16491_v39 = vpack.c.b16 %v16489_v47, %v16490_v34  ;;  %v16497_v17 = vld [vmem:[#allocation97_spill] sm:$0xff]  ;;  %v16503_v36 = vld [vmem:[#allocation26_spill] sm:$0xff] }
 0x88b   : > { %v5369_v7 = vunpack.c.l.b16 %v4521_v52  ;;  %v14631_v19 = vsel %vm5591_vm2, %v5563_v54, %v4851_v48  ;;  %v16498_v54 = vpack.c.b16 %v16496_v45, %v16497_v17  ;;  %v16504_v18 = vpack.c.b16 %v16502_v56, %v16503_v36  ;;  %v16512_v45 = vld [vmem:[#allocation99_spill] sm:$0xff] }
 0x88d   : > { %v5391_v15 = vpack.c.b16 %v5369_v7, %v5368_v8  ;;  %v3439_v23 = vpop.f32.mrf.mxu0  ;;  %v4258_v8 = vpop.f32.mrf.mxu3  ;;  %v16499_v7 = vld [vmem:[#allocation35_spill] sm:$0xff]  ;;  %v5554_v11 = vsel %vm5542_vm3, %v16504_v18, %v14387_v63 }
 0x88e   : > { %v4168_v20 = vpop.f32.mrf.mxu1  ;;  %v16501_v26 = vpack.c.b16 %v16499_v7, %v16500_v51  ;;  %v16515_v7 = vld [vmem:[#allocation85_spill] sm:$0xff]  ;;  %v4259_v56 = vadd.f32 %v4258_v8, %v3529_v4 }
 0x88f   : > { %5196 = vrot.lane.b32.xlu2 %v16488_v41, %s12957_s1  ;;  %5416 = vrot.lane.b32.xlu0 %v5391_v15, %s12959_s10  ;;  %v4169_v60 = vadd.f32 %v4168_v20, %v3439_v23  ;;  %v5599_v41 = vsel %vm5591_vm2, %v5554_v11, %v14409_v29  ;;  %v16508_v29 = vld [vmem:[#allocation74_spill] sm:$0xff] }
 0x890   : > { %4748 = vrot.lane.b32.xlu1 %v16491_v39, %s12953_s22  ;;  %v5566_v24 = vsel %vm5542_vm3, %v16501_v26, %v4741_v32  ;;  %v5632_v47 = vsel %vm5624_vm4, %v5599_v41, %v14371_v62  ;;  %v3531_v62 = vpop.f32.mrf.mxu2  ;;  %v16517_v26 = vld [vmem:[#allocation114_spill] sm:$0xff]  ;;  %v16520_v41 = vld [vmem:[#allocation29_spill] sm:$0xff] }
 0x891   : > { %v14655_v42 = vpop.permute.xlu0 %5074  ;;  %v14657_v40 = vpop.permute.xlu2 %5076  ;;  %v4522_v21 = vpack.c.bf16 %v4169_v60, %v4169_v60  ;;  %v5665_v39 = vsel %vm5657_vm6, %v5632_v47, %v14483_v58  ;;  %v16509_v60 = vld [vmem:[#allocation73_spill] sm:$0xff] }
 0x892   : > { %v5403_v33 = vpop.permute.xlu1 %5402  ;;  %v5698_v63 = vsel %vm5690_vm5, %v5665_v39, %v14513_v5 }
 0x893   : > { %v5762_v10 = vsel %vm5756_vm8, %v5729_v61, %v5403_v33  ;;  %v5370_v20 = vunpack.c.l.b16 %v4522_v21  ;;  %v16506_v61 = vld [vmem:[#allocation59_spill] sm:$0xff] }
 0x894   : > { %v5795_v30 = vsel %vm5789_vm10, %v5762_v10, %v16492_v1  ;;  %v16507_v33 = vpack.c.b16 %v16505_v57, %v16506_v61  ;;  %v16510_v10 = vpack.c.b16 %v16508_v29, %v16509_v60 }
 0x895   : > { %11367 = vmatmul.msk.bf16.gmra.mxu2 %vm5841_vm9, %v5795_v30  ;;  %v3441_v22 = vpop.f32.mrf.mxu0 }
 0x896   : > { %v4170_v52 = vpop.f32.mrf.mxu1 }
 0x897   : > { %v4171_v48 = vadd.f32 %v4170_v52, %v3441_v22  ;;  %5532 = vrot.lane.b32.xlu2 %v5505_v28, %s12952_s18  ;;  %5308 = vrot.lane.b32.xlu0 %v16495_v14, %s12958_s2  ;;  %v5731_v28 = vsel %vm5723_vm7, %v5698_v63, %v14485_v37  ;;  %v4260_v52 = vpop.f32.mrf.mxu3  ;;  %v16511_v37 = vld [vmem:[#allocation100_spill] sm:$0xff]  ;;  %v4558_v63 = vpack.c.bf16 %v4259_v56, %v4259_v56  ;;  %v16534_v56 = vld [vmem:[#allocation61_spill] sm:$0xff] }
 0x898   : > { %5084 = vrot.lane.b32.xlu1 %v16498_v54, %s12956_s28  ;;  %v16513_v17 = vpack.c.b16 %v16511_v37, %v16512_v45  ;;  %v16514_v54 = vld [vmem:[#allocation86_spill] sm:$0xff]  ;;  %v4261_v36 = vadd.f32 %v4260_v52, %v3531_v62  ;;  %v16524_v62 = vld [vmem:[#allocation75_spill] sm:$0xff] }
 0x899   : > { %v4523_v49 = vpack.c.bf16 %v4171_v48, %v4171_v48  ;;  %v4853_v55 = vpop.permute.xlu0 %4852  ;;  %v5407_v15 = vpop.permute.xlu2 %5406  ;;  %v16516_v51 = vpack.c.b16 %v16514_v54, %v16515_v7 }
 0x89a   : > { %v14679_v23 = vsel %vm5591_vm2, %v5566_v24, %v4853_v55  ;;  %v14681_v12 = vpop.permute.xlu1 %5186  ;;  %v16518_v24 = vld [vmem:[#allocation113_spill] sm:$0xff]  ;;  %v4559_v29 = vpack.c.bf16 %v4261_v36, %v4261_v36 }
 0x89b   : > { %v5371_v13 = vunpack.c.l.b16 %v4523_v49  ;;  %v3534_v49 = vpop.f32.mrf.mxu2 }
 0x89d   : > { %v5392_v32 = vpack.c.b16 %v5371_v13, %v5370_v20  ;;  %v3444_v27 = vpop.f32.mrf.mxu0 }
 0x89e   : > { %v4173_v34 = vpop.f32.mrf.mxu1 }
 0x89f   : > { %4750 = vrot.lane.b32.xlu0 %v16507_v33, %s12953_s22  ;;  %5418 = vrot.lane.b32.xlu2 %v5392_v32, %s12959_s10  ;;  %v4174_v21 = vadd.f32 %v4173_v34, %v3444_v27  ;;  %v4263_v11 = vpop.f32.mrf.mxu3  ;;  %v16521_v32 = vld [vmem:[#allocation28_spill] sm:$0xff] }
 0x8a0   : > { %4862 = vrot.lane.b32.xlu1 %v16510_v10, %s12954_s23  ;;  %v16522_v27 = vpack.c.b16 %v16520_v41, %v16521_v32 }
 0x8a1   : > { %v5405_v58 = vpop.permute.xlu0 %5404  ;;  %v14707_v1 = vpop.permute.xlu2 %4854  ;;  %v4524_v0 = vpack.c.bf16 %v4174_v21, %v4174_v21  ;;  %v5486_v21 = vunpack.c.l.b16 %v4558_v63 }
 0x8a2   : > { %v14709_v30 = vpop.permute.xlu1 %5522  ;;  %v5764_v22 = vsel %vm5756_vm8, %v5731_v28, %v5405_v58  ;;  %v5557_v47 = vsel %vm5542_vm3, %v16522_v27, %v14328_v9  ;;  %v16523_v9 = vld [vmem:[#allocation76_spill] sm:$0xff]  ;;  %v16527_v58 = vld [vmem:[#allocation127_spill] sm:$0xff] }
 0x8a3   : > { %v5797_v5 = vsel %vm5789_vm10, %v5764_v22, %v14354_v59  ;;  %v16519_v59 = vpack.c.b16 %v16517_v26, %v16518_v24  ;;  %v5372_v34 = vunpack.c.l.b16 %v4524_v0  ;;  %v5601_v57 = vsel %vm5591_vm2, %v5557_v47, %v14445_v35  ;;  %v16526_v35 = vld [vmem:[#allocation128_spill] sm:$0xff]  ;;  %v16529_v0 = vld [vmem:[#allocation137_spill] sm:$0xff]  ;;  %v3536_v37 = vpop.f32.mrf.mxu2  ;;  %v16531_v24 = vld [vmem:[#allocation115_spill] sm:$0xff] }
 0x8a4   : > { %v5634_v61 = vsel %vm5624_vm4, %v5601_v57, %v14469_v6  ;;  %v16525_v28 = vpack.c.b16 %v16523_v9, %v16524_v62  ;;  %v16528_v6 = vpack.c.b16 %v16526_v35, %v16527_v58  ;;  %v16530_v26 = vld [vmem:[#allocation116_spill] sm:$0xff] }
 0x8a5   : > { %11368 = vmatmul.msk.bf16.gmra.mxu2 %vm5841_vm9, %v5797_v5  ;;  %v3446_v48 = vpop.f32.mrf.mxu0  ;;  %v5667_v8 = vsel %vm5657_vm6, %v5634_v61, %v14411_v31  ;;  %v5487_v5 = vunpack.c.l.b16 %v4559_v29  ;;  %v16539_v62 = vld [vmem:[#allocation88_spill] sm:$0xff] }
 0x8a6   : > { %v4175_v38 = vpop.f32.mrf.mxu1  ;;  %v5700_v10 = vsel %vm5690_vm5, %v5667_v8, %v14509_v2 }
 0x8a7   : > { %v4176_v14 = vadd.f32 %v4175_v38, %v3446_v48  ;;  %5086 = vrot.lane.b32.xlu0 %v16513_v17, %s12956_s28  ;;  %4974 = vrot.lane.b32.xlu2 %v16516_v51, %s12955_s26  ;;  %v5733_v22 = vsel %vm5723_vm7, %v5700_v10, %v14557_v3  ;;  %v4265_v45 = vpop.f32.mrf.mxu3  ;;  %v4264_v17 = vadd.f32 %v4263_v11, %v3534_v49  ;;  %v16537_v10 = vld [vmem:[#allocation101_spill] sm:$0xff] }
 0x8a8   : > { %5198 = vrot.lane.b32.xlu1 %v16519_v59, %s12957_s1  ;;  %v5766_v31 = vsel %vm5756_vm8, %v5733_v22, %v5407_v15  ;;  %v5506_v15 = vpack.c.b16 %v5487_v5, %v5486_v21  ;;  %v16532_v59 = vpack.c.b16 %v16530_v26, %v16531_v24  ;;  %v4266_v41 = vadd.f32 %v4265_v45, %v3536_v37 }
 0x8a9   : > { %v4525_v55 = vpack.c.bf16 %v4176_v14, %v4176_v14  ;;  %v14727_v20 = vpop.permute.xlu0 %5188  ;;  %v14729_v13 = vpop.permute.xlu2 %5190  ;;  %v5799_v14 = vsel %vm5789_vm10, %v5766_v31, %v16529_v0 }
 0x8aa   : > { %v14731_v18 = vpop.permute.xlu1 %4964  ;;  %v4561_v57 = vpack.c.bf16 %v4266_v41, %v4266_v41 }
 0x8ab   : > { %v5373_v39 = vunpack.c.l.b16 %v4525_v55  ;;  %v16533_v55 = vld [vmem:[#allocation62_spill] sm:$0xff]  ;;  %v3539_v58 = vpop.f32.mrf.mxu2 }
 0x8ac   : > { %v16535_v36 = vpack.c.b16 %v16533_v55, %v16534_v56  ;;  %v5489_v29 = vunpack.c.l.b16 %v4561_v57 }
 0x8ad   : > { %v5393_v33 = vpack.c.b16 %v5373_v39, %v5372_v34  ;;  %v3449_v4 = vpop.f32.mrf.mxu0  ;;  %v4560_v34 = vpack.c.bf16 %v4264_v17, %v4264_v17  ;;  %v16542_v17 = vld [vmem:[#allocation78_spill] sm:$0xff] }
 0x8ae   : > { %v4178_v60 = vpop.f32.mrf.mxu1 }
 0x8af   : > { %4864 = vrot.lane.b32.xlu0 %v16525_v28, %s12954_s23  ;;  %5310 = vrot.lane.b32.xlu2 %v16528_v6, %s12958_s2  ;;  %v4179_v38 = vadd.f32 %v4178_v60, %v3449_v4  ;;  %v5669_v4 = vsel %vm5657_vm6, %v14586_v44, %v14602_v25  ;;  %v5488_v63 = vunpack.c.l.b16 %v4560_v34  ;;  %v16536_v60 = vld [vmem:[#allocation102_spill] sm:$0xff]  ;;  %v16540_v28 = vld [vmem:[#allocation87_spill] sm:$0xff]  ;;  %v4268_v21 = vpop.f32.mrf.mxu3 }
 0x8b0   : > { %5420 = vrot.lane.b32.xlu1 %v5393_v33, %s12959_s10  ;;  %v16538_v9 = vpack.c.b16 %v16536_v60, %v16537_v10  ;;  %v16541_v35 = vpack.c.b16 %v16539_v62, %v16540_v28  ;;  %v5702_v6 = vsel %vm5690_vm5, %v5669_v4, %v14511_v43  ;;  %v16548_v4 = vld [vmem:[#allocation90_spill] sm:$0xff] }
 0x8b1   : > { %v14758_v52 = vpop.permute.xlu0 %5524  ;;  %v14760_v2 = vpop.permute.xlu2 %5526  ;;  %v4526_v7 = vpack.c.bf16 %v4179_v38, %v4179_v38  ;;  %v5735_v22 = vsel %vm5723_vm7, %v5702_v6, %v14607_v53  ;;  %v5507_v0 = vpack.c.b16 %v5489_v29, %v5488_v63  ;;  %v16545_v53 = vld [vmem:[#allocation130_spill] sm:$0xff]  ;;  %v16552_v29 = vld [vmem:[#allocation63_spill] sm:$0xff] }
 0x8b2   : > { %v14762_v48 = vpop.permute.xlu1 %5300 }
 0x8b3   : > { %v5374_v47 = vunpack.c.l.b16 %v4526_v7  ;;  %v16546_v7 = vld [vmem:[#allocation129_spill] sm:$0xff]  ;;  %v3541_v41 = vpop.f32.mrf.mxu2 }
 0x8b5   : > { %11369 = vmatmul.msk.bf16.gmra.mxu2 %vm5841_vm9, %v5799_v14  ;;  %v3451_v3 = vpop.f32.mrf.mxu0 }
 0x8b6   : > { %v4180_v54 = vpop.f32.mrf.mxu1 }
 0x8b7   : > { %v4181_v51 = vadd.f32 %v4180_v54, %v3451_v3  ;;  %5200 = vrot.lane.b32.xlu0 %v16532_v59, %s12957_s1  ;;  %4752 = vrot.lane.b32.xlu2 %v16535_v36, %s12953_s22  ;;  %v16543_v54 = vld [vmem:[#allocation77_spill] sm:$0xff]  ;;  %v5638_v36 = vsel %vm5624_vm4, %v14631_v19, %v14578_v50  ;;  %v16551_v19 = vld [vmem:[#allocation64_spill] sm:$0xff] }
 0x8b8   : > { %5534 = vrot.lane.b32.xlu1 %v5506_v15, %s12952_s18  ;;  %v16544_v15 = vpack.c.b16 %v16542_v17, %v16543_v54  ;;  %v16553_v60 = vpack.c.b16 %v16551_v19, %v16552_v29  ;;  %v16561_v17 = vld [vmem:[#allocation103_spill] sm:$0xff]  ;;  %v16568_v29 = vld [vmem:[#allocation38_spill] sm:$0xff] }
 0x8b9   : > { %v4527_v32 = vpack.c.bf16 %v4181_v51, %v4181_v51  ;;  %v14776_v27 = vpop.permute.xlu0 %4966  ;;  %v14778_v49 = vpop.permute.xlu2 %4968  ;;  %v16547_v51 = vpack.c.b16 %v16545_v53, %v16546_v7 }
 0x8ba   : > { %v14780_v11 = vpop.permute.xlu1 %4742 }
 0x8bb   : > { %v5375_v39 = vunpack.c.l.b16 %v4527_v32  ;;  %v4270_v32 = vpop.f32.mrf.mxu3 }
 0x8bc   : > { %v4271_v50 = vadd.f32 %v4270_v32, %v3541_v41 }
 0x8bd   : > { %v5394_v61 = vpack.c.b16 %v5375_v39, %v5374_v47  ;;  %v3454_v33 = vpop.f32.mrf.mxu0  ;;  %v5671_v47 = vsel %vm5657_vm6, %v5638_v36, %v14655_v42 }
 0x8be   : > { %v4183_v8 = vpop.f32.mrf.mxu1  ;;  %v5704_v57 = vsel %vm5690_vm5, %v5671_v47, %v14681_v12  ;;  %v4563_v6 = vpack.c.bf16 %v4271_v50, %v4271_v50  ;;  %v3544_v47 = vpop.f32.mrf.mxu2 }
 0x8bf   : > { %5088 = vrot.lane.b32.xlu2 %v16538_v9, %s12956_s28  ;;  %5422 = vrot.lane.b32.xlu0 %v5394_v61, %s12959_s10  ;;  %v4184_v5 = vadd.f32 %v4183_v8, %v3454_v33  ;;  %v4269_v33 = vadd.f32 %v4268_v21, %v3539_v58  ;;  %v16549_v8 = vld [vmem:[#allocation89_spill] sm:$0xff]  ;;  %v5737_v42 = vsel %vm5723_vm7, %v5704_v57, %v14609_v46 }
 0x8c0   : > { %4976 = vrot.lane.b32.xlu1 %v16541_v35, %s12955_s26  ;;  %v16550_v63 = vpack.c.b16 %v16548_v4, %v16549_v8 }
 0x8c1   : > { %v14796_v44 = vpop.permute.xlu0 %5302  ;;  %v14798_v25 = vpop.permute.xlu2 %5304  ;;  %v4528_v45 = vpack.c.bf16 %v4184_v5, %v4184_v5  ;;  %v4562_v35 = vpack.c.bf16 %v4269_v33, %v4269_v33  ;;  %v16566_v33 = vld [vmem:[#allocation39_spill] sm:$0xff] }
 0x8c2   : > { %v5409_v31 = vpop.permute.xlu1 %5408 }
 0x8c3   : > { %v5768_v38 = vsel %vm5756_vm8, %v5735_v22, %v5409_v31  ;;  %v5376_v55 = vunpack.c.l.b16 %v4528_v45  ;;  %v5490_v5 = vunpack.c.l.b16 %v4562_v35  ;;  %v16558_v45 = vld [vmem:[#allocation117_spill] sm:$0xff] }
 0x8c4   : > { %v5801_v14 = vsel %vm5789_vm10, %v5768_v38, %v14551_v16  ;;  %v5491_v38 = vunpack.c.l.b16 %v4563_v6  ;;  %v16573_v6 = vld [vmem:[#allocation105_spill] sm:$0xff] }
 0x8c5   : > { %11370 = vmatmul.msk.bf16.gmra.mxu2 %vm5841_vm9, %v5801_v14  ;;  %v3456_v37 = vpop.f32.mrf.mxu0  ;;  %v16555_v14 = vld [vmem:[#allocation131_spill] sm:$0xff] }
 0x8c6   : > { %v4185_v43 = vpop.f32.mrf.mxu1  ;;  %v5508_v36 = vpack.c.b16 %v5491_v38, %v5490_v5 }
 0x8c7   : > { %v4186_v3 = vadd.f32 %v4185_v43, %v3456_v37  ;;  %4866 = vrot.lane.b32.xlu2 %v16544_v15, %s12954_s23  ;;  %5536 = vrot.lane.b32.xlu0 %v5507_v0, %s12952_s18  ;;  %v16554_v0 = vld [vmem:[#allocation132_spill] sm:$0xff]  ;;  %v16557_v43 = vld [vmem:[#allocation118_spill] sm:$0xff]  ;;  %v5640_v15 = vsel %vm5624_vm4, %v14679_v23, %v14731_v18  ;;  %v16564_v18 = vld [vmem:[#allocation65_spill] sm:$0xff] }
 0x8c8   : > { %5312 = vrot.lane.b32.xlu1 %v16547_v51, %s12958_s2  ;;  %v16556_v37 = vpack.c.b16 %v16554_v0, %v16555_v14  ;;  %v5673_v41 = vsel %vm5657_vm6, %v5640_v15, %v14657_v40  ;;  %v16563_v23 = vld [vmem:[#allocation66_spill] sm:$0xff]  ;;  %v16567_v40 = vld [vmem:[#allocation40_spill] sm:$0xff] }
 0x8c9   : > { %v4529_v26 = vpack.c.bf16 %v4186_v3, %v4186_v3  ;;  %v14815_v16 = vpop.permute.xlu0 %4744  ;;  %v5413_v24 = vpop.permute.xlu2 %5412  ;;  %v16559_v3 = vpack.c.b16 %v16557_v43, %v16558_v45  ;;  %v16565_v57 = vpack.c.b16 %v16563_v23, %v16564_v18  ;;  %v4196_v4 = vadd.f32 %v16567_v40, %v16566_v33  ;;  %v16588_v33 = vld [vmem:[#allocation41_spill] sm:$0xff] }
 0x8ca   : > { %v14817_v59 = vpop.permute.xlu1 %5078 }
 0x8cb   : > { %v5377_v56 = vunpack.c.l.b16 %v4529_v26 }
 0x8cd   : > { %v5395_v34 = vpack.c.b16 %v5377_v56, %v5376_v55  ;;  %v3459_v39 = vpop.f32.mrf.mxu0 }
 0x8ce   : > { %v4188_v61 = vpop.f32.mrf.mxu1 }
 0x8cf   : > { %4978 = vrot.lane.b32.xlu0 %v16550_v63, %s12955_s26  ;;  %5424 = vrot.lane.b32.xlu2 %v5395_v34, %s12959_s10  ;;  %v4189_v28 = vadd.f32 %v4188_v61, %v3459_v39  ;;  %v4273_v34 = vpop.f32.mrf.mxu3  ;;  %v5706_v39 = vsel %vm5690_vm5, %v5673_v41, %v14727_v20 }
 0x8d0   : > { %4754 = vrot.lane.b32.xlu1 %v16553_v60, %s12953_s22  ;;  %v5739_v61 = vsel %vm5723_vm7, %v5706_v39, %v14762_v48  ;;  %v4532_v60 = vpack.c.bf16 %v16568_v29, %v16568_v29  ;;  %v16569_v48 = vld [vmem:[#allocation37_spill] sm:$0xff]  ;;  %v4274_v43 = vadd.f32 %v4273_v34, %v3544_v47 }
 0x8d1   : > { %v5411_v10 = vpop.permute.xlu0 %5410  ;;  %v14837_v12 = vpop.permute.xlu2 %4746  ;;  %v4530_v21 = vpack.c.bf16 %v4189_v28, %v4189_v28  ;;  %v5772_v8 = vsel %vm5756_vm8, %v5739_v61, %v5413_v24  ;;  %v16587_v61 = vld [vmem:[#allocation42_spill] sm:$0xff] }
 0x8d2   : > { %v14839_v9 = vpop.permute.xlu1 %4856  ;;  %v5770_v62 = vsel %vm5756_vm8, %v5737_v42, %v5411_v10  ;;  %v5805_v19 = vsel %vm5789_vm10, %v5772_v8, %v14758_v52  ;;  %v4533_v42 = vpack.c.bf16 %v4196_v4, %v4196_v4  ;;  %v16570_v10 = vld [vmem:[#allocation36_spill] sm:$0xff]  ;;  %v3546_v24 = vpop.f32.mrf.mxu2  ;;  %v5380_v0 = vunpack.c.l.b16 %v4532_v60 }
 0x8d3   : > { %v5803_v58 = vsel %vm5789_vm10, %v5770_v62, %v14709_v30  ;;  %v16560_v30 = vld [vmem:[#allocation104_spill] sm:$0xff]  ;;  %v5378_v55 = vunpack.c.l.b16 %v4530_v21  ;;  %v16571_v62 = vpack.c.b16 %v16569_v48, %v16570_v10  ;;  %v4564_v15 = vpack.c.bf16 %v4274_v43, %v4274_v43 }
 0x8d4   : > { %v16562_v54 = vpack.c.b16 %v16560_v30, %v16561_v17  ;;  %v16575_v52 = vld [vmem:[#allocation92_spill] sm:$0xff]  ;;  %v5381_v14 = vunpack.c.l.b16 %v4533_v42  ;;  %v16589_v40 = vpack.c.b16 %v16587_v61, %v16588_v33  ;;  %v14945_v42 = vld [vmem:[%s12993_s17] ss:$0 sm:$0xff] }
 0x8d5   : > { %11371 = vmatmul.msk.bf16.gmra.mxu2 %vm5841_vm9, %v5803_v58  ;;  %v3461_v22 = vpop.f32.mrf.mxu0  ;;  %v5569_v28 = vsel %vm5542_vm3, %v16571_v62, %v14780_v11  ;;  %v16572_v58 = vld [vmem:[#allocation106_spill] sm:$0xff]  ;;  %v16579_v11 = vld [vmem:[#allocation79_spill] sm:$0xff]  ;;  %v5492_v34 = vunpack.c.l.b16 %v4564_v15 }
 0x8d6   : > { %v4190_v31 = vpop.f32.mrf.mxu1  ;;  %v5609_v5 = vsel %vm5591_vm2, %v5569_v28, %v14707_v1  ;;  %v5572_v4 = vsel %vm5542_vm3, %v16589_v40, %v14815_v16 }
 0x8d7   : > { %v4191_v46 = vadd.f32 %v4190_v31, %v3461_v22  ;;  %5314 = vrot.lane.b32.xlu0 %v16556_v37, %s12958_s2  ;;  %5202 = vrot.lane.b32.xlu2 %v16559_v3, %s12957_s1  ;;  %v4275_v35 = vpop.f32.mrf.mxu3  ;;  %v16574_v22 = vpack.c.b16 %v16572_v58, %v16573_v6  ;;  %v16576_v31 = vld [vmem:[#allocation91_spill] sm:$0xff]  ;;  %v5642_v30 = vsel %vm5624_vm4, %v5609_v5, %v14776_v27  ;;  %v16584_v27 = vld [vmem:[#allocation120_spill] sm:$0xff] }
 0x8d8   : > { %5090 = vrot.lane.b32.xlu1 %v16562_v54, %s12956_s28  ;;  %v16577_v21 = vpack.c.b16 %v16575_v52, %v16576_v31  ;;  %v4276_v45 = vadd.f32 %v4275_v35, %v3546_v24  ;;  %v5675_v17 = vsel %vm5657_vm6, %v5642_v30, %v14817_v59  ;;  %v5397_v54 = vpack.c.b16 %v5381_v14, %v5380_v0 }
 0x8d9   : > { %v4531_v53 = vpack.c.bf16 %v4191_v46, %v4191_v46  ;;  %v14860_v7 = vpop.permute.xlu0 %5080  ;;  %v14864_v26 = vpop.permute.xlu2 %5082  ;;  %v16578_v46 = vld [vmem:[#allocation80_spill] sm:$0xff] }
 0x8da   : > { %v14862_v51 = vpop.permute.xlu1 %5192  ;;  %v16580_v38 = vpack.c.b16 %v16578_v46, %v16579_v11  ;;  %v4565_v1 = vpack.c.bf16 %v4276_v45, %v4276_v45 }
 0x8db   : > { %v5379_v56 = vunpack.c.l.b16 %v4531_v53 }
 0x8dc   : > { %v5493_v39 = vunpack.c.l.b16 %v4565_v1 }
 0x8dd   : > { %v5396_v32 = vpack.c.b16 %v5379_v56, %v5378_v55  ;;  %v5708_v55 = vsel %vm5690_vm5, %v5675_v17, %v14729_v13  ;;  %v16581_v56 = vld [vmem:[#allocation134_spill] sm:$0xff] }
 0x8de   : > { %v5741_v23 = vsel %vm5723_vm7, %v5708_v55, %v14796_v44  ;;  %v5509_v8 = vpack.c.b16 %v5493_v39, %v5492_v34 }
 0x8df   : > { %4756 = vrot.lane.b32.xlu0 %v16565_v57, %s12953_s22  ;;  %5538 = vrot.lane.b32.xlu2 %v5508_v36, %s12952_s18  ;;  %v16582_v36 = vld [vmem:[#allocation133_spill] sm:$0xff]  ;;  %s12966_s22 = smov 96  }
 0x8e0   : > { %5426 = vrot.lane.b32.xlu1 %v5396_v32, %s12959_s10  ;;  %v16583_v41 = vpack.c.b16 %v16581_v56, %v16582_v36  ;;  %v16585_v32 = vld [vmem:[#allocation119_spill] sm:$0xff]  ;;  %v16593_v36 = vld [vmem:[#allocation46_spill] sm:$0xff] }
 0x8e1   : > { %v14881_v63 = vpop.permute.xlu0 %4858  ;;  %v14883_v50 = vpop.permute.xlu2 %4860  ;;  %v16586_v47 = vpack.c.b16 %v16584_v27, %v16585_v32 }
 0x8e2   : > { %v5529_v20 = vpop.permute.xlu1 %5528 }
 0x8e5   : > { %11372 = vmatmul.msk.bf16.gmra.mxu2 %vm5841_vm9, %v5805_v19  ;;  %v5611_v19 = vsel %vm5591_vm2, %v5572_v4, %v14839_v9 }
 0x8e7   : > { %5092 = vrot.lane.b32.xlu0 %v16574_v22, %s12956_s28  ;;  %4980 = vrot.lane.b32.xlu2 %v16577_v21, %s12955_s26  ;;  %v16591_v21 = vld [vmem:[#allocation43_spill] sm:$0xff]  ;;  %s16628_s26 = sld [smem:[#allocation6_spill]] }
 0x8e8   : > { %4868 = vrot.lane.b32.xlu1 %v16580_v38, %s12954_s23  ;;  %s12967_s23 = smov 112   ;;  %s16629_s28 = sld [smem:[#allocation4_spill]] }
 0x8e9   : > { %v5195_v37 = vpop.permute.xlu0 %5194  ;;  %v14913_v53 = vpop.permute.xlu2 %5196 }
 0x8ea   : > { %v4971_v3 = vpop.permute.xlu1 %4970 }
 0x8ef   : > { %5428 = vrot.lane.b32.xlu0 %v5397_v54, %s12959_s10  ;;  %5316 = vrot.lane.b32.xlu2 %v16583_v41, %s12958_s2  ;;  %v16594_v41 = vld [vmem:[#allocation45_spill] sm:$0xff]  ;;  %s16631_s2 = sld [smem:[#allocation8_spill]] }
 0x8f0   : > { %5204 = vrot.lane.b32.xlu1 %v16586_v47, %s12957_s1  ;;  %s16630_s1 = sld [smem:[#allocation5_spill]] }
 0x8f1   : > { %v5531_v59 = vpop.permute.xlu0 %5530  ;;  %v14939_v44 = vpop.permute.xlu2 %5532  ;;  %s16632_s10 = sld [smem:[#allocation3_spill]] }
 0x8f2   : > { %v5415_v13 = vpop.permute.xlu1 %5414 }
 0x8f3   : > { %v5774_v18 = vsel %vm5756_vm8, %v5741_v23, %v5415_v13 }
 0x8f4   : > { %v5807_v57 = vsel %vm5789_vm10, %v5774_v18, %v14760_v2  ;;  %v5644_v2 = vsel %vm5624_vm4, %v5611_v19, %v14778_v49 }
 0x8f5   : > { %11373 = vmatmul.msk.bf16.gmra.mxu2 %vm5841_vm9, %v5807_v57  ;;  %v5677_v10 = vsel %vm5657_vm6, %v5644_v2, %v14860_v7 }
 0x8f6   : > { %v5710_v16 = vsel %vm5690_vm5, %v5677_v10, %v14862_v51  ;;  %v16590_v51 = vld [vmem:[#allocation44_spill] sm:$0xff] }
 0x8f7   : > { %v5890_v29 = vpop.f32.mrf.mxu2  ;;  %v5743_v24 = vsel %vm5723_vm7, %v5710_v16, %v14798_v25  ;;  %v16592_v5 = vpack.c.b16 %v16590_v51, %v16591_v21 }
 0x8f8   : > { %5540 = vrot.lane.b32.xlu1 %v5509_v8, %s12952_s18  ;;  %v5891_v9 = vadd.f32 %v14945_v42, %v5890_v29  ;;  %s12965_s18 = smov 80  }
 0x8f9   : > { %v4973_v60 = vpop.permute.xlu0 %4972  ;;  %v5419_v49 = vpop.permute.xlu2 %5418  ;;  %v5575_v46 = vsel %vm5542_vm3, %v16592_v5, %v14837_v12 }
 0x8fa   : > { %v5307_v48 = vpop.permute.xlu1 %5306  ;;  %v5970_v58 = vmax.f32 %v5891_v9, 0.0  ;;  %v5613_v25 = vsel %vm5591_vm2, %v5575_v46, %v14881_v63 }
 0x8fb   : > { %v5646_v11 = vsel %vm5624_vm4, %v5613_v25, %v4971_v3 }
 0x8ff   : > { %v5892_v62 = vpop.f32.mrf.mxu2 }
 0x900   : > { %v5893_v28 = vadd.f32 %v14945_v42, %v5892_v62 }
 0x901   : > { %v5417_v35 = vpop.permute.xlu0 %5416  ;;  %v4975_v43 = vpop.permute.xlu2 %4974 }
 0x902   : > { %v5971_v6 = vmax.f32 %v5893_v28, 0.0  ;;  %v4749_v22 = vpop.permute.xlu1 %4748  ;;  %v5776_v52 = vsel %vm5756_vm8, %v5743_v24, %v5417_v35 }
 0x903   : > { %v5809_v7 = vsel %vm5789_vm10, %v5776_v52, %v5529_v20  ;;  %v5679_v20 = vsel %vm5657_vm6, %v5646_v11, %v14864_v26 }
 0x904   : > { %v14957_v31 = vpack.c.bf16 %v5971_v6, %v5970_v58  ;;  %v5712_v45 = vsel %vm5690_vm5, %v5679_v20, %v5195_v37  ;;  %v16595_v37 = vpack.c.b16 %v16593_v36, %v16594_v41  ;;  %v16599_v20 = vld [vmem:[#allocation50_spill] sm:$0xff] }
 0x905   : > { %11374 = vmatmul.msk.bf16.gmra.mxu2 %vm5841_vm9, %v5809_v7  ;;  %v5745_v30 = vsel %vm5723_vm7, %v5712_v45, %v5307_v48  ;;  %v16597_v48 = vld [vmem:[#allocation47_spill] sm:$0xff] }
 0x906   : > { %v5778_v63 = vsel %vm5756_vm8, %v5745_v30, %v5419_v49  ;;  %v5578_v27 = vsel %vm5542_vm3, %v16595_v37, %v4749_v22 }
 0x907   : > { %v5895_v38 = vpop.f32.mrf.mxu2  ;;  %v5811_v56 = vsel %vm5789_vm10, %v5778_v63, %v5531_v59  ;;  %v5615_v47 = vsel %vm5591_vm2, %v5578_v27, %v14883_v50 }
 0x908   : > { %v5896_v12 = vadd.f32 %v14945_v42, %v5895_v38  ;;  %v5648_v13 = vsel %vm5624_vm4, %v5615_v47, %v4973_v60  ;;  %v16596_v60 = vld [vmem:[#allocation48_spill] sm:$0xff] }
 0x909   : > { %v5309_v0 = vpop.permute.xlu0 %5308  ;;  %v5311_v32 = vpop.permute.xlu2 %5310  ;;  %v16598_v10 = vpack.c.b16 %v16596_v60, %v16597_v48  ;;  %v16602_v47 = vld [vmem:[#allocation52_spill] sm:$0xff] }
 0x90a   : > { %v5085_v14 = vpop.permute.xlu1 %5084  ;;  %v5972_v3 = vmax.f32 %v5896_v12, 0.0 }
 0x90b   : > { %v5681_v59 = vsel %vm5657_vm6, %v5648_v13, %v5085_v14  ;;  %v16600_v14 = vld [vmem:[#allocation49_spill] sm:$0xff] }
 0x90c   : > { %v5714_v18 = vsel %vm5690_vm5, %v5681_v59, %v14913_v53 }
 0x90d   : > { %v5747_v8 = vsel %vm5723_vm7, %v5714_v18, %v5309_v0 }
 0x90f   : > { %v5897_v17 = vpop.f32.mrf.mxu2 }
 0x910   : > { %v5898_v54 = vadd.f32 %v14945_v42, %v5897_v17 }
 0x911   : > { %v4751_v15 = vpop.permute.xlu0 %4750  ;;  %v4753_v61 = vpop.permute.xlu2 %4752 }
 0x912   : > { %v5973_v1 = vmax.f32 %v5898_v54, 0.0  ;;  %v4863_v55 = vpop.permute.xlu1 %4862  ;;  %v5581_v16 = vsel %vm5542_vm3, %v16598_v10, %v4751_v15 }
 0x913   : > { %v5617_v62 = vsel %vm5591_vm2, %v5581_v16, %v4863_v55 }
 0x914   : > { %v14976_v26 = vpack.c.bf16 %v5973_v1, %v5972_v3  ;;  %v5650_v35 = vsel %vm5624_vm4, %v5617_v62, %v4975_v43  ;;  %v16601_v43 = vpack.c.b16 %v16599_v20, %v16600_v14  ;;  %v16605_v62 = vld [vmem:[#allocation54_spill] sm:$0xff] }
 0x915   : > { %11375 = vmatmul.msk.bf16.gmra.mxu2 %vm5841_vm9, %v5811_v56 }
 0x916   : > { %v5584_v45 = vsel %vm5542_vm3, %v16601_v43, %v4753_v61 }
 0x918   : > { %v5900_v34 = vpop.f32.mrf.mxu2 }
 0x919   : > { %v5087_v39 = vpop.permute.xlu0 %5086  ;;  %v5901_v57 = vadd.f32 %v14945_v42, %v5900_v34  ;;  %v5089_v58 = vpop.permute.xlu2 %5088  ;;  %v16603_v34 = vld [vmem:[#allocation51_spill] sm:$0xff] }
 0x91a   : > { %v5199_v23 = vpop.permute.xlu1 %5198  ;;  %v5683_v6 = vsel %vm5657_vm6, %v5650_v35, %v5087_v39  ;;  %v16604_v39 = vpack.c.b16 %v16602_v47, %v16603_v34 }
 0x91b   : > { %v5974_v19 = vmax.f32 %v5901_v57, 0.0  ;;  %v5716_v22 = vsel %vm5690_vm5, %v5683_v6, %v5199_v23 }
 0x91c   : > { %v5749_v51 = vsel %vm5723_vm7, %v5716_v22, %v5311_v32 }
 0x920   : > { %v5902_v33 = vpop.f32.mrf.mxu2 }
 0x921   : > { %v5903_v40 = vadd.f32 %v14945_v42, %v5902_v33  ;;  %v4865_v4 = vpop.permute.xlu0 %4864  ;;  %v4867_v0 = vpop.permute.xlu2 %4866 }
 0x922   : > { %v5421_v50 = vpop.permute.xlu1 %5420  ;;  %v5619_v12 = vsel %vm5591_vm2, %v5584_v45, %v4865_v4 }
 0x923   : > { %v5975_v29 = vmax.f32 %v5903_v40, 0.0  ;;  %v5780_v2 = vsel %vm5756_vm8, %v5747_v8, %v5421_v50 }
 0x924   : > { %v5813_v53 = vsel %vm5789_vm10, %v5780_v2, %v14939_v44 }
 0x925   : > { %11376 = vmatmul.msk.bf16.gmra.mxu2 %vm5841_vm9, %v5813_v53  ;;  %v15000_v9 = vpack.c.bf16 %v5975_v29, %v5974_v19 }
 0x928   : > { %v5905_v28 = vpop.f32.mrf.mxu2 }
 0x929   : > { %v5201_v24 = vpop.permute.xlu0 %5200  ;;  %v5906_v52 = vadd.f32 %v14945_v42, %v5905_v28  ;;  %v5425_v55 = vpop.permute.xlu2 %5424  ;;  %v16606_v28 = vld [vmem:[#allocation53_spill] sm:$0xff] }
 0x92a   : > { %v5535_v49 = vpop.permute.xlu1 %5534 }
 0x92b   : > { %v5976_v25 = vmax.f32 %v5906_v52, 0.0 }
 0x930   : > { %v5907_v7 = vpop.f32.mrf.mxu2 }
 0x931   : > { %v5908_v44 = vadd.f32 %v14945_v42, %v5907_v7  ;;  %v5423_v21 = vpop.permute.xlu0 %5422  ;;  %v5203_v13 = vpop.permute.xlu2 %5202 }
 0x932   : > { %v4977_v5 = vpop.permute.xlu1 %4976  ;;  %v5782_v46 = vsel %vm5756_vm8, %v5749_v51, %v5423_v21 }
 0x933   : > { %v5977_v11 = vmax.f32 %v5908_v44, 0.0  ;;  %v5815_v38 = vsel %vm5789_vm10, %v5782_v46, %v5535_v49  ;;  %v5652_v17 = vsel %vm5624_vm4, %v5619_v12, %v4977_v5 }
 0x934   : > { %v5685_v15 = vsel %vm5657_vm6, %v5652_v17, %v5089_v58 }
 0x935   : > { %11377 = vmatmul.msk.bf16.gmra.mxu2 %vm5841_vm9, %v5815_v38  ;;  %v15016_v30 = vpack.c.bf16 %v5977_v11, %v5976_v25  ;;  %v5718_v1 = vsel %vm5690_vm5, %v5685_v15, %v5201_v24  ;;  %v16607_v24 = vpack.c.b16 %v16605_v62, %v16606_v28 }
 0x938   : > { %v15020_v54 = vpop.f32.mrf.mxu2 }
 0x939   : > { %v5537_v63 = vpop.permute.xlu0 %5536  ;;  %v5539_v50 = vpop.permute.xlu2 %5538 }
 0x93a   : > { %v5313_v3 = vpop.permute.xlu1 %5312 }
 0x93b   : > { %v5751_v56 = vsel %vm5723_vm7, %v5718_v1, %v5313_v3 }
 0x93c   : > { %v5784_v41 = vsel %vm5756_vm8, %v5751_v56, %v5425_v55 }
 0x93d   : > { %v5817_v32 = vsel %vm5789_vm10, %v5784_v41, %v5537_v63 }
 0x940   : > { %v5912_v36 = vpop.f32.mrf.mxu2 }
 0x941   : > { %v4979_v37 = vpop.permute.xlu0 %4978  ;;  %v4981_v53 = vpop.permute.xlu2 %4980  ;;  %v5913_v41 = vadd.f32 %v14945_v42, %v5912_v36 }
 0x942   : > { %v4755_v27 = vpop.permute.xlu1 %4754 }
 0x943   : > { %v5587_v23 = vsel %vm5542_vm3, %v16604_v39, %v4755_v27  ;;  %v5979_v34 = vmax.f32 %v5913_v41, 0.0 }
 0x944   : > { %v5621_v59 = vsel %vm5591_vm2, %v5587_v23, %v4867_v0 }
 0x945   : > { %11378 = vmatmul.msk.bf16.gmra.mxu2 %vm5841_vm9, %v5817_v32  ;;  %v5654_v61 = vsel %vm5624_vm4, %v5621_v59, %v4979_v37  ;;  %v5911_v32 = vadd.f32 %v14945_v42, %v15020_v54 }
 0x947   : > { %v5978_v23 = vmax.f32 %v5911_v32, 0.0 }
 0x948   : > { %v5915_v18 = vpop.f32.mrf.mxu2 }
 0x949   : > { %v5315_v33 = vpop.permute.xlu0 %5314  ;;  %v5317_v51 = vpop.permute.xlu2 %5316  ;;  %v5916_v1 = vadd.f32 %v14945_v42, %v5915_v18  ;;  %v15074_v59 = vpack.c.bf16 %v5979_v34, %v5978_v23  ;;  %v11399_v34 = vld [vmem:[%s12998_s21 + $0x20] sm:$0xf]  ;;  %v12619_v23 = vld [vmem:[%s12998_s21 + $0x24] sm:$0xf0] }
 0x94a   : > { %v5091_v57 = vpop.permute.xlu1 %5090 }
 0x94b   : > { %v5687_v40 = vsel %vm5657_vm6, %v5654_v61, %v5091_v57  ;;  %v5980_v47 = vmax.f32 %v5916_v1, 0.0 }
 0x94c   : > { %v5720_v4 = vsel %vm5690_vm5, %v5687_v40, %v5203_v13 }
 0x94d   : > { %v5753_v19 = vsel %vm5723_vm7, %v5720_v4, %v5315_v33 }
 0x950   : > { %v5917_v8 = vpop.f32.mrf.mxu2 }
 0x951   : > { %v4757_v48 = vpop.permute.xlu0 %4756  ;;  %v5918_v63 = vadd.f32 %v14945_v42, %v5917_v8 }
 0x952   : > { %v5427_v29 = vpop.permute.xlu1 %5426  ;;  %v5590_v35 = vsel %vm5542_vm3, %v16607_v24, %v4757_v48  ;;  %v12615_v48 = vld [vmem:[%s12998_s21 + $0x4] sm:$0xf0] }
 0x953   : > { %v5786_v2 = vsel %vm5756_vm8, %v5753_v19, %v5427_v29  ;;  %v5981_v37 = vmax.f32 %v5918_v63, 0.0 }
 0x954   : > { %v5819_v60 = vsel %vm5789_vm10, %v5786_v2, %v5539_v50 }
 0x955   : > { %11379 = vmatmul.msk.bf16.gmra.mxu2 %vm5841_vm9, %v5819_v60  ;;  %v15069_v39 = vpack.c.bf16 %v5981_v37, %v5980_v47  ;;  %v11383_v60 = vld [vmem:[%s12998_s21] sm:$0xf] }
 0x958   : > { %v5920_v10 = vpop.f32.mrf.mxu2 }
 0x959   : > { %v5093_v49 = vpop.permute.xlu0 %5092  ;;  %v5921_v45 = vadd.f32 %v14945_v42, %v5920_v10  ;;  %v11384_v10 = vor.u32 %v12615_v48, %v11383_v60  ;;  %v12616_v60 = vld [vmem:[%s12998_s21 + $0x14] sm:$0xf]  ;;  %v11393_v48 = vld [vmem:[%s12998_s21 + $0x18] sm:$0xf0] }
 0x95a   : > { %v4869_v16 = vpop.permute.xlu1 %4868 }
 0x95b   : > { %v5623_v58 = vsel %vm5591_vm2, %v5590_v35, %v4869_v16  ;;  %v5982_v55 = vmax.f32 %v5921_v45, 0.0 }
 0x95c   : > { %v5656_v6 = vsel %vm5624_vm4, %v5623_v58, %v4981_v53 }
 0x95d   : > { %v5689_v7 = vsel %vm5657_vm6, %v5656_v6, %v5093_v49 }
 0x960   : > { %v5922_v22 = vpop.f32.mrf.mxu2 }
 0x961   : > { %v5429_v46 = vpop.permute.xlu0 %5428  ;;  %v5923_v14 = vadd.f32 %v14945_v42, %v5922_v22 }
 0x962   : > { %v5205_v52 = vpop.permute.xlu1 %5204 }
 0x963   : > { %v5722_v44 = vsel %vm5690_vm5, %v5689_v7, %v5205_v52  ;;  %v5983_v15 = vmax.f32 %v5923_v14, 0.0 }
 0x964   : > { %v5755_v21 = vsel %vm5723_vm7, %v5722_v44, %v5317_v51  ;;  %v11391_v44 = vld [vmem:[%s12998_s21 + $0x10] sm:$0xf]  ;;  %v12617_v51 = vld [vmem:[%s12998_s21 + $0x14] sm:$0xf0] }
 0x965   : > { %v5788_v25 = vsel %vm5756_vm8, %v5755_v21, %v5429_v46  ;;  %v15064_v27 = vpack.c.bf16 %v5983_v15, %v5982_v55 }
 0x968   : > { %v5925_v5 = vpop.f32.mrf.mxu2 }
 0x969   : > { %v5926_v0 = vadd.f32 %v14945_v42, %v5925_v5 }
 0x96a   : > { %v5541_v11 = vpop.permute.xlu1 %5540 }
 0x96b   : > { %v5821_v38 = vsel %vm5789_vm10, %v5788_v25, %v5541_v11  ;;  %v5984_v12 = vmax.f32 %v5926_v0, 0.0  ;;  %v11392_v25 = vor.u32 %v12617_v51, %v11391_v44  ;;  %v11431_v51 = vld [vmem:[%s12998_s21 + $0x60] sm:$0xf] }
 0x96c   : > { %11380 = vmatmul.msk.bf16.gmra.mxu2 %vm5841_vm9, %v5821_v38 }
 0x970   : > { %v5927_v20 = vpop.f32.mrf.mxu2 }
 0x971   : > { %v5928_v43 = vadd.f32 %v14945_v42, %v5927_v20 }
 0x973   : > { %v5985_v17 = vmax.f32 %v5928_v43, 0.0 }
 0x975   : > { %v15057_v3 = vpack.c.bf16 %v5985_v17, %v5984_v12 }
 0x977   : > { %6450 = vmatpush.bf16.msrb.mxu3 %v15057_v3 }
 0x978   : > { %v15061_v56 = vpop.f32.mrf.mxu2 }
 0x97b   : > { %6451 = vmatpush.bf16.msrb.mxu3 %v15064_v27 }
 0x97f   : > { %6452 = vmatpush.bf16.msrb.mxu3 %v15069_v39 }
 0x980   : > { %v15072_v13 = vpop.f32.mrf.mxu2 }
 0x983   : > { %6453 = vmatpush.bf16.msrb.mxu3 %v15074_v59 }
 0x987   : > { %6454 = vmatpush.bf16.msrb.mxu3 %v15016_v30 }
 0x988   : > { %v5935_v36 = vpop.f32.mrf.mxu2 }
 0x989   : > { %v5936_v32 = vadd.f32 %v14945_v42, %v5935_v36 }
 0x98b   : > { %6455 = vmatpush.bf16.msrb.mxu3 %v15000_v9  ;;  %v5988_v36 = vmax.f32 %v5936_v32, 0.0  ;;  %v11433_v32 = vld [vmem:[%s12998_s21 + $0x68] sm:$0xf0] }
 0x98f   : > { %6456 = vmatpush.bf16.msrb.mxu3 %v14976_v26 }
 0x990   : > { %v5937_v54 = vpop.f32.mrf.mxu2 }
 0x991   : > { %v5938_v55 = vadd.f32 %v14945_v42, %v5937_v54  ;;  %v11400_v54 = vor.u32 %v12619_v23, %v11399_v34 }
 0x993   : > { %6457 = vmatpush.bf16.msrb.mxu3 %v14957_v31 }
 0x996   : > { %6458 = vmatmul.bf16.vlgmr.msrb.gmra.mxu3 %v11384_v10  ;;  %v11396_v10 = vor.u32 %v12616_v60, %v11393_v48 }
 0x998   : > { %v5940_v18 = vpop.f32.mrf.mxu2 }
 0x999   : > { %v5941_v15 = vadd.f32 %v14945_v42, %v5940_v18  ;;  %v5933_v18 = vadd.f32 %v14945_v42, %v15072_v13  ;;  %v12614_v13 = vld [vmem:[%s12998_s21 + $0x4] sm:$0xf] }
 0x99b   : > { %v5990_v47 = vmax.f32 %v5941_v15, 0.0  ;;  %v11447_v15 = vld [vmem:[%s12998_s21 + $0x80] sm:$0xf] }
 0x9a0   : > { %v5942_v57 = vpop.f32.mrf.mxu2 }
 0x9a1   : > { %v5943_v12 = vadd.f32 %v14945_v42, %v5942_v57  ;;  %v5989_v57 = vmax.f32 %v5938_v55, 0.0 }
 0x9a3   : > { %v5991_v41 = vmax.f32 %v5943_v12, 0.0  ;;  %v11425_v12 = vld [vmem:[%s12998_s21 + $0x58] sm:$0xf0] }
 0x9a6   : > { %6463 = vmatmul.bf16.gmra.mxu3 %v11392_v25  ;;  %v12622_v25 = vld [vmem:[%s12998_s21 + $0x44] sm:$0xf] }
 0x9a8   : > { %v5945_v61 = vpop.f32.mrf.mxu2 }
 0x9a9   : > { %v5946_v43 = vadd.f32 %v14945_v42, %v5945_v61  ;;  %v15118_v61 = vpack.c.bf16 %v5991_v41, %v5990_v47  ;;  %v12626_v41 = vld [vmem:[%s12998_s21 + $0x64] sm:$0xf] }
 0x9aa   : > { %v11436_v34 = vor.u32 %v12626_v41, %v11433_v32 }
 0x9ab   : > { %v5992_v1 = vmax.f32 %v5946_v43, 0.0  ;;  %16613 = vst [vmem:[#allocation93_spill] sm:$0xff] %v15118_v61 }
 0x9b0   : > { %v5947_v33 = vpop.f32.mrf.mxu2 }
 0x9b1   : > { %v5948_v0 = vadd.f32 %v14945_v42, %v5947_v33  ;;  %v5931_v33 = vadd.f32 %v14945_v42, %v15061_v56  ;;  %v11407_v56 = vld [vmem:[%s12998_s21 + $0x30] sm:$0xf] }
 0x9b3   : > { %v5993_v17 = vmax.f32 %v5948_v0, 0.0  ;;  %v11439_v0 = vld [vmem:[%s12998_s21 + $0x70] sm:$0xf] }
 0x9b5   : > { %v15110_v37 = vpack.c.bf16 %v5993_v17, %v5992_v1  ;;  %v12631_v1 = vld [vmem:[%s12998_s21 + $0x84] sm:$0xf0] }
 0x9b6   : > { %6468 = vmatmul.bf16.gmra.mxu3 %v11400_v54  ;;  %v11448_v55 = vor.u32 %v12631_v1, %v11447_v15 }
 0x9b7   : > { %16612 = vst [vmem:[#allocation94_spill] sm:$0xff] %v15110_v37 }
 0x9b8   : > { %v5950_v40 = vpop.f32.mrf.mxu2 }
 0x9b9   : > { %v5951_v11 = vadd.f32 %v14945_v42, %v5950_v40  ;;  %v5987_v40 = vmax.f32 %v5933_v18, 0.0  ;;  %v11455_v18 = vld [vmem:[%s12998_s21 + $0x90] sm:$0xf] }
 0x9bb   : > { %v5994_v45 = vmax.f32 %v5951_v11, 0.0  ;;  %v11417_v11 = vld [vmem:[%s12998_s21 + $0x48] sm:$0xf0] }
 0x9c0   : > { %v5952_v4 = vpop.f32.mrf.mxu2 }
 0x9c1   : > { %v5953_v21 = vadd.f32 %v14945_v42, %v5952_v4  ;;  %v15123_v4 = vpack.c.bf16 %v5989_v57, %v5988_v36  ;;  %v12633_v57 = vld [vmem:[%s12998_s21 + $0x94] sm:$0xf0]  ;;  %v11441_v36 = vld [vmem:[%s12998_s21 + $0x78] sm:$0xf0] }
 0x9c2   : > { %v11456_v54 = vor.u32 %v12633_v57, %v11455_v18  ;;  %v11585_v18 = vld [vmem:[%s12998_s21 + $0x198] sm:$0xf0] }
 0x9c3   : > { %v5995_v20 = vmax.f32 %v5953_v21, 0.0  ;;  %16614 = vst [vmem:[#allocation108_spill] sm:$0xff] %v15123_v4  ;;  %v12627_v21 = vld [vmem:[%s12998_s21 + $0x64] sm:$0xf0] }
 0x9c5   : > { %v15105_v63 = vpack.c.bf16 %v5995_v20, %v5994_v45  ;;  %v12629_v20 = vld [vmem:[%s12998_s21 + $0x74] sm:$0xf0]  ;;  %v12624_v45 = vld [vmem:[%s12998_s21 + $0x54] sm:$0xf] }
 0x9c6   : > { %v11440_v43 = vor.u32 %v12629_v20, %v11439_v0  ;;  %v11428_v17 = vor.u32 %v12624_v45, %v11425_v12  ;;  %v11479_v20 = vld [vmem:[%s12998_s21 + $0xc0] sm:$0xf]  ;;  %v12634_v12 = vld [vmem:[%s12998_s21 + $0xa4] sm:$0xf] }
 0x9c7   : > { %16611 = vst [vmem:[#allocation121_spill] sm:$0xff] %v15105_v63 }
 0x9c8   : > { %v5955_v8 = vpop.f32.mrf.mxu2 }
 0x9c9   : > { %v5956_v52 = vadd.f32 %v14945_v42, %v5955_v8  ;;  %v5986_v8 = vmax.f32 %v5931_v33, 0.0  ;;  %v12628_v33 = vld [vmem:[%s12998_s21 + $0x74] sm:$0xf] }
 0x9cb   : > { %v5996_v38 = vmax.f32 %v5956_v52, 0.0  ;;  %v12620_v52 = vld [vmem:[%s12998_s21 + $0x34] sm:$0xf] }
 0x9d0   : > { %v5957_v50 = vpop.f32.mrf.mxu2 }
 0x9d1   : > { %v5958_v49 = vadd.f32 %v14945_v42, %v5957_v50  ;;  %v11385_v50 = vld [vmem:[%s12998_s21 + $0x8] sm:$0xf0] }
 0x9d3   : > { %v5997_v5 = vmax.f32 %v5958_v49, 0.0  ;;  %v12625_v49 = vld [vmem:[%s12998_s21 + $0x54] sm:$0xf0] }
 0x9d5   : > { %v15100_v14 = vpack.c.bf16 %v5997_v5, %v5996_v38  ;;  %v11432_v5 = vor.u32 %v12627_v21, %v11431_v51  ;;  %v11420_v38 = vor.u32 %v12622_v25, %v11417_v11 }
 0x9d7   : > { %16610 = vst [vmem:[#allocation122_spill] sm:$0xff] %v15100_v14 }
 0x9d8   : > { %v5960_v19 = vpop.f32.mrf.mxu2 }
 0x9d9   : > { %v5961_v24 = vadd.f32 %v14945_v42, %v5960_v19  ;;  %v15128_v19 = vpack.c.bf16 %v5987_v40, %v5986_v8  ;;  %v11444_v8 = vor.u32 %v12628_v33, %v11441_v36  ;;  %v11487_v36 = vld [vmem:[%s12998_s21 + $0xd0] sm:$0xf] }
 0x9db   : > { %v5998_v7 = vmax.f32 %v5961_v24, 0.0  ;;  %16615 = vst [vmem:[#allocation107_spill] sm:$0xff] %v15128_v19  ;;  %v11401_v24 = vld [vmem:[%s12998_s21 + $0x28] sm:$0xf0] }
 0x9e0   : > { %v5962_v29 = vpop.f32.mrf.mxu2 }
 0x9e1   : > { %v5963_v62 = vadd.f32 %v14945_v42, %v5962_v29  ;;  %v12621_v29 = vld [vmem:[%s12998_s21 + $0x34] sm:$0xf0] }
 0x9e3   : > { %v5999_v6 = vmax.f32 %v5963_v62, 0.0 }
 0x9e5   : > { %v15095_v46 = vpack.c.bf16 %v5999_v6, %v5998_v7  ;;  %v11409_v7 = vld [vmem:[%s12998_s21 + $0x38] sm:$0xf0] }
 0x9e6   : > { %v11412_v44 = vor.u32 %v12620_v52, %v11409_v7 }
 0x9e7   : > { %16609 = vst [vmem:[#allocation67_spill] sm:$0xff] %v15095_v46 }
 0x9ef   : > { %v5965_v2 = vpop.f32.mrf.mxu2 }
 0x9f0   : > { %v5966_v16 = vadd.f32 %v14945_v42, %v5965_v2  ;;  %v11408_v2 = vor.u32 %v12621_v29, %v11407_v56  ;;  %v12630_v29 = vld [vmem:[%s12998_s21 + $0x84] sm:$0xf] }
 0x9f2   : > { %v6000_v35 = vmax.f32 %v5966_v16, 0.0  ;;  %6473 = vmatmul.bf16.gmra.mxu3 %v11408_v2  ;;  %v11415_v16 = vld [vmem:[%s12998_s21 + $0x40] sm:$0xf]  ;;  %v11449_v2 = vld [vmem:[%s12998_s21 + $0x88] sm:$0xf0] }
 0x9f3   : > { %v11452_v48 = vor.u32 %v12630_v29, %v11449_v2 }
 0x9f7   : > { %v5967_v53 = vpop.f32.mrf.mxu2 }
 0x9f8   : > { %v5968_v28 = vadd.f32 %v14945_v42, %v5967_v53  ;;  %v11388_v42 = vor.u32 %v12614_v13, %v11385_v50  ;;  %v12623_v53 = vld [vmem:[%s12998_s21 + $0x44] sm:$0xf0]  ;;  %v11463_v50 = vld [vmem:[%s12998_s21 + $0xa0] sm:$0xf] }
 0x9f9   : > { %v11416_v62 = vor.u32 %v12623_v53, %v11415_v16 }
 0x9fa   : > { %v6001_v58 = vmax.f32 %v5968_v28, 0.0  ;;  %v12618_v28 = vld [vmem:[%s12998_s21 + $0x24] sm:$0xf] }
 0x9fc   : > { %v15088_v22 = vpack.c.bf16 %v6001_v58, %v6000_v35  ;;  %v11404_v35 = vor.u32 %v12618_v28, %v11401_v24  ;;  %v11423_v58 = vld [vmem:[%s12998_s21 + $0x50] sm:$0xf]  ;;  %v12637_v28 = vld [vmem:[%s12998_s21 + $0xb4] sm:$0xf0] }
 0x9fd   : > { %v11424_v6 = vor.u32 %v12625_v49, %v11423_v58  ;;  %v11457_v58 = vld [vmem:[%s12998_s21 + $0x98] sm:$0xf0] }
 0x9fe   : > { %16608 = vst [vmem:[#allocation68_spill] sm:$0xff] %v15088_v22  ;;  %6639 = vmatpush.bf16.msra.mxu2 %v15088_v22 }
 0xa02   : > { %6640 = vmatpush.bf16.msra.mxu2 %v15095_v46  ;;  %6478 = vmatmul.bf16.gmra.mxu3 %v11416_v62  ;;  %v11471_v62 = vld [vmem:[%s12998_s21 + $0xb0] sm:$0xf] }
 0xa03   : > { %v11472_v24 = vor.u32 %v12637_v28, %v11471_v62 }
 0xa06   : > { %6641 = vmatpush.bf16.msra.mxu2 %v15100_v14 }
 0xa0a   : > { %6642 = vmatpush.bf16.msra.mxu2 %v15105_v63 }
 0xa0e   : > { %6643 = vmatpush.bf16.msra.mxu2 %v15110_v37 }
 0xa12   : > { %6644 = vmatpush.bf16.msra.mxu2 %v15118_v61  ;;  %6483 = vmatmul.bf16.gmra.mxu3 %v11424_v6 }
 0xa16   : > { %6645 = vmatpush.bf16.msra.mxu2 %v15123_v4 }
 0xa19   : > { %v6459_v47 = vpop.f32.mrf.mxu3 }
 0xa1a   : > { %6646 = vmatpush.bf16.msra.mxu2 %v15128_v19 }
 0xa1d   : > { %6647 = vmatmul.bf16.vlgmr.msra.gmra.mxu2 %v11388_v42  ;;  %v12635_v42 = vld [vmem:[%s12998_s21 + $0xa4] sm:$0xf0] }
 0xa1e   : > { %v11464_v56 = vor.u32 %v12635_v42, %v11463_v50  ;;  %v12636_v50 = vld [vmem:[%s12998_s21 + $0xb4] sm:$0xf] }
 0xa21   : > { %v6461_v23 = vpop.f32.mrf.mxu3 }
 0xa22   : > { %6488 = vmatmul.bf16.gmra.mxu3 %v11432_v5 }
 0xa29   : > { %v6464_v40 = vpop.f32.mrf.mxu3 }
 0xa2d   : > { %6652 = vmatmul.bf16.gmra.mxu2 %v11396_v10 }
 0xa31   : > { %v6466_v13 = vpop.f32.mrf.mxu3 }
 0xa32   : > { %6493 = vmatmul.bf16.gmra.mxu3 %v11440_v43  ;;  %v12639_v43 = vld [vmem:[%s12998_s21 + $0xc4] sm:$0xf0] }
 0xa33   : > { %v11480_v45 = vor.u32 %v12639_v43, %v11479_v20 }
 0xa39   : > { %v6469_v60 = vpop.f32.mrf.mxu3 }
 0xa3d   : > { %6657 = vmatmul.bf16.gmra.mxu2 %v11404_v35  ;;  %v12632_v35 = vld [vmem:[%s12998_s21 + $0x94] sm:$0xf] }
 0xa41   : > { %v6471_v16 = vpop.f32.mrf.mxu3 }
 0xa42   : > { %6498 = vmatmul.bf16.gmra.mxu3 %v11448_v55 }
 0xa4d   : > { %6662 = vmatmul.bf16.gmra.mxu2 %v11412_v44  ;;  %v11460_v44 = vor.u32 %v12632_v35, %v11457_v58  ;;  %v11495_v58 = vld [vmem:[%s12998_s21 + $0xe0] sm:$0xf] }
 0xa52   : > { %6503 = vmatmul.bf16.gmra.mxu3 %v11456_v54 }
 0xa5d   : > { %6667 = vmatmul.bf16.gmra.mxu2 %v11420_v38 }
 0xa62   : > { %6508 = vmatmul.bf16.gmra.mxu3 %v11464_v56 }
 0xa6d   : > { %6672 = vmatmul.bf16.gmra.mxu2 %v11428_v17  ;;  %v11465_v17 = vld [vmem:[%s12998_s21 + $0xa8] sm:$0xf0] }
 0xa6e   : > { %v11468_v32 = vor.u32 %v12634_v12, %v11465_v17 }
 0xa72   : > { %6513 = vmatmul.bf16.gmra.mxu3 %v11472_v24 }
 0xa75   : > { %v6474_v6 = vpop.f32.mrf.mxu3 }
 0xa7d   : > { %6677 = vmatmul.bf16.gmra.mxu2 %v11436_v34  ;;  %v6476_v38 = vpop.f32.mrf.mxu3 }
 0xa82   : > { %6518 = vmatmul.bf16.gmra.mxu3 %v11480_v45 }
 0xa85   : > { %v6479_v1 = vpop.f32.mrf.mxu3 }
 0xa8d   : > { %6682 = vmatmul.bf16.gmra.mxu2 %v11444_v8  ;;  %v6481_v54 = vpop.f32.mrf.mxu3 }
 0xa95   : > { %v6484_v56 = vpop.f32.mrf.mxu3 }
 0xa9d   : > { %6687 = vmatmul.bf16.gmra.mxu2 %v11452_v48  ;;  %v6486_v24 = vpop.f32.mrf.mxu3 }
 0xaa0   : > { %v6648_v10 = vpop.f32.mrf.mxu2 }
 0xaa1   : > { %v6649_v53 = vadd.f32 %v6648_v10, %v6459_v47 }
 0xaa3   : > { %v6828_v52 = vpack.c.bf16 %v6649_v53, %v6649_v53 }
 0xaa5   : > { %v15167_v21 = vunpack.c.l.b16 %v6828_v52 }
 0xaa8   : > { %v6650_v49 = vpop.f32.mrf.mxu2 }
 0xaa9   : > { %v6651_v7 = vadd.f32 %v6650_v49, %v6461_v23  ;;  %v12643_v49 = vld [vmem:[%s12998_s21 + $0xe4] sm:$0xf0] }
 0xaaa   : > { %v11496_v52 = vor.u32 %v12643_v49, %v11495_v58  ;;  %v12642_v49 = vld [vmem:[%s12998_s21 + $0xe4] sm:$0xf] }
 0xaab   : > { %v6829_v51 = vpack.c.bf16 %v6651_v7, %v6651_v7  ;;  %v11481_v7 = vld [vmem:[%s12998_s21 + $0xc8] sm:$0xf0] }
 0xaad   : > { %v15169_v5 = vunpack.c.l.b16 %v6829_v51  ;;  %6692 = vmatmul.bf16.gmra.mxu2 %v11460_v44  ;;  %v6489_v51 = vpop.f32.mrf.mxu3 }
 0xab0   : > { %v6653_v11 = vpop.f32.mrf.mxu2 }
 0xab1   : > { %v6654_v0 = vadd.f32 %v6653_v11, %v6464_v40  ;;  %v12641_v40 = vld [vmem:[%s12998_s21 + $0xd4] sm:$0xf0] }
 0xab2   : > { %v11488_v8 = vor.u32 %v12641_v40, %v11487_v36 }
 0xab3   : > { %v6830_v55 = vpack.c.bf16 %v6654_v0, %v6654_v0 }
 0xab4   : > { %6523 = vmatmul.bf16.gmra.mxu3 %v11488_v8 }
 0xab5   : > { %v15177_v34 = vunpack.c.l.b16 %v6830_v55  ;;  %v11503_v55 = vld [vmem:[%s12998_s21 + $0xf0] sm:$0xf] }
 0xab8   : > { %v6655_v15 = vpop.f32.mrf.mxu2 }
 0xab9   : > { %v6656_v41 = vadd.f32 %v6655_v15, %v6466_v13  ;;  %v11473_v13 = vld [vmem:[%s12998_s21 + $0xb8] sm:$0xf0]  ;;  %v6491_v15 = vpop.f32.mrf.mxu3 }
 0xaba   : > { %v11476_v48 = vor.u32 %v12636_v50, %v11473_v13 }
 0xabb   : > { %v6831_v47 = vpack.c.bf16 %v6656_v41, %v6656_v41  ;;  %v12645_v41 = vld [vmem:[%s12998_s21 + $0xf4] sm:$0xf0] }
 0xabd   : > { %v15179_v23 = vunpack.c.l.b16 %v6831_v47  ;;  %6697 = vmatmul.bf16.gmra.mxu2 %v11468_v32  ;;  %v11504_v32 = vor.u32 %v12645_v41, %v11503_v55 }
 0xac0   : > { %v6658_v57 = vpop.f32.mrf.mxu2 }
 0xac1   : > { %v6659_v33 = vadd.f32 %v6658_v57, %v6469_v60  ;;  %v12640_v57 = vld [vmem:[%s12998_s21 + $0xd4] sm:$0xf]  ;;  %v6494_v36 = vpop.f32.mrf.mxu3 }
 0xac3   : > { %v6832_v29 = vpack.c.bf16 %v6659_v33, %v6659_v33 }
 0xac4   : > { %6528 = vmatmul.bf16.gmra.mxu3 %v11496_v52 }
 0xac5   : > { %v15187_v53 = vunpack.c.l.b16 %v6832_v29 }
 0xac8   : > { %v6660_v42 = vpop.f32.mrf.mxu2 }
 0xac9   : > { %v6661_v2 = vadd.f32 %v6660_v42, %v6471_v16  ;;  %v12638_v16 = vld [vmem:[%s12998_s21 + $0xc4] sm:$0xf] }
 0xaca   : > { %v11484_v20 = vor.u32 %v12638_v16, %v11481_v7 }
 0xacb   : > { %v6833_v10 = vpack.c.bf16 %v6661_v2, %v6661_v2 }
 0xacd   : > { %v15189_v62 = vunpack.c.l.b16 %v6833_v10  ;;  %6702 = vmatmul.bf16.gmra.mxu2 %v11476_v48  ;;  %v6496_v10 = vpop.f32.mrf.mxu3 }
 0xad0   : > { %v6663_v28 = vpop.f32.mrf.mxu2 }
 0xad1   : > { %v6664_v35 = vadd.f32 %v6663_v28, %v6474_v6  ;;  %v12647_v28 = vld [vmem:[%s12998_s21 + $0x104] sm:$0xf0] }
 0xad3   : > { %v6834_v11 = vpack.c.bf16 %v6664_v35, %v6664_v35 }
 0xad4   : > { %6533 = vmatmul.bf16.gmra.mxu3 %v11504_v32  ;;  %v11519_v32 = vld [vmem:[%s12998_s21 + $0x110] sm:$0xf] }
 0xad5   : > { %v15197_v45 = vunpack.c.l.b16 %v6834_v11  ;;  %v6499_v16 = vpop.f32.mrf.mxu3 }
 0xad8   : > { %v6665_v44 = vpop.f32.mrf.mxu2 }
 0xad9   : > { %v6666_v0 = vadd.f32 %v6665_v44, %v6476_v38  ;;  %v11489_v38 = vld [vmem:[%s12998_s21 + $0xd8] sm:$0xf0] }
 0xada   : > { %v11492_v50 = vor.u32 %v12640_v57, %v11489_v38  ;;  %v12644_v38 = vld [vmem:[%s12998_s21 + $0xf4] sm:$0xf] }
 0xadb   : > { %v6835_v43 = vpack.c.bf16 %v6666_v0, %v6666_v0 }
 0xadd   : > { %v15199_v12 = vunpack.c.l.b16 %v6835_v43  ;;  %6707 = vmatmul.bf16.gmra.mxu2 %v11484_v20  ;;  %v6501_v41 = vpop.f32.mrf.mxu3 }
 0xae0   : > { %v6668_v17 = vpop.f32.mrf.mxu2 }
 0xae1   : > { %v6669_v47 = vadd.f32 %v6668_v17, %v6479_v1  ;;  %v11511_v1 = vld [vmem:[%s12998_s21 + $0x100] sm:$0xf] }
 0xae2   : > { %v11512_v35 = vor.u32 %v12647_v28, %v11511_v1 }
 0xae3   : > { %v6836_v40 = vpack.c.bf16 %v6669_v47, %v6669_v47  ;;  %v12649_v47 = vld [vmem:[%s12998_s21 + $0x114] sm:$0xf0] }
 0xae4   : > { %6538 = vmatmul.bf16.gmra.mxu3 %v11512_v35  ;;  %v11520_v57 = vor.u32 %v12649_v47, %v11519_v32  ;;  %v11527_v35 = vld [vmem:[%s12998_s21 + $0x120] sm:$0xf]  ;;  %v11535_v32 = vld [vmem:[%s12998_s21 + $0x130] sm:$0xf]  ;;  %v12653_v47 = vld [vmem:[%s12998_s21 + $0x134] sm:$0xf0] }
 0xae5   : > { %v6928_v42 = vunpack.c.l.b16 %v6836_v40  ;;  %v6504_v40 = vpop.f32.mrf.mxu3 }
 0xae8   : > { %v6670_v33 = vpop.f32.mrf.mxu2 }
 0xae9   : > { %v6671_v8 = vadd.f32 %v6670_v33, %v6481_v54  ;;  %v11497_v54 = vld [vmem:[%s12998_s21 + $0xe8] sm:$0xf0] }
 0xaea   : > { %v11500_v11 = vor.u32 %v12642_v49, %v11497_v54  ;;  %v11513_v54 = vld [vmem:[%s12998_s21 + $0x108] sm:$0xf0] }
 0xaeb   : > { %v6837_v13 = vpack.c.bf16 %v6671_v8, %v6671_v8 }
 0xaed   : > { %v6929_v29 = vunpack.c.l.b16 %v6837_v13  ;;  %6712 = vmatmul.bf16.gmra.mxu2 %v11492_v50  ;;  %v6506_v1 = vpop.f32.mrf.mxu3 }
 0xaef   : > { %v6936_v2 = vpack.c.b16 %v6929_v29, %v6928_v42 }
 0xaf0   : > { %v6673_v48 = vpop.f32.mrf.mxu2 }
 0xaf1   : > { %6940 = vrot.lane.b32.xlu2 %v6936_v2, %s12961_s7  ;;  %v6674_v58 = vadd.f32 %v6673_v48, %v6484_v56 }
 0xaf3   : > { %v6838_v7 = vpack.c.bf16 %v6674_v58, %v6674_v58  ;;  %v12651_v58 = vld [vmem:[%s12998_s21 + $0x124] sm:$0xf0] }
 0xaf4   : > { %6543 = vmatmul.bf16.gmra.mxu3 %v11520_v57  ;;  %v11528_v49 = vor.u32 %v12651_v58, %v11527_v35  ;;  %v11536_v57 = vor.u32 %v12653_v47, %v11535_v32 }
 0xaf5   : > { %v6930_v20 = vunpack.c.l.b16 %v6838_v7  ;;  %v6509_v7 = vpop.f32.mrf.mxu3 }
 0xaf8   : > { %v6675_v52 = vpop.f32.mrf.mxu2 }
 0xaf9   : > { %v6676_v44 = vadd.f32 %v6675_v52, %v6486_v24  ;;  %v11505_v24 = vld [vmem:[%s12998_s21 + $0xf8] sm:$0xf0] }
 0xafa   : > { %v11508_v13 = vor.u32 %v12644_v38, %v11505_v24  ;;  %v12648_v24 = vld [vmem:[%s12998_s21 + $0x114] sm:$0xf] }
 0xafb   : > { %v6839_v0 = vpack.c.bf16 %v6676_v44, %v6676_v44 }
 0xafd   : > { %v6931_v43 = vunpack.c.l.b16 %v6839_v0  ;;  %6717 = vmatmul.bf16.gmra.mxu2 %v11500_v11 }
 0xaff   : > { %v6937_v17 = vpack.c.b16 %v6931_v43, %v6930_v20 }
 0xb00   : > { %v6678_v55 = vpop.f32.mrf.mxu2 }
 0xb01   : > { %v6679_v56 = vadd.f32 %v6678_v55, %v6489_v51  ;;  %6942 = vrot.lane.b32.xlu0 %v6937_v17, %s12961_s7 }
 0xb03   : > { %v6840_v8 = vpack.c.bf16 %v6679_v56, %v6679_v56  ;;  %v6511_v56 = vpop.f32.mrf.mxu3 }
 0xb04   : > { %6548 = vmatmul.bf16.gmra.mxu3 %v11528_v49 }
 0xb05   : > { %v15217_v29 = vunpack.c.l.b16 %v6840_v8 }
 0xb08   : > { %v6680_v33 = vpop.f32.mrf.mxu2 }
 0xb09   : > { %v6681_v50 = vadd.f32 %v6680_v33, %v6491_v15  ;;  %v12646_v15 = vld [vmem:[%s12998_s21 + $0x104] sm:$0xf] }
 0xb0a   : > { %v11516_v0 = vor.u32 %v12646_v15, %v11513_v54  ;;  %v12655_v54 = vld [vmem:[%s12998_s21 + $0x144] sm:$0xf0] }
 0xb0b   : > { %v6841_v42 = vpack.c.bf16 %v6681_v50, %v6681_v50  ;;  %v6514_v8 = vpop.f32.mrf.mxu3 }
 0xb0d   : > { %v15219_v51 = vunpack.c.l.b16 %v6841_v42  ;;  %6722 = vmatmul.bf16.gmra.mxu2 %v11508_v13 }
 0xb10   : > { %v6683_v48 = vpop.f32.mrf.mxu2 }
 0xb11   : > { %v6684_v28 = vadd.f32 %v6683_v48, %v6494_v36  ;;  %v12675_v36 = vld [vmem:[%s12998_s21 + $0x1e4] sm:$0xf0] }
 0xb13   : > { %v6842_v44 = vpack.c.bf16 %v6684_v28, %v6684_v28  ;;  %v6516_v15 = vpop.f32.mrf.mxu3 }
 0xb14   : > { %6553 = vmatmul.bf16.gmra.mxu3 %v11536_v57 }
 0xb15   : > { %v15227_v43 = vunpack.c.l.b16 %v6842_v44 }
 0xb18   : > { %v6685_v52 = vpop.f32.mrf.mxu2 }
 0xb19   : > { %v6686_v11 = vadd.f32 %v6685_v52, %v6496_v10  ;;  %v11521_v10 = vld [vmem:[%s12998_s21 + $0x118] sm:$0xf0] }
 0xb1a   : > { %v11524_v42 = vor.u32 %v12648_v24, %v11521_v10 }
 0xb1b   : > { %v6843_v20 = vpack.c.bf16 %v6686_v11, %v6686_v11  ;;  %v12650_v11 = vld [vmem:[%s12998_s21 + $0x124] sm:$0xf] }
 0xb1d   : > { %v15229_v17 = vunpack.c.l.b16 %v6843_v20  ;;  %6727 = vmatmul.bf16.gmra.mxu2 %v11516_v0  ;;  %v6519_v20 = vpop.f32.mrf.mxu3 }
 0xb20   : > { %v6688_v55 = vpop.f32.mrf.mxu2 }
 0xb21   : > { %v6689_v38 = vadd.f32 %v6688_v55, %v6499_v16  ;;  %v11543_v16 = vld [vmem:[%s12998_s21 + $0x140] sm:$0xf] }
 0xb22   : > { %v11544_v52 = vor.u32 %v12655_v54, %v11543_v16 }
 0xb23   : > { %v6844_v50 = vpack.c.bf16 %v6689_v38, %v6689_v38 }
 0xb24   : > { %6558 = vmatmul.bf16.gmra.mxu3 %v11544_v52 }
 0xb25   : > { %v6956_v28 = vunpack.c.l.b16 %v6844_v50  ;;  %v6521_v50 = vpop.f32.mrf.mxu3 }
 0xb28   : > { %v6690_v33 = vpop.f32.mrf.mxu2 }
 0xb29   : > { %v6691_v13 = vadd.f32 %v6690_v33, %v6501_v41  ;;  %v11529_v41 = vld [vmem:[%s12998_s21 + $0x128] sm:$0xf0] }
 0xb2a   : > { %v11532_v47 = vor.u32 %v12650_v11, %v11529_v41  ;;  %v12670_v11 = vld [vmem:[%s12998_s21 + $0x1c4] sm:$0xf] }
 0xb2b   : > { %v6845_v48 = vpack.c.bf16 %v6691_v13, %v6691_v13  ;;  %v11551_v13 = vld [vmem:[%s12998_s21 + $0x150] sm:$0xf] }
 0xb2d   : > { %v6957_v35 = vunpack.c.l.b16 %v6845_v48  ;;  %6732 = vmatmul.bf16.gmra.mxu2 %v11524_v42  ;;  %v12657_v42 = vld [vmem:[%s12998_s21 + $0x154] sm:$0xf0] }
 0xb2e   : > { %v11552_v48 = vor.u32 %v12657_v42, %v11551_v13 }
 0xb2f   : > { %v6964_v58 = vpack.c.b16 %v6957_v35, %v6956_v28  ;;  %v12652_v28 = vld [vmem:[%s12998_s21 + $0x134] sm:$0xf] }
 0xb30   : > { %v6693_v49 = vpop.f32.mrf.mxu2 }
 0xb31   : > { %6968 = vrot.lane.b32.xlu0 %v6964_v58, %s12962_s11  ;;  %v6694_v44 = vadd.f32 %v6693_v49, %v6504_v40 }
 0xb33   : > { %v6846_v55 = vpack.c.bf16 %v6694_v44, %v6694_v44 }
 0xb34   : > { %6563 = vmatmul.bf16.gmra.mxu3 %v11552_v48 }
 0xb35   : > { %v6958_v38 = vunpack.c.l.b16 %v6846_v55 }
 0xb37   : > { %v6524_v58 = vpop.f32.mrf.mxu3 }
 0xb38   : > { %v6695_v0 = vpop.f32.mrf.mxu2 }
 0xb39   : > { %v6696_v32 = vadd.f32 %v6695_v0, %v6506_v1  ;;  %v11537_v1 = vld [vmem:[%s12998_s21 + $0x138] sm:$0xf0] }
 0xb3a   : > { %v11540_v54 = vor.u32 %v12652_v28, %v11537_v1 }
 0xb3b   : > { %v6847_v57 = vpack.c.bf16 %v6696_v32, %v6696_v32  ;;  %v11559_v32 = vld [vmem:[%s12998_s21 + $0x160] sm:$0xf] }
 0xb3d   : > { %v6959_v24 = vunpack.c.l.b16 %v6847_v57  ;;  %6737 = vmatmul.bf16.gmra.mxu2 %v11532_v47  ;;  %v12659_v47 = vld [vmem:[%s12998_s21 + $0x164] sm:$0xf0] }
 0xb3e   : > { %v11560_v57 = vor.u32 %v12659_v47, %v11559_v32 }
 0xb3f   : > { %v6965_v10 = vpack.c.b16 %v6959_v24, %v6958_v38  ;;  %v6526_v0 = vpop.f32.mrf.mxu3  ;;  %v11545_v38 = vld [vmem:[%s12998_s21 + $0x148] sm:$0xf0] }
 0xb40   : > { %v6698_v33 = vpop.f32.mrf.mxu2 }
 0xb41   : > { %v6699_v40 = vadd.f32 %v6698_v33, %v6509_v7  ;;  %6970 = vrot.lane.b32.xlu1 %v6965_v10, %s12962_s11 }
 0xb43   : > { %v6848_v49 = vpack.c.bf16 %v6699_v40, %v6699_v40 }
 0xb44   : > { %6568 = vmatmul.bf16.gmra.mxu3 %v11560_v57 }
 0xb45   : > { %v15247_v44 = vunpack.c.l.b16 %v6848_v49  ;;  %v11567_v49 = vld [vmem:[%s12998_s21 + $0x170] sm:$0xf] }
 0xb47   : > { %v6529_v10 = vpop.f32.mrf.mxu3 }
 0xb48   : > { %v6700_v35 = vpop.f32.mrf.mxu2 }
 0xb49   : > { %v6701_v16 = vadd.f32 %v6700_v35, %v6511_v56  ;;  %v12654_v56 = vld [vmem:[%s12998_s21 + $0x144] sm:$0xf] }
 0xb4a   : > { %v11548_v13 = vor.u32 %v12654_v56, %v11545_v38 }
 0xb4b   : > { %v6849_v52 = vpack.c.bf16 %v6701_v16, %v6701_v16  ;;  %v12661_v16 = vld [vmem:[%s12998_s21 + $0x174] sm:$0xf0] }
 0xb4d   : > { %v15249_v7 = vunpack.c.l.b16 %v6849_v52  ;;  %6742 = vmatmul.bf16.gmra.mxu2 %v11540_v54  ;;  %v11568_v54 = vor.u32 %v12661_v16, %v11567_v49  ;;  %v12663_v49 = vld [vmem:[%s12998_s21 + $0x184] sm:$0xf0] }
 0xb4f   : > { %v6531_v35 = vpop.f32.mrf.mxu3 }
 0xb50   : > { %v6703_v41 = vpop.f32.mrf.mxu2 }
 0xb51   : > { %v6704_v55 = vadd.f32 %v6703_v41, %v6514_v8  ;;  %v12656_v41 = vld [vmem:[%s12998_s21 + $0x154] sm:$0xf] }
 0xb53   : > { %v6850_v33 = vpack.c.bf16 %v6704_v55, %v6704_v55 }
 0xb54   : > { %6573 = vmatmul.bf16.gmra.mxu3 %v11568_v54 }
 0xb55   : > { %v15257_v48 = vunpack.c.l.b16 %v6850_v33 }
 0xb57   : > { %v6534_v32 = vpop.f32.mrf.mxu3 }
 0xb58   : > { %v6705_v24 = vpop.f32.mrf.mxu2 }
 0xb59   : > { %v6706_v40 = vadd.f32 %v6705_v24, %v6516_v15  ;;  %v11553_v15 = vld [vmem:[%s12998_s21 + $0x158] sm:$0xf0] }
 0xb5a   : > { %v11556_v56 = vor.u32 %v12656_v41, %v11553_v15 }
 0xb5b   : > { %v6851_v42 = vpack.c.bf16 %v6706_v40, %v6706_v40  ;;  %v12693_v40 = vld [vmem:[%s13003_s25 + $0x38] sm:$0xff] }
 0xb5c   : > { %7295 = vmatpush.bf16.msra.mxu3 %v12693_v40 }
 0xb5d   : > { %v15259_v28 = vunpack.c.l.b16 %v6851_v42  ;;  %6747 = vmatmul.bf16.gmra.mxu2 %v11548_v13 }
 0xb5f   : > { %v6536_v42 = vpop.f32.mrf.mxu3 }
 0xb60   : > { %v6708_v1 = vpop.f32.mrf.mxu2 }
 0xb61   : > { %v6709_v52 = vadd.f32 %v6708_v1, %v6519_v20  ;;  %v11575_v1 = vld [vmem:[%s12998_s21 + $0x180] sm:$0xf] }
 0xb62   : > { %v11576_v16 = vor.u32 %v12663_v49, %v11575_v1  ;;  %v12665_v1 = vld [vmem:[%s12998_s21 + $0x194] sm:$0xf0] }
 0xb63   : > { %v6852_v47 = vpack.c.bf16 %v6709_v52, %v6709_v52  ;;  %v11561_v52 = vld [vmem:[%s12998_s21 + $0x168] sm:$0xf0] }
 0xb64   : > { %6578 = vmatmul.bf16.gmra.mxu3 %v11576_v16  ;;  %v12660_v16 = vld [vmem:[%s12998_s21 + $0x174] sm:$0xf] }
 0xb65   : > { %v6984_v24 = vunpack.c.l.b16 %v6852_v47 }
 0xb67   : > { %v6539_v15 = vpop.f32.mrf.mxu3 }
 0xb68   : > { %v6710_v55 = vpop.f32.mrf.mxu2 }
 0xb69   : > { %v6711_v57 = vadd.f32 %v6710_v55, %v6521_v50  ;;  %v12658_v50 = vld [vmem:[%s12998_s21 + $0x164] sm:$0xf] }
 0xb6b   : > { %v6853_v38 = vpack.c.bf16 %v6711_v57, %v6711_v57  ;;  %v11564_v57 = vor.u32 %v12658_v50, %v11561_v52 }
 0xb6d   : > { %v6985_v33 = vunpack.c.l.b16 %v6853_v38  ;;  %6752 = vmatmul.bf16.gmra.mxu2 %v11556_v56 }
 0xb6f   : > { %v6992_v13 = vpack.c.b16 %v6985_v33, %v6984_v24 }
 0xb70   : > { %v6713_v20 = vpop.f32.mrf.mxu2 }
 0xb71   : > { %6996 = vrot.lane.b32.xlu1 %v6992_v13, %s12963_s0  ;;  %v6714_v54 = vadd.f32 %v6713_v20, %v6524_v58  ;;  %v6541_v13 = vpop.f32.mrf.mxu3  ;;  %v11583_v20 = vld [vmem:[%s12998_s21 + $0x190] sm:$0xf] }
 0xb72   : > { %v11584_v49 = vor.u32 %v12665_v1, %v11583_v20  ;;  %v12667_v20 = vld [vmem:[%s12998_s21 + $0x1a4] sm:$0xf0] }
 0xb73   : > { %v6854_v55 = vpack.c.bf16 %v6714_v54, %v6714_v54 }
 0xb74   : > { %6583 = vmatmul.bf16.gmra.mxu3 %v11584_v49 }
 0xb75   : > { %v6986_v38 = vunpack.c.l.b16 %v6854_v55 }
 0xb78   : > { %v6715_v41 = vpop.f32.mrf.mxu2 }
 0xb79   : > { %v6716_v47 = vadd.f32 %v6715_v41, %v6526_v0  ;;  %v11569_v0 = vld [vmem:[%s12998_s21 + $0x178] sm:$0xf0]  ;;  %v6544_v50 = vpop.f32.mrf.mxu3 }
 0xb7a   : > { %v11572_v55 = vor.u32 %v12660_v16, %v11569_v0 }
 0xb7b   : > { %v6855_v56 = vpack.c.bf16 %v6716_v47, %v6716_v47 }
 0xb7d   : > { %v6987_v24 = vunpack.c.l.b16 %v6855_v56  ;;  %6757 = vmatmul.bf16.gmra.mxu2 %v11564_v57 }
 0xb7f   : > { %v6993_v33 = vpack.c.b16 %v6987_v24, %v6986_v38 }
 0xb80   : > { %v6718_v40 = vpop.f32.mrf.mxu2 }
 0xb81   : > { %v6719_v58 = vadd.f32 %v6718_v40, %v6529_v10  ;;  %6998 = vrot.lane.b32.xlu2 %v6993_v33, %s12963_s0  ;;  %v15284_v24 = vpop.f32.mrf.mxu3  ;;  %v11591_v40 = vld [vmem:[%s12998_s21 + $0x1a0] sm:$0xf] }
 0xb82   : > { %v11592_v1 = vor.u32 %v12667_v20, %v11591_v40  ;;  %v11599_v20 = vld [vmem:[%s12998_s21 + $0x1b0] sm:$0xf] }
 0xb83   : > { %v6856_v52 = vpack.c.bf16 %v6719_v58, %v6719_v58  ;;  %v11577_v58 = vld [vmem:[%s12998_s21 + $0x188] sm:$0xf0] }
 0xb84   : > { %6588 = vmatmul.bf16.gmra.mxu3 %v11592_v1  ;;  %v12669_v1 = vld [vmem:[%s12998_s21 + $0x1b4] sm:$0xf0] }
 0xb85   : > { %v15278_v57 = vunpack.c.l.b16 %v6856_v52  ;;  %v11600_v6 = vor.u32 %v12669_v1, %v11599_v20  ;;  %v12666_v1 = vld [vmem:[%s12998_s21 + $0x1a4] sm:$0xf] }
 0xb88   : > { %v6720_v54 = vpop.f32.mrf.mxu2 }
 0xb89   : > { %v6721_v41 = vadd.f32 %v6720_v54, %v6531_v35  ;;  %v12662_v35 = vld [vmem:[%s12998_s21 + $0x184] sm:$0xf]  ;;  %v6549_v16 = vpop.f32.mrf.mxu3 }
 0xb8a   : > { %v11580_v52 = vor.u32 %v12662_v35, %v11577_v58 }
 0xb8b   : > { %v6857_v47 = vpack.c.bf16 %v6721_v41, %v6721_v41 }
 0xb8d   : > { %v15280_v10 = vunpack.c.l.b16 %v6857_v47  ;;  %6762 = vmatmul.bf16.gmra.mxu2 %v11572_v55 }
 0xb90   : > { %v6723_v38 = vpop.f32.mrf.mxu2 }
 0xb91   : > { %v6724_v33 = vadd.f32 %v6723_v38, %v6534_v32  ;;  %v6551_v40 = vpop.f32.mrf.mxu3 }
 0xb93   : > { %v6858_v0 = vpack.c.bf16 %v6724_v33, %v6724_v33  ;;  %v12664_v33 = vld [vmem:[%s12998_s21 + $0x194] sm:$0xf] }
 0xb94   : > { %6593 = vmatmul.bf16.gmra.mxu3 %v11600_v6 }
 0xb95   : > { %v15290_v55 = vunpack.c.l.b16 %v6858_v0  ;;  %v11588_v0 = vor.u32 %v12664_v33, %v11585_v18  ;;  %v12692_v18 = vld [vmem:[%s13003_s25 + $0x30] sm:$0xff]  ;;  %v11593_v33 = vld [vmem:[%s12998_s21 + $0x1a8] sm:$0xf0] }
 0xb96   : > { %7296 = vmatpush.bf16.msra.mxu3 %v12692_v18 }
 0xb98   : > { %v6725_v49 = vpop.f32.mrf.mxu2 }
 0xb99   : > { %v6726_v54 = vadd.f32 %v6725_v49, %v6536_v42  ;;  %v6554_v35 = vpop.f32.mrf.mxu3 }
 0xb9b   : > { %v6859_v41 = vpack.c.bf16 %v6726_v54, %v6726_v54 }
 0xb9d   : > { %v15292_v47 = vunpack.c.l.b16 %v6859_v41  ;;  %6767 = vmatmul.bf16.gmra.mxu2 %v11580_v52 }
 0xba0   : > { %v6728_v38 = vpop.f32.mrf.mxu2 }
 0xba1   : > { %v6729_v60 = vadd.f32 %v6728_v38, %v6539_v15  ;;  %v6556_v15 = vpop.f32.mrf.mxu3  ;;  %v11607_v38 = vld [vmem:[%s12998_s21 + $0x1c0] sm:$0xf] }
 0xba3   : > { %v6860_v58 = vpack.c.bf16 %v6729_v60, %v6729_v60  ;;  %v12671_v60 = vld [vmem:[%s12998_s21 + $0x1c4] sm:$0xf0] }
 0xba5   : > { %v7012_v52 = vunpack.c.l.b16 %v6860_v58 }
 0xba8   : > { %v6730_v42 = vpop.f32.mrf.mxu2 }
 0xba9   : > { %v6731_v49 = vadd.f32 %v6730_v42, %v6541_v13  ;;  %v11608_v13 = vor.u32 %v12671_v60, %v11607_v38  ;;  %v6559_v58 = vpop.f32.mrf.mxu3  ;;  %v11601_v38 = vld [vmem:[%s12998_s21 + $0x1b8] sm:$0xf0] }
 0xbab   : > { %v6861_v54 = vpack.c.bf16 %v6731_v49, %v6731_v49  ;;  %6598 = vmatmul.bf16.gmra.mxu3 %v11608_v13  ;;  %v11596_v49 = vor.u32 %v12666_v1, %v11593_v33 }
 0xbad   : > { %v7013_v41 = vunpack.c.l.b16 %v6861_v54  ;;  %6772 = vmatmul.bf16.gmra.mxu2 %v11588_v0 }
 0xbaf   : > { %v7020_v25 = vpack.c.b16 %v7013_v41, %v7012_v52  ;;  %v12673_v52 = vld [vmem:[%s12998_s21 + $0x1d4] sm:$0xf0] }
 0xbb0   : > { %v6733_v20 = vpop.f32.mrf.mxu2 }
 0xbb1   : > { %v15300_v6 = vadd.f32 %v6733_v20, %v6544_v50  ;;  %7024 = vrot.lane.b32.xlu2 %v7020_v25, %s12964_s4  ;;  %v6561_v0 = vpop.f32.mrf.mxu3  ;;  %v11615_v25 = vld [vmem:[%s12998_s21 + $0x1d0] sm:$0xf]  ;;  %v12668_v20 = vld [vmem:[%s12998_s21 + $0x1b4] sm:$0xf] }
 0xbb2   : > { %v11616_v41 = vor.u32 %v12673_v52, %v11615_v25  ;;  %v11604_v32 = vor.u32 %v12668_v20, %v11601_v38 }
 0xbb8   : > { %v6735_v42 = vpop.f32.mrf.mxu2 }
 0xbb9   : > { %v6564_v13 = vpop.f32.mrf.mxu3 }
 0xbbb   : > { %6603 = vmatmul.bf16.gmra.mxu3 %v11616_v41  ;;  %v11623_v41 = vld [vmem:[%s12998_s21 + $0x1e0] sm:$0xf] }
 0xbbc   : > { %v11624_v56 = vor.u32 %v12675_v36, %v11623_v41 }
 0xbbd   : > { %6777 = vmatmul.bf16.gmra.mxu2 %v11596_v49 }
 0xbc0   : > { %v6738_v50 = vpop.f32.mrf.mxu2 }
 0xbc1   : > { %v6739_v54 = vadd.f32 %v6738_v50, %v6549_v16  ;;  %v15318_v25 = vpop.f32.mrf.mxu3  ;;  %v12672_v16 = vld [vmem:[%s12998_s21 + $0x1d4] sm:$0xf] }
 0xbc3   : > { %v6864_v18 = vpack.c.bf16 %v6739_v54, %v6739_v54 }
 0xbc5   : > { %v15312_v33 = vunpack.c.l.b16 %v6864_v18 }
 0xbc8   : > { %v6740_v60 = vpop.f32.mrf.mxu2 }
 0xbc9   : > { %v6741_v8 = vadd.f32 %v6740_v60, %v6551_v40  ;;  %v11609_v40 = vld [vmem:[%s12998_s21 + $0x1c8] sm:$0xf0] }
 0xbca   : > { %v11612_v38 = vor.u32 %v12670_v11, %v11609_v40  ;;  %v6736_v40 = vadd.f32 %v6735_v42, %v15284_v24  ;;  %v12674_v42 = vld [vmem:[%s12998_s21 + $0x1e4] sm:$0xf] }
 0xbcb   : > { %v6865_v1 = vpack.c.bf16 %v6741_v8, %v6741_v8  ;;  %6608 = vmatmul.bf16.gmra.mxu3 %v11624_v56  ;;  %v11617_v56 = vld [vmem:[%s12998_s21 + $0x1d8] sm:$0xf0] }
 0xbcc   : > { %v11620_v11 = vor.u32 %v12672_v16, %v11617_v56 }
 0xbcd   : > { %v15314_v49 = vunpack.c.l.b16 %v6865_v1  ;;  %6782 = vmatmul.bf16.gmra.mxu2 %v11604_v32  ;;  %v6569_v32 = vpop.f32.mrf.mxu3 }
 0xbd0   : > { %v6743_v50 = vpop.f32.mrf.mxu2 }
 0xbd1   : > { %v6744_v52 = vadd.f32 %v6743_v50, %v6554_v35 }
 0xbd3   : > { %v6866_v54 = vpack.c.bf16 %v6744_v52, %v6744_v52 }
 0xbd5   : > { %v15324_v18 = vunpack.c.l.b16 %v6866_v54  ;;  %v15330_v50 = vpop.f32.mrf.mxu3 }
 0xbd8   : > { %v6745_v8 = vpop.f32.mrf.mxu2 }
 0xbd9   : > { %v6746_v20 = vadd.f32 %v6745_v8, %v6556_v15 }
 0xbdb   : > { %v6867_v60 = vpack.c.bf16 %v6746_v20, %v6746_v20 }
 0xbdd   : > { %v15326_v1 = vunpack.c.l.b16 %v6867_v60  ;;  %6787 = vmatmul.bf16.gmra.mxu2 %v11612_v38  ;;  %v6574_v38 = vpop.f32.mrf.mxu3  ;;  %v6863_v60 = vpack.c.bf16 %v6736_v40, %v6736_v40  ;;  %v12691_v40 = vld [vmem:[%s13003_s25 + $0x28] sm:$0xff] }
 0xbde   : > { %7297 = vmatpush.bf16.msra.mxu3 %v12691_v40 }
 0xbe0   : > { %v6748_v36 = vpop.f32.mrf.mxu2 }
 0xbe1   : > { %v6749_v41 = vadd.f32 %v6748_v36, %v6559_v58  ;;  %v6862_v36 = vpack.c.bf16 %v15300_v6, %v15300_v6  ;;  %v12677_v6 = vld [vmem:[%s12998_s21 + $0x1f4] sm:$0xf0] }
 0xbe3   : > { %v6868_v52 = vpack.c.bf16 %v6749_v41, %v6749_v41  ;;  %v7014_v24 = vunpack.c.l.b16 %v6862_v36 }
 0xbe5   : > { %v7040_v54 = vunpack.c.l.b16 %v6868_v52  ;;  %v15340_v52 = vpop.f32.mrf.mxu3 }
 0xbe8   : > { %v6750_v2 = vpop.f32.mrf.mxu2 }
 0xbe9   : > { %v6751_v15 = vadd.f32 %v6750_v2, %v6561_v0  ;;  %v7015_v2 = vunpack.c.l.b16 %v6863_v60  ;;  %v11625_v0 = vld [vmem:[%s12998_s21 + $0x1e8] sm:$0xf0]  ;;  %v11633_v60 = vld [vmem:[%s12998_s21 + $0x1f8] sm:$0xf0] }
 0xbeb   : > { %v6869_v8 = vpack.c.bf16 %v6751_v15, %v6751_v15  ;;  %v7021_v16 = vpack.c.b16 %v7015_v2, %v7014_v24  ;;  %v11628_v15 = vor.u32 %v12674_v42, %v11625_v0 }
 0xbed   : > { %v7041_v20 = vunpack.c.l.b16 %v6869_v8  ;;  %6792 = vmatmul.bf16.gmra.mxu2 %v11620_v11  ;;  %v11631_v11 = vld [vmem:[%s12998_s21 + $0x1f0] sm:$0xf] }
 0xbef   : > { %v7048_v35 = vpack.c.b16 %v7041_v20, %v7040_v54  ;;  %v6579_v54 = vpop.f32.mrf.mxu3  ;;  %v12676_v20 = vld [vmem:[%s12998_s21 + $0x1f4] sm:$0xf] }
 0xbf0   : > { %v6753_v58 = vpop.f32.mrf.mxu2  ;;  %v11636_v36 = vor.u32 %v12676_v20, %v11633_v60 }
 0xbf1   : > { %v6754_v41 = vadd.f32 %v6753_v58, %v6564_v13  ;;  %7052 = vrot.lane.b32.xlu0 %v7048_v35, %s12965_s18  ;;  %v11632_v13 = vor.u32 %v12677_v6, %v11631_v11 }
 0xbf3   : > { %6613 = vmatmul.bf16.gmra.mxu3 %v11632_v13 }
 0xbf7   : > { %v6581_v2 = vpop.f32.mrf.mxu3 }
 0xbf8   : > { %v6755_v56 = vpop.f32.mrf.mxu2 }
 0xbf9   : > { %7026 = vrot.lane.b32.xlu0 %v7021_v16, %s12964_s4  ;;  %v6756_v22 = vadd.f32 %v6755_v56, %v15318_v25 }
 0xbfb   : > { %v6871_v60 = vpack.c.bf16 %v6756_v22, %v6756_v22  ;;  %v16616_v22 = vpack.c.b16 %v15219_v51, %v15217_v29 }
 0xbfd   : > { %6797 = vmatmul.bf16.gmra.mxu2 %v11628_v15  ;;  %v7043_v37 = vunpack.c.l.b16 %v6871_v60 }
 0xbff   : > { %v6584_v0 = vpop.f32.mrf.mxu3 }
 0xc00   : > { %v6758_v35 = vpop.f32.mrf.mxu2 }
 0xc01   : > { %v15346_v8 = vadd.f32 %v6758_v35, %v6569_v32 }
 0xc07   : > { %v6586_v11 = vpop.f32.mrf.mxu3 }
 0xc08   : > { %v15350_v58 = vpop.f32.mrf.mxu2 }
 0xc0d   : > { %6802 = vmatmul.bf16.gmra.mxu2 %v11636_v36 }
 0xc0f   : > { %v6589_v35 = vpop.f32.mrf.mxu3 }
 0xc10   : > { %v6763_v24 = vpop.f32.mrf.mxu2 }
 0xc11   : > { %v15352_v42 = vadd.f32 %v6763_v24, %v6574_v38  ;;  %v6870_v24 = vpack.c.bf16 %v6754_v41, %v6754_v41 }
 0xc18   : > { %v15354_v16 = vpop.f32.mrf.mxu2 }
 0xc20   : > { %v6768_v15 = vpop.f32.mrf.mxu2 }
 0xc21   : > { %v6769_v6 = vadd.f32 %v6768_v15, %v6579_v54  ;;  %v15358_v54 = vpop.f32.mrf.mxu3  ;;  %v7042_v15 = vunpack.c.l.b16 %v6870_v24  ;;  %v12679_v24 = vld [vmem:[%s12998_s21 + $0x204] sm:$0xf0] }
 0xc23   : > { %v6876_v13 = vpack.c.bf16 %v6769_v6, %v6769_v6 }
 0xc25   : > { %v7068_v14 = vunpack.c.l.b16 %v6876_v13 }
 0xc28   : > { %v6770_v32 = vpop.f32.mrf.mxu2 }
 0xc29   : > { %v6771_v40 = vadd.f32 %v6770_v32, %v6581_v2  ;;  %v7049_v2 = vpack.c.b16 %v7043_v37, %v7042_v15  ;;  %v6594_v25 = vpop.f32.mrf.mxu3  ;;  %v16617_v37 = vpack.c.b16 %v15314_v49, %v15312_v33  ;;  %v12678_v33 = vld [vmem:[%s12998_s21 + $0x204] sm:$0xf]  ;;  %v11641_v49 = vld [vmem:[%s12998_s21 + $0x208] sm:$0xf0] }
 0xc2b   : > { %v6877_v46 = vpack.c.bf16 %v6771_v40, %v6771_v40 }
 0xc2d   : > { %v7069_v20 = vunpack.c.l.b16 %v6877_v46 }
 0xc2f   : > { %v7076_v36 = vpack.c.b16 %v7069_v20, %v7068_v14  ;;  %v12690_v14 = vld [vmem:[%s13003_s25 + $0x20] sm:$0xff] }
 0xc30   : > { %v6773_v38 = vpop.f32.mrf.mxu2  ;;  %7298 = vmatpush.bf16.msra.mxu3 %v12690_v14 }
 0xc31   : > { %v6774_v63 = vadd.f32 %v6773_v38, %v6584_v0  ;;  %7080 = vrot.lane.b32.xlu1 %v7076_v36, %s12966_s22  ;;  %v15368_v0 = vpop.f32.mrf.mxu3  ;;  %v11639_v38 = vld [vmem:[%s12998_s21 + $0x200] sm:$0xf] }
 0xc33   : > { %v6878_v19 = vpack.c.bf16 %v6774_v63, %v6774_v63  ;;  %v6761_v63 = vadd.f32 %v15350_v58, %v15330_v50 }
 0xc38   : > { %v6775_v6 = vpop.f32.mrf.mxu2 }
 0xc39   : > { %7054 = vrot.lane.b32.xlu1 %v7049_v2, %s12965_s18  ;;  %v6599_v40 = vpop.f32.mrf.mxu3  ;;  %v6776_v14 = vadd.f32 %v6775_v6, %v6586_v11 }
 0xc3b   : > { %v6879_v61 = vpack.c.bf16 %v6776_v14, %v6776_v14 }
 0xc40   : > { %v6778_v56 = vpop.f32.mrf.mxu2 }
 0xc41   : > { %v15361_v46 = vadd.f32 %v6778_v56, %v6589_v35  ;;  %6944 = vrot.lane.b32.xlu1 %v16616_v22, %s12961_s7  ;;  %v6601_v51 = vpop.f32.mrf.mxu3  ;;  %v11640_v56 = vor.u32 %v12679_v24, %v11639_v38  ;;  %v11644_v22 = vor.u32 %v12678_v33, %v11641_v49 }
 0xc43   : > { %6618 = vmatmul.bf16.gmra.mxu3 %v11640_v56  ;;  %6807 = vmatmul.bf16.gmra.mxu2 %v11644_v22  ;;  %v12680_v56 = vld [vmem:[%s12998_s21 + $0x214] sm:$0xf]  ;;  %v11649_v22 = vld [vmem:[%s12998_s21 + $0x218] sm:$0xf0] }
 0xc48   : > { %v6780_v41 = vpop.f32.mrf.mxu2 }
 0xc49   : > { %7028 = vrot.lane.b32.xlu1 %v16617_v37, %s12964_s4  ;;  %v6604_v60 = vpop.f32.mrf.mxu3  ;;  %v6781_v58 = vadd.f32 %v6780_v41, %v15358_v54  ;;  %v11655_v54 = vld [vmem:[%s12998_s21 + $0x220] sm:$0xf]  ;;  %v12683_v41 = vld [vmem:[%s12998_s21 + $0x224] sm:$0xf0] }
 0xc50   : > { %v6783_v32 = vpop.f32.mrf.mxu2 }
 0xc51   : > { %v15374_v13 = vadd.f32 %v6783_v32, %v6594_v25  ;;  %v6606_v4 = vpop.f32.mrf.mxu3 }
 0xc58   : > { %v15376_v29 = vpop.f32.mrf.mxu2 }
 0xc59   : > { %v6609_v33 = vpop.f32.mrf.mxu3 }
 0xc60   : > { %v6788_v35 = vpop.f32.mrf.mxu2 }
 0xc61   : > { %v6789_v20 = vadd.f32 %v6788_v35, %v6599_v40 }
 0xc63   : > { %v6884_v15 = vpack.c.bf16 %v6789_v20, %v6789_v20  ;;  %v7070_v20 = vunpack.c.l.b16 %v6878_v19 }
 0xc65   : > { %v7096_v25 = vunpack.c.l.b16 %v6884_v15  ;;  %v11647_v15 = vld [vmem:[%s12998_s21 + $0x210] sm:$0xf] }
 0xc68   : > { %v6790_v36 = vpop.f32.mrf.mxu2 }
 0xc69   : > { %v6791_v2 = vadd.f32 %v6790_v36, %v6601_v51  ;;  %v7071_v51 = vunpack.c.l.b16 %v6879_v61  ;;  %v11652_v61 = vor.u32 %v12680_v56, %v11649_v22  ;;  %v11657_v56 = vld [vmem:[%s12998_s21 + $0x228] sm:$0xf0] }
 0xc6b   : > { %v6885_v37 = vpack.c.bf16 %v6791_v2, %v6791_v2  ;;  %v7077_v6 = vpack.c.b16 %v7071_v51, %v7070_v20  ;;  %v12681_v2 = vld [vmem:[%s12998_s21 + $0x214] sm:$0xf0]  ;;  %6812 = vmatmul.bf16.gmra.mxu2 %v11652_v61 }
 0xc6c   : > { %v11648_v49 = vor.u32 %v12681_v2, %v11647_v15  ;;  %v12689_v51 = vld [vmem:[%s13003_s25 + $0x18] sm:$0xff]  ;;  %v11656_v15 = vor.u32 %v12683_v41, %v11655_v54  ;;  %v12682_v2 = vld [vmem:[%s12998_s21 + $0x224] sm:$0xf] }
 0xc6d   : > { %v7097_v32 = vunpack.c.l.b16 %v6885_v37  ;;  %v6873_v37 = vpack.c.bf16 %v6761_v63, %v6761_v63  ;;  %7299 = vmatpush.bf16.msra.mxu3 %v12689_v51  ;;  %v11660_v22 = vor.u32 %v12682_v2, %v11657_v56  ;;  %v11665_v51 = vld [vmem:[%s12998_s21 + $0x238] sm:$0xf0]  ;;  %v6971_v2 = vpop.permute.xlu1 %6970 }
 0xc6e   : > { %6623 = vmatmul.bf16.gmra.mxu3 %v11648_v49 }
 0xc6f   : > { %v7104_v40 = vpack.c.b16 %v7097_v32, %v7096_v25  ;;  %v6872_v32 = vpack.c.bf16 %v15346_v8, %v15346_v8  ;;  %v7045_v50 = vunpack.c.l.b16 %v6873_v37  ;;  %v6881_v8 = vpack.c.bf16 %v6781_v58, %v6781_v58 }
 0xc70   : > { %v6793_v35 = vpop.f32.mrf.mxu2  ;;  %v6766_v37 = vadd.f32 %v15354_v16, %v15340_v52 }
 0xc71   : > { %7108 = vrot.lane.b32.xlu2 %v7104_v40, %s12967_s23  ;;  %v6794_v11 = vadd.f32 %v6793_v35, %v6604_v60  ;;  %v16618_v40 = vpack.c.b16 %v15249_v7, %v15247_v44  ;;  %v6611_v35 = vpop.f32.mrf.mxu3  ;;  %v7044_v20 = vunpack.c.l.b16 %v6872_v32  ;;  %v12688_v32 = vld [vmem:[%s13003_s25 + $0x10] sm:$0xff] }
 0xc72   : > { %7300 = vmatpush.bf16.msra.mxu3 %v12688_v32 }
 0xc73   : > { %v6886_v38 = vpack.c.bf16 %v6794_v11, %v6794_v11 }
 0xc75   : > { %v7098_v19 = vunpack.c.l.b16 %v6886_v38  ;;  %v6880_v38 = vpack.c.bf16 %v15361_v46, %v15361_v46 }
 0xc77   : > { %v7072_v46 = vunpack.c.l.b16 %v6880_v38 }
 0xc78   : > { %v6795_v36 = vpop.f32.mrf.mxu2 }
 0xc79   : > { %v6796_v24 = vadd.f32 %v6795_v36, %v6606_v4  ;;  %7082 = vrot.lane.b32.xlu2 %v7077_v6, %s12966_s22  ;;  %v7050_v6 = vpack.c.b16 %v7045_v50, %v7044_v20  ;;  %v6614_v63 = vpop.f32.mrf.mxu3  ;;  %v12685_v50 = vld [vmem:[%s12998_s21 + $0x234] sm:$0xf0]  ;;  %v12687_v20 = vld [vmem:[%s13003_s25 + $0x8] sm:$0xff] }
 0xc7a   : > { %7301 = vmatpush.bf16.msra.mxu3 %v12687_v20 }
 0xc7b   : > { %v6887_v14 = vpack.c.bf16 %v6796_v24, %v6796_v24  ;;  %v16619_v24 = vpack.c.b16 %v15280_v10, %v15278_v57  ;;  %6817 = vmatmul.bf16.gmra.mxu2 %v11660_v22 }
 0xc7d   : > { %v7099_v60 = vunpack.c.l.b16 %v6887_v14 }
 0xc7e   : > { %6628 = vmatmul.bf16.gmra.mxu3 %v11656_v15 }
 0xc7f   : > { %v7105_v4 = vpack.c.b16 %v7099_v60, %v7098_v19  ;;  %v16620_v60 = vpack.c.b16 %v15229_v17, %v15227_v43  ;;  %v6874_v17 = vpack.c.bf16 %v15352_v42, %v15352_v42  ;;  %v16623_v42 = vpack.c.b16 %v15326_v1, %v15324_v18  ;;  %v6941_v18 = vpop.permute.xlu2 %6940  ;;  %v6943_v1 = vpop.permute.xlu0 %6942 }
 0xc80   : > { %v6798_v25 = vpop.f32.mrf.mxu2 }
 0xc81   : > { %7110 = vrot.lane.b32.xlu0 %v7105_v4, %s12967_s23  ;;  %6972 = vrot.lane.b32.xlu2 %v16618_v40, %s12962_s11  ;;  %v6799_v11 = vadd.f32 %v6798_v25, %v6609_v33  ;;  %v7073_v33 = vunpack.c.l.b16 %v6881_v8  ;;  %v6786_v4 = vadd.f32 %v15376_v29, %v15368_v0  ;;  %v11663_v40 = vld [vmem:[%s12998_s21 + $0x230] sm:$0xf]  ;;  %v6616_v58 = vpop.f32.mrf.mxu3  ;;  %v6882_v0 = vpack.c.bf16 %v15374_v13, %v15374_v13 }
 0xc82   : > { %v11664_v16 = vor.u32 %v12685_v50, %v11663_v40  ;;  %v16621_v29 = vpack.c.b16 %v15292_v47, %v15290_v55  ;;  %v7046_v55 = vunpack.c.l.b16 %v6874_v17  ;;  %v16625_v40 = vpack.c.b16 %v15179_v23, %v15177_v34 }
 0xc83   : > { %v6888_v44 = vpack.c.bf16 %v6799_v11, %v6799_v11  ;;  %v7078_v57 = vpack.c.b16 %v7073_v33, %v7072_v46  ;;  %v6875_v11 = vpack.c.bf16 %v6766_v37, %v6766_v37  ;;  %v6883_v8 = vpack.c.bf16 %v6786_v4, %v6786_v4 }
 0xc84   : > { %v7074_v47 = vunpack.c.l.b16 %v6882_v0  ;;  %v7142_v50 = vsel %vm7136_vm11, %v16625_v40, %v6943_v1  ;;  %v16626_v23 = vpack.c.b16 %v15189_v62, %v15187_v53 }
 0xc85   : > { %v7100_v14 = vunpack.c.l.b16 %v6888_v44  ;;  %v12686_v44 = vld [vmem:[%s13003_s25] sm:$0xff]  ;;  %v7047_v13 = vunpack.c.l.b16 %v6875_v11 }
 0xc86   : > { %7302 = vmatpush.bf16.msra.mxu3 %v12686_v44 }
 0xc87   : > { %v6999_v56 = vpop.permute.xlu2 %6998  ;;  %v6969_v33 = vpop.permute.xlu0 %6968 }
 0xc88   : > { %v6800_v36 = vpop.f32.mrf.mxu2 }
 0xc89   : > { %v6801_v7 = vadd.f32 %v6800_v36, %v6611_v35  ;;  %7000 = vrot.lane.b32.xlu0 %v16619_v24, %s12963_s0  ;;  %7056 = vrot.lane.b32.xlu2 %v7050_v6, %s12965_s18  ;;  %v12684_v35 = vld [vmem:[%s12998_s21 + $0x234] sm:$0xf]  ;;  %v16622_v6 = vpack.c.b16 %v15259_v28, %v15257_v48  ;;  %v7051_v48 = vpack.c.b16 %v7047_v13, %v7046_v55 }
 0xc8a   : > { %v11668_v38 = vor.u32 %v12684_v35, %v11665_v51  ;;  %v7153_v35 = vsel %vm7149_vm12, %v7142_v50, %v6971_v2 }
 0xc8b   : > { %v6889_v49 = vpack.c.bf16 %v6801_v7, %v6801_v7  ;;  %v7075_v7 = vunpack.c.l.b16 %v6883_v8  ;;  %v7162_v51 = vsel %vm7158_vm14, %v7153_v35, %v6999_v56 }
 0xc8c   : > { %6822 = vmatmul.bf16.gmra.mxu2 %v11668_v38 }
 0xc8d   : > { %v7101_v61 = vunpack.c.l.b16 %v6889_v49  ;;  %v7079_v28 = vpack.c.b16 %v7075_v7, %v7074_v47  ;;  %v6997_v49 = vpop.permute.xlu1 %6996 }
 0xc8e   : > { %6633 = vmatmul.bf16.gmra.mxu3 %v11664_v16  ;;  %v12694_v16 = vld [vmem:[%s13003_s25 + $0x40] sm:$0xff] }
 0xc8f   : > { %v7106_v10 = vpack.c.b16 %v7101_v61, %v7100_v14  ;;  %v7025_v22 = vpop.permute.xlu2 %7024  ;;  %v7053_v61 = vpop.permute.xlu0 %7052  ;;  %7331 = vmatpush.bf16.msrb.mxu3 %v12694_v16 }
 0xc90   : > { %v6803_v19 = vpop.f32.mrf.mxu2 }
 0xc91   : > { %7112 = vrot.lane.b32.xlu1 %v7106_v10, %s12967_s23  ;;  %7084 = vrot.lane.b32.xlu0 %v7078_v57, %s12966_s22  ;;  %v6804_v25 = vadd.f32 %v6803_v19, %v6614_v63  ;;  %v16624_v63 = vpack.c.b16 %v15169_v5, %v15167_v21 }
 0xc92   : > { %6946 = vrot.lane.b32.xlu2 %v16620_v60, %s12961_s7  ;;  %s16633_s7 = sld [smem:[#allocation9_spill]] }
 0xc93   : > { %v6890_v43 = vpack.c.bf16 %v6804_v25, %v6804_v25  ;;  %v7139_v46 = vsel %vm7136_vm11, %v16624_v63, %v6941_v18 }
 0xc94   : > { %v7151_v14 = vsel %vm7149_vm12, %v7139_v46, %v6969_v33 }
 0xc95   : > { %v7102_v24 = vunpack.c.l.b16 %v6890_v43  ;;  %v7160_v57 = vsel %vm7158_vm14, %v7151_v14, %v6997_v49 }
 0xc96   : > { %v7169_v19 = vsel %vm7167_vm13, %v7160_v57, %v7025_v22 }
 0xc97   : > { %v7178_v60 = vsel %vm7176_vm15, %v7169_v19, %v7053_v61  ;;  %v7027_v32 = vpop.permute.xlu0 %7026 }
 0xc98   : > { %v6805_v52 = vpop.f32.mrf.mxu2  ;;  %v7171_v20 = vsel %vm7167_vm13, %v7162_v51, %v7027_v32 }
 0xc99   : > { %7002 = vrot.lane.b32.xlu1 %v16621_v29, %s12963_s0  ;;  %6974 = vrot.lane.b32.xlu0 %v16622_v6, %s12962_s11  ;;  %v6806_v36 = vadd.f32 %v6805_v52, %v6616_v58  ;;  %s16635_s0 = sld [smem:[#allocation10_spill]] }
 0xc9a   : > { %7030 = vrot.lane.b32.xlu2 %v16623_v42, %s12964_s4 }
 0xc9b   : > { %v6891_v54 = vpack.c.bf16 %v6806_v36, %v6806_v36 }
 0xc9d   : > { %v7103_v41 = vunpack.c.l.b16 %v6891_v54 }
 0xc9f   : > { %v7107_v15 = vpack.c.b16 %v7103_v41, %v7102_v24 }
 0xca1   : > { %7058 = vrot.lane.b32.xlu0 %v7051_v48, %s12965_s18  ;;  %7086 = vrot.lane.b32.xlu1 %v7079_v28, %s12966_s22  ;;  %s16637_s18 = sld [smem:[#allocation15_spill]] }
 0xca2   : > { %7114 = vrot.lane.b32.xlu2 %v7107_v15, %s12967_s23  ;;  %v16627_v15 = vpack.c.b16 %v15199_v12, %v15197_v45  ;;  %s16639_s23 = sld [smem:[#allocation7_spill]] }
 0xca3   : > { %v7081_v10 = vpop.permute.xlu1 %7080 }
 0xca4   : > { %v7187_v37 = vsel %vm7185_vm0, %v7178_v60, %v7081_v10 }
 0xcab   : > { %v7055_v25 = vpop.permute.xlu1 %7054 }
 0xcac   : > { %v7180_v8 = vsel %vm7176_vm15, %v7171_v20, %v7055_v25 }
 0xcb3   : > { %v6945_v11 = vpop.permute.xlu1 %6944 }
 0xcb4   : > { %v7145_v0 = vsel %vm7136_vm11, %v16626_v23, %v6945_v11 }
 0xcbb   : > { %v7029_v29 = vpop.permute.xlu1 %7028 }
 0xcc6   : > { %v6619_v44 = vpop.f32.mrf.mxu3  ;;  %v6808_v13 = vpop.f32.mrf.mxu2 }
 0xcc7   : > { %v6809_v12 = vadd.f32 %v6808_v13, %v6619_v44 }
 0xcc9   : > { %v6892_v19 = vpack.c.bf16 %v6809_v12, %v6809_v12 }
 0xccb   : > { %v7109_v21 = vpop.permute.xlu2 %7108 }
 0xccc   : > { %v7196_v5 = vsel %vm7194_vm1, %v7187_v37, %v7109_v21 }
 0xccd   : > { %7303 = vmatmul.bf16.vlgmr.msra.gmra.mxu3 %v7196_v5  ;;  %v7124_v5 = vunpack.c.l.b16 %v6892_v19 }
 0xcce   : > { %v6621_v62 = vpop.f32.mrf.mxu3  ;;  %v6810_v41 = vpop.f32.mrf.mxu2 }
 0xccf   : > { %v6811_v10 = vadd.f32 %v6810_v41, %v6621_v62 }
 0xcd1   : > { %v6893_v60 = vpack.c.bf16 %v6811_v10, %v6811_v10 }
 0xcd3   : > { %v7083_v4 = vpop.permute.xlu2 %7082 }
 0xcd4   : > { %v7189_v43 = vsel %vm7185_vm0, %v7180_v8, %v7083_v4  ;;  %v7125_v4 = vunpack.c.l.b16 %v6893_v60 }
 0xcd6   : > { %v7132_v25 = vpack.c.b16 %v7125_v4, %v7124_v5 }
 0xcdb   : > { %v6973_v58 = vpop.permute.xlu2 %6972 }
 0xcdc   : > { %v7155_v36 = vsel %vm7149_vm12, %v7145_v0, %v6973_v58 }
 0xce3   : > { %v7057_v34 = vpop.permute.xlu2 %7056 }
 0xcec   : > { %v6947_v7 = vpop.permute.xlu2 %6946 }
 0xced   : > { %v7148_v18 = vsel %vm7136_vm11, %v16627_v15, %v6947_v7 }
 0xcee   : > { %v6813_v14 = vpop.f32.mrf.mxu2 }
 0xcf1   : > { %v6624_v46 = vpop.f32.mrf.mxu3 }
 0xcf2   : > { %v6814_v50 = vadd.f32 %v6813_v14, %v6624_v46 }
 0xcf3   : > { %v7111_v17 = vpop.permute.xlu0 %7110 }
 0xcf4   : > { %v7199_v52 = vsel %vm7194_vm1, %v7189_v43, %v7111_v17  ;;  %v7031_v1 = vpop.permute.xlu2 %7030  ;;  %v6894_v35 = vpack.c.bf16 %v6814_v50, %v6814_v50 }
 0xcf5   : > { %7308 = vmatmul.bf16.gmra.mxu3 %v7199_v52 }
 0xcf6   : > { %v6815_v21 = vpop.f32.mrf.mxu2  ;;  %v7126_v20 = vunpack.c.l.b16 %v6894_v35 }
 0xcf9   : > { %v6626_v37 = vpop.f32.mrf.mxu3 }
 0xcfa   : > { %v6816_v58 = vadd.f32 %v6815_v21, %v6626_v37 }
 0xcfb   : > { %v7001_v6 = vpop.permute.xlu0 %7000 }
 0xcfc   : > { %v7164_v38 = vsel %vm7158_vm14, %v7155_v36, %v7001_v6  ;;  %v7115_v57 = vpop.permute.xlu2 %7114  ;;  %v6895_v51 = vpack.c.bf16 %v6816_v58, %v6816_v58 }
 0xcfd   : > { %v7173_v42 = vsel %vm7167_vm13, %v7164_v38, %v7029_v29 }
 0xcfe   : > { %v7182_v55 = vsel %vm7176_vm15, %v7173_v42, %v7057_v34  ;;  %v6818_v40 = vpop.f32.mrf.mxu2  ;;  %v7127_v11 = vunpack.c.l.b16 %v6895_v51 }
 0xd00   : > { %v7133_v17 = vpack.c.b16 %v7127_v11, %v7126_v20 }
 0xd01   : > { %v6629_v32 = vpop.f32.mrf.mxu3 }
 0xd02   : > { %v6819_v52 = vadd.f32 %v6818_v40, %v6629_v32 }
 0xd03   : > { %v7113_v24 = vpop.permute.xlu1 %7112  ;;  %v7085_v54 = vpop.permute.xlu0 %7084 }
 0xd04   : > { %v7191_v47 = vsel %vm7185_vm0, %v7182_v55, %v7085_v54  ;;  %v6896_v0 = vpack.c.bf16 %v6819_v52, %v6819_v52 }
 0xd05   : > { %v7202_v53 = vsel %vm7194_vm1, %v7191_v47, %v7113_v24 }
 0xd06   : > { %7313 = vmatmul.bf16.gmra.mxu3 %v7202_v53  ;;  %v6820_v43 = vpop.f32.mrf.mxu2  ;;  %v7128_v6 = vunpack.c.l.b16 %v6896_v0 }
 0xd09   : > { %v6631_v8 = vpop.f32.mrf.mxu3 }
 0xd0a   : > { %v6821_v16 = vadd.f32 %v6820_v43, %v6631_v8 }
 0xd0b   : > { %v7003_v48 = vpop.permute.xlu1 %7002  ;;  %v6975_v28 = vpop.permute.xlu0 %6974 }
 0xd0c   : > { %v7157_v2 = vsel %vm7149_vm12, %v7148_v18, %v6975_v28  ;;  %v6897_v29 = vpack.c.bf16 %v6821_v16, %v6821_v16 }
 0xd0d   : > { %v7166_v56 = vsel %vm7158_vm14, %v7157_v2, %v7003_v48 }
 0xd0e   : > { %v7175_v49 = vsel %vm7167_vm13, %v7166_v56, %v7031_v1  ;;  %v7129_v36 = vunpack.c.l.b16 %v6897_v29  ;;  %v12899_v56 = vld [vmem:[%s13008_s29] ss:$0 sm:$0xff] }
 0xd0f   : > { %v6823_v23 = vpop.f32.mrf.mxu2 }
 0xd10   : > { %v7134_v38 = vpack.c.b16 %v7129_v36, %v7128_v6 }
 0xd11   : > { %v6634_v34 = vpop.f32.mrf.mxu3 }
 0xd12   : > { %v6824_v13 = vadd.f32 %v6823_v23, %v6634_v34 }
 0xd13   : > { %v7059_v33 = vpop.permute.xlu0 %7058  ;;  %v7087_v22 = vpop.permute.xlu1 %7086 }
 0xd14   : > { %v7184_v63 = vsel %vm7176_vm15, %v7175_v49, %v7059_v33  ;;  %v6898_v24 = vpack.c.bf16 %v6824_v13, %v6824_v13  ;;  %v12710_v13 = vld [vmem:[%s13018_s8 + $0x30] sm:$0xff] }
 0xd15   : > { %v7193_v61 = vsel %vm7185_vm0, %v7184_v63, %v7087_v22 }
 0xd16   : > { %v7205_v45 = vsel %vm7194_vm1, %v7193_v61, %v7115_v57  ;;  %v7130_v55 = vunpack.c.l.b16 %v6898_v24  ;;  %v12711_v57 = vld [vmem:[%s13018_s8 + $0x38] sm:$0xff]  ;;  %v12699_v24 = vld [vmem:[%s13013_s3 + $0x20] sm:$0xff] }
 0xd17   : > { %7318 = vmatmul.bf16.gmra.mxu3 %v7205_v45  ;;  %v6825_v44 = vpop.f32.mrf.mxu2  ;;  %7751 = vmatpush.bf16.msrb.mxu2 %v12711_v57 }
 0xd19   : > { %v6636_v42 = vpop.f32.mrf.mxu3 }
 0xd1a   : > { %v6826_v7 = vadd.f32 %v6825_v44, %v6636_v42  ;;  %v12696_v42 = vld [vmem:[%s13013_s3 + $0x8] sm:$0xff]  ;;  %v12697_v44 = vld [vmem:[%s13013_s3 + $0x10] sm:$0xff] }
 0xd1b   : > { %7752 = vmatpush.bf16.msrb.mxu2 %v12710_v13 }
 0xd1c   : > { %v6899_v54 = vpack.c.bf16 %v6826_v7, %v6826_v7  ;;  %v12698_v7 = vld [vmem:[%s13013_s3 + $0x18] sm:$0xff] }
 0xd1e   : > { %v7131_v47 = vunpack.c.l.b16 %v6899_v54  ;;  %v12700_v54 = vld [vmem:[%s13013_s3 + $0x28] sm:$0xff] }
 0xd20   : > { %v7135_v53 = vpack.c.b16 %v7131_v47, %v7130_v55  ;;  %v12701_v55 = vld [vmem:[%s13013_s3 + $0x30] sm:$0xff]  ;;  %v12709_v47 = vld [vmem:[%s13018_s8 + $0x28] sm:$0xff] }
 0xd21   : > { %7753 = vmatpush.bf16.msrb.mxu2 %v12709_v47 }
 0xd27   : > { %11705 = vmatmul.msk.bf16.vlgmr.msrb.gmra.mxu3 %vm7136_vm11, %v7132_v25 }
 0xd37   : > { %11706 = vmatmul.msk.bf16.gmra.mxu3 %vm7136_vm11, %v7133_v17 }
 0xd47   : > { %11707 = vmatmul.msk.bf16.gmra.mxu3 %vm7136_vm11, %v7134_v38  ;;  %v12695_v38 = vld [vmem:[%s13013_s3] sm:$0xff] }
 0xd50   : > { %v7304_v62 = vpop.f32.mrf.mxu3 }
 0xd51   : > { %v7305_v33 = vadd.f32 %v12899_v56, %v7304_v62 }
 0xd57   : > { %11708 = vmatmul.msk.bf16.gmra.mxu3 %vm7136_vm11, %v7135_v53  ;;  %v12702_v53 = vld [vmem:[%s13013_s3 + $0x38] sm:$0xff] }
 0xd58   : > { %v7306_v41 = vpop.f32.mrf.mxu3 }
 0xd59   : > { %v7307_v8 = vadd.f32 %v12899_v56, %v7306_v41 }
 0xd78   : > { %v7309_v48 = vpop.f32.mrf.mxu3 }
 0xd79   : > { %v7310_v35 = vadd.f32 %v12899_v56, %v7309_v48 }
 0xd80   : > { %v7311_v28 = vpop.f32.mrf.mxu3 }
 0xd81   : > { %v7312_v32 = vadd.f32 %v12899_v56, %v7311_v28 }
 0xd89   : > { %v7314_v15 = vpop.f32.mrf.mxu3 }
 0xd8a   : > { %v7315_v5 = vadd.f32 %v12899_v56, %v7314_v15 }
 0xd91   : > { %v7316_v18 = vpop.f32.mrf.mxu3 }
 0xd92   : > { %v7317_v19 = vadd.f32 %v12899_v56, %v7316_v18 }
 0xd9a   : > { %v7319_v1 = vpop.f32.mrf.mxu3 }
 0xd9b   : > { %v7320_v10 = vadd.f32 %v12899_v56, %v7319_v1 }
 0xda2   : > { %v7321_v2 = vpop.f32.mrf.mxu3 }
 0xda3   : > { %v7322_v60 = vadd.f32 %v12899_v56, %v7321_v2 }
 0xdaa   : > { %v7333_v49 = vpop.f32.mrf.mxu3 }
 0xdab   : > { %v7334_v22 = vadd.f32 %v7333_v49, %v7305_v33  ;;  %v12703_v49 = vld [vmem:[%s13013_s3 + $0x40] sm:$0xff] }
 0xdad   : > { %v15521_v6 = vmax.f32 %v7334_v22, 0.0 }
 0xdb2   : > { %v7335_v63 = vpop.f32.mrf.mxu3 }
 0xdb3   : > { %v7336_v52 = vadd.f32 %v7335_v63, %v7307_v8 }
 0xdb5   : > { %v15515_v0 = vmax.f32 %v7336_v52, 0.0 }
 0xdb7   : > { %v15526_v36 = vpack.c.bf16 %v15515_v0, %v15521_v6 }
 0xdba   : > { %v7338_v46 = vpop.f32.mrf.mxu3 }
 0xdbb   : > { %v7339_v43 = vadd.f32 %v7338_v46, %v7310_v35 }
 0xdbd   : > { %v15512_v23 = vmax.f32 %v7339_v43, 0.0 }
 0xdc2   : > { %v7340_v14 = vpop.f32.mrf.mxu3 }
 0xdc3   : > { %v7341_v51 = vadd.f32 %v7340_v14, %v7312_v32 }
 0xdc5   : > { %v15506_v16 = vmax.f32 %v7341_v51, 0.0 }
 0xdc7   : > { %v15519_v29 = vpack.c.bf16 %v15506_v16, %v15512_v23 }
 0xdca   : > { %v7343_v61 = vpop.f32.mrf.mxu3 }
 0xdcb   : > { %v7344_v40 = vadd.f32 %v7343_v61, %v7315_v5 }
 0xdcd   : > { %v15503_v17 = vmax.f32 %v7344_v40, 0.0 }
 0xdd2   : > { %v7345_v45 = vpop.f32.mrf.mxu3 }
 0xdd3   : > { %v7346_v4 = vadd.f32 %v7345_v45, %v7317_v19  ;;  %v12708_v45 = vld [vmem:[%s13018_s8 + $0x20] sm:$0xff] }
 0xdd4   : > { %7754 = vmatpush.bf16.msrb.mxu2 %v12708_v45 }
 0xdd5   : > { %v15497_v20 = vmax.f32 %v7346_v4, 0.0 }
 0xdd7   : > { %v15510_v34 = vpack.c.bf16 %v15497_v20, %v15503_v17 }
 0xdda   : > { %v7348_v12 = vpop.f32.mrf.mxu3 }
 0xddb   : > { %v7349_v37 = vadd.f32 %v7348_v12, %v7320_v10 }
 0xddd   : > { %v15493_v50 = vmax.f32 %v7349_v37, 0.0 }
 0xde2   : > { %v7350_v21 = vpop.f32.mrf.mxu3 }
 0xde3   : > { %v7351_v25 = vadd.f32 %v7350_v21, %v7322_v60 }
 0xde5   : > { %v15495_v58 = vmax.f32 %v7351_v25, 0.0 }
 0xde7   : > { %v15501_v11 = vpack.c.bf16 %v15495_v58, %v15493_v50 }
 0xde9   : > { %7459 = vmatpush.bf16.msra.mxu3 %v15501_v11 }
 0xded   : > { %7460 = vmatpush.bf16.msra.mxu3 %v15510_v34 }
 0xdf1   : > { %7461 = vmatpush.bf16.msra.mxu3 %v15519_v29 }
 0xdf5   : > { %7462 = vmatpush.bf16.msra.mxu3 %v15526_v36 }
 0xdf8   : > { %11745 = vmatmul.msk.bf16.vlgmr.msra.gmra.mxu3 %vm7167_vm13, %v12695_v38  ;;  %v12707_v38 = vld [vmem:[%s13018_s8 + $0x18] sm:$0xff] }
 0xdf9   : > { %7755 = vmatpush.bf16.msrb.mxu2 %v12707_v38  ;;  %v12720_v38 = vld [vmem:[%s13018_s8 + $0x80] sm:$0xff] }
 0xe08   : > { %11746 = vmatmul.msk.bf16.gmra.mxu3 %vm7167_vm13, %v12696_v42 }
 0xe18   : > { %11747 = vmatmul.msk.bf16.gmra.mxu3 %vm7167_vm13, %v12697_v44 }
 0xe28   : > { %11748 = vmatmul.msk.bf16.gmra.mxu3 %vm7167_vm13, %v12698_v7 }
 0xe38   : > { %11749 = vmatmul.msk.bf16.gmra.mxu3 %vm7167_vm13, %v12699_v24 }
 0xe48   : > { %11750 = vmatmul.msk.bf16.gmra.mxu3 %vm7167_vm13, %v12700_v54 }
 0xe58   : > { %11751 = vmatmul.msk.bf16.gmra.mxu3 %vm7167_vm13, %v12701_v55 }
 0xe68   : > { %11752 = vmatmul.msk.bf16.gmra.mxu3 %vm7167_vm13, %v12702_v53  ;;  %v12706_v53 = vld [vmem:[%s13018_s8 + $0x10] sm:$0xff] }
 0xe69   : > { %7756 = vmatpush.bf16.msrb.mxu2 %v12706_v53 }
 0xe78   : > { %11753 = vmatmul.msk.bf16.gmra.mxu3 %vm7167_vm13, %v12703_v49  ;;  %v12719_v49 = vld [vmem:[%s13018_s8 + $0x78] sm:$0xff] }
 0xe7b   : > { %v15547_v62 = vpop.f32.mrf.mxu3 }
 0xe83   : > { %v15549_v41 = vpop.f32.mrf.mxu3 }
 0xe8b   : > { %v7469_v48 = vpop.f32.mrf.mxu3 }
 0xe8c   : > { %v7511_v28 = vpack.c.bf16 %v7469_v48, %v7469_v48  ;;  %v12705_v48 = vld [vmem:[%s13018_s8 + $0x8] sm:$0xff] }
 0xe8d   : > { %7757 = vmatpush.bf16.msrb.mxu2 %v12705_v48 }
 0xe8e   : > { %v7534_v1 = vunpack.c.l.b16 %v7511_v28 }
 0xe93   : > { %v7471_v15 = vpop.f32.mrf.mxu3 }
 0xe94   : > { %v7512_v18 = vpack.c.bf16 %v7471_v15, %v7471_v15 }
 0xe96   : > { %v7535_v2 = vunpack.c.l.b16 %v7512_v18  ;;  %v12704_v18 = vld [vmem:[%s13018_s8] sm:$0xff] }
 0xe97   : > { %7758 = vmatpush.bf16.msrb.mxu2 %v12704_v18 }
 0xe98   : > { %v7536_v56 = vpack.c.b16 %v7535_v2, %v7534_v1 }
 0xe9a   : > { %7537 = vrot.lane.b32.xlu0 %v7536_v56, %s12962_s11 }
 0xe9b   : > { %v7474_v33 = vpop.f32.mrf.mxu3  ;;  %7765 = vmatpush.bf16.msra.mxu2 %v12719_v49 }
 0xe9c   : > { %v7513_v22 = vpack.c.bf16 %v7474_v33, %v7474_v33 }
 0xe9e   : > { %v7541_v14 = vunpack.c.l.b16 %v7513_v22  ;;  %v12718_v22 = vld [vmem:[%s13018_s8 + $0x70] sm:$0xff] }
 0xe9f   : > { %7766 = vmatpush.bf16.msra.mxu2 %v12718_v22 }
 0xea3   : > { %v7476_v63 = vpop.f32.mrf.mxu3 }
 0xea4   : > { %v7514_v46 = vpack.c.bf16 %v7476_v63, %v7476_v63  ;;  %v12717_v63 = vld [vmem:[%s13018_s8 + $0x68] sm:$0xff] }
 0xea5   : > { %7767 = vmatpush.bf16.msra.mxu2 %v12717_v63 }
 0xea6   : > { %v7542_v61 = vunpack.c.l.b16 %v7514_v46  ;;  %v12716_v46 = vld [vmem:[%s13018_s8 + $0x60] sm:$0xff] }
 0xea8   : > { %v7543_v57 = vpack.c.b16 %v7542_v61, %v7541_v14  ;;  %v12715_v14 = vld [vmem:[%s13018_s8 + $0x58] sm:$0xff]  ;;  %v7510_v61 = vpack.c.bf16 %v15549_v41, %v15549_v41 }
 0xea9   : > { %7768 = vmatpush.bf16.msra.mxu2 %v12716_v46 }
 0xeaa   : > { %7544 = vrot.lane.b32.xlu1 %v7543_v57, %s12964_s4  ;;  %v7509_v57 = vpack.c.bf16 %v15547_v62, %v15547_v62  ;;  %v7530_v45 = vunpack.c.l.b16 %v7510_v61 }
 0xeab   : > { %v7479_v12 = vpop.f32.mrf.mxu3 }
 0xeac   : > { %v7515_v10 = vpack.c.bf16 %v7479_v12, %v7479_v12  ;;  %v7529_v12 = vunpack.c.l.b16 %v7509_v57 }
 0xead   : > { %7769 = vmatpush.bf16.msra.mxu2 %v12715_v14 }
 0xeae   : > { %v7548_v37 = vunpack.c.l.b16 %v7515_v10 }
 0xeb3   : > { %v7481_v19 = vpop.f32.mrf.mxu3 }
 0xeb4   : > { %v7516_v60 = vpack.c.bf16 %v7481_v19, %v7481_v19  ;;  %v7531_v19 = vpack.c.b16 %v7530_v45, %v7529_v12 }
 0xeb6   : > { %v7549_v21 = vunpack.c.l.b16 %v7516_v60 }
 0xeb8   : > { %v7550_v5 = vpack.c.b16 %v7549_v21, %v7548_v37 }
 0xeba   : > { %7551 = vrot.lane.b32.xlu2 %v7550_v5, %s12966_s22 }
 0xebb   : > { %v15557_v4 = vpop.f32.mrf.mxu3 }
 0xec3   : > { %v15559_v25 = vpop.f32.mrf.mxu3 }
 0xecb   : > { %v7489_v32 = vpop.f32.mrf.mxu3 }
 0xecc   : > { %v7519_v40 = vpack.c.bf16 %v7489_v32, %v7489_v32 }
 0xece   : > { %v7560_v8 = vunpack.c.l.b16 %v7519_v40  ;;  %v12721_v40 = vld [vmem:[%s13018_s8 + $0x88] sm:$0xff] }
 0xecf   : > { %7785 = vmatpush.bf16.msrb.mxu3 %v12721_v40 }
 0xed3   : > { %v7491_v35 = vpop.f32.mrf.mxu3  ;;  %7786 = vmatpush.bf16.msrb.mxu3 %v12720_v38 }
 0xed4   : > { %v7520_v51 = vpack.c.bf16 %v7491_v35, %v7491_v35 }
 0xed6   : > { %v7561_v43 = vunpack.c.l.b16 %v7520_v51 }
 0xed8   : > { %v7562_v52 = vpack.c.b16 %v7561_v43, %v7560_v8  ;;  %v12714_v8 = vld [vmem:[%s13018_s8 + $0x50] sm:$0xff] }
 0xed9   : > { %7770 = vmatpush.bf16.msra.mxu2 %v12714_v8  ;;  %v12730_v8 = vld [vmem:[%s13033_s24 + $0x30] sm:$0xff] }
 0xeda   : > { %7563 = vrot.lane.b32.xlu0 %v7562_v52, %s12962_s11  ;;  %s16634_s11 = sld [smem:[#allocation13_spill]] }
 0xedb   : > { %v7494_v42 = vpop.f32.mrf.mxu3 }
 0xedc   : > { %v7521_v44 = vpack.c.bf16 %v7494_v42, %v7494_v42  ;;  %v12713_v42 = vld [vmem:[%s13018_s8 + $0x48] sm:$0xff] }
 0xedd   : > { %7771 = vmatpush.bf16.msra.mxu2 %v12713_v42  ;;  %v12729_v42 = vld [vmem:[%s13033_s24 + $0x28] sm:$0xff] }
 0xede   : > { %v7567_v24 = vunpack.c.l.b16 %v7521_v44 }
 0xee3   : > { %v7496_v13 = vpop.f32.mrf.mxu3 }
 0xee4   : > { %v7522_v7 = vpack.c.bf16 %v7496_v13, %v7496_v13  ;;  %v12712_v13 = vld [vmem:[%s13018_s8 + $0x40] sm:$0xff] }
 0xee5   : > { %7772 = vmatpush.bf16.msra.mxu2 %v12712_v13  ;;  %v12737_v13 = vld [vmem:[%s13033_s24 + $0x68] sm:$0xff] }
 0xee6   : > { %v7568_v54 = vunpack.c.l.b16 %v7522_v7  ;;  %v7518_v7 = vpack.c.bf16 %v15559_v25, %v15559_v25  ;;  %v12900_v25 = vld [vmem:[%s13023_s14] ss:$0 sm:$0xff] }
 0xee8   : > { %v7569_v55 = vpack.c.b16 %v7568_v54, %v7567_v24  ;;  %v7517_v24 = vpack.c.bf16 %v15557_v4, %v15557_v4  ;;  %v7556_v54 = vunpack.c.l.b16 %v7518_v7 }
 0xeea   : > { %7570 = vrot.lane.b32.xlu1 %v7569_v55, %s12964_s4  ;;  %v7555_v55 = vunpack.c.l.b16 %v7517_v24 }
 0xeeb   : > { %v7499_v47 = vpop.f32.mrf.mxu3 }
 0xeec   : > { %v7523_v28 = vpack.c.bf16 %v7499_v47, %v7499_v47  ;;  %v7557_v53 = vpack.c.b16 %v7556_v54, %v7555_v55  ;;  %v12728_v54 = vld [vmem:[%s13033_s24 + $0x20] sm:$0xff] }
 0xeed   : > { %v12736_v55 = vld [vmem:[%s13033_s24 + $0x60] sm:$0xff] }
 0xeee   : > { %v7574_v1 = vunpack.c.l.b16 %v7523_v28 }
 0xef3   : > { %v7501_v15 = vpop.f32.mrf.mxu3 }
 0xef4   : > { %v7524_v2 = vpack.c.bf16 %v7501_v15, %v7501_v15 }
 0xef6   : > { %v7575_v56 = vunpack.c.l.b16 %v7524_v2 }
 0xef8   : > { %v7576_v33 = vpack.c.b16 %v7575_v56, %v7574_v1 }
 0xefa   : > { %7577 = vrot.lane.b32.xlu2 %v7576_v33, %s12966_s22  ;;  %s16638_s22 = sld [smem:[#allocation17_spill]] }
 0xefb   : > { %v7504_v41 = vpop.f32.mrf.mxu3 }
 0xefc   : > { %v7525_v35 = vpack.c.bf16 %v7504_v41, %v7504_v41 }
 0xefe   : > { %v7581_v43 = vunpack.c.l.b16 %v7525_v35  ;;  %v12739_v35 = vld [vmem:[%s13033_s24 + $0x78] sm:$0xff] }
 0xf03   : > { %v7506_v62 = vpop.f32.mrf.mxu3 }
 0xf04   : > { %v7526_v51 = vpack.c.bf16 %v7506_v62, %v7506_v62  ;;  %v12731_v62 = vld [vmem:[%s13033_s24 + $0x38] sm:$0xff] }
 0xf05   : > { %8186 = vmatpush.bf16.msra.mxu3 %v12731_v62  ;;  %v12743_v62 = vld [vmem:[%s13033_s24 + $0x98] sm:$0xff] }
 0xf06   : > { %v7582_v52 = vunpack.c.l.b16 %v7526_v51 }
 0xf08   : > { %v7583_v44 = vpack.c.b16 %v7582_v52, %v7581_v43  ;;  %v12738_v43 = vld [vmem:[%s13033_s24 + $0x70] sm:$0xff] }
 0xf09   : > { %8187 = vmatpush.bf16.msra.mxu3 %v12730_v8  ;;  %v12752_v8 = vld [vmem:[%s13033_s24 + $0xe0] sm:$0xff] }
 0xf0a   : > { %11826 = vmatmul.msk.bf16.vlgmr.msrb.gmra.mxu3 %vm7149_vm12, %v7583_v44 }
 0xf0c   : > { %v7538_v10 = vpop.permute.xlu0 %7537 }
 0xf0d   : > { %v7586_v60 = vsel %vm7149_vm12, %v7531_v19, %v7538_v10  ;;  %8188 = vmatpush.bf16.msra.mxu3 %v12729_v42  ;;  %v12751_v42 = vld [vmem:[%s13033_s24 + $0xd8] sm:$0xff] }
 0xf11   : > { %8189 = vmatpush.bf16.msra.mxu3 %v12728_v54  ;;  %v12759_v54 = vld [vmem:[%s13033_s24 + $0x118] sm:$0xff] }
 0xf14   : > { %v7552_v5 = vpop.permute.xlu2 %7551 }
 0xf1c   : > { %v7545_v37 = vpop.permute.xlu1 %7544 }
 0xf1d   : > { %v7588_v21 = vsel %vm7167_vm13, %v7586_v60, %v7545_v37  ;;  %v12722_v60 = vld [vmem:[%s13028_s19] sm:$0xff]  ;;  %v12723_v37 = vld [vmem:[%s13028_s19 + $0x8] sm:$0xff] }
 0xf1e   : > { %v7590_v32 = vsel %vm7185_vm0, %v7588_v21, %v7552_v5  ;;  %v7799_v21 = vld [vmem:[%s13028_s19 + $0x10] sm:$0x3] }
 0xf1f   : > { %7759 = vmatmul.bf16.vlgmr.msrb.gmra.mxu2 %v7590_v32  ;;  %v7810_v5 = vunpack.c.l.b16 %v7799_v21  ;;  %v12746_v21 = vld [vmem:[%s13033_s24 + $0xb0] sm:$0xff] }
 0xf21   : > { %v7813_v32 = vpack.c.b16 %v7810_v5, %v7810_v5  ;;  %v12754_v5 = vld [vmem:[%s13033_s24 + $0xf0] sm:$0xff] }
 0xf4c   : > { %v7564_v47 = vpop.permute.xlu0 %7563 }
 0xf4d   : > { %v7594_v48 = vsel %vm7149_vm12, %v7557_v53, %v7564_v47 }
 0xf54   : > { %v7578_v18 = vpop.permute.xlu2 %7577 }
 0xf5c   : > { %v7571_v28 = vpop.permute.xlu1 %7570 }
 0xf5d   : > { %v7596_v15 = vsel %vm7167_vm13, %v7594_v48, %v7571_v28  ;;  %v12727_v48 = vld [vmem:[%s13033_s24 + $0x18] sm:$0xff] }
 0xf5e   : > { %v7598_v1 = vsel %vm7185_vm0, %v7596_v15, %v7578_v18  ;;  %v12735_v15 = vld [vmem:[%s13033_s24 + $0x58] sm:$0xff]  ;;  %8190 = vmatpush.bf16.msra.mxu3 %v12727_v48 }
 0xf5f   : > { %7773 = vmatmul.bf16.vlgmr.msra.gmra.mxu2 %v7598_v1 }
 0xf8d   : > { %v7788_v4 = vpop.f32.mrf.mxu3 }
 0xf95   : > { %v7790_v57 = vpop.f32.mrf.mxu3 }
 0xfa2   : > { %v7760_v2 = vpop.f32.mrf.mxu2 }
 0xfa3   : > { %v7761_v49 = vadd.f32 %v12900_v25, %v7760_v2  ;;  %v12726_v2 = vld [vmem:[%s13033_s24 + $0x10] sm:$0xff] }
 0xfa4   : > { %8191 = vmatpush.bf16.msra.mxu3 %v12726_v2 }
 0xfaa   : > { %v7762_v56 = vpop.f32.mrf.mxu2 }
 0xfab   : > { %v7763_v63 = vadd.f32 %v12900_v25, %v7762_v56  ;;  %v12734_v56 = vld [vmem:[%s13033_s24 + $0x50] sm:$0xff] }
 0xfe2   : > { %v7774_v33 = vpop.f32.mrf.mxu2 }
 0xfe3   : > { %v7775_v22 = vadd.f32 %v7774_v33, %v7761_v49 }
 0xfe5   : > { %v7789_v14 = vadd.f32 %v7788_v4, %v7775_v22  ;;  %v12725_v4 = vld [vmem:[%s13033_s24 + $0x8] sm:$0xff] }
 0xfe6   : > { %v12733_v22 = vld [vmem:[%s13033_s24 + $0x48] sm:$0xff]  ;;  %8192 = vmatpush.bf16.msra.mxu3 %v12725_v4 }
 0xfe7   : > { %v15594_v12 = vmax.f32 %v7789_v14, 0.0  ;;  %v12724_v14 = vld [vmem:[%s13033_s24] sm:$0xff] }
 0xfea   : > { %v7776_v46 = vpop.f32.mrf.mxu2  ;;  %8193 = vmatpush.bf16.msra.mxu3 %v12724_v14 }
 0xfeb   : > { %v7777_v61 = vadd.f32 %v7776_v46, %v7763_v63 }
 0xfed   : > { %v7791_v45 = vadd.f32 %v7790_v57, %v7777_v61  ;;  %v12747_v61 = vld [vmem:[%s13033_s24 + $0xb8] sm:$0xff]  ;;  %v12732_v57 = vld [vmem:[%s13033_s24 + $0x40] sm:$0xff] }
 0xfee   : > { %8212 = vmatpush.bf16.msrb.mxu3 %v12747_v61 }
 0xfef   : > { %v15596_v10 = vmax.f32 %v7791_v45, 0.0 }
 0xff1   : > { %v15600_v19 = vpack.c.bf16 %v15596_v10, %v15594_v12 }
 0xff2   : > { %8213 = vmatpush.bf16.msrb.mxu3 %v12746_v21 }
 0xff3   : > { %7830 = vmatpush.bf16.msrb.mxu2 %v15600_v19 }
 0xff6   : > { %11835 = vmatmul.msk.bf16.vlgmr.msrb.gmra.mxu2 %vm7136_vm11, %v12722_v60  ;;  %v12755_v60 = vld [vmem:[%s13033_s24 + $0xf8] sm:$0xff] }
 0xff7   : > { %8199 = vmatpush.bf16.msra.mxu2 %v12739_v35  ;;  %v12753_v35 = vld [vmem:[%s13033_s24 + $0xe8] sm:$0xff] }
 0xffb   : > { %8200 = vmatpush.bf16.msra.mxu2 %v12738_v43 }
 0xfff   : > { %8201 = vmatpush.bf16.msra.mxu2 %v12737_v13  ;;  %v12750_v13 = vld [vmem:[%s13033_s24 + $0xd0] sm:$0xff] }
0x1003   : > { %8202 = vmatpush.bf16.msra.mxu2 %v12736_v55  ;;  %v12748_v55 = vld [vmem:[%s13033_s24 + $0xc0] sm:$0xff] }
0x1006   : > { %11836 = vmatmul.msk.bf16.gmra.mxu2 %vm7136_vm11, %v12723_v37 }
0x1007   : > { %8203 = vmatpush.bf16.msra.mxu2 %v12735_v15  ;;  %v8253_v15 = vld [vmem:[%s13043_s6 + $0x8] sm:$0xff] }
0x100b   : > { %8204 = vmatpush.bf16.msra.mxu2 %v12734_v56  ;;  %v8252_v56 = vld [vmem:[%s13043_s6] sm:$0xff] }
0x100f   : > { %8205 = vmatpush.bf16.msra.mxu2 %v12733_v22 }
0x1013   : > { %8206 = vmatpush.bf16.msra.mxu2 %v12732_v57 }
0x1016   : > { %11837 = vmatmul.msk.bf16.gmra.mxu2 %vm7136_vm11, %v7813_v32  ;;  %v12745_v32 = vld [vmem:[%s13033_s24 + $0xa8] sm:$0xff] }
0x1017   : > { %8225 = vmatpush.bf16.msrb.mxu2 %v12755_v60  ;;  %8214 = vmatpush.bf16.msrb.mxu3 %v12745_v32 }
0x101b   : > { %8226 = vmatpush.bf16.msrb.mxu2 %v12754_v5 }
0x101f   : > { %8227 = vmatpush.bf16.msrb.mxu2 %v12753_v35 }
0x1023   : > { %8228 = vmatpush.bf16.msrb.mxu2 %v12752_v8 }
0x1027   : > { %8229 = vmatpush.bf16.msrb.mxu2 %v12751_v42 }
0x102b   : > { %8230 = vmatpush.bf16.msrb.mxu2 %v12750_v13 }
0x1079   : > { %v7832_v41 = vpop.f32.mrf.mxu2 }
0x107a   : > { %v15609_v40 = vpack.c.bf16 %v7832_v41, %v7832_v41  ;;  %v12744_v41 = vld [vmem:[%s13033_s24 + $0xa0] sm:$0xff] }
0x107b   : > { %8215 = vmatpush.bf16.msrb.mxu3 %v12744_v41 }
0x107c   : > { %v7852_v51 = vunpack.c.l.b16 %v15609_v40 }
0x107e   : > { %v7853_v52 = vpack.c.b16 %v7852_v51, %v7852_v51  ;;  %v12742_v51 = vld [vmem:[%s13033_s24 + $0x90] sm:$0xff] }
0x107f   : > { %8216 = vmatpush.bf16.msrb.mxu3 %v12743_v62 }
0x1080   : > { %v7854_v38 = vrot.slane %v7853_v52, 2 }
0x1081   : > { %v7834_v44 = vpop.f32.mrf.mxu2 }
0x1082   : > { %v15618_v7 = vpack.c.bf16 %v7834_v44, %v7834_v44  ;;  %7855 = vrot.lane.b32.xlu2 %v7854_v38, %s12964_s4  ;;  %v12741_v38 = vld [vmem:[%s13033_s24 + $0x88] sm:$0xff]  ;;  %v12740_v44 = vld [vmem:[%s13033_s24 + $0x80] sm:$0xff] }
0x1083   : > { %8217 = vmatpush.bf16.msrb.mxu3 %v12742_v51 }
0x1084   : > { %v7858_v24 = vunpack.c.l.b16 %v15618_v7 }
0x1086   : > { %v7859_v47 = vpack.c.b16 %v7858_v24, %v7858_v24  ;;  %v12749_v24 = vld [vmem:[%s13033_s24 + $0xc8] sm:$0xff] }
0x1087   : > { %8218 = vmatpush.bf16.msrb.mxu3 %v12741_v38  ;;  %8231 = vmatpush.bf16.msrb.mxu2 %v12749_v24 }
0x1088   : > { %v7860_v53 = vrot.slane %v7859_v47, 2  ;;  %v12758_v47 = vld [vmem:[%s13033_s24 + $0x110] sm:$0xff] }
0x1089   : > { %v7837_v28 = vpop.f32.mrf.mxu2 }
0x108a   : > { %v15626_v18 = vpack.c.bf16 %v7837_v28, %v7837_v28  ;;  %7861 = vrot.lane.b32.xlu0 %v7860_v53, %s12964_s4  ;;  %v12756_v53 = vld [vmem:[%s13033_s24 + $0x100] sm:$0xff] }
0x108b   : > { %8219 = vmatpush.bf16.msrb.mxu3 %v12740_v44  ;;  %8232 = vmatpush.bf16.msrb.mxu2 %v12748_v55 }
0x108c   : > { %v7864_v1 = vunpack.c.l.b16 %v15626_v18 }
0x108e   : > { %v7865_v25 = vpack.c.b16 %v7864_v1, %v7864_v1 }
0x1090   : > { %v7866_v33 = vrot.slane %v7865_v25, 2 }
0x1091   : > { %v7839_v49 = vpop.f32.mrf.mxu2 }
0x1092   : > { %v15634_v63 = vpack.c.bf16 %v7839_v49, %v7839_v49  ;;  %7867 = vrot.lane.b32.xlu0 %v7866_v33, %s12964_s4 }
0x1094   : > { %v7870_v46 = vunpack.c.l.b16 %v15634_v63 }
0x1096   : > { %v7871_v45 = vpack.c.b16 %v7870_v46, %v7870_v46 }
0x1098   : > { %v7872_v37 = vrot.slane %v7871_v45, 2 }
0x1099   : > { %v7842_v48 = vpop.f32.mrf.mxu2 }
0x109a   : > { %7873 = vrot.lane.b32.xlu1 %v7872_v37, %s12964_s4  ;;  %v12902_v37 = vld [vmem:[%s13048_s12] ss:$0 sm:$0xff]  ;;  %s16636_s4 = sld [smem:[#allocation12_spill]] }
0x10a1   : > { %v7844_v1 = vpop.f32.mrf.mxu2 }
0x10dc   : > { %v7856_v43 = vpop.permute.xlu2 %7855 }
0x10dd   : > { %v7877_v52 = vsel %vm7167_vm13, %v15609_v40, %v7856_v43  ;;  %v12757_v40 = vld [vmem:[%s13033_s24 + $0x108] sm:$0xff] }
0x10de   : > { %8194 = vmatmul.bf16.vlgmr.msra.gmra.mxu3 %v7877_v52 }
0x10df   : > { %8242 = vmatpush.bf16.msra.mxu3 %v12759_v54 }
0x10e3   : > { %8243 = vmatpush.bf16.msra.mxu3 %v12758_v47 }
0x10e7   : > { %8244 = vmatpush.bf16.msra.mxu3 %v12757_v40 }
0x10eb   : > { %8245 = vmatpush.bf16.msra.mxu3 %v12756_v53 }
0x10fc   : > { %v7862_v28 = vpop.permute.xlu0 %7861 }
0x10fd   : > { %v7881_v2 = vsel %vm7167_vm13, %v15618_v7, %v7862_v28  ;;  %v7850_v7 = vpack.c.bf16 %v7842_v48, %v7842_v48 }
0x10fe   : > { %8207 = vmatmul.bf16.vlgmr.msra.gmra.mxu2 %v7881_v2 }
0x10ff   : > { %11983 = vmatpush.xpose.msk.msra.mxu2 %vm7149_vm12, %v8253_v15 }
0x1103   : > { %11984 = vmatpush.xpose.msk.msra.mxu2 %vm7149_vm12, %v8252_v56 }
0x1104   : > { %v7868_v25 = vpop.permute.xlu0 %7867 }
0x1105   : > { %v7885_v33 = vsel %vm7167_vm13, %v15626_v18, %v7868_v25 }
0x1106   : > { %8220 = vmatmul.bf16.vlgmr.msrb.gmra.mxu3 %v7885_v33 }
0x1107   : > { %12834 = vmatpush.xpose.msk.msrb.mxu3 %vm7149_vm12, %v8253_v15 }
0x110b   : > { %12835 = vmatpush.xpose.msk.msrb.mxu3 %vm7149_vm12, %v8252_v56 }
0x110c   : > { %v7874_v4 = vpop.permute.xlu1 %7873 }
0x110d   : > { %v7889_v49 = vsel %vm7167_vm13, %v15634_v63, %v7874_v4 }
0x110e   : > { %8233 = vmatmul.bf16.vlgmr.msrb.gmra.mxu2 %v7889_v49  ;;  %v8369_v49 = vlaneseq }
0x110f   : > { %8466 = vmatpush.msrb.mxu2 %v8253_v15 }
0x1111   : > { %8467 = vmatpush.msrb.mxu2 %v8252_v56 }
0x1116   : > { %11982 = vmatmul.msk.bf16.vlgmr.msra.gmra.mxu3 %vm7167_vm13, %v7850_v7  ;;  %v8370_v7 = vand.u32 127, %v8369_v49 }
0x111e   : > { %11985 = vmatmul.msk.f32.vlgmr.msra.gmra.mxu2 %vm7149_vm12, %v15521_v6 }
0x1126   : > { %11986 = vmatmul.msk.f32.gmra.mxu2 %vm7149_vm12, %v15515_v0  ;;  %11992 = vmatmul.msk.f32.vlgmr.msrb.gmra.mxu3 %vm7149_vm12, %v15495_v58 }
0x112e   : > { %11987 = vmatmul.msk.f32.gmra.mxu2 %vm7149_vm12, %v15512_v23 }
0x1136   : > { %11988 = vmatmul.msk.f32.gmra.mxu2 %vm7149_vm12, %v15506_v16 }
0x113e   : > { %11989 = vmatmul.msk.f32.gmra.mxu2 %vm7149_vm12, %v15503_v17 }
0x1146   : > { %11990 = vmatmul.msk.f32.gmra.mxu2 %vm7149_vm12, %v15497_v20 }
0x114e   : > { %11991 = vmatmul.msk.f32.gmra.mxu2 %vm7149_vm12, %v15493_v50 }
0x1161   : > { %v15692_v18 = vpop.f32.mrf.mxu3 }
0x1169   : > { %v8197_v22 = vpop.f32.mrf.mxu3 }
0x116a   : > { %v15711_v22 = vcvt.s32.f32 %v8370_v7 }
0x1181   : > { %v15694_v63 = vpop.f32.mrf.mxu2 }
0x1189   : > { %v8210_v46 = vpop.f32.mrf.mxu2  ;;  %v15696_v14 = vpop.f32.mrf.mxu3 }
0x1191   : > { %v8223_v61 = vpop.f32.mrf.mxu3  ;;  %v15698_v57 = vpop.f32.mrf.mxu2 }
0x1199   : > { %v8236_v45 = vpop.f32.mrf.mxu2  ;;  %v15700_v60 = vpop.f32.mrf.mxu3 }
0x11a1   : > { %v8249_v21 = vpop.f32.mrf.mxu3  ;;  %v8301_v5 = vpop.f32.mrf.mxu2 }
0x11a2   : > { %v8326_v32 = vmul.f32 2.0, %v8301_v5 }
0x11a4   : > { %v8337_v41 = vsub.f32 %v12902_v37, %v8326_v32 }
0x11a6   : > { %v8345_v62 = vsel %vm7136_vm11, %v8337_v41, inf }
0x11a7   : > { %8346 = vmin.xlane.f32.xlu1 %v8345_v62 }
0x11a9   : > { %v8304_v35 = vpop.f32.mrf.mxu2  ;;  %v8322_v46 = vpop.f32.mrf.mxu3 }
0x11aa   : > { %v8327_v51 = vmul.f32 2.0, %v8304_v35  ;;  %v8333_v21 = vmul.f32 2.0, %v8322_v46 }
0x11ac   : > { %v8338_v8 = vsub.f32 %v12902_v37, %v8327_v51  ;;  %v8344_v32 = vsub.f32 %v12902_v37, %v8333_v21 }
0x11ae   : > { %v8348_v43 = vsel %vm7136_vm11, %v8338_v8, inf  ;;  %v8366_v51 = vsel %vm7136_vm11, %v8344_v32, inf }
0x11af   : > { %8349 = vmin.xlane.f32.xlu2 %v8348_v43 }
0x11b1   : > { %v8307_v52 = vpop.f32.mrf.mxu2 }
0x11b2   : > { %v8328_v38 = vmul.f32 2.0, %v8307_v52 }
0x11b4   : > { %v8339_v42 = vsub.f32 %v12902_v37, %v8328_v38 }
0x11b6   : > { %v8351_v44 = vsel %vm7136_vm11, %v8339_v42, inf }
0x11b7   : > { %8352 = vmin.xlane.f32.xlu0 %v8351_v44 }
0x11b9   : > { %v8310_v13 = vpop.f32.mrf.mxu2 }
0x11ba   : > { %v8329_v24 = vmul.f32 2.0, %v8310_v13 }
0x11bc   : > { %v8340_v54 = vsub.f32 %v12902_v37, %v8329_v24 }
0x11be   : > { %v8354_v55 = vsel %vm7136_vm11, %v8340_v54, inf }
0x11bf   : > { %8355 = vmin.xlane.f32.xlu2 %v8354_v55 }
0x11c1   : > { %v8313_v47 = vpop.f32.mrf.mxu2 }
0x11c2   : > { %v8330_v40 = vmul.f32 2.0, %v8313_v47 }
0x11c4   : > { %v8341_v53 = vsub.f32 %v12902_v37, %v8330_v40 }
0x11c6   : > { %v8357_v48 = vsel %vm7136_vm11, %v8341_v53, inf }
0x11c7   : > { %8358 = vmin.xlane.f32.xlu1 %v8357_v48 }
0x11c9   : > { %v8316_v28 = vpop.f32.mrf.mxu2 }
0x11ca   : > { %v8331_v15 = vmul.f32 2.0, %v8316_v28 }
0x11cc   : > { %v8342_v1 = vsub.f32 %v12902_v37, %v8331_v15  ;;  %v12968_v15 = vmov 0.0  }
0x11ce   : > { %v8360_v2 = vsel %vm7136_vm11, %v8342_v1, inf }
0x11cf   : > { %8361 = vmin.xlane.f32.xlu2 %v8360_v2 }
0x11d1   : > { %v8319_v56 = vpop.f32.mrf.mxu2 }
0x11d2   : > { %v8332_v25 = vmul.f32 2.0, %v8319_v56 }
0x11d4   : > { %v8343_v33 = vsub.f32 %v12902_v37, %v8332_v25 }
0x11d6   : > { %v8363_v4 = vsel %vm7136_vm11, %v8343_v33, inf }
0x11d7   : > { %8364 = vmin.xlane.f32.xlu1 %v8363_v4 }
0x121a   : > { %v8347_v61 = vpop.xlane.xlu1 %8346 }
0x121b   : > { %vm8372_vm2 = vcmp.le.f32.partialorder %v8337_v41, %v8347_v61 }
0x121c   : > { %v8380_v45 = vsel %vm8372_vm2, %v15711_v22, 16.0 }
0x121d   : > { %v8388_v5 = vsel %vm7136_vm11, %v8380_v45, inf }
0x121e   : > { %8389 = vmin.xlane.f32.xlu0 %v8388_v5 }
0x1222   : > { %v8350_v62 = vpop.xlane.xlu2 %8349 }
0x1223   : > { %vm8373_vm3 = vcmp.le.f32.partialorder %v8338_v8, %v8350_v62 }
0x1224   : > { %v8381_v35 = vsel %vm8373_vm3, %v15711_v22, 16.0 }
0x1225   : > { %v8391_v43 = vsel %vm7136_vm11, %v8381_v35, inf }
0x1226   : > { %8367 = vmin.xlane.f32.xlu0 %v8366_v51  ;;  %8392 = vmin.xlane.f32.xlu2 %v8391_v43  ;;  %v12761_v43 = vld [vmem:[%s16628_s26 + $0x8] sm:$0xff] }
0x1227   : > { %8596 = vmatpush.bf16.msra.mxu2 %v12761_v43 }
0x122a   : > { %v8353_v52 = vpop.xlane.xlu0 %8352 }
0x122b   : > { %vm8374_vm4 = vcmp.le.f32.partialorder %v8339_v42, %v8353_v52  ;;  %v12760_v52 = vld [vmem:[%s16628_s26] sm:$0xff] }
0x122c   : > { %v8382_v41 = vsel %vm8374_vm4, %v15711_v22, 16.0  ;;  %8597 = vmatpush.bf16.msra.mxu2 %v12760_v52 }
0x122d   : > { %v8394_v38 = vsel %vm7136_vm11, %v8382_v41, inf  ;;  %v12763_v41 = vld [vmem:[%s16628_s26 + $0x18] sm:$0xff] }
0x122e   : > { %8395 = vmin.xlane.f32.xlu1 %v8394_v38  ;;  %8543 = vmatpush.bf16.msra.mxu3 %v12763_v41  ;;  %v12762_v38 = vld [vmem:[%s16628_s26 + $0x10] sm:$0xff] }
0x1232   : > { %v8356_v44 = vpop.xlane.xlu2 %8355  ;;  %8544 = vmatpush.bf16.msra.mxu3 %v12762_v38 }
0x1233   : > { %vm8375_vm5 = vcmp.le.f32.partialorder %v8340_v54, %v8356_v44 }
0x1234   : > { %v8383_v37 = vsel %vm8375_vm5, %v15711_v22, 16.0 }
0x1235   : > { %v8397_v8 = vsel %vm7136_vm11, %v8383_v37, inf }
0x1236   : > { %8398 = vmin.xlane.f32.xlu2 %v8397_v8 }
0x123a   : > { %v8359_v13 = vpop.xlane.xlu1 %8358 }
0x123b   : > { %vm8376_vm6 = vcmp.le.f32.partialorder %v8341_v53, %v8359_v13 }
0x123c   : > { %v8384_v24 = vsel %vm8376_vm6, %v15711_v22, 16.0 }
0x123d   : > { %v8400_v55 = vsel %vm7136_vm11, %v8384_v24, inf }
0x123e   : > { %8401 = vmin.xlane.f32.xlu0 %v8400_v55 }
0x1242   : > { %v8362_v42 = vpop.xlane.xlu2 %8361 }
0x1243   : > { %vm8377_vm7 = vcmp.le.f32.partialorder %v8342_v1, %v8362_v42 }
0x1244   : > { %v8385_v47 = vsel %vm8377_vm7, %v15711_v22, 16.0 }
0x1245   : > { %v8403_v40 = vsel %vm7136_vm11, %v8385_v47, inf }
0x1246   : > { %8404 = vmin.xlane.f32.xlu1 %v8403_v40 }
0x124a   : > { %v8365_v54 = vpop.xlane.xlu1 %8364 }
0x124b   : > { %vm8378_vm8 = vcmp.le.f32.partialorder %v8343_v33, %v8365_v54 }
0x124c   : > { %v8386_v48 = vsel %vm8378_vm8, %v15711_v22, 16.0 }
0x124d   : > { %v8406_v28 = vsel %vm7136_vm11, %v8386_v48, inf }
0x124e   : > { %8407 = vmin.xlane.f32.xlu2 %v8406_v28 }
0x1291   : > { %v8390_v53 = vpop.xlane.xlu0 %8389 }
0x1292   : > { %vm8412_vm9 = vcmp.eq.f32.partialorder %v15711_v22, %v8390_v53 }
0x1293   : > { %v8420_v2 = vsel %vm8412_vm9, 1.0, %v12968_v15  ;;  %vm9021_vm9 = vcmask 1041408  }
0x1294   : > { %11993 = vmatmul.msk.f32.vlgmr.msrb.gmra.mxu2 %vm7136_vm11, %v8420_v2 }
0x1299   : > { %v8368_v1 = vpop.xlane.xlu0 %8367  ;;  %v8393_v56 = vpop.xlane.xlu2 %8392 }
0x129a   : > { %vm8379_vm10 = vcmp.le.f32.partialorder %v8344_v32, %v8368_v1  ;;  %vm8413_vm14 = vcmp.eq.f32.partialorder %v15711_v22, %v8393_v56 }
0x129b   : > { %v8387_v25 = vsel %vm8379_vm10, %v15711_v22, 16.0  ;;  %v8421_v33 = vsel %vm8413_vm14, 1.0, %v12968_v15  ;;  %vm9017_vm10 = vcmask 31744  }
0x129c   : > { %11994 = vmatmul.msk.f32.gmra.mxu2 %vm7136_vm11, %v8421_v33  ;;  %v8409_v4 = vsel %vm7136_vm11, %v8387_v25, inf }
0x129d   : > { %8410 = vmin.xlane.f32.xlu0 %v8409_v4 }
0x12a1   : > { %v8396_v7 = vpop.xlane.xlu1 %8395 }
0x12a2   : > { %vm8414_vm15 = vcmp.eq.f32.partialorder %v15711_v22, %v8396_v7 }
0x12a3   : > { %v8422_v46 = vsel %vm8414_vm15, 1.0, %v12968_v15 }
0x12a4   : > { %11995 = vmatmul.msk.f32.gmra.mxu2 %vm7136_vm11, %v8422_v46 }
0x12a9   : > { %v8399_v61 = vpop.xlane.xlu2 %8398 }
0x12aa   : > { %vm8415_vm0 = vcmp.eq.f32.partialorder %v15711_v22, %v8399_v61 }
0x12ab   : > { %v8423_v45 = vsel %vm8415_vm0, 1.0, %v12968_v15 }
0x12ac   : > { %11996 = vmatmul.msk.f32.gmra.mxu2 %vm7136_vm11, %v8423_v45 }
0x12b1   : > { %v8402_v21 = vpop.xlane.xlu0 %8401 }
0x12b2   : > { %vm8416_vm1 = vcmp.eq.f32.partialorder %v15711_v22, %v8402_v21 }
0x12b3   : > { %v8424_v5 = vsel %vm8416_vm1, 1.0, %v12968_v15 }
0x12b4   : > { %11997 = vmatmul.msk.f32.gmra.mxu2 %vm7136_vm11, %v8424_v5 }
0x12b9   : > { %v8405_v32 = vpop.xlane.xlu1 %8404 }
0x12ba   : > { %vm8417_vm2 = vcmp.eq.f32.partialorder %v15711_v22, %v8405_v32 }
0x12bb   : > { %v8425_v62 = vsel %vm8417_vm2, 1.0, %v12968_v15 }
0x12bc   : > { %11998 = vmatmul.msk.f32.gmra.mxu2 %vm7136_vm11, %v8425_v62 }
0x12c1   : > { %v8408_v35 = vpop.xlane.xlu2 %8407 }
0x12c2   : > { %vm8418_vm3 = vcmp.eq.f32.partialorder %v15711_v22, %v8408_v35 }
0x12c3   : > { %v8426_v51 = vsel %vm8418_vm3, 1.0, %v12968_v15 }
0x12c4   : > { %11999 = vmatmul.msk.f32.gmra.mxu2 %vm7136_vm11, %v8426_v51  ;;  %v12904_v51 = vld [vmem:[%s16630_s1] ss:$0 sm:$0xff]  ;;  %s16640_s1 = sld [smem:[#allocation11_spill]] }
0x1310   : > { %v8411_v44 = vpop.xlane.xlu0 %8410 }
0x1311   : > { %vm8419_vm4 = vcmp.eq.f32.partialorder %v15711_v22, %v8411_v44 }
0x1312   : > { %v8427_v37 = vsel %vm8419_vm4, 1.0, %v12968_v15 }
0x1313   : > { %12000 = vmatmul.msk.f32.gmra.mxu2 %vm7136_vm11, %v8427_v37 }
0x1317   : > { %v8469_v8 = vpop.f32.mrf.mxu2 }
0x1318   : > { %v8493_v24 = vsub.f32 %v15521_v6, %v8469_v8 }
0x131b   : > { %12021 = vmatmul.msk.bf16.vlgmr.msra.gmra.mxu2 %vm7149_vm12, %v15526_v36 }
0x131f   : > { %v8472_v13 = vpop.f32.mrf.mxu2 }
0x1320   : > { %v8494_v55 = vsub.f32 %v15515_v0, %v8472_v13 }
0x1322   : > { %v8505_v42 = vpack.c.bf16 %v8494_v55, %v8493_v24 }
0x1324   : > { %12009 = vmatmul.msk.bf16.vlgmr.msra.gmra.mxu3 %vm7149_vm12, %v8505_v42 }
0x1327   : > { %v8475_v47 = vpop.f32.mrf.mxu2 }
0x1328   : > { %v8495_v54 = vsub.f32 %v15512_v23, %v8475_v47  ;;  %v8640_v23 = vld [vmem:[%s16629_s28 + $0x8] sm:$0xff] }
0x1329   : > { %12025 = vmatpush.xpose.msk.msrb.mxu3 %vm7167_vm13, %v8640_v23  ;;  %8724 = vmatpush.msrb.mxu2 %v8640_v23 }
0x132b   : > { %12022 = vmatmul.msk.bf16.gmra.mxu2 %vm7149_vm12, %v15519_v29 }
0x132f   : > { %v8478_v40 = vpop.f32.mrf.mxu2 }
0x1330   : > { %v8496_v48 = vsub.f32 %v15506_v16, %v8478_v40  ;;  %v8639_v16 = vld [vmem:[%s16629_s28] sm:$0xff] }
0x1331   : > { %12026 = vmatpush.xpose.msk.msrb.mxu3 %vm7167_vm13, %v8639_v16  ;;  %8725 = vmatpush.msrb.mxu2 %v8639_v16 }
0x1332   : > { %v8506_v36 = vpack.c.bf16 %v8496_v48, %v8495_v54  ;;  %v12767_v48 = vld [vmem:[%s16631_s2 + $0x18] sm:$0xff] }
0x1333   : > { %8824 = vmatpush.bf16.msra.mxu2 %v12767_v48  ;;  %v15865_v48 = vld [vmem:[%s16634_s11 + $0x18] sm:$0xff] }
0x1334   : > { %12010 = vmatmul.msk.bf16.gmra.mxu3 %vm7149_vm12, %v8506_v36  ;;  %v12766_v36 = vld [vmem:[%s16631_s2 + $0x10] sm:$0xff] }
0x1337   : > { %v8481_v6 = vpop.f32.mrf.mxu2  ;;  %8825 = vmatpush.bf16.msra.mxu2 %v12766_v36  ;;  %v12780_v36 = vld [vmem:[%s16636_s4] sm:$0xff]  ;;  %s16643_s4 = sld [smem:[#allocation18_spill]] }
0x1338   : > { %v8497_v28 = vsub.f32 %v15503_v17, %v8481_v6  ;;  %v12765_v6 = vld [vmem:[%s16631_s2 + $0x8] sm:$0xff] }
0x133b   : > { %12023 = vmatmul.msk.bf16.gmra.mxu2 %vm7149_vm12, %v15510_v34 }
0x133c   : > { %8826 = vmatpush.bf16.msra.mxu2 %v12765_v6  ;;  %v12778_v6 = vld [vmem:[%s16635_s0 + $0x10] sm:$0xff] }
0x133f   : > { %v8484_v0 = vpop.f32.mrf.mxu2 }
0x1340   : > { %v8498_v53 = vsub.f32 %v15497_v20, %v8484_v0  ;;  %v12764_v0 = vld [vmem:[%s16631_s2] sm:$0xff] }
0x1341   : > { %8827 = vmatpush.bf16.msra.mxu2 %v12764_v0  ;;  %v12777_v0 = vld [vmem:[%s16635_s0 + $0x8] sm:$0xff] }
0x1342   : > { %v8507_v2 = vpack.c.bf16 %v8498_v53, %v8497_v28  ;;  %v12771_v28 = vld [vmem:[%s16631_s2 + $0x38] sm:$0xff] }
0x1343   : > { %8783 = vmatpush.bf16.msra.mxu3 %v12771_v28  ;;  %v12776_v28 = vld [vmem:[%s16635_s0] sm:$0xff] }
0x1344   : > { %12011 = vmatmul.msk.bf16.gmra.mxu3 %vm7149_vm12, %v8507_v2 }
0x1347   : > { %v8487_v34 = vpop.f32.mrf.mxu2 }
0x1348   : > { %v8499_v17 = vsub.f32 %v15493_v50, %v8487_v34  ;;  %v12770_v34 = vld [vmem:[%s16631_s2 + $0x30] sm:$0xff] }
0x1349   : > { %8784 = vmatpush.bf16.msra.mxu3 %v12770_v34  ;;  %v12787_v34 = vld [vmem:[%s16637_s18 + $0x30] sm:$0xff] }
0x134b   : > { %12024 = vmatmul.msk.bf16.gmra.mxu2 %vm7149_vm12, %v15501_v11 }
0x1396   : > { %v8490_v29 = vpop.f32.mrf.mxu2 }
0x1397   : > { %v8500_v20 = vsub.f32 %v15495_v58, %v8490_v29  ;;  %v12769_v29 = vld [vmem:[%s16631_s2 + $0x28] sm:$0xff] }
0x1398   : > { %8785 = vmatpush.bf16.msra.mxu3 %v12769_v29 }
0x1399   : > { %v8508_v1 = vpack.c.bf16 %v8500_v20, %v8499_v17  ;;  %v12768_v20 = vld [vmem:[%s16631_s2 + $0x20] sm:$0xff] }
0x139b   : > { %12012 = vmatmul.msk.bf16.gmra.mxu3 %vm7149_vm12, %v8508_v1 }
0x139c   : > { %8786 = vmatpush.bf16.msra.mxu3 %v12768_v20  ;;  %v12786_v20 = vld [vmem:[%s16637_s18 + $0x28] sm:$0xff] }
0x139e   : > { %v8599_v56 = vpop.f32.mrf.mxu2 }
0x13a6   : > { %v15784_v33 = vpop.f32.mrf.mxu2 }
0x13a7   : > { %v8546_v25 = vpop.f32.mrf.mxu3 }
0x13a8   : > { %v15782_v11 = vadd.f32 %v8599_v56, %v8546_v25 }
0x13ab   : > { %12027 = vmatmul.msk.f32.vlgmr.msrb.gmra.mxu3 %vm7167_vm13, %v15594_v12 }
0x13ae   : > { %v8604_v7 = vpop.f32.mrf.mxu2 }
0x13af   : > { %v15788_v4 = vpop.f32.mrf.mxu3 }
0x13b3   : > { %12028 = vmatmul.msk.f32.gmra.mxu3 %vm7167_vm13, %v15596_v10 }
0x13b6   : > { %v15794_v46 = vpop.f32.mrf.mxu2 }
0x13b7   : > { %v8551_v50 = vpop.f32.mrf.mxu3 }
0x13b8   : > { %v15792_v58 = vadd.f32 %v8604_v7, %v8551_v50  ;;  %v12901_v50 = vld [vmem:[%s16632_s10] ss:$0 sm:$0xff]  ;;  %s16641_s10 = sld [smem:[#allocation16_spill]] }
0x13be   : > { %v8609_v45 = vpop.f32.mrf.mxu2 }
0x13bf   : > { %v15796_v61 = vpop.f32.mrf.mxu3 }
0x13c6   : > { %v15828_v17 = vpop.f32.mrf.mxu2 }
0x13c7   : > { %v8556_v21 = vpop.f32.mrf.mxu3 }
0x13c8   : > { %v15798_v5 = vadd.f32 %v8609_v45, %v8556_v21  ;;  %v8196_v45 = vadd.f32 %v12901_v50, %v15692_v18  ;;  %v12791_v50 = vld [vmem:[%s16637_s18 + $0x50] sm:$0xff] }
0x13ce   : > { %v15831_v1 = vpop.f32.mrf.mxu2 }
0x13cf   : > { %v15800_v32 = vpop.f32.mrf.mxu3 }
0x13d6   : > { %v15833_v56 = vpop.f32.mrf.mxu2 }
0x141e   : > { %v15802_v62 = vpop.f32.mrf.mxu3 }
0x1426   : > { %v15804_v35 = vpop.f32.mrf.mxu3 }
0x142e   : > { %v8670_v43 = vpop.f32.mrf.mxu3 }
0x142f   : > { %v8677_v52 = vmul.f32 2.0, %v8670_v43 }
0x1431   : > { %v8682_v41 = vsub.f32 %v12904_v51, %v8677_v52 }
0x1433   : > { %v8684_v38 = vsel %vm7136_vm11, %v8682_v41, inf }
0x1434   : > { %8685 = vmin.xlane.f32.xlu1 %v8684_v38 }
0x1436   : > { %v8673_v44 = vpop.f32.mrf.mxu3 }
0x1437   : > { %v8678_v37 = vmul.f32 2.0, %v8673_v44  ;;  %v12905_v44 = vld [vmem:[%s16633_s7] ss:$0 sm:$0xff]  ;;  %s16642_s7 = sld [smem:[#allocation19_spill]] }
0x1439   : > { %v8683_v8 = vsub.f32 %v12904_v51, %v8678_v37  ;;  %v8209_v51 = vadd.f32 %v15694_v63, %v8196_v45  ;;  %v12783_v45 = vld [vmem:[%s16637_s18 + $0x10] sm:$0xff] }
0x143b   : > { %v8687_v13 = vsel %vm7136_vm11, %v8683_v8, inf  ;;  %v8222_v52 = vadd.f32 %v15696_v14, %v8209_v51  ;;  %v12790_v51 = vld [vmem:[%s16637_s18 + $0x48] sm:$0xff] }
0x143c   : > { %8688 = vmin.xlane.f32.xlu2 %v8687_v13 }
0x14a7   : > { %v8686_v24 = vpop.xlane.xlu1 %8685 }
0x14a8   : > { %vm8690_vm5 = vcmp.le.f32.partialorder %v8682_v41, %v8686_v24  ;;  %v8235_v41 = vadd.f32 %v15698_v57, %v8222_v52  ;;  %v12789_v52 = vld [vmem:[%s16637_s18 + $0x40] sm:$0xff] }
0x14a9   : > { %v8692_v55 = vsel %vm8690_vm5, %v15711_v22, 16.0 }
0x14aa   : > { %v8694_v42 = vsel %vm7136_vm11, %v8692_v55, inf  ;;  %v8248_v38 = vadd.f32 %v15700_v60, %v8235_v41  ;;  %v15848_v60 = vld [vmem:[%s16634_s11] sm:$0xff] }
0x14ab   : > { %8695 = vmin.xlane.f32.xlu0 %v8694_v42  ;;  %v12781_v41 = vld [vmem:[%s16637_s18] sm:$0xff] }
0x14af   : > { %v8689_v47 = vpop.xlane.xlu2 %8688 }
0x14b0   : > { %vm8691_vm6 = vcmp.le.f32.partialorder %v8683_v8, %v8689_v47  ;;  %v8251_v8 = vmax.f32 %v8248_v38, 0.0  ;;  %v15854_v47 = vld [vmem:[%s16634_s11 + $0x8] sm:$0xff] }
0x14b1   : > { %v8693_v40 = vsel %vm8691_vm6, %v15711_v22, 16.0 }
0x14b2   : > { %v8697_v54 = vsel %vm7136_vm11, %v8693_v40, inf  ;;  %v9011_v63 = vpack.c.bf16 %v8251_v8, %v8251_v8  ;;  %v15859_v40 = vld [vmem:[%s16634_s11 + $0x10] sm:$0xff] }
0x14b3   : > { %8698 = vmin.xlane.f32.xlu1 %v8697_v54  ;;  %v12779_v54 = vld [vmem:[%s16635_s0 + $0x18] sm:$0xff] }
0x14b4   : > { %v9023_v42 = vsel %vm9021_vm9, %v9011_v63, 0  ;;  %v12797_v63 = vld [vmem:[%s16638_s22 + $0x20] sm:$0xff] }
0x151e   : > { %v8696_v53 = vpop.xlane.xlu0 %8695 }
0x151f   : > { %vm8700_vm7 = vcmp.eq.f32.partialorder %v15711_v22, %v8696_v53 }
0x1520   : > { %v8702_v2 = vsel %vm8700_vm7, 1.0, %v12968_v15 }
0x1521   : > { %12029 = vmatmul.msk.f32.vlgmr.msrb.gmra.mxu2 %vm7136_vm11, %v8702_v2 }
0x1522   : > { %8964 = vmatpush.bf16.msrb.mxu2 %v12779_v54 }
0x1526   : > { %v8699_v23 = vpop.xlane.xlu1 %8698  ;;  %8965 = vmatpush.bf16.msrb.mxu2 %v12778_v6 }
0x1527   : > { %vm8701_vm8 = vcmp.eq.f32.partialorder %v15711_v22, %v8699_v23 }
0x1528   : > { %v8703_v16 = vsel %vm8701_vm8, 1.0, %v12968_v15 }
0x1529   : > { %12030 = vmatmul.msk.f32.gmra.mxu2 %vm7136_vm11, %v8703_v16  ;;  %v12788_v16 = vld [vmem:[%s16637_s18 + $0x38] sm:$0xff] }
0x152a   : > { %8966 = vmatpush.bf16.msrb.mxu2 %v12777_v0 }
0x152e   : > { %8967 = vmatpush.bf16.msrb.mxu2 %v12776_v28  ;;  %v12906_v28 = vld [vmem:[%s16640_s1] ss:$0 sm:$0xff]  ;;  %s10204_s1 = sshll.u32 %s16654_s16, 1 }
0x1531   : > { %12064 = vmatmul.msk.bf16.vlgmr.msra.gmra.mxu2 %vm7167_vm13, %v15600_v19 }
0x15a4   : > { %v8727_v22 = vpop.f32.mrf.mxu2 }
0x15a5   : > { %v8733_v25 = vsub.f32 %v15594_v12, %v8727_v22  ;;  %v12785_v22 = vld [vmem:[%s16637_s18 + $0x20] sm:$0xff] }
0x15ac   : > { %v8730_v15 = vpop.f32.mrf.mxu2 }
0x15ad   : > { %v8734_v19 = vsub.f32 %v15596_v10, %v8730_v15 }
0x15af   : > { %v8743_v7 = vpack.c.bf16 %v8734_v19, %v8733_v25  ;;  %v12792_v19 = vld [vmem:[%s16637_s18 + $0x58] sm:$0xff] }
0x15b0   : > { %9095 = vmatpush.bf16.msra.mxu2 %v12792_v19 }
0x15b1   : > { %12047 = vmatmul.msk.bf16.vlgmr.msra.gmra.mxu3 %vm7167_vm13, %v8743_v7  ;;  %v12784_v7 = vld [vmem:[%s16637_s18 + $0x18] sm:$0xff] }
0x15b4   : > { %v8829_v21 = vpop.f32.mrf.mxu2  ;;  %9096 = vmatpush.bf16.msra.mxu2 %v12791_v50 }
0x15b8   : > { %9097 = vmatpush.bf16.msra.mxu2 %v12790_v51 }
0x15bc   : > { %v8831_v10 = vpop.f32.mrf.mxu2  ;;  %9098 = vmatpush.bf16.msra.mxu2 %v12789_v52 }
0x1634   : > { %v8788_v43 = vpop.f32.mrf.mxu3 }
0x1635   : > { %v8830_v12 = vadd.f32 %v8829_v21, %v8788_v43  ;;  %v12782_v43 = vld [vmem:[%s16637_s18 + $0x8] sm:$0xff] }
0x1637   : > { %v8838_v13 = vadd.f32 %v12905_v44, %v8830_v12 }
0x1639   : > { %v8840_v55 = vmax.f32 %v8838_v13, 0.0 }
0x163c   : > { %v8790_v37 = vpop.f32.mrf.mxu3 }
0x163d   : > { %v8832_v18 = vadd.f32 %v8831_v10, %v8790_v37 }
0x163f   : > { %v8839_v24 = vadd.f32 %v12905_v44, %v8832_v18 }
0x1641   : > { %v8841_v14 = vmax.f32 %v8839_v24, 0.0  ;;  %v12798_v24 = vld [vmem:[%s16638_s22 + $0x28] sm:$0xff] }
0x1643   : > { %v15845_v57 = vpack.c.bf16 %v8841_v14, %v8840_v55  ;;  %v12903_v55 = vld [vmem:[%s16639_s23] ss:$0 sm:$0xff]  ;;  %v8602_v14 = vadd.f32 %v15784_v33, %v15788_v4  ;;  %s16645_s23 = sld [smem:[#allocation14_spill]] }
0x1644   : > { %v8623_v54 = vadd.f32 %v12903_v55, %v15782_v11  ;;  %v8625_v33 = vadd.f32 %v12903_v55, %v15792_v58 }
0x1645   : > { %8890 = vmatpush.bf16.msrb.mxu3 %v15845_v57 }
0x1646   : > { %v8631_v6 = vmax.f32 %v8623_v54, 0.0  ;;  %v8633_v11 = vmax.f32 %v8625_v33, 0.0 }
0x1648   : > { %12081 = vmatmul.msk.bf16.vlgmr.msrb.gmra.mxu3 %vm7136_vm11, %v15848_v60 }
0x1649   : > { %9032 = vmatpush.bf16.msra.mxu3 %v9023_v42 }
0x164d   : > { %9153 = vmatpush.bf16.msrb.mxu3 %v12788_v16 }
0x1651   : > { %9154 = vmatpush.bf16.msrb.mxu3 %v12787_v34 }
0x1655   : > { %9155 = vmatpush.bf16.msrb.mxu3 %v12786_v20 }
0x1658   : > { %12082 = vmatmul.msk.bf16.gmra.mxu3 %vm7136_vm11, %v15854_v47 }
0x1659   : > { %9156 = vmatpush.bf16.msrb.mxu3 %v12785_v22 }
0x165d   : > { %9157 = vmatpush.bf16.msrb.mxu3 %v12784_v7 }
0x1661   : > { %9158 = vmatpush.bf16.msrb.mxu3 %v12783_v45 }
0x1665   : > { %9159 = vmatpush.bf16.msrb.mxu3 %v12782_v43 }
0x1668   : > { %12083 = vmatmul.msk.bf16.gmra.mxu3 %vm7136_vm11, %v15859_v40 }
0x1669   : > { %9160 = vmatpush.bf16.msrb.mxu3 %v12781_v41 }
0x1678   : > { %12084 = vmatmul.msk.bf16.gmra.mxu3 %vm7136_vm11, %v15865_v48 }
0x1688   : > { %12109 = vmatmul.msk.bf16.vlgmr.msra.gmra.mxu3 %vm9017_vm10, %v12780_v36  ;;  %v8624_v36 = vadd.f32 %v12903_v55, %v8602_v14 }
0x1689   : > { %9255 = vmatpush.bf16.msra.mxu3 %v12798_v24 }
0x168d   : > { %9256 = vmatpush.bf16.msra.mxu3 %v12797_v63 }
0x16cb   : > { %v8892_v53 = vpop.f32.mrf.mxu3 }
0x16d3   : > { %v8894_v2 = vpop.f32.mrf.mxu3 }
0x16d4   : > { %v8912_v23 = vpack.c.bf16 %v8894_v2, %v8892_v53  ;;  %v8632_v53 = vmax.f32 %v8624_v36, 0.0 }
0x16d6   : > { %12101 = vmatmul.msk.bf16.vlgmr.msrb.gmra.mxu2 %vm7167_vm13, %v8912_v23 }
0x16db   : > { %v8897_v29 = vpop.f32.mrf.mxu3 }
0x16e3   : > { %v8899_v15 = vpop.f32.mrf.mxu3 }
0x16e4   : > { %v8913_v25 = vpack.c.bf16 %v8899_v15, %v8897_v29  ;;  %v8607_v29 = vadd.f32 %v15794_v46, %v15796_v61  ;;  %v8627_v61 = vadd.f32 %v12903_v55, %v15798_v5 }
0x16e6   : > { %12102 = vmatmul.msk.bf16.gmra.mxu2 %vm7167_vm13, %v8913_v25  ;;  %v8626_v4 = vadd.f32 %v12903_v55, %v8607_v29  ;;  %v8635_v43 = vmax.f32 %v8627_v61, 0.0  ;;  %v12794_v29 = vld [vmem:[%s16638_s22 + $0x8] sm:$0xff] }
0x16e8   : > { %v8634_v15 = vmax.f32 %v8626_v4, 0.0 }
0x16eb   : > { %v8902_v21 = vpop.f32.mrf.mxu3 }
0x16f3   : > { %v8904_v38 = vpop.f32.mrf.mxu3 }
0x16f4   : > { %v8914_v12 = vpack.c.bf16 %v8904_v38, %v8902_v21  ;;  %v8612_v21 = vadd.f32 %v15828_v17, %v15800_v32  ;;  %v8617_v32 = vadd.f32 %v15833_v56, %v15804_v35  ;;  %v12907_v56 = vld [vmem:[%s16641_s10] ss:$0 sm:$0xff]  ;;  %s1042_s10 = scalar_lea.vmem %s13146_s30, %s10204_s1 }
0x16f6   : > { %12103 = vmatmul.msk.bf16.gmra.mxu2 %vm7167_vm13, %v8914_v12  ;;  %v8628_v51 = vadd.f32 %v12903_v55, %v8612_v21 }
0x16f8   : > { %v8636_v52 = vmax.f32 %v8628_v51, 0.0 }
0x16fb   : > { %v8907_v44 = vpop.f32.mrf.mxu3 }
0x1703   : > { %v8909_v10 = vpop.f32.mrf.mxu3 }
0x1704   : > { %v8915_v37 = vpack.c.bf16 %v8909_v10, %v8907_v44  ;;  %v8615_v10 = vadd.f32 %v15831_v1, %v15802_v62 }
0x1706   : > { %12104 = vmatmul.msk.bf16.gmra.mxu2 %vm7167_vm13, %v8915_v37  ;;  %v8629_v5 = vadd.f32 %v12903_v55, %v8615_v10 }
0x170b   : > { %v9034_v8 = vpop.f32.mrf.mxu3 }
0x1713   : > { %v9036_v13 = vpop.f32.mrf.mxu3 }
0x1714   : > { %v9039_v18 = vpack.c.bf16 %v9036_v13, %v9034_v8  ;;  %v8630_v8 = vadd.f32 %v12903_v55, %v8617_v32  ;;  %v8637_v13 = vmax.f32 %v8629_v5, 0.0 }
0x1716   : > { %12126 = vmatmul.msk.bf16.vlgmr.msra.gmra.mxu2 %vm7167_vm13, %v15845_v57  ;;  %9161 = vmatmul.bf16.vlgmr.msrb.gmra.mxu3 %v9039_v18  ;;  %v8638_v24 = vmax.f32 %v8630_v8, 0.0 }
0x1759   : > { %v8969_v42 = vpop.f32.mrf.mxu2 }
0x175a   : > { %v8989_v0 = vadd.f32 %v8969_v42, %v8631_v6 }
0x175c   : > { %v9001_v57 = vadd.f32 %v12906_v28, %v8989_v0 }
0x1761   : > { %v8971_v2 = vpop.f32.mrf.mxu2 }
0x1762   : > { %v8990_v23 = vadd.f32 %v8971_v2, %v8632_v53 }
0x1764   : > { %v9002_v16 = vadd.f32 %v12906_v28, %v8990_v23 }
0x1766   : > { %v9217_v34 = vpack.c.bf16 %v9002_v16, %v9001_v57 }
0x1768   : > { %12171 = vmatmul.msk.bf16.vlgmr.msra.gmra.mxu3 %vm7149_vm12, %v9217_v34  ;;  %v12795_v34 = vld [vmem:[%s16638_s22 + $0x10] sm:$0xff] }
0x1769   : > { %v8974_v20 = vpop.f32.mrf.mxu2 }
0x176a   : > { %v8991_v22 = vadd.f32 %v8974_v20, %v8633_v11  ;;  %v12793_v20 = vld [vmem:[%s16638_s22] sm:$0xff] }
0x176c   : > { %v9003_v7 = vadd.f32 %v12906_v28, %v8991_v22 }
0x1771   : > { %v8976_v25 = vpop.f32.mrf.mxu2 }
0x1772   : > { %v8992_v19 = vadd.f32 %v8976_v25, %v8634_v15 }
0x1774   : > { %v9004_v50 = vadd.f32 %v12906_v28, %v8992_v19 }
0x1776   : > { %v9218_v45 = vpack.c.bf16 %v9004_v50, %v9003_v7 }
0x1778   : > { %12172 = vmatmul.msk.bf16.gmra.mxu3 %vm7149_vm12, %v9218_v45 }
0x1779   : > { %v8979_v46 = vpop.f32.mrf.mxu2 }
0x177a   : > { %v8993_v58 = vadd.f32 %v8979_v46, %v8635_v43 }
0x177c   : > { %v9005_v12 = vadd.f32 %v12906_v28, %v8993_v58 }
0x1781   : > { %v8981_v41 = vpop.f32.mrf.mxu2 }
0x1782   : > { %v8994_v38 = vadd.f32 %v8981_v41, %v8636_v52 }
0x1784   : > { %v9006_v44 = vadd.f32 %v12906_v28, %v8994_v38 }
0x1786   : > { %v9219_v37 = vpack.c.bf16 %v9006_v44, %v9005_v12  ;;  %v12908_v44 = vld [vmem:[%s16643_s4] ss:$0 sm:$0xff] }
0x1788   : > { %12173 = vmatmul.msk.bf16.gmra.mxu3 %vm7149_vm12, %v9219_v37 }
0x1789   : > { %v8984_v17 = vpop.f32.mrf.mxu2 }
0x178a   : > { %v8995_v18 = vadd.f32 %v8984_v17, %v8637_v13 }
0x178c   : > { %v9007_v42 = vadd.f32 %v12906_v28, %v8995_v18 }
0x1791   : > { %v8986_v63 = vpop.f32.mrf.mxu2 }
0x1792   : > { %v8996_v14 = vadd.f32 %v8986_v63, %v8638_v24 }
0x1794   : > { %v9008_v54 = vadd.f32 %v12906_v28, %v8996_v14  ;;  %v12796_v28 = vld [vmem:[%s16638_s22 + $0x18] sm:$0xff] }
0x1796   : > { %v9220_v36 = vpack.c.bf16 %v9008_v54, %v9007_v42  ;;  %v16644_v42 = vld [vmem:[#allocation107_spill] sm:$0xff] }
0x1798   : > { %12174 = vmatmul.msk.bf16.gmra.mxu3 %vm7149_vm12, %v9220_v36 }
0x1799   : > { %v9100_v62 = vpop.f32.mrf.mxu2  ;;  %v9162_v1 = vpop.f32.mrf.mxu3 }
0x179a   : > { %v9163_v35 = vadd.f32 %v9162_v1, %v9100_v62 }
0x179c   : > { %v9171_v55 = vadd.f32 %v12907_v56, %v9163_v35 }
0x179e   : > { %v9173_v23 = vmax.f32 %v9171_v55, 0.0 }
0x17a1   : > { %v9102_v6 = vpop.f32.mrf.mxu2  ;;  %v9164_v0 = vpop.f32.mrf.mxu3 }
0x17a2   : > { %v9165_v53 = vadd.f32 %v9164_v0, %v9102_v6 }
0x17a4   : > { %v9172_v2 = vadd.f32 %v12907_v56, %v9165_v53 }
0x17a6   : > { %v9174_v57 = vmax.f32 %v9172_v2, 0.0 }
0x17a8   : > { %v9175_v16 = vpack.c.bf16 %v9174_v57, %v9173_v23 }
0x17aa   : > { %9183 = vmatpush.bf16.msrb.mxu2 %v9175_v16 }
0x17ad   : > { %12159 = vmatmul.msk.bf16.vlgmr.msrb.gmra.mxu2 %vm7136_vm11, %v15848_v60 }
0x17ae   : > { %9318 = vmatpush.bf16.msra.mxu2 %v12796_v28  ;;  %v12799_v28 = vld [vmem:[%s16645_s23] sm:$0xff] }
0x17b2   : > { %9319 = vmatpush.bf16.msra.mxu2 %v12795_v34  ;;  %v16646_v34 = vld [vmem:[#allocation108_spill] sm:$0xff] }
0x17b6   : > { %9320 = vmatpush.bf16.msra.mxu2 %v12794_v29  ;;  %v12800_v29 = vld [vmem:[%s16645_s23 + $0x8] sm:$0xff] }
0x17ba   : > { %9321 = vmatpush.bf16.msra.mxu2 %v12793_v20  ;;  %v16647_v20 = vld [vmem:[#allocation93_spill] sm:$0xff] }
0x17bd   : > { %12160 = vmatmul.msk.bf16.gmra.mxu2 %vm7136_vm11, %v15854_v47 }
0x17cd   : > { %12161 = vmatmul.msk.bf16.gmra.mxu2 %vm7136_vm11, %v15859_v40 }
0x17dd   : > { %12162 = vmatmul.msk.bf16.gmra.mxu2 %vm7136_vm11, %v15865_v48  ;;  %v12817_v48 = vld [vmem:[%s16642_s7 + $0x10] sm:$0xff] }
0x17de   : > { %9699 = vmatpush.bf16.msrb.mxu2 %v12817_v48  ;;  %v16649_v48 = vld [vmem:[#allocation121_spill] sm:$0xff] }
0x17eb   : > { %v9258_v45 = vpop.f32.mrf.mxu3 }
0x17f3   : > { %v9260_v21 = vpop.f32.mrf.mxu3 }
0x17fb   : > { %v9263_v51 = vpop.f32.mrf.mxu3 }
0x1830   : > { %v9185_v33 = vpop.f32.mrf.mxu2 }
0x1838   : > { %v9187_v60 = vpop.f32.mrf.mxu2 }
0x1839   : > { %v9205_v4 = vpack.c.bf16 %v9187_v60, %v9185_v33  ;;  %v12801_v60 = vld [vmem:[%s16645_s23 + $0x10] sm:$0xff] }
0x183b   : > { %12191 = vmatmul.msk.bf16.vlgmr.msra.gmra.mxu2 %vm7167_vm13, %v9205_v4  ;;  %v16648_v4 = vld [vmem:[#allocation94_spill] sm:$0xff] }
0x1840   : > { %v9190_v47 = vpop.f32.mrf.mxu2 }
0x1848   : > { %v9192_v11 = vpop.f32.mrf.mxu2 }
0x1849   : > { %v9206_v40 = vpack.c.bf16 %v9192_v11, %v9190_v47 }
0x184b   : > { %12192 = vmatmul.msk.bf16.gmra.mxu2 %vm7167_vm13, %v9206_v40  ;;  %v12802_v40 = vld [vmem:[%s16645_s23 + $0x18] sm:$0xff] }
0x1850   : > { %v9195_v22 = vpop.f32.mrf.mxu2 }
0x1858   : > { %v9197_v15 = vpop.f32.mrf.mxu2 }
0x1859   : > { %v9207_v25 = vpack.c.bf16 %v9197_v15, %v9195_v22  ;;  %v12803_v15 = vld [vmem:[%s16645_s23 + $0x20] sm:$0xff] }
0x185b   : > { %12193 = vmatmul.msk.bf16.gmra.mxu2 %vm7167_vm13, %v9207_v25  ;;  %v16650_v25 = vld [vmem:[#allocation122_spill] sm:$0xff] }
0x1860   : > { %v9200_v19 = vpop.f32.mrf.mxu2 }
0x1868   : > { %v9202_v7 = vpop.f32.mrf.mxu2 }
0x1869   : > { %v9208_v50 = vpack.c.bf16 %v9202_v7, %v9200_v19 }
0x186b   : > { %12194 = vmatmul.msk.bf16.gmra.mxu2 %vm7167_vm13, %v9208_v50  ;;  %v12804_v50 = vld [vmem:[%s16645_s23 + $0x28] sm:$0xff] }
0x187b   : > { %12279 = vmatmul.msk.bf16.vlgmr.msrb.gmra.mxu2 %vm7136_vm11, %v14957_v31  ;;  %v9265_v31 = vpop.f32.mrf.mxu3 }
0x188b   : > { %12280 = vmatmul.msk.bf16.gmra.mxu2 %vm7136_vm11, %v14976_v26 }
0x189b   : > { %12281 = vmatmul.msk.bf16.gmra.mxu2 %vm7136_vm11, %v15000_v9  ;;  %v9268_v9 = vpop.f32.mrf.mxu3 }
0x18a3   : > { %v9270_v52 = vpop.f32.mrf.mxu3 }
0x18ab   : > { %12282 = vmatmul.msk.bf16.gmra.mxu2 %vm7136_vm11, %v15016_v30 }
0x18bb   : > { %12283 = vmatmul.msk.bf16.gmra.mxu2 %vm7136_vm11, %v15074_v59  ;;  %v9273_v59 = vpop.f32.mrf.mxu3 }
0x18be   : > { %v9323_v46 = vpop.f32.mrf.mxu2 }
0x18bf   : > { %v9324_v61 = vadd.f32 %v9323_v46, %v9258_v45  ;;  %v16651_v45 = vld [vmem:[#allocation67_spill] sm:$0xff]  ;;  %v12805_v46 = vld [vmem:[%s16645_s23 + $0x30] sm:$0xff] }
0x18c1   : > { %v9347_v55 = vadd.f32 %v12908_v44, %v9324_v61 }
0x18c3   : > { %v9275_v37 = vpop.f32.mrf.mxu3  ;;  %v9355_v57 = vmax.f32 %v9347_v55, 0.0 }
0x18c6   : > { %v9325_v43 = vpop.f32.mrf.mxu2 }
0x18cb   : > { %12284 = vmatmul.msk.bf16.gmra.mxu2 %vm7136_vm11, %v15069_v39 }
0x18ce   : > { %v9328_v26 = vpop.f32.mrf.mxu2 }
0x18d6   : > { %v9330_v58 = vpop.f32.mrf.mxu2 }
0x18d7   : > { %v9331_v8 = vadd.f32 %v9330_v58, %v9265_v31  ;;  %v12807_v31 = vld [vmem:[%s16645_s23 + $0x40] sm:$0xff] }
0x18d9   : > { %v9350_v54 = vadd.f32 %v12908_v44, %v9331_v8  ;;  %v12816_v8 = vld [vmem:[%s16642_s7 + $0x8] sm:$0xff] }
0x18db   : > { %12285 = vmatmul.msk.bf16.gmra.mxu2 %vm7136_vm11, %v15064_v27  ;;  %v9329_v27 = vadd.f32 %v9328_v26, %v9263_v51  ;;  %v9358_v6 = vmax.f32 %v9350_v54, 0.0  ;;  %v16652_v51 = vld [vmem:[#allocation68_spill] sm:$0xff] }
0x18dc   : > { %v12815_v54 = vld [vmem:[%s16642_s7] sm:$0xff] }
0x18dd   : > { %v9349_v1 = vadd.f32 %v12908_v44, %v9329_v27 }
0x18de   : > { %v9333_v30 = vpop.f32.mrf.mxu2 }
0x18df   : > { %v9334_v32 = vadd.f32 %v9333_v30, %v9268_v9  ;;  %v9357_v53 = vmax.f32 %v9349_v1, 0.0  ;;  %v12808_v30 = vld [vmem:[%s16645_s23 + $0x48] sm:$0xff] }
0x18e1   : > { %v9351_v24 = vadd.f32 %v12908_v44, %v9334_v32  ;;  %v9396_v23 = vpack.c.bf16 %v9358_v6, %v9357_v53 }
0x18e3   : > { %v9359_v35 = vmax.f32 %v9351_v24, 0.0  ;;  %v12812_v24 = vld [vmem:[%s16645_s23 + $0x68] sm:$0xff] }
0x18e6   : > { %v9335_v41 = vpop.f32.mrf.mxu2 }
0x18e7   : > { %v9336_v10 = vadd.f32 %v9335_v41, %v9270_v52 }
0x18e9   : > { %v9352_v13 = vadd.f32 %v12908_v44, %v9336_v10 }
0x18eb   : > { %12286 = vmatmul.msk.bf16.gmra.mxu2 %vm7136_vm11, %v15057_v3  ;;  %v9326_v3 = vadd.f32 %v9325_v43, %v9260_v21  ;;  %v9360_v36 = vmax.f32 %v9352_v13, 0.0  ;;  %v12806_v43 = vld [vmem:[%s16645_s23 + $0x38] sm:$0xff] }
0x18ed   : > { %v9348_v56 = vadd.f32 %v12908_v44, %v9326_v3  ;;  %v9397_v0 = vpack.c.bf16 %v9360_v36, %v9359_v35  ;;  %v12813_v3 = vld [vmem:[%s16645_s23 + $0x70] sm:$0xff]  ;;  %v12814_v35 = vld [vmem:[%s16645_s23 + $0x78] sm:$0xff] }
0x18ee   : > { %v9338_v38 = vpop.f32.mrf.mxu2 }
0x18ef   : > { %v9339_v12 = vadd.f32 %v9338_v38, %v9273_v59  ;;  %v9356_v2 = vmax.f32 %v9348_v56, 0.0  ;;  %v12809_v38 = vld [vmem:[%s16645_s23 + $0x50] sm:$0xff] }
0x18f1   : > { %v9353_v17 = vadd.f32 %v12908_v44, %v9339_v12  ;;  %v9395_v16 = vpack.c.bf16 %v9356_v2, %v9355_v57 }
0x18f3   : > { %v9361_v63 = vmax.f32 %v9353_v17, 0.0 }
0x18f6   : > { %v9340_v39 = vpop.f32.mrf.mxu2 }
0x18f7   : > { %v9341_v5 = vadd.f32 %v9340_v39, %v9275_v37  ;;  %v12810_v37 = vld [vmem:[%s16645_s23 + $0x58] sm:$0xff] }
0x18f9   : > { %v9354_v18 = vadd.f32 %v12908_v44, %v9341_v5  ;;  %v12811_v5 = vld [vmem:[%s16645_s23 + $0x60] sm:$0xff] }
0x18fb   : > { %v9362_v14 = vmax.f32 %v9354_v18, 0.0  ;;  %12287 = vmatmul.msk.bf16.gmra.mxu2 %vm7136_vm11, %v16644_v42 }
0x18fd   : > { %v9398_v62 = vpack.c.bf16 %v9362_v14, %v9361_v63 }
0x18fe   : > { %v15957_v33 = vpop.f32.mrf.mxu2 }
0x18ff   : > { %9531 = vmatpush.bf16.msrb.mxu3 %v9398_v62 }
0x1903   : > { %9532 = vmatpush.bf16.msrb.mxu3 %v9397_v0 }
0x1906   : > { %v15963_v47 = vpop.f32.mrf.mxu2 }
0x1907   : > { %9533 = vmatpush.bf16.msrb.mxu3 %v9396_v23 }
0x190b   : > { %9534 = vmatpush.bf16.msrb.mxu3 %v9395_v16  ;;  %12288 = vmatmul.msk.bf16.gmra.mxu2 %vm7136_vm11, %v16646_v34 }
0x190e   : > { %12259 = vmatmul.msk.bf16.vlgmr.msrb.gmra.mxu3 %vm7167_vm13, %v12799_v28  ;;  %v15965_v11 = vpop.f32.mrf.mxu2 }
0x190f   : > { %9847 = vmatpush.bf16.msra.mxu3 %v12816_v8 }
0x1913   : > { %9848 = vmatpush.bf16.msra.mxu3 %v12815_v54 }
0x1916   : > { %v15971_v22 = vpop.f32.mrf.mxu2 }
0x191b   : > { %12289 = vmatmul.msk.bf16.gmra.mxu2 %vm7136_vm11, %v16647_v20 }
0x191e   : > { %12260 = vmatmul.msk.bf16.gmra.mxu3 %vm7167_vm13, %v12800_v29  ;;  %v15976_v19 = vpop.f32.mrf.mxu2 }
0x1926   : > { %v15979_v7 = vpop.f32.mrf.mxu2 }
0x192b   : > { %12290 = vmatmul.msk.bf16.gmra.mxu2 %vm7136_vm11, %v16648_v4 }
0x192e   : > { %12261 = vmatmul.msk.bf16.gmra.mxu3 %vm7167_vm13, %v12801_v60  ;;  %v15985_v21 = vpop.f32.mrf.mxu2 }
0x1936   : > { %v15988_v61 = vpop.f32.mrf.mxu2 }
0x193b   : > { %12291 = vmatmul.msk.bf16.gmra.mxu2 %vm7136_vm11, %v16649_v48 }
0x193e   : > { %12262 = vmatmul.msk.bf16.gmra.mxu3 %vm7167_vm13, %v12802_v40 }
0x194b   : > { %12292 = vmatmul.msk.bf16.gmra.mxu2 %vm7136_vm11, %v16650_v25 }
0x194e   : > { %12263 = vmatmul.msk.bf16.gmra.mxu3 %vm7167_vm13, %v12803_v15 }
0x195b   : > { %12293 = vmatmul.msk.bf16.gmra.mxu2 %vm7136_vm11, %v16651_v45 }
0x195e   : > { %12264 = vmatmul.msk.bf16.gmra.mxu3 %vm7167_vm13, %v12804_v50 }
0x196b   : > { %12294 = vmatmul.msk.bf16.gmra.mxu2 %vm7136_vm11, %v16652_v51 }
0x196e   : > { %12265 = vmatmul.msk.bf16.gmra.mxu3 %vm7167_vm13, %v12805_v46 }
0x197e   : > { %12266 = vmatmul.msk.bf16.gmra.mxu3 %vm7167_vm13, %v12806_v43 }
0x198e   : > { %12267 = vmatmul.msk.bf16.gmra.mxu3 %vm7167_vm13, %v12807_v31 }
0x1991   : > { %v9536_v26 = vpop.f32.mrf.mxu3 }
0x1999   : > { %v9538_v58 = vpop.f32.mrf.mxu3 }
0x199a   : > { %v9616_v9 = vpack.c.bf16 %v9538_v58, %v9536_v26 }
0x199e   : > { %12268 = vmatmul.msk.bf16.gmra.mxu3 %vm7167_vm13, %v12808_v30 }
0x19a1   : > { %v9541_v52 = vpop.f32.mrf.mxu3 }
0x19a9   : > { %v9543_v41 = vpop.f32.mrf.mxu3 }
0x19aa   : > { %v9617_v59 = vpack.c.bf16 %v9543_v41, %v9541_v52  ;;  %v16042_v52 = vld [vmem:[%s13133_s20] ss:$0 sm:$0xff] }
0x19ae   : > { %12269 = vmatmul.msk.bf16.gmra.mxu3 %vm7167_vm13, %v12809_v38 }
0x19b1   : > { %v9546_v12 = vpop.f32.mrf.mxu3 }
0x19b9   : > { %v9548_v44 = vpop.f32.mrf.mxu3 }
0x19ba   : > { %v9618_v10 = vpack.c.bf16 %v9548_v44, %v9546_v12 }
0x19be   : > { %12270 = vmatmul.msk.bf16.gmra.mxu3 %vm7167_vm13, %v12810_v37 }
0x19c1   : > { %v9551_v39 = vpop.f32.mrf.mxu3 }
0x19c9   : > { %v9553_v32 = vpop.f32.mrf.mxu3 }
0x19ca   : > { %v9619_v17 = vpack.c.bf16 %v9553_v32, %v9551_v39  ;;  %v9721_v32 = vpop.f32.mrf.mxu2 }
0x19ce   : > { %12271 = vmatmul.msk.bf16.gmra.mxu3 %vm7167_vm13, %v12811_v5 }
0x19d1   : > { %v9556_v13 = vpop.f32.mrf.mxu3 }
0x19d9   : > { %v9558_v18 = vpop.f32.mrf.mxu3 }
0x19da   : > { %v9620_v27 = vpack.c.bf16 %v9558_v18, %v9556_v13 }
0x19de   : > { %12272 = vmatmul.msk.bf16.gmra.mxu3 %vm7167_vm13, %v12812_v24 }
0x19e1   : > { %v9561_v63 = vpop.f32.mrf.mxu3 }
0x19e9   : > { %v9563_v14 = vpop.f32.mrf.mxu3 }
0x19ea   : > { %v9621_v42 = vpack.c.bf16 %v9563_v14, %v9561_v63 }
0x19ee   : > { %12273 = vmatmul.msk.bf16.gmra.mxu3 %vm7167_vm13, %v12813_v3 }
0x19f1   : > { %v9566_v36 = vpop.f32.mrf.mxu3 }
0x19f9   : > { %v9568_v62 = vpop.f32.mrf.mxu3 }
0x19fa   : > { %v9622_v1 = vpack.c.bf16 %v9568_v62, %v9566_v36 }
0x19fe   : > { %12274 = vmatmul.msk.bf16.gmra.mxu3 %vm7167_vm13, %v12814_v35  ;;  %vm10107_vm13 = vcmp.lt.s32.totalorder %v8369_v49, 256 }
0x1a01   : > { %v9571_v56 = vpop.f32.mrf.mxu3 }
0x1a09   : > { %v9573_v6 = vpop.f32.mrf.mxu3 }
0x1a0a   : > { %v9623_v0 = vpack.c.bf16 %v9573_v6, %v9571_v56 }
0x1a0e   : > { %12303 = vmatmul.msk.bf16.vlgmr.msra.gmra.mxu3 %vm7149_vm12, %v9616_v9 }
0x1a11   : > { %v9576_v55 = vpop.f32.mrf.mxu3 }
0x1a19   : > { %v9578_v53 = vpop.f32.mrf.mxu3 }
0x1a1a   : > { %v9624_v2 = vpack.c.bf16 %v9578_v53, %v9576_v55 }
0x1a1e   : > { %12304 = vmatmul.msk.bf16.gmra.mxu3 %vm7149_vm12, %v9617_v59 }
0x1a21   : > { %v9581_v23 = vpop.f32.mrf.mxu3 }
0x1a29   : > { %v9583_v57 = vpop.f32.mrf.mxu3 }
0x1a2a   : > { %v9625_v16 = vpack.c.bf16 %v9583_v57, %v9581_v23 }
0x1a2e   : > { %12305 = vmatmul.msk.bf16.gmra.mxu3 %vm7149_vm12, %v9618_v10 }
0x1a31   : > { %v9586_v28 = vpop.f32.mrf.mxu3 }
0x1a39   : > { %v9588_v34 = vpop.f32.mrf.mxu3 }
0x1a3a   : > { %v9626_v29 = vpack.c.bf16 %v9588_v34, %v9586_v28 }
0x1a3e   : > { %12306 = vmatmul.msk.bf16.gmra.mxu3 %vm7149_vm12, %v9619_v17 }
0x1a41   : > { %v9591_v20 = vpop.f32.mrf.mxu3 }
0x1a49   : > { %v9593_v60 = vpop.f32.mrf.mxu3 }
0x1a4a   : > { %v9627_v4 = vpack.c.bf16 %v9593_v60, %v9591_v20 }
0x1a4e   : > { %12307 = vmatmul.msk.bf16.gmra.mxu3 %vm7149_vm12, %v9620_v27 }
0x1a51   : > { %v9596_v40 = vpop.f32.mrf.mxu3 }
0x1a59   : > { %v9598_v48 = vpop.f32.mrf.mxu3 }
0x1a5a   : > { %v9628_v15 = vpack.c.bf16 %v9598_v48, %v9596_v40 }
0x1a5e   : > { %12308 = vmatmul.msk.bf16.gmra.mxu3 %vm7149_vm12, %v9621_v42 }
0x1a61   : > { %v16019_v25 = vpop.f32.mrf.mxu3 }
0x1a69   : > { %v16021_v50 = vpop.f32.mrf.mxu3 }
0x1a6a   : > { %v9629_v45 = vpack.c.bf16 %v16021_v50, %v16019_v25 }
0x1a6e   : > { %12309 = vmatmul.msk.bf16.gmra.mxu3 %vm7149_vm12, %v9622_v1 }
0x1a71   : > { %v16026_v46 = vpop.f32.mrf.mxu3 }
0x1a79   : > { %v16028_v51 = vpop.f32.mrf.mxu3 }
0x1a7a   : > { %v9630_v43 = vpack.c.bf16 %v16028_v51, %v16026_v46 }
0x1a7e   : > { %12310 = vmatmul.msk.bf16.gmra.mxu3 %vm7149_vm12, %v9623_v0 }
0x1a81   : > { %v16033_v31 = vpop.f32.mrf.mxu3 }
0x1a89   : > { %v16035_v26 = vpop.f32.mrf.mxu3 }
0x1a8a   : > { %v9631_v58 = vpack.c.bf16 %v16035_v26, %v16033_v31 }
0x1a8e   : > { %12311 = vmatmul.msk.bf16.gmra.mxu3 %vm7149_vm12, %v9624_v2 }
0x1a91   : > { %v9850_v9 = vpop.f32.mrf.mxu3 }
0x1a92   : > { %v9851_v30 = vadd.f32 %v9850_v9, %v15957_v33 }
0x1a94   : > { %v9934_v59 = vadd.f32 %v16042_v52, %v9851_v30 }
0x1a96   : > { %v9966_v44 = vmax.f32 %v9934_v59, 0.0 }
0x1a99   : > { %v9852_v41 = vpop.f32.mrf.mxu3 }
0x1a9a   : > { %v9853_v38 = vadd.f32 %v9852_v41, %v15963_v47  ;;  %v9723_v47 = vpop.f32.mrf.mxu2 }
0x1a9c   : > { %v9935_v12 = vadd.f32 %v16042_v52, %v9853_v38 }
0x1a9e   : > { %v9967_v10 = vmax.f32 %v9935_v12, 0.0  ;;  %12312 = vmatmul.msk.bf16.gmra.mxu3 %vm7149_vm12, %v9625_v16 }
0x1aa0   : > { %v16048_v37 = vpack.c.bf16 %v9967_v10, %v9966_v44 }
0x1aa1   : > { %v9855_v39 = vpop.f32.mrf.mxu3 }
0x1aa2   : > { %v9856_v17 = vadd.f32 %v9855_v39, %v15965_v11  ;;  %v9726_v42 = vpop.f32.mrf.mxu2 }
0x1aa4   : > { %v9936_v5 = vadd.f32 %v16042_v52, %v9856_v17 }
0x1aa6   : > { %v9968_v18 = vmax.f32 %v9936_v5, 0.0 }
0x1aa9   : > { %v9857_v33 = vpop.f32.mrf.mxu3 }
0x1aaa   : > { %v9858_v8 = vadd.f32 %v9857_v33, %v15971_v22  ;;  %v9728_v35 = vpop.f32.mrf.mxu2 }
0x1aac   : > { %v9937_v13 = vadd.f32 %v16042_v52, %v9858_v8 }
0x1aae   : > { %v9969_v27 = vmax.f32 %v9937_v13, 0.0  ;;  %12313 = vmatmul.msk.bf16.gmra.mxu3 %vm7149_vm12, %v9626_v29 }
0x1ab0   : > { %v16055_v24 = vpack.c.bf16 %v9969_v27, %v9968_v18 }
0x1ab1   : > { %v9860_v63 = vpop.f32.mrf.mxu3 }
0x1ab2   : > { %v9861_v14 = vadd.f32 %v9860_v63, %v15976_v19  ;;  %v9731_v53 = vpop.f32.mrf.mxu2 }
0x1ab4   : > { %v9938_v11 = vadd.f32 %v16042_v52, %v9861_v14 }
0x1ab6   : > { %v9970_v36 = vmax.f32 %v9938_v11, 0.0 }
0x1ab9   : > { %v9862_v3 = vpop.f32.mrf.mxu3 }
0x1aba   : > { %v9863_v54 = vadd.f32 %v9862_v3, %v15979_v7  ;;  %v9733_v28 = vpop.f32.mrf.mxu2 }
0x1abc   : > { %v9939_v22 = vadd.f32 %v16042_v52, %v9863_v54 }
0x1abe   : > { %v9971_v62 = vmax.f32 %v9939_v22, 0.0  ;;  %12314 = vmatmul.msk.bf16.gmra.mxu3 %vm7149_vm12, %v9627_v4 }
0x1ac0   : > { %v16062_v1 = vpack.c.bf16 %v9971_v62, %v9970_v36 }
0x1ac1   : > { %v9865_v56 = vpop.f32.mrf.mxu3 }
0x1ac2   : > { %v9866_v6 = vadd.f32 %v9865_v56, %v15985_v21  ;;  %v9736_v40 = vpop.f32.mrf.mxu2 }
0x1ac4   : > { %v9940_v19 = vadd.f32 %v16042_v52, %v9866_v6 }
0x1ac6   : > { %v9972_v2 = vmax.f32 %v9940_v19, 0.0 }
0x1ac9   : > { %v9867_v0 = vpop.f32.mrf.mxu3 }
0x1aca   : > { %v9868_v55 = vadd.f32 %v9867_v0, %v15988_v61  ;;  %v9738_v9 = vpop.f32.mrf.mxu2 }
0x1acc   : > { %v9941_v7 = vadd.f32 %v16042_v52, %v9868_v55 }
0x1ace   : > { %v9973_v23 = vmax.f32 %v9941_v7, 0.0  ;;  %12315 = vmatmul.msk.bf16.gmra.mxu3 %vm7149_vm12, %v9628_v15 }
0x1ad0   : > { %v16069_v57 = vpack.c.bf16 %v9973_v23, %v9972_v2 }
0x1ad1   : > { %v9870_v16 = vpop.f32.mrf.mxu3 }
0x1ad2   : > { %v9871_v34 = vadd.f32 %v9870_v16, %v9721_v32  ;;  %v9741_v59 = vpop.f32.mrf.mxu2 }
0x1ad4   : > { %v9942_v21 = vadd.f32 %v16042_v52, %v9871_v34 }
0x1ad6   : > { %v9974_v4 = vmax.f32 %v9942_v21, 0.0 }
0x1ad9   : > { %v9872_v29 = vpop.f32.mrf.mxu3 }
0x1ada   : > { %v9873_v20 = vadd.f32 %v9872_v29, %v9723_v47  ;;  %v9743_v12 = vpop.f32.mrf.mxu2 }
0x1adc   : > { %v9943_v60 = vadd.f32 %v16042_v52, %v9873_v20 }
0x1ade   : > { %v9975_v61 = vmax.f32 %v9943_v60, 0.0  ;;  %12316 = vmatmul.msk.bf16.gmra.mxu3 %vm7149_vm12, %v9629_v45 }
0x1ae0   : > { %v10003_v48 = vpack.c.bf16 %v9975_v61, %v9974_v4 }
0x1ae1   : > { %v9875_v15 = vpop.f32.mrf.mxu3 }
0x1ae2   : > { %v9746_v45 = vpop.f32.mrf.mxu2  ;;  %v9876_v18 = vadd.f32 %v9875_v15, %v9726_v42  ;;  %v10038_v21 = vsel %vm7136_vm11, %v10003_v48, 0  ;;  %v10032_v48 = vsel %vm7136_vm11, %v16062_v1, 0  ;;  %v10026_v1 = vsel %vm7136_vm11, %v16048_v37, 0 }
0x1ae4   : > { %v9944_v11 = vadd.f32 %v16042_v52, %v9876_v18 }
0x1ae6   : > { %v9976_v6 = vmax.f32 %v9944_v11, 0.0 }
0x1ae9   : > { %v9877_v30 = vpop.f32.mrf.mxu3 }
0x1aea   : > { %v9748_v26 = vpop.f32.mrf.mxu2  ;;  %v9878_v8 = vadd.f32 %v9877_v30, %v9728_v35 }
0x1aec   : > { %v9945_v63 = vadd.f32 %v16042_v52, %v9878_v8 }
0x1aee   : > { %12317 = vmatmul.msk.bf16.gmra.mxu3 %vm7149_vm12, %v9630_v43  ;;  %v9977_v22 = vmax.f32 %v9945_v63, 0.0 }
0x1af0   : > { %v10004_v55 = vpack.c.bf16 %v9977_v22, %v9976_v6 }
0x1af1   : > { %v9880_v41 = vpop.f32.mrf.mxu3 }
0x1af2   : > { %v9881_v46 = vadd.f32 %v9880_v41, %v9731_v53  ;;  %v9751_v35 = vpop.f32.mrf.mxu2  ;;  %v10041_v2 = vsel %vm7136_vm11, %v10004_v55, 0 }
0x1af4   : > { %v9946_v5 = vadd.f32 %v16042_v52, %v9881_v46 }
0x1af6   : > { %v9978_v27 = vmax.f32 %v9946_v5, 0.0 }
0x1af9   : > { %v9882_v38 = vpop.f32.mrf.mxu3 }
0x1afa   : > { %v9883_v10 = vadd.f32 %v9882_v38, %v9733_v28  ;;  %v9753_v23 = vpop.f32.mrf.mxu2 }
0x1afc   : > { %v9947_v43 = vadd.f32 %v16042_v52, %v9883_v10 }
0x1afe   : > { %12318 = vmatmul.msk.bf16.gmra.mxu3 %vm7149_vm12, %v9631_v58  ;;  %v9979_v13 = vmax.f32 %v9947_v43, 0.0  ;;  %vm10102_vm12 = vcmask 1040384  }
0x1b00   : > { %v10005_v3 = vpack.c.bf16 %v9979_v13, %v9978_v27 }
0x1b01   : > { %v9885_v25 = vpop.f32.mrf.mxu3 }
0x1b02   : > { %v9886_v50 = vadd.f32 %v9885_v25, %v9736_v40  ;;  %v10044_v56 = vsel %vm7136_vm11, %v10005_v3, 0  ;;  %v9756_v61 = vpop.f32.mrf.mxu2 }
0x1b04   : > { %v9948_v39 = vadd.f32 %v16042_v52, %v9886_v50 }
0x1b06   : > { %v9980_v17 = vmax.f32 %v9948_v39, 0.0 }
0x1b09   : > { %v9887_v44 = vpop.f32.mrf.mxu3 }
0x1b0a   : > { %v9888_v32 = vadd.f32 %v9887_v44, %v9738_v9  ;;  %v10035_v9 = vsel %vm7136_vm11, %v16069_v57, 0  ;;  %v9758_v41 = vpop.f32.mrf.mxu2  ;;  %v10029_v57 = vsel %vm7136_vm11, %v16055_v24, 0 }
0x1b0c   : > { %v9949_v51 = vadd.f32 %v16042_v52, %v9888_v32 }
0x1b0e   : > { %v9981_v33 = vmax.f32 %v9949_v51, 0.0 }
0x1b10   : > { %v10006_v31 = vpack.c.bf16 %v9981_v33, %v9980_v17 }
0x1b11   : > { %v9890_v58 = vpop.f32.mrf.mxu3 }
0x1b12   : > { %v10047_v47 = vsel %vm7136_vm11, %v10006_v31, 0  ;;  %v9891_v14 = vadd.f32 %v9890_v58, %v9741_v59  ;;  %v9761_v39 = vpop.f32.mrf.mxu2 }
0x1b13   : > { %10073 = vmatpush.bf16.xpose.msra.mxu2 %v10047_v47 }
0x1b14   : > { %v9950_v36 = vadd.f32 %v16042_v52, %v9891_v14 }
0x1b16   : > { %v9982_v42 = vmax.f32 %v9950_v36, 0.0 }
0x1b19   : > { %v9892_v54 = vpop.f32.mrf.mxu3 }
0x1b1a   : > { %v9893_v62 = vadd.f32 %v9892_v54, %v9743_v12  ;;  %v9763_v33 = vpop.f32.mrf.mxu2 }
0x1b1b   : > { %10074 = vmatpush.bf16.xpose.msra.mxu2 %v10044_v56 }
0x1b1c   : > { %v9951_v0 = vadd.f32 %v16042_v52, %v9893_v62 }
0x1b1e   : > { %v9983_v19 = vmax.f32 %v9951_v0, 0.0 }
0x1b20   : > { %v16095_v53 = vpack.c.bf16 %v9983_v19, %v9982_v42 }
0x1b21   : > { %v9895_v7 = vpop.f32.mrf.mxu3 }
0x1b22   : > { %v9896_v16 = vadd.f32 %v9895_v7, %v9746_v45  ;;  %v9766_v24 = vpop.f32.mrf.mxu2 }
0x1b23   : > { %10075 = vmatpush.bf16.xpose.msra.mxu2 %v10041_v2 }
0x1b24   : > { %v9952_v34 = vadd.f32 %v16042_v52, %v9896_v16 }
0x1b26   : > { %v9984_v60 = vmax.f32 %v9952_v34, 0.0 }
0x1b29   : > { %v9897_v28 = vpop.f32.mrf.mxu3 }
0x1b2a   : > { %v9898_v29 = vadd.f32 %v9897_v28, %v9748_v26  ;;  %v9768_v37 = vpop.f32.mrf.mxu2 }
0x1b2b   : > { %10076 = vmatpush.bf16.xpose.msra.mxu2 %v10038_v21 }
0x1b2c   : > { %v9953_v20 = vadd.f32 %v16042_v52, %v9898_v29 }
0x1b2e   : > { %v9985_v4 = vmax.f32 %v9953_v20, 0.0 }
0x1b30   : > { %v16101_v40 = vpack.c.bf16 %v9985_v4, %v9984_v60 }
0x1b31   : > { %v9900_v15 = vpop.f32.mrf.mxu3 }
0x1b32   : > { %v9901_v30 = vadd.f32 %v9900_v15, %v9751_v35  ;;  %v9771_v22 = vpop.f32.mrf.mxu2 }
0x1b33   : > { %10077 = vmatpush.bf16.xpose.msra.mxu2 %v10035_v9 }
0x1b34   : > { %v9954_v38 = vadd.f32 %v16042_v52, %v9901_v30 }
0x1b36   : > { %v9986_v50 = vmax.f32 %v9954_v38, 0.0 }
0x1b39   : > { %v9902_v59 = vpop.f32.mrf.mxu3 }
0x1b3a   : > { %v9903_v12 = vadd.f32 %v9902_v59, %v9753_v23  ;;  %v9773_v62 = vpop.f32.mrf.mxu2 }
0x1b3b   : > { %10078 = vmatpush.bf16.xpose.msra.mxu2 %v10032_v48  ;;  %v9998_v48 = vld [vmem:[%s13138_s27] sm:$0x1] }
0x1b3c   : > { %v9955_v25 = vadd.f32 %v16042_v52, %v9903_v12 }
0x1b3e   : > { %v9987_v45 = vmax.f32 %v9955_v25, 0.0 }
0x1b40   : > { %v16109_v44 = vpack.c.bf16 %v9987_v45, %v9986_v50 }
0x1b41   : > { %v9905_v10 = vpop.f32.mrf.mxu3 }
0x1b42   : > { %v9906_v32 = vadd.f32 %v9905_v10, %v9756_v61  ;;  %v9776_v35 = vpop.f32.mrf.mxu2 }
0x1b43   : > { %10079 = vmatpush.bf16.xpose.msra.mxu2 %v10029_v57 }
0x1b44   : > { %v9956_v51 = vadd.f32 %v16042_v52, %v9906_v32  ;;  %v10056_v32 = vsel %vm7136_vm11, %v16109_v44, 0 }
0x1b46   : > { %v9988_v5 = vmax.f32 %v9956_v51, 0.0  ;;  %v10050_v51 = vsel %vm7136_vm11, %v16095_v53, 0 }
0x1b49   : > { %v9907_v46 = vpop.f32.mrf.mxu3 }
0x1b4a   : > { %v9908_v43 = vadd.f32 %v9907_v46, %v9758_v41  ;;  %v9778_v42 = vpop.f32.mrf.mxu2  ;;  %v10053_v46 = vsel %vm7136_vm11, %v16101_v40, 0 }
0x1b4b   : > { %10080 = vmatpush.bf16.xpose.msra.mxu2 %v10026_v1 }
0x1b4c   : > { %v9957_v17 = vadd.f32 %v16042_v52, %v9908_v43 }
0x1b4e   : > { %v9989_v31 = vmax.f32 %v9957_v17, 0.0 }
0x1b50   : > { %v10010_v26 = vpack.c.bf16 %v9989_v31, %v9988_v5 }
0x1b51   : > { %v9910_v58 = vpop.f32.mrf.mxu3 }
0x1b52   : > { %v9911_v8 = vadd.f32 %v9910_v58, %v9761_v39  ;;  %12319 = vmatmul.msk.bf16.vlgmr.msra.gmra.mxu2 %vm7136_vm11, %v9998_v48  ;;  %v10059_v57 = vsel %vm7136_vm11, %v10010_v26, 0  ;;  %v10015_v39 = vld [vmem:[#allocation2] sm:$0x1] }
0x1b54   : > { %v9958_v47 = vadd.f32 %v16042_v52, %v9911_v8 }
0x1b56   : > { %v9990_v63 = vmax.f32 %v9958_v47, 0.0 }
0x1b59   : > { %v9912_v13 = vpop.f32.mrf.mxu3 }
0x1b5a   : > { %v9913_v18 = vadd.f32 %v9912_v13, %v9763_v33 }
0x1b5c   : > { %v9959_v27 = vadd.f32 %v16042_v52, %v9913_v18 }
0x1b5e   : > { %v9991_v14 = vmax.f32 %v9959_v27, 0.0 }
0x1b60   : > { %v10011_v3 = vpack.c.bf16 %v9991_v14, %v9990_v63 }
0x1b61   : > { %v9915_v11 = vpop.f32.mrf.mxu3 }
0x1b62   : > { %v9916_v15 = vadd.f32 %v9915_v11, %v9766_v24  ;;  %v10062_v10 = vsel %vm7136_vm11, %v10011_v3, 0 }
0x1b64   : > { %v9960_v59 = vadd.f32 %v16042_v52, %v9916_v15 }
0x1b66   : > { %v9992_v25 = vmax.f32 %v9960_v59, 0.0 }
0x1b69   : > { %v9917_v54 = vpop.f32.mrf.mxu3 }
0x1b6a   : > { %v9918_v60 = vadd.f32 %v9917_v54, %v9768_v37 }
0x1b6c   : > { %v9961_v30 = vadd.f32 %v16042_v52, %v9918_v60 }
0x1b6e   : > { %v9993_v38 = vmax.f32 %v9961_v30, 0.0 }
0x1b70   : > { %v10012_v50 = vpack.c.bf16 %v9993_v38, %v9992_v25 }
0x1b71   : > { %v9920_v36 = vpop.f32.mrf.mxu3 }
0x1b72   : > { %v9921_v23 = vadd.f32 %v9920_v36, %v9771_v22  ;;  %v10065_v45 = vsel %vm7136_vm11, %v10012_v50, 0 }
0x1b74   : > { %v9962_v21 = vadd.f32 %v16042_v52, %v9921_v23 }
0x1b76   : > { %v9994_v9 = vmax.f32 %v9962_v21, 0.0 }
0x1b79   : > { %v9922_v56 = vpop.f32.mrf.mxu3 }
0x1b7a   : > { %v9923_v55 = vadd.f32 %v9922_v56, %v9773_v62 }
0x1b7c   : > { %v9963_v28 = vadd.f32 %v16042_v52, %v9923_v55 }
0x1b7e   : > { %v9995_v4 = vmax.f32 %v9963_v28, 0.0 }
0x1b80   : > { %v10013_v41 = vpack.c.bf16 %v9995_v4, %v9994_v9 }
0x1b81   : > { %v9925_v6 = vpop.f32.mrf.mxu3 }
0x1b82   : > { %v9926_v0 = vadd.f32 %v9925_v6, %v9776_v35  ;;  %v10068_v12 = vsel %vm7136_vm11, %v10013_v41, 0 }
0x1b84   : > { %v9964_v7 = vadd.f32 %v16042_v52, %v9926_v0 }
0x1b86   : > { %v9996_v34 = vmax.f32 %v9964_v7, 0.0 }
0x1b89   : > { %v9927_v19 = vpop.f32.mrf.mxu3 }
0x1b8a   : > { %v9928_v2 = vadd.f32 %v9927_v19, %v9778_v42 }
0x1b8c   : > { %v9965_v16 = vadd.f32 %v16042_v52, %v9928_v2  ;;  %v12969_v52 = vmov 0  }
0x1b8d   : > { %12896 = vset.pattern.permute.xlu2 %v12969_v52  ;;  %12897 = vset.pattern.permute.xlu0 %v12969_v52 }
0x1b8e   : > { %v9997_v29 = vmax.f32 %v9965_v16, 0.0  ;;  %10018 = vperm.xlu2 %12896, %v10015_v39  }
0x1b90   : > { %v10014_v20 = vpack.c.bf16 %v9997_v29, %v9996_v34 }
0x1b92   : > { %v10071_v61 = vsel %vm7136_vm11, %v10014_v20, 0 }
0x1b93   : > { %10086 = vmatpush.bf16.xpose.msrb.mxu2 %v10071_v61 }
0x1b9b   : > { %10087 = vmatpush.bf16.xpose.msrb.mxu2 %v10068_v12 }
0x1ba3   : > { %10088 = vmatpush.bf16.xpose.msrb.mxu2 %v10065_v45 }
0x1bab   : > { %10089 = vmatpush.bf16.xpose.msrb.mxu2 %v10062_v10 }
0x1bb3   : > { %10090 = vmatpush.bf16.xpose.msrb.mxu2 %v10059_v57 }
0x1bbb   : > { %10091 = vmatpush.bf16.xpose.msrb.mxu2 %v10056_v32 }
0x1bc3   : > { %10092 = vmatpush.bf16.xpose.msrb.mxu2 %v10053_v46 }
0x1bcb   : > { %10093 = vmatpush.bf16.xpose.msrb.mxu2 %v10050_v51 }
0x1bd2   : > { %12320 = vmatmul.msk.bf16.vlgmr.msrb.gmra.mxu2 %vm7136_vm11, %v9998_v48 }
0x1bd5   : > { %v10082_v43 = vpop.f32.mrf.mxu2 }
0x1bdd   : > { %v10084_v1 = vpop.f32.mrf.mxu2 }
0x1be8   : > { %v10019_v17 = vpop.permute.xlu2 %10018 }
0x1be9   : > { %v10021_v33 = vperm.slane %v10019_v17, 0 }
0x1beb   : > { %v10083_v44 = vadd.f32 %v10082_v43, %v10021_v33 }
0x1c55   : > { %v10095_v5 = vpop.f32.mrf.mxu2 }
0x1c56   : > { %v10096_v31 = vadd.f32 %v10095_v5, %v10021_v33 }
0x1c58   : > { %v10101_v26 = vrot.slane %v10096_v31, 7 }
0x1c5a   : > { %v10103_v40 = vsel %vm10102_vm12, %v10083_v44, %v10101_v26 }
0x1c5b   : > { %10109 = vst.msk [vmem:[%s1042_s10] sm:$0x3] %vm10107_vm13, %v10103_v40 }
0x1c5d   : > { %v10097_v58 = vpop.f32.mrf.mxu2 }
0x1c5e PF: > { %s81_s15 = sadd.s32 1, %s12916_s15  }
0x1c5f   : > { %p78_p4 = scmp.ge.s32.totalorder %s81_s15, 4  }
0x1c61   :  { %80 = sbr.rel (!%p78_p4) target bundleno = 63 (0x3f), region = 220 }

</bundles_post_ra>
